<compile_context>
chip_gen: v7x
topology: tpu7x:2x2x1
jax: 0.10.0
libtpu: 0.0.40
codegen_flags: <defaults>
</compile_context>

<pallas_src>
import functools

import jax
import jax.numpy as jnp
from jax.experimental import pallas as pl
from jax.experimental.pallas import tpu as pltpu


def _round_up(x, m):
    return ((x + m - 1) // m) * m


def _vmem_limit_bytes():
    """Generation-aware VMEM budget (~75% of per-core capacity)."""
    try:
        return int(pltpu.get_tpu_info().vmem_capacity_bytes) * 3 // 4
    except Exception:  # conservative fallback that fits v5e/v6e/v7x
        return 48 * 1024 * 1024


# ----------------------------------------------------------------------------
# Pallas kernels
# ----------------------------------------------------------------------------
def _conv_block_kernel(y_ref, w_ref, shift_ref, o_ref, *, wp2, m_dot):
    """Fused conv(4x4, s=2, p=1) + BN shift + LeakyReLU(0.2) for one batch block.

    y_ref    : (1, rows_blk, kc)   bf16  stacked space-to-depth'd inputs, one
                                         r_img-row stripe per image (zero tail).
    w_ref    : (4, kc, coutp)      bf16  per-tap weights (BN scale folded in).
    shift_ref: (1, coutp)          f32   folded BN shift.
    o_ref    : (1, m_dot, coutp)   bf16  m_dot = B * r_img wide rows (junk
                                         column / stripe-pad rows dropped outside).
    The four 2x2 taps of the equivalent stride-1 conv are contiguous row-slices
    at offsets {0, 1, wp2, wp2 + 1}; using the full stacked block as M reuses
    each RHS tap across all images in the block.
    """
    coutp = w_ref.shape[2]
    acc = jnp.zeros((m_dot, coutp), jnp.float32)
    for a in range(2):                           # unrolled 2x2 taps
        for b in range(2):
            lhs = y_ref[0, pl.ds(a * wp2 + b, m_dot), :]
            acc = acc + jnp.dot(lhs, w_ref[2 * a + b],
                                preferred_element_type=jnp.float32)
    z = acc + shift_ref[...]
    z = jnp.where(z >= 0.0, z, 0.2 * z)          # LeakyReLU(0.2), f32
    o_ref[0] = z.astype(o_ref.dtype)


def _head_block_kernel(y_ref, w_ref, shift_ref, w5_ref, o_ref, *,
                       wp2, block, r_img):
    """conv4 (+BN+LeakyReLU) fused with conv5 (4x4 valid conv == full
    contraction of the 4x4xC map) and the final Sigmoid, one batch block.

    w5_ref: (r_img, coutp) f32 conv5 weights on the same wide (i*wp2 + j) row
            grid as the conv4 result; zero on junk rows / padded channels.
    o_ref : (1, block, 128) f32 -- per-image score broadcast over 128 lanes
            (lane-dense store); lane 0 is extracted outside.
    """
    coutp = w_ref.shape[2]
    m_dot = block * r_img
    acc = jnp.zeros((m_dot, coutp), jnp.float32)
    for a in range(2):
        for b in range(2):
            lhs = y_ref[0, pl.ds(a * wp2 + b, m_dot), :]
            acc = acc + jnp.dot(lhs, w_ref[2 * a + b],
                                preferred_element_type=jnp.float32)
    z = acc + shift_ref[...]
    z = jnp.where(z >= 0.0, z, 0.2 * z)                       # conv4 activation
    zr = z.reshape(block, r_img, coutp)
    w5b = w5_ref[...].reshape(1, r_img, coutp)
    logit = jnp.sum(zr * w5b, axis=2)                         # (block, r_img)
    logit = jnp.sum(logit, axis=1, keepdims=True)             # (block, 1)
    score = 1.0 / (1.0 + jnp.exp(-logit))                     # sigmoid
    o_ref[0] = jnp.broadcast_to(score, (block, 128)).astype(o_ref.dtype)


# ----------------------------------------------------------------------------
# pallas_call wrappers
# ----------------------------------------------------------------------------
def _conv_block(y, w_taps, shift, *, wp2, block, r_img):
    nb, rows_blk, kc = y.shape
    coutp = w_taps.shape[2]
    m_dot = block * r_img
    kernel = functools.partial(_conv_block_kernel, wp2=wp2, m_dot=m_dot)
    return pl.pallas_call(
        kernel,
        out_shape=jax.ShapeDtypeStruct((nb, m_dot, coutp), jnp.bfloat16),
        grid=(nb,),
        in_specs=[
            pl.BlockSpec((1, rows_blk, kc), lambda g: (g, 0, 0)),   # batch block
            pl.BlockSpec((4, kc, coutp), lambda g: (0, 0, 0)),      # resident
            pl.BlockSpec((1, coutp), lambda g: (0, 0)),             # resident
        ],
        out_specs=pl.BlockSpec((1, m_dot, coutp), lambda g: (g, 0, 0)),
        compiler_params=pltpu.CompilerParams(
            dimension_semantics=("parallel",),
            vmem_limit_bytes=_vmem_limit_bytes(),
        ),
    )(y, w_taps, shift)


def _head_block(y, w_taps, shift, w5_wide, *, wp2, block, r_img):
    nb, rows_blk, kc = y.shape
    coutp = w_taps.shape[2]
    kernel = functools.partial(_head_block_kernel, wp2=wp2, block=block,
                               r_img=r_img)
    return pl.pallas_call(
        kernel,
        out_shape=jax.ShapeDtypeStruct((nb, block, 128), jnp.float32),
        grid=(nb,),
        in_specs=[
            pl.BlockSpec((1, rows_blk, kc), lambda g: (g, 0, 0)),
            pl.BlockSpec((4, kc, coutp), lambda g: (0, 0, 0)),
            pl.BlockSpec((1, coutp), lambda g: (0, 0)),
            pl.BlockSpec((r_img, coutp), lambda g: (0, 0)),
        ],
        out_specs=pl.BlockSpec((1, block, 128), lambda g: (g, 0, 0)),
        compiler_params=pltpu.CompilerParams(
            dimension_semantics=("parallel",),
            vmem_limit_bytes=_vmem_limit_bytes(),
        ),
    )(y, w_taps, shift, w5_wide)


# ----------------------------------------------------------------------------
# Layout glue (plain JAX; each pass fuses into a single XLA copy)
# ----------------------------------------------------------------------------
def _pad_to_channels(h, c_target):
    c = h.shape[-1]
    if c_target > c:
        return jnp.pad(h, ((0, 0), (0, 0), (0, 0), (0, c_target - c)))
    if c_target < c:
        return h[..., :c_target]
    return h


def _pad_s2d_stack(x, block):
    """(N, H, W, C) -> (N/block, block*r_img + tail, 4C) bf16.

    Zero-pad H,W by 1, space-to-depth by 2, flatten spatially; each image gets
    a 16-row-aligned stripe of r_img rows so the cross-image tap slices in the
    kernel stay contiguous; a zero tail keeps the last tap slice in bounds.
    """
    n, h, w, c = x.shape
    assert h % 2 == 0 and w % 2 == 0 and n % block == 0
    xp = jnp.pad(x, ((0, 0), (1, 1), (1, 1), (0, 0)))
    hp2, wp2 = (h + 2) // 2, (w + 2) // 2
    y = xp.reshape(n, hp2, 2, wp2, 2, c).transpose(0, 1, 3, 2, 4, 5)
    y = y.reshape(n, hp2 * wp2, 4 * c)
    r_img = _round_up(hp2 * wp2, 16)
    y = jnp.pad(y, ((0, 0), (0, r_img - hp2 * wp2), (0, 0)))
    y = y.reshape(n // block, block * r_img, 4 * c)
    tail = _round_up(wp2 + 1, 16)
    y = jnp.pad(y, ((0, 0), (0, tail), (0, 0)))
    return y.astype(jnp.bfloat16), wp2, r_img


def _wide_to_nhwc(out, block, r_img, ho, wp2, wo):
    """(nb, block*r_img, C) wide kernel output -> (N, ho, wo, C): drop the junk
    (j == wo) column and the stripe-padding rows."""
    nb, _, c = out.shape
    h = out.reshape(nb * block, r_img, c)[:, :ho * wp2, :]
    h = h.reshape(nb * block, ho, wp2, c)[:, :, :wo, :]
    return h


# ----------------------------------------------------------------------------
# One-time parameter preparation (hoisted out of the per-call path)
# ----------------------------------------------------------------------------
def _prep_conv_weight(w, scale, cin_pad, cout_pad):
    """(Cout, Cin, 4, 4) conv weight -> (4, 4*cin_pad, cout_pad) bf16 per-tap
    matrices for the space-to-depth formulation (BN scale folded in)."""
    cout, cin, _, _ = w.shape
    w = w * scale[:, None, None, None]
    w = jnp.pad(w, ((0, cout_pad - cout), (0, cin_pad - cin), (0, 0), (0, 0)))
    w = w.reshape(cout_pad, cin_pad, 2, 2, 2, 2)       # (co, c, a, dh, b, dw)
    w = w.transpose(2, 4, 3, 5, 1, 0)                  # (a, b, dh, dw, c, co)
    return w.reshape(4, 4 * cin_pad, cout_pad).astype(jnp.bfloat16)


def _prep_shift(shift, cout_pad):
    cout = shift.shape[0]
    return jnp.pad(shift, (0, cout_pad - cout)).reshape(1, cout_pad).astype(jnp.float32)


def _prep_head_weight(w5, wp2, r_img, cin_pad):
    """(1, Cin, 4, 4) conv5 weight -> (r_img, cin_pad) f32 on the wide row grid
    (row = i*wp2 + j), zero on junk / padding rows and padded channels."""
    cin = w5.shape[1]
    m = jnp.transpose(w5[0], (1, 2, 0))                            # (4, 4, Cin)
    m = jnp.pad(m, ((0, 0), (0, wp2 - 4), (0, cin_pad - cin)))     # (4, wp2, cp)
    m = m.reshape(4 * wp2, cin_pad)
    m = jnp.pad(m, ((0, r_img - 4 * wp2), (0, 0)))
    return m.astype(jnp.float32)


def prepare_params(params, image_size=64):
    """Fold BN (eval mode), pad and relayout all weights once."""
    depths = params["w1"].shape[0]
    assert image_size // 16 == 4, "the final 4x4 valid conv requires 64x64 input"

    def cinp(c):   # K = 4*cin must be a multiple of 128 (lane density)
        return _round_up(c, 32)

    def coutp(c):  # lane-dense output stores
        return _round_up(c, 128)

    body = []
    specs = [
        (params["w1"], jnp.ones((depths,), jnp.float32), jnp.zeros((depths,), jnp.float32)),
        (params["w2"], params["s2"], params["b2"]),
        (params["w3"], params["s3"], params["b3"]),
    ]
    for w, s, sh in specs:
        co, ci = w.shape[0], w.shape[1]
        body.append((_prep_conv_weight(w, s, cinp(ci), coutp(co)),
                     _prep_shift(sh, coutp(co))))

    w4 = params["w4"]
    co4, ci4 = w4.shape[0], w4.shape[1]
    w4_taps = _prep_conv_weight(w4, params["s4"], cinp(ci4), coutp(co4))
    sh4 = _prep_shift(params["b4"], coutp(co4))

    h4 = image_size // 8                     # layer-4 input spatial size (= 8)
    wp2 = (h4 + 2) // 2
    r_img = _round_up(wp2 * wp2, 16)
    w5_wide = _prep_head_weight(params["w5"], wp2, r_img, coutp(co4))
    return {"body": body, "head": (w4_taps, sh4, w5_wide)}


# ----------------------------------------------------------------------------
# Forward pass
# ----------------------------------------------------------------------------
def discriminator_forward(prepared, x, block=8):
    """x: (N, num_colors, 64, 64) float32 NCHW. Returns sigmoid scores, (N,)."""
    n = x.shape[0]
    assert x.shape[2] == x.shape[3] and x.shape[2] // 16 == 4, \
        "the final 4x4 valid conv requires a 64x64 input"

    b = min(block, n)
    n_pad = _round_up(n, b)

    # One-time NCHW -> NHWC; channels-last (lane-major) everywhere after this.
    h = jnp.transpose(x, (0, 2, 3, 1)).astype(jnp.bfloat16)
    if n_pad > n:
        h = jnp.pad(h, ((0, n_pad - n), (0, 0), (0, 0), (0, 0)))

    # conv1..conv3 (+BN +LeakyReLU)
    for w_taps, shift in prepared["body"]:
        cin_pad = w_taps.shape[1] // 4
        ho, wo = h.shape[1] // 2, h.shape[2] // 2
        h = _pad_to_channels(h, cin_pad)
        y, wp2, r_img = _pad_s2d_stack(h, b)
        out = _conv_block(y, w_taps, shift, wp2=wp2, block=b, r_img=r_img)
        h = _wide_to_nhwc(out, b, r_img, ho, wp2, wo)

    # conv4 + BN4 + LeakyReLU fused with conv5 + Sigmoid
    w4_taps, sh4, w5_wide = prepared["head"]
    cin4 = w4_taps.shape[1] // 4
    h = _pad_to_channels(h, cin4)
    y, wp2, r_img = _pad_s2d_stack(h, b)
    assert w5_wide.shape[0] == r_img, "prepare_params image_size mismatch"
    out = _head_block(y, w4_taps, sh4, w5_wide, wp2=wp2, block=b, r_img=r_img)
    scores = out[:, :, 0].reshape(n_pad)[:n]
    return jnp.squeeze(scores)


# ----------------------------------------------------------------------------
# Deterministic parameter init (DCGAN-style) and eval-mode BN folding
# ----------------------------------------------------------------------------
def _bn_fold(gamma, beta, running_mean, running_var, eps=1e-5):
    scale = gamma / jnp.sqrt(running_var + eps)
    shift = beta - running_mean * scale
    return scale, shift


def init_params(key, num_colors=3, depths=8):
    ks = jax.random.split(key, 17)
    p = {}
    p["w1"] = 0.02 * jax.random.normal(ks[0], (depths, num_colors, 4, 4), jnp.float32)
    p["w2"] = 0.02 * jax.random.normal(ks[1], (depths * 2, depths, 4, 4), jnp.float32)
    p["w3"] = 0.02 * jax.random.normal(ks[2], (depths * 4, depths * 2, 4, 4), jnp.float32)
    p["w4"] = 0.02 * jax.random.normal(ks[3], (depths * 8, depths * 4, 4, 4), jnp.float32)
    p["w5"] = 0.02 * jax.random.normal(ks[4], (1, depths * 8, 4, 4), jnp.float32)

    def bn(kg, kb, km, kv, c):
        gamma = 1.0 + 0.1 * jax.random.normal(kg, (c,), jnp.float32)
        beta = 0.1 * jax.random.normal(kb, (c,), jnp.float32)
        mean = 0.1 * jax.random.normal(km, (c,), jnp.float32)
        var = 1.0 + 0.1 * jax.random.uniform(kv, (c,), jnp.float32)
        return _bn_fold(gamma, beta, mean, var)

    p["s2"], p["b2"] = bn(ks[5], ks[6], ks[7], ks[8], depths * 2)
    p["s3"], p["b3"] = bn(ks[9], ks[10], ks[11], ks[12], depths * 4)
    p["s4"], p["b4"] = bn(ks[13], ks[14], ks[15], ks[16], depths * 8)
    return p


# ----------------------------------------------------------------------------
# Pure-JAX reference (same eval-mode BN semantics) for a correctness check
# ----------------------------------------------------------------------------
def _reference_forward(params, x):
    def conv(h, w, stride, pad):
        return jax.lax.conv_general_dilated(
            h, w, window_strides=(stride, stride),
            padding=((pad, pad), (pad, pad)),
            dimension_numbers=("NCHW", "OIHW", "NCHW"))

    def bn(h, scale, shift):
        return h * scale[None, :, None, None] + shift[None, :, None, None]

    def leaky(h):
        return jnp.where(h >= 0, h, 0.2 * h)

    h = leaky(conv(x, params["w1"], 2, 1))
    h = leaky(bn(conv(h, params["w2"], 2, 1), params["s2"], params["b2"]))
    h = leaky(bn(conv(h, params["w3"], 2, 1), params["s3"], params["b3"]))
    h = leaky(bn(conv(h, params["w4"], 2, 1), params["s4"], params["b4"]))
    h = jax.nn.sigmoid(conv(h, params["w5"], 1, 0))
    return jnp.squeeze(h)


if __name__ == "__main__":
    # Small config consistent with the module: depths scaled down to 8, but the
    # spatial size must be 64 so the final 4x4 valid conv sees a 4x4 map.
    N, num_colors, depths, image_size = 2, 3, 8, 64

    key = jax.random.PRNGKey(0)
    kx, kp = jax.random.split(key)
    x = jax.random.normal(kx, (N, num_colors, image_size, image_size), jnp.float32)
    params = init_params(kp, num_colors=num_colors, depths=depths)

    prepared = prepare_params(params, image_size=image_size)   # one-time weight prep
    fwd = jax.jit(discriminator_forward)
    out = jax.block_until_ready(fwd(prepared, x))

    assert out.shape == (N,), out.shape
    assert bool(jnp.all(jnp.isfinite(out))), out
    assert bool(jnp.all((out >= 0.0) & (out <= 1.0))), out

    ref = jax.block_until_ready(_reference_forward(params, x))
    err = float(jnp.max(jnp.abs(out - ref)))
    assert err < 2e-2, f"max |pallas - reference| = {err}"

    print("KERNEL_OK")
</pallas_src>

<mosaic_0001>
module attributes {stable_mosaic.version = 11 : i64} {
  func.func @_conv_block_kernel(%arg0: i32, %arg1: memref<1x2256x128xbf16, #tpu.memory_space<vmem>>, %arg2: memref<4x128x128xbf16, #tpu.memory_space<vmem>>, %arg3: memref<1x128xf32, #tpu.memory_space<vmem>>, %arg4: memref<1x2208x128xbf16, #tpu.memory_space<vmem>>) attributes {dimension_semantics = [#tpu.dimension_semantics<parallel>], iteration_bounds = array<i64: 1>, scalar_prefetch = 0 : i64, scratch_operands = 0 : i64, tpu.core_type = #tpu.core_type<tc>, window_params = [{transform_indices = @transform_0, window_bounds = array<i64: 1, 2256, 128>}, {pipeline_mode = #tpu.pipeline_mode<synchronous>, transform_indices = @transform_1, window_bounds = array<i64: 4, 128, 128>}, {pipeline_mode = #tpu.pipeline_mode<synchronous>, transform_indices = @transform_2, window_bounds = array<i64: 1, 128>}, {transform_indices = @transform_3, window_bounds = array<i64: 1, 2208, 128>}]} {
    %cst = arith.constant 0.000000e+00 : f32
    %0 = vector.broadcast %cst : f32 to vector<2208x128xf32>
    %c0 = arith.constant 0 : index
    %c0_0 = arith.constant 0 : index
    %c0_1 = arith.constant 0 : index
    %1 = vector.load %arg1[%c0, %c0_0, %c0_1] : memref<1x2256x128xbf16, #tpu.memory_space<vmem>>, vector<1x2208x128xbf16>
    %2 = vector.shape_cast %1 : vector<1x2208x128xbf16> to vector<2208x128xbf16>
    %c0_2 = arith.constant 0 : index
    %c0_3 = arith.constant 0 : index
    %c0_4 = arith.constant 0 : index
    %3 = vector.load %arg2[%c0_2, %c0_3, %c0_4] : memref<4x128x128xbf16, #tpu.memory_space<vmem>>, vector<1x128x128xbf16>
    %4 = vector.shape_cast %3 : vector<1x128x128xbf16> to vector<128x128xbf16>
    %cst_5 = arith.constant dense<0.000000e+00> : vector<2208x128xf32>
    %5 = tpu.matmul %2, %4, %cst_5 {dimension_numbers = #tpu.dot_dimension_numbers<[1], [0], [0], [1], [0, 0, 1, 1], [], []>} : vector<2208x128xbf16>, vector<128x128xbf16>, vector<2208x128xf32> -> vector<2208x128xf32>
    %6 = arith.addf %0, %5 : vector<2208x128xf32>
    %c0_6 = arith.constant 0 : index
    %c1 = arith.constant 1 : index
    %c0_7 = arith.constant 0 : index
    %7 = vector.load %arg1[%c0_6, %c1, %c0_7] : memref<1x2256x128xbf16, #tpu.memory_space<vmem>>, vector<1x2208x128xbf16>
    %8 = vector.shape_cast %7 : vector<1x2208x128xbf16> to vector<2208x128xbf16>
    %c1_8 = arith.constant 1 : index
    %c0_9 = arith.constant 0 : index
    %c0_10 = arith.constant 0 : index
    %9 = vector.load %arg2[%c1_8, %c0_9, %c0_10] : memref<4x128x128xbf16, #tpu.memory_space<vmem>>, vector<1x128x128xbf16>
    %10 = vector.shape_cast %9 : vector<1x128x128xbf16> to vector<128x128xbf16>
    %cst_11 = arith.constant dense<0.000000e+00> : vector<2208x128xf32>
    %11 = tpu.matmul %8, %10, %cst_11 {dimension_numbers = #tpu.dot_dimension_numbers<[1], [0], [0], [1], [0, 0, 1, 1], [], []>} : vector<2208x128xbf16>, vector<128x128xbf16>, vector<2208x128xf32> -> vector<2208x128xf32>
    %12 = arith.addf %6, %11 : vector<2208x128xf32>
    %c0_12 = arith.constant 0 : index
    %c33 = arith.constant 33 : index
    %c0_13 = arith.constant 0 : index
    %13 = vector.load %arg1[%c0_12, %c33, %c0_13] : memref<1x2256x128xbf16, #tpu.memory_space<vmem>>, vector<1x2208x128xbf16>
    %14 = vector.shape_cast %13 : vector<1x2208x128xbf16> to vector<2208x128xbf16>
    %c2 = arith.constant 2 : index
    %c0_14 = arith.constant 0 : index
    %c0_15 = arith.constant 0 : index
    %15 = vector.load %arg2[%c2, %c0_14, %c0_15] : memref<4x128x128xbf16, #tpu.memory_space<vmem>>, vector<1x128x128xbf16>
    %16 = vector.shape_cast %15 : vector<1x128x128xbf16> to vector<128x128xbf16>
    %cst_16 = arith.constant dense<0.000000e+00> : vector<2208x128xf32>
    %17 = tpu.matmul %14, %16, %cst_16 {dimension_numbers = #tpu.dot_dimension_numbers<[1], [0], [0], [1], [0, 0, 1, 1], [], []>} : vector<2208x128xbf16>, vector<128x128xbf16>, vector<2208x128xf32> -> vector<2208x128xf32>
    %18 = arith.addf %12, %17 : vector<2208x128xf32>
    %c0_17 = arith.constant 0 : index
    %c34 = arith.constant 34 : index
    %c0_18 = arith.constant 0 : index
    %19 = vector.load %arg1[%c0_17, %c34, %c0_18] : memref<1x2256x128xbf16, #tpu.memory_space<vmem>>, vector<1x2208x128xbf16>
    %20 = vector.shape_cast %19 : vector<1x2208x128xbf16> to vector<2208x128xbf16>
    %c3 = arith.constant 3 : index
    %c0_19 = arith.constant 0 : index
    %c0_20 = arith.constant 0 : index
    %21 = vector.load %arg2[%c3, %c0_19, %c0_20] : memref<4x128x128xbf16, #tpu.memory_space<vmem>>, vector<1x128x128xbf16>
    %22 = vector.shape_cast %21 : vector<1x128x128xbf16> to vector<128x128xbf16>
    %cst_21 = arith.constant dense<0.000000e+00> : vector<2208x128xf32>
    %23 = tpu.matmul %20, %22, %cst_21 {dimension_numbers = #tpu.dot_dimension_numbers<[1], [0], [0], [1], [0, 0, 1, 1], [], []>} : vector<2208x128xbf16>, vector<128x128xbf16>, vector<2208x128xf32> -> vector<2208x128xf32>
    %24 = arith.addf %18, %23 : vector<2208x128xf32>
    %c0_22 = arith.constant 0 : index
    %c0_23 = arith.constant 0 : index
    %25 = vector.load %arg3[%c0_22, %c0_23] : memref<1x128xf32, #tpu.memory_space<vmem>>, vector<1x128xf32>
    %26 = vector.broadcast %25 : vector<1x128xf32> to vector<2208x128xf32>
    %27 = arith.addf %24, %26 : vector<2208x128xf32>
    %cst_24 = arith.constant 0.000000e+00 : f32
    %28 = vector.broadcast %cst_24 : f32 to vector<2208x128xf32>
    %29 = arith.cmpf oge, %27, %28 : vector<2208x128xf32>
    %cst_25 = arith.constant 2.000000e-01 : f32
    %30 = vector.broadcast %cst_25 : f32 to vector<2208x128xf32>
    %31 = arith.mulf %30, %27 : vector<2208x128xf32>
    %32 = arith.select %29, %27, %31 : vector<2208x128xi1>, vector<2208x128xf32>
    %33 = arith.truncf %32 : vector<2208x128xf32> to vector<2208x128xbf16>
    %c0_26 = arith.constant 0 : index
    %c0_27 = arith.constant 0 : index
    %c0_28 = arith.constant 0 : index
    %34 = vector.load %arg4[%c0_26, %c0_27, %c0_28] : memref<1x2208x128xbf16, #tpu.memory_space<vmem>>, vector<1x2208x128xbf16>
    %35 = vector.shape_cast %34 : vector<1x2208x128xbf16> to vector<2208x128xbf16>
    %36 = vector.shape_cast %33 : vector<2208x128xbf16> to vector<1x2208x128xbf16>
    tpu.vector_store %arg4[%c0_26, %c0_27, %c0_28], %36 {strides = array<i32>} : memref<1x2208x128xbf16, #tpu.memory_space<vmem>>, vector<1x2208x128xbf16>,
    return
  }
  func.func @transform_0(%arg0: i32) -> (i32, i32, i32) {
    %c0_i32 = arith.constant 0 : i32
    %c0_i32_0 = arith.constant 0 : i32
    %c0_i32_1 = arith.constant 0 : i32
    return %arg0, %c0_i32, %c0_i32_0 : i32, i32, i32
  }
  func.func @transform_1(%arg0: i32) -> (i32, i32, i32) {
    %c0_i32 = arith.constant 0 : i32
    %c0_i32_0 = arith.constant 0 : i32
    %c0_i32_1 = arith.constant 0 : i32
    %c0_i32_2 = arith.constant 0 : i32
    return %c0_i32, %c0_i32_0, %c0_i32_1 : i32, i32, i32
  }
  func.func @transform_2(%arg0: i32) -> (i32, i32) {
    %c0_i32 = arith.constant 0 : i32
    %c0_i32_0 = arith.constant 0 : i32
    %c0_i32_1 = arith.constant 0 : i32
    return %c0_i32, %c0_i32_0 : i32, i32
  }
  func.func @transform_3(%arg0: i32) -> (i32, i32, i32) {
    %c0_i32 = arith.constant 0 : i32
    %c0_i32_0 = arith.constant 0 : i32
    %c0_i32_1 = arith.constant 0 : i32
    return %arg0, %c0_i32, %c0_i32_0 : i32, i32, i32
  }
}

module attributes {stable_mosaic.version = 11 : i64} {
  func.func @_conv_block_kernel(%arg0: i32, %arg1: memref<1x640x128xbf16, #tpu.memory_space<vmem>>, %arg2: memref<4x128x128xbf16, #tpu.memory_space<vmem>>, %arg3: memref<1x128xf32, #tpu.memory_space<vmem>>, %arg4: memref<1x608x128xbf16, #tpu.memory_space<vmem>>) attributes {dimension_semantics = [#tpu.dimension_semantics<parallel>], iteration_bounds = array<i64: 1>, scalar_prefetch = 0 : i64, scratch_operands = 0 : i64, tpu.core_type = #tpu.core_type<tc>, window_params = [{transform_indices = @transform_0, window_bounds = array<i64: 1, 640, 128>}, {pipeline_mode = #tpu.pipeline_mode<synchronous>, transform_indices = @transform_1, window_bounds = array<i64: 4, 128, 128>}, {pipeline_mode = #tpu.pipeline_mode<synchronous>, transform_indices = @transform_2, window_bounds = array<i64: 1, 128>}, {transform_indices = @transform_3, window_bounds = array<i64: 1, 608, 128>}]} {
    %cst = arith.constant 0.000000e+00 : f32
    %0 = vector.broadcast %cst : f32 to vector<608x128xf32>
    %c0 = arith.constant 0 : index
    %c0_0 = arith.constant 0 : index
    %c0_1 = arith.constant 0 : index
    %1 = vector.load %arg1[%c0, %c0_0, %c0_1] : memref<1x640x128xbf16, #tpu.memory_space<vmem>>, vector<1x608x128xbf16>
    %2 = vector.shape_cast %1 : vector<1x608x128xbf16> to vector<608x128xbf16>
    %c0_2 = arith.constant 0 : index
    %c0_3 = arith.constant 0 : index
    %c0_4 = arith.constant 0 : index
    %3 = vector.load %arg2[%c0_2, %c0_3, %c0_4] : memref<4x128x128xbf16, #tpu.memory_space<vmem>>, vector<1x128x128xbf16>
    %4 = vector.shape_cast %3 : vector<1x128x128xbf16> to vector<128x128xbf16>
    %cst_5 = arith.constant dense<0.000000e+00> : vector<608x128xf32>
    %5 = tpu.matmul %2, %4, %cst_5 {dimension_numbers = #tpu.dot_dimension_numbers<[1], [0], [0], [1], [0, 0, 1, 1], [], []>} : vector<608x128xbf16>, vector<128x128xbf16>, vector<608x128xf32> -> vector<608x128xf32>
    %6 = arith.addf %0, %5 : vector<608x128xf32>
    %c0_6 = arith.constant 0 : index
    %c1 = arith.constant 1 : index
    %c0_7 = arith.constant 0 : index
    %7 = vector.load %arg1[%c0_6, %c1, %c0_7] : memref<1x640x128xbf16, #tpu.memory_space<vmem>>, vector<1x608x128xbf16>
    %8 = vector.shape_cast %7 : vector<1x608x128xbf16> to vector<608x128xbf16>
    %c1_8 = arith.constant 1 : index
    %c0_9 = arith.constant 0 : index
    %c0_10 = arith.constant 0 : index
    %9 = vector.load %arg2[%c1_8, %c0_9, %c0_10] : memref<4x128x128xbf16, #tpu.memory_space<vmem>>, vector<1x128x128xbf16>
    %10 = vector.shape_cast %9 : vector<1x128x128xbf16> to vector<128x128xbf16>
    %cst_11 = arith.constant dense<0.000000e+00> : vector<608x128xf32>
    %11 = tpu.matmul %8, %10, %cst_11 {dimension_numbers = #tpu.dot_dimension_numbers<[1], [0], [0], [1], [0, 0, 1, 1], [], []>} : vector<608x128xbf16>, vector<128x128xbf16>, vector<608x128xf32> -> vector<608x128xf32>
    %12 = arith.addf %6, %11 : vector<608x128xf32>
    %c0_12 = arith.constant 0 : index
    %c17 = arith.constant 17 : index
    %c0_13 = arith.constant 0 : index
    %13 = vector.load %arg1[%c0_12, %c17, %c0_13] : memref<1x640x128xbf16, #tpu.memory_space<vmem>>, vector<1x608x128xbf16>
    %14 = vector.shape_cast %13 : vector<1x608x128xbf16> to vector<608x128xbf16>
    %c2 = arith.constant 2 : index
    %c0_14 = arith.constant 0 : index
    %c0_15 = arith.constant 0 : index
    %15 = vector.load %arg2[%c2, %c0_14, %c0_15] : memref<4x128x128xbf16, #tpu.memory_space<vmem>>, vector<1x128x128xbf16>
    %16 = vector.shape_cast %15 : vector<1x128x128xbf16> to vector<128x128xbf16>
    %cst_16 = arith.constant dense<0.000000e+00> : vector<608x128xf32>
    %17 = tpu.matmul %14, %16, %cst_16 {dimension_numbers = #tpu.dot_dimension_numbers<[1], [0], [0], [1], [0, 0, 1, 1], [], []>} : vector<608x128xbf16>, vector<128x128xbf16>, vector<608x128xf32> -> vector<608x128xf32>
    %18 = arith.addf %12, %17 : vector<608x128xf32>
    %c0_17 = arith.constant 0 : index
    %c18 = arith.constant 18 : index
    %c0_18 = arith.constant 0 : index
    %19 = vector.load %arg1[%c0_17, %c18, %c0_18] : memref<1x640x128xbf16, #tpu.memory_space<vmem>>, vector<1x608x128xbf16>
    %20 = vector.shape_cast %19 : vector<1x608x128xbf16> to vector<608x128xbf16>
    %c3 = arith.constant 3 : index
    %c0_19 = arith.constant 0 : index
    %c0_20 = arith.constant 0 : index
    %21 = vector.load %arg2[%c3, %c0_19, %c0_20] : memref<4x128x128xbf16, #tpu.memory_space<vmem>>, vector<1x128x128xbf16>
    %22 = vector.shape_cast %21 : vector<1x128x128xbf16> to vector<128x128xbf16>
    %cst_21 = arith.constant dense<0.000000e+00> : vector<608x128xf32>
    %23 = tpu.matmul %20, %22, %cst_21 {dimension_numbers = #tpu.dot_dimension_numbers<[1], [0], [0], [1], [0, 0, 1, 1], [], []>} : vector<608x128xbf16>, vector<128x128xbf16>, vector<608x128xf32> -> vector<608x128xf32>
    %24 = arith.addf %18, %23 : vector<608x128xf32>
    %c0_22 = arith.constant 0 : index
    %c0_23 = arith.constant 0 : index
    %25 = vector.load %arg3[%c0_22, %c0_23] : memref<1x128xf32, #tpu.memory_space<vmem>>, vector<1x128xf32>
    %26 = vector.broadcast %25 : vector<1x128xf32> to vector<608x128xf32>
    %27 = arith.addf %24, %26 : vector<608x128xf32>
    %cst_24 = arith.constant 0.000000e+00 : f32
    %28 = vector.broadcast %cst_24 : f32 to vector<608x128xf32>
    %29 = arith.cmpf oge, %27, %28 : vector<608x128xf32>
    %cst_25 = arith.constant 2.000000e-01 : f32
    %30 = vector.broadcast %cst_25 : f32 to vector<608x128xf32>
    %31 = arith.mulf %30, %27 : vector<608x128xf32>
    %32 = arith.select %29, %27, %31 : vector<608x128xi1>, vector<608x128xf32>
    %33 = arith.truncf %32 : vector<608x128xf32> to vector<608x128xbf16>
    %c0_26 = arith.constant 0 : index
    %c0_27 = arith.constant 0 : index
    %c0_28 = arith.constant 0 : index
    %34 = vector.load %arg4[%c0_26, %c0_27, %c0_28] : memref<1x608x128xbf16, #tpu.memory_space<vmem>>, vector<1x608x128xbf16>
    %35 = vector.shape_cast %34 : vector<1x608x128xbf16> to vector<608x128xbf16>
    %36 = vector.shape_cast %33 : vector<608x128xbf16> to vector<1x608x128xbf16>
    tpu.vector_store %arg4[%c0_26, %c0_27, %c0_28], %36 {strides = array<i32>} : memref<1x608x128xbf16, #tpu.memory_space<vmem>>, vector<1x608x128xbf16>,
    return
  }
  func.func @transform_0(%arg0: i32) -> (i32, i32, i32) {
    %c0_i32 = arith.constant 0 : i32
    %c0_i32_0 = arith.constant 0 : i32
    %c0_i32_1 = arith.constant 0 : i32
    return %arg0, %c0_i32, %c0_i32_0 : i32, i32, i32
  }
  func.func @transform_1(%arg0: i32) -> (i32, i32, i32) {
    %c0_i32 = arith.constant 0 : i32
    %c0_i32_0 = arith.constant 0 : i32
    %c0_i32_1 = arith.constant 0 : i32
    %c0_i32_2 = arith.constant 0 : i32
    return %c0_i32, %c0_i32_0, %c0_i32_1 : i32, i32, i32
  }
  func.func @transform_2(%arg0: i32) -> (i32, i32) {
    %c0_i32 = arith.constant 0 : i32
    %c0_i32_0 = arith.constant 0 : i32
    %c0_i32_1 = arith.constant 0 : i32
    return %c0_i32, %c0_i32_0 : i32, i32
  }
  func.func @transform_3(%arg0: i32) -> (i32, i32, i32) {
    %c0_i32 = arith.constant 0 : i32
    %c0_i32_0 = arith.constant 0 : i32
    %c0_i32_1 = arith.constant 0 : i32
    return %arg0, %c0_i32, %c0_i32_0 : i32, i32, i32
  }
}

module attributes {stable_mosaic.version = 11 : i64} {
  func.func @_conv_block_kernel(%arg0: i32, %arg1: memref<1x208x128xbf16, #tpu.memory_space<vmem>>, %arg2: memref<4x128x128xbf16, #tpu.memory_space<vmem>>, %arg3: memref<1x128xf32, #tpu.memory_space<vmem>>, %arg4: memref<1x192x128xbf16, #tpu.memory_space<vmem>>) attributes {dimension_semantics = [#tpu.dimension_semantics<parallel>], iteration_bounds = array<i64: 1>, scalar_prefetch = 0 : i64, scratch_operands = 0 : i64, tpu.core_type = #tpu.core_type<tc>, window_params = [{transform_indices = @transform_0, window_bounds = array<i64: 1, 208, 128>}, {pipeline_mode = #tpu.pipeline_mode<synchronous>, transform_indices = @transform_1, window_bounds = array<i64: 4, 128, 128>}, {pipeline_mode = #tpu.pipeline_mode<synchronous>, transform_indices = @transform_2, window_bounds = array<i64: 1, 128>}, {transform_indices = @transform_3, window_bounds = array<i64: 1, 192, 128>}]} {
    %cst = arith.constant 0.000000e+00 : f32
    %0 = vector.broadcast %cst : f32 to vector<192x128xf32>
    %c0 = arith.constant 0 : index
    %c0_0 = arith.constant 0 : index
    %c0_1 = arith.constant 0 : index
    %1 = vector.load %arg1[%c0, %c0_0, %c0_1] : memref<1x208x128xbf16, #tpu.memory_space<vmem>>, vector<1x192x128xbf16>
    %2 = vector.shape_cast %1 : vector<1x192x128xbf16> to vector<192x128xbf16>
    %c0_2 = arith.constant 0 : index
    %c0_3 = arith.constant 0 : index
    %c0_4 = arith.constant 0 : index
    %3 = vector.load %arg2[%c0_2, %c0_3, %c0_4] : memref<4x128x128xbf16, #tpu.memory_space<vmem>>, vector<1x128x128xbf16>
    %4 = vector.shape_cast %3 : vector<1x128x128xbf16> to vector<128x128xbf16>
    %cst_5 = arith.constant dense<0.000000e+00> : vector<192x128xf32>
    %5 = tpu.matmul %2, %4, %cst_5 {dimension_numbers = #tpu.dot_dimension_numbers<[1], [0], [0], [1], [0, 0, 1, 1], [], []>} : vector<192x128xbf16>, vector<128x128xbf16>, vector<192x128xf32> -> vector<192x128xf32>
    %6 = arith.addf %0, %5 : vector<192x128xf32>
    %c0_6 = arith.constant 0 : index
    %c1 = arith.constant 1 : index
    %c0_7 = arith.constant 0 : index
    %7 = vector.load %arg1[%c0_6, %c1, %c0_7] : memref<1x208x128xbf16, #tpu.memory_space<vmem>>, vector<1x192x128xbf16>
    %8 = vector.shape_cast %7 : vector<1x192x128xbf16> to vector<192x128xbf16>
    %c1_8 = arith.constant 1 : index
    %c0_9 = arith.constant 0 : index
    %c0_10 = arith.constant 0 : index
    %9 = vector.load %arg2[%c1_8, %c0_9, %c0_10] : memref<4x128x128xbf16, #tpu.memory_space<vmem>>, vector<1x128x128xbf16>
    %10 = vector.shape_cast %9 : vector<1x128x128xbf16> to vector<128x128xbf16>
    %cst_11 = arith.constant dense<0.000000e+00> : vector<192x128xf32>
    %11 = tpu.matmul %8, %10, %cst_11 {dimension_numbers = #tpu.dot_dimension_numbers<[1], [0], [0], [1], [0, 0, 1, 1], [], []>} : vector<192x128xbf16>, vector<128x128xbf16>, vector<192x128xf32> -> vector<192x128xf32>
    %12 = arith.addf %6, %11 : vector<192x128xf32>
    %c0_12 = arith.constant 0 : index
    %c9 = arith.constant 9 : index
    %c0_13 = arith.constant 0 : index
    %13 = vector.load %arg1[%c0_12, %c9, %c0_13] : memref<1x208x128xbf16, #tpu.memory_space<vmem>>, vector<1x192x128xbf16>
    %14 = vector.shape_cast %13 : vector<1x192x128xbf16> to vector<192x128xbf16>
    %c2 = arith.constant 2 : index
    %c0_14 = arith.constant 0 : index
    %c0_15 = arith.constant 0 : index
    %15 = vector.load %arg2[%c2, %c0_14, %c0_15] : memref<4x128x128xbf16, #tpu.memory_space<vmem>>, vector<1x128x128xbf16>
    %16 = vector.shape_cast %15 : vector<1x128x128xbf16> to vector<128x128xbf16>
    %cst_16 = arith.constant dense<0.000000e+00> : vector<192x128xf32>
    %17 = tpu.matmul %14, %16, %cst_16 {dimension_numbers = #tpu.dot_dimension_numbers<[1], [0], [0], [1], [0, 0, 1, 1], [], []>} : vector<192x128xbf16>, vector<128x128xbf16>, vector<192x128xf32> -> vector<192x128xf32>
    %18 = arith.addf %12, %17 : vector<192x128xf32>
    %c0_17 = arith.constant 0 : index
    %c10 = arith.constant 10 : index
    %c0_18 = arith.constant 0 : index
    %19 = vector.load %arg1[%c0_17, %c10, %c0_18] : memref<1x208x128xbf16, #tpu.memory_space<vmem>>, vector<1x192x128xbf16>
    %20 = vector.shape_cast %19 : vector<1x192x128xbf16> to vector<192x128xbf16>
    %c3 = arith.constant 3 : index
    %c0_19 = arith.constant 0 : index
    %c0_20 = arith.constant 0 : index
    %21 = vector.load %arg2[%c3, %c0_19, %c0_20] : memref<4x128x128xbf16, #tpu.memory_space<vmem>>, vector<1x128x128xbf16>
    %22 = vector.shape_cast %21 : vector<1x128x128xbf16> to vector<128x128xbf16>
    %cst_21 = arith.constant dense<0.000000e+00> : vector<192x128xf32>
    %23 = tpu.matmul %20, %22, %cst_21 {dimension_numbers = #tpu.dot_dimension_numbers<[1], [0], [0], [1], [0, 0, 1, 1], [], []>} : vector<192x128xbf16>, vector<128x128xbf16>, vector<192x128xf32> -> vector<192x128xf32>
    %24 = arith.addf %18, %23 : vector<192x128xf32>
    %c0_22 = arith.constant 0 : index
    %c0_23 = arith.constant 0 : index
    %25 = vector.load %arg3[%c0_22, %c0_23] : memref<1x128xf32, #tpu.memory_space<vmem>>, vector<1x128xf32>
    %26 = vector.broadcast %25 : vector<1x128xf32> to vector<192x128xf32>
    %27 = arith.addf %24, %26 : vector<192x128xf32>
    %cst_24 = arith.constant 0.000000e+00 : f32
    %28 = vector.broadcast %cst_24 : f32 to vector<192x128xf32>
    %29 = arith.cmpf oge, %27, %28 : vector<192x128xf32>
    %cst_25 = arith.constant 2.000000e-01 : f32
    %30 = vector.broadcast %cst_25 : f32 to vector<192x128xf32>
    %31 = arith.mulf %30, %27 : vector<192x128xf32>
    %32 = arith.select %29, %27, %31 : vector<192x128xi1>, vector<192x128xf32>
    %33 = arith.truncf %32 : vector<192x128xf32> to vector<192x128xbf16>
    %c0_26 = arith.constant 0 : index
    %c0_27 = arith.constant 0 : index
    %c0_28 = arith.constant 0 : index
    %34 = vector.load %arg4[%c0_26, %c0_27, %c0_28] : memref<1x192x128xbf16, #tpu.memory_space<vmem>>, vector<1x192x128xbf16>
    %35 = vector.shape_cast %34 : vector<1x192x128xbf16> to vector<192x128xbf16>
    %36 = vector.shape_cast %33 : vector<192x128xbf16> to vector<1x192x128xbf16>
    tpu.vector_store %arg4[%c0_26, %c0_27, %c0_28], %36 {strides = array<i32>} : memref<1x192x128xbf16, #tpu.memory_space<vmem>>, vector<1x192x128xbf16>,
    return
  }
  func.func @transform_0(%arg0: i32) -> (i32, i32, i32) {
    %c0_i32 = arith.constant 0 : i32
    %c0_i32_0 = arith.constant 0 : i32
    %c0_i32_1 = arith.constant 0 : i32
    return %arg0, %c0_i32, %c0_i32_0 : i32, i32, i32
  }
  func.func @transform_1(%arg0: i32) -> (i32, i32, i32) {
    %c0_i32 = arith.constant 0 : i32
    %c0_i32_0 = arith.constant 0 : i32
    %c0_i32_1 = arith.constant 0 : i32
    %c0_i32_2 = arith.constant 0 : i32
    return %c0_i32, %c0_i32_0, %c0_i32_1 : i32, i32, i32
  }
  func.func @transform_2(%arg0: i32) -> (i32, i32) {
    %c0_i32 = arith.constant 0 : i32
    %c0_i32_0 = arith.constant 0 : i32
    %c0_i32_1 = arith.constant 0 : i32
    return %c0_i32, %c0_i32_0 : i32, i32
  }
  func.func @transform_3(%arg0: i32) -> (i32, i32, i32) {
    %c0_i32 = arith.constant 0 : i32
    %c0_i32_0 = arith.constant 0 : i32
    %c0_i32_1 = arith.constant 0 : i32
    return %arg0, %c0_i32, %c0_i32_0 : i32, i32, i32
  }
}

module attributes {stable_mosaic.version = 11 : i64} {
  func.func @_head_block_kernel(%arg0: i32, %arg1: memref<1x80x128xbf16, #tpu.memory_space<vmem>>, %arg2: memref<4x128x128xbf16, #tpu.memory_space<vmem>>, %arg3: memref<1x128xf32, #tpu.memory_space<vmem>>, %arg4: memref<32x128xf32, #tpu.memory_space<vmem>>, %arg5: memref<1x2x128xf32, #tpu.memory_space<vmem>>) attributes {dimension_semantics = [#tpu.dimension_semantics<parallel>], iteration_bounds = array<i64: 1>, scalar_prefetch = 0 : i64, scratch_operands = 0 : i64, tpu.core_type = #tpu.core_type<tc>, window_params = [{transform_indices = @transform_0, window_bounds = array<i64: 1, 80, 128>}, {pipeline_mode = #tpu.pipeline_mode<synchronous>, transform_indices = @transform_1, window_bounds = array<i64: 4, 128, 128>}, {pipeline_mode = #tpu.pipeline_mode<synchronous>, transform_indices = @transform_2, window_bounds = array<i64: 1, 128>}, {pipeline_mode = #tpu.pipeline_mode<synchronous>, transform_indices = @transform_3, window_bounds = array<i64: 32, 128>}, {transform_indices = @transform_4, window_bounds = array<i64: 1, 2, 128>}]} {
    %cst = arith.constant 0.000000e+00 : f32
    %0 = vector.broadcast %cst : f32 to vector<64x128xf32>
    %c0 = arith.constant 0 : index
    %c0_0 = arith.constant 0 : index
    %c0_1 = arith.constant 0 : index
    %1 = vector.load %arg1[%c0, %c0_0, %c0_1] : memref<1x80x128xbf16, #tpu.memory_space<vmem>>, vector<1x64x128xbf16>
    %2 = vector.shape_cast %1 : vector<1x64x128xbf16> to vector<64x128xbf16>
    %c0_2 = arith.constant 0 : index
    %c0_3 = arith.constant 0 : index
    %c0_4 = arith.constant 0 : index
    %3 = vector.load %arg2[%c0_2, %c0_3, %c0_4] : memref<4x128x128xbf16, #tpu.memory_space<vmem>>, vector<1x128x128xbf16>
    %4 = vector.shape_cast %3 : vector<1x128x128xbf16> to vector<128x128xbf16>
    %cst_5 = arith.constant dense<0.000000e+00> : vector<64x128xf32>
    %5 = tpu.matmul %2, %4, %cst_5 {dimension_numbers = #tpu.dot_dimension_numbers<[1], [0], [0], [1], [0, 0, 1, 1], [], []>} : vector<64x128xbf16>, vector<128x128xbf16>, vector<64x128xf32> -> vector<64x128xf32>
    %6 = arith.addf %0, %5 : vector<64x128xf32>
    %c0_6 = arith.constant 0 : index
    %c1 = arith.constant 1 : index
    %c0_7 = arith.constant 0 : index
    %7 = vector.load %arg1[%c0_6, %c1, %c0_7] : memref<1x80x128xbf16, #tpu.memory_space<vmem>>, vector<1x64x128xbf16>
    %8 = vector.shape_cast %7 : vector<1x64x128xbf16> to vector<64x128xbf16>
    %c1_8 = arith.constant 1 : index
    %c0_9 = arith.constant 0 : index
    %c0_10 = arith.constant 0 : index
    %9 = vector.load %arg2[%c1_8, %c0_9, %c0_10] : memref<4x128x128xbf16, #tpu.memory_space<vmem>>, vector<1x128x128xbf16>
    %10 = vector.shape_cast %9 : vector<1x128x128xbf16> to vector<128x128xbf16>
    %cst_11 = arith.constant dense<0.000000e+00> : vector<64x128xf32>
    %11 = tpu.matmul %8, %10, %cst_11 {dimension_numbers = #tpu.dot_dimension_numbers<[1], [0], [0], [1], [0, 0, 1, 1], [], []>} : vector<64x128xbf16>, vector<128x128xbf16>, vector<64x128xf32> -> vector<64x128xf32>
    %12 = arith.addf %6, %11 : vector<64x128xf32>
    %c0_12 = arith.constant 0 : index
    %c5 = arith.constant 5 : index
    %c0_13 = arith.constant 0 : index
    %13 = vector.load %arg1[%c0_12, %c5, %c0_13] : memref<1x80x128xbf16, #tpu.memory_space<vmem>>, vector<1x64x128xbf16>
    %14 = vector.shape_cast %13 : vector<1x64x128xbf16> to vector<64x128xbf16>
    %c2 = arith.constant 2 : index
    %c0_14 = arith.constant 0 : index
    %c0_15 = arith.constant 0 : index
    %15 = vector.load %arg2[%c2, %c0_14, %c0_15] : memref<4x128x128xbf16, #tpu.memory_space<vmem>>, vector<1x128x128xbf16>
    %16 = vector.shape_cast %15 : vector<1x128x128xbf16> to vector<128x128xbf16>
    %cst_16 = arith.constant dense<0.000000e+00> : vector<64x128xf32>
    %17 = tpu.matmul %14, %16, %cst_16 {dimension_numbers = #tpu.dot_dimension_numbers<[1], [0], [0], [1], [0, 0, 1, 1], [], []>} : vector<64x128xbf16>, vector<128x128xbf16>, vector<64x128xf32> -> vector<64x128xf32>
    %18 = arith.addf %12, %17 : vector<64x128xf32>
    %c0_17 = arith.constant 0 : index
    %c6 = arith.constant 6 : index
    %c0_18 = arith.constant 0 : index
    %19 = vector.load %arg1[%c0_17, %c6, %c0_18] : memref<1x80x128xbf16, #tpu.memory_space<vmem>>, vector<1x64x128xbf16>
    %20 = vector.shape_cast %19 : vector<1x64x128xbf16> to vector<64x128xbf16>
    %c3 = arith.constant 3 : index
    %c0_19 = arith.constant 0 : index
    %c0_20 = arith.constant 0 : index
    %21 = vector.load %arg2[%c3, %c0_19, %c0_20] : memref<4x128x128xbf16, #tpu.memory_space<vmem>>, vector<1x128x128xbf16>
    %22 = vector.shape_cast %21 : vector<1x128x128xbf16> to vector<128x128xbf16>
    %cst_21 = arith.constant dense<0.000000e+00> : vector<64x128xf32>
    %23 = tpu.matmul %20, %22, %cst_21 {dimension_numbers = #tpu.dot_dimension_numbers<[1], [0], [0], [1], [0, 0, 1, 1], [], []>} : vector<64x128xbf16>, vector<128x128xbf16>, vector<64x128xf32> -> vector<64x128xf32>
    %24 = arith.addf %18, %23 : vector<64x128xf32>
    %c0_22 = arith.constant 0 : index
    %c0_23 = arith.constant 0 : index
    %25 = vector.load %arg3[%c0_22, %c0_23] : memref<1x128xf32, #tpu.memory_space<vmem>>, vector<1x128xf32>
    %26 = vector.broadcast %25 : vector<1x128xf32> to vector<64x128xf32>
    %27 = arith.addf %24, %26 : vector<64x128xf32>
    %cst_24 = arith.constant 0.000000e+00 : f32
    %28 = vector.broadcast %cst_24 : f32 to vector<64x128xf32>
    %29 = arith.cmpf oge, %27, %28 : vector<64x128xf32>
    %cst_25 = arith.constant 2.000000e-01 : f32
    %30 = vector.broadcast %cst_25 : f32 to vector<64x128xf32>
    %31 = arith.mulf %30, %27 : vector<64x128xf32>
    %32 = arith.select %29, %27, %31 : vector<64x128xi1>, vector<64x128xf32>
    %33 = vector.shape_cast %32 : vector<64x128xf32> to vector<2x32x128xf32>
    %c0_26 = arith.constant 0 : index
    %c0_27 = arith.constant 0 : index
    %34 = vector.load %arg4[%c0_26, %c0_27] : memref<32x128xf32, #tpu.memory_space<vmem>>, vector<32x128xf32>
    %35 = vector.shape_cast %34 : vector<32x128xf32> to vector<1x32x128xf32>
    %36 = vector.broadcast %35 : vector<1x32x128xf32> to vector<2x32x128xf32>
    %37 = arith.mulf %33, %36 : vector<2x32x128xf32>
    %cst_28 = arith.constant dense<0.000000e+00> : vector<2x32xf32>
    %38 = vector.multi_reduction <add>, %37, %cst_28 [2] : vector<2x32x128xf32> to vector<2x32xf32>
    %cst_29 = arith.constant dense<0.000000e+00> : vector<2xf32>
    %39 = vector.multi_reduction <add>, %38, %cst_29 [1] : vector<2x32xf32> to vector<2xf32>
    %40 = vector.shape_cast %39 : vector<2xf32> to vector<2x1xf32>
    %cst_30 = arith.constant 0.000000e+00 : f32
    %41 = vector.broadcast %cst_30 : f32 to vector<2x1xf32>
    %42 = arith.subf %41, %40 : vector<2x1xf32>
    %43 = math.exp %42 : vector<2x1xf32>
    %cst_31 = arith.constant 1.000000e+00 : f32
    %44 = vector.broadcast %cst_31 : f32 to vector<2x1xf32>
    %45 = arith.addf %44, %43 : vector<2x1xf32>
    %cst_32 = arith.constant 1.000000e+00 : f32
    %46 = vector.broadcast %cst_32 : f32 to vector<2x1xf32>
    %47 = arith.divf %46, %45 : vector<2x1xf32>
    %48 = vector.shape_cast %47 : vector<2x1xf32> to vector<2x1xf32>
    %49 = vector.broadcast %48 : vector<2x1xf32> to vector<2x128xf32>
    %c0_33 = arith.constant 0 : index
    %c0_34 = arith.constant 0 : index
    %c0_35 = arith.constant 0 : index
    %50 = vector.load %arg5[%c0_33, %c0_34, %c0_35] : memref<1x2x128xf32, #tpu.memory_space<vmem>>, vector<1x2x128xf32>
    %51 = vector.shape_cast %50 : vector<1x2x128xf32> to vector<2x128xf32>
    %52 = vector.shape_cast %49 : vector<2x128xf32> to vector<1x2x128xf32>
    tpu.vector_store %arg5[%c0_33, %c0_34, %c0_35], %52 {strides = array<i32>} : memref<1x2x128xf32, #tpu.memory_space<vmem>>, vector<1x2x128xf32>,
    return
  }
  func.func @transform_0(%arg0: i32) -> (i32, i32, i32) {
    %c0_i32 = arith.constant 0 : i32
    %c0_i32_0 = arith.constant 0 : i32
    %c0_i32_1 = arith.constant 0 : i32
    return %arg0, %c0_i32, %c0_i32_0 : i32, i32, i32
  }
  func.func @transform_1(%arg0: i32) -> (i32, i32, i32) {
    %c0_i32 = arith.constant 0 : i32
    %c0_i32_0 = arith.constant 0 : i32
    %c0_i32_1 = arith.constant 0 : i32
    %c0_i32_2 = arith.constant 0 : i32
    return %c0_i32, %c0_i32_0, %c0_i32_1 : i32, i32, i32
  }
  func.func @transform_2(%arg0: i32) -> (i32, i32) {
    %c0_i32 = arith.constant 0 : i32
    %c0_i32_0 = arith.constant 0 : i32
    %c0_i32_1 = arith.constant 0 : i32
    return %c0_i32, %c0_i32_0 : i32, i32
  }
  func.func @transform_3(%arg0: i32) -> (i32, i32) {
    %c0_i32 = arith.constant 0 : i32
    %c0_i32_0 = arith.constant 0 : i32
    %c0_i32_1 = arith.constant 0 : i32
    return %c0_i32, %c0_i32_0 : i32, i32
  }
  func.func @transform_4(%arg0: i32) -> (i32, i32, i32) {
    %c0_i32 = arith.constant 0 : i32
    %c0_i32_0 = arith.constant 0 : i32
    %c0_i32_1 = arith.constant 0 : i32
    return %arg0, %c0_i32, %c0_i32_0 : i32, i32, i32
  }
}

</mosaic_0001>

<bundles_post_ra>
// kernel: discriminator_forward.4
= control target key start
LH: loop header
LB: loop body
LE: loop exit
PB: predicated region body
PF: predicated region fallthrough
CT: control target
= control target key end

     0   :  { %vm1018_vm0 = vsmask.f32 7424  ;;  %vm8488_vm1 = vcmask 1046528   ;;  %s20895_s1 = inlined_call_operand.vmem [shape: bf16[4,128,128], index: 1, kind: input, shape index: {}]   ;;  %s20896_s0 = inlined_call_operand.vmem [shape: bf16[1,2256,128], index: 0, kind: input, shape index: {}]   ;;  %s20897_s2 = inlined_call_operand.vmem [shape: f32[1,128], index: 2, kind: input, shape index: {}]   ;;  %s20898_s3 = inlined_call_operand.vmem [shape: bf16[1,2208,128], index: 3, kind: output, shape index: {}]  }
   0x1   :  { %v17179_v0 = vld [vmem:[%s20895_s1 + $0x40] sm:$0xff]   ;;  %v17181_v2 = vld [vmem:[%s20895_s1 + $0x48] sm:$0xff]   ;;  %v17183_v4 = vld [vmem:[%s20895_s1 + $0x50] sm:$0xff]  }
   0x2   :  { %v17180_v1 = vld [vmem:[%s20895_s1 + $0x80] sm:$0xff]   ;;  %15183 = vmatprep.subr.bf16.mxu1 %v17179_v0  ;;  %v17182_v3 = vld [vmem:[%s20895_s1 + $0x88] sm:$0xff]   ;;  %v17184_v5 = vld [vmem:[%s20895_s1 + $0x90] sm:$0xff]  }
   0x3   :  { %15767 = vmatprep.subr.bf16.mxu0 %v17180_v1  ;;  %15184 = vmatpush3.bf16.msra.mxu1 %v17179_v0  ;;  %v17185_v6 = vld [vmem:[%s20895_s1 + $0x58] sm:$0xff]   ;;  %v17187_v8 = vld [vmem:[%s20895_s1 + $0x60] sm:$0xff]   ;;  %v17189_v10 = vld [vmem:[%s20895_s1 + $0x68] sm:$0xff]  }
   0x4   :  { %15768 = vmatpush3.bf16.msra.mxu0 %v17180_v1  ;;  %15185 = vmatprep.subr.bf16.mxu1 %v17181_v2  ;;  %v17186_v7 = vld [vmem:[%s20895_s1 + $0x98] sm:$0xff]   ;;  %v17188_v9 = vld [vmem:[%s20895_s1 + $0xa0] sm:$0xff]   ;;  %v17190_v11 = vld [vmem:[%s20895_s1 + $0xa8] sm:$0xff]  }
   0x5   :  { %15769 = vmatprep.subr.bf16.mxu0 %v17182_v3  ;;  %v17195_v12 = vld [vmem:[%s20896_s0] sm:$0xff]   ;;  %v17196_v13 = vld [vmem:[%s20896_s0 + $0x8] sm:$0xff]   ;;  %v17191_v14 = vld [vmem:[%s20895_s1 + $0x70] sm:$0xff]  }
   0x6   :  { %v4773_v15 = vld [vmem:[%s20896_s0 + $0x10] sm:$0xf]  ;;  %v4774_v16 = vld [vmem:[%s20896_s0 + $0x14] sm:$0xf]  ;;  %v1020_v18 = vshrl.u32 %v17195_v12, 16  ;;  %v1022_v19 = vshll.u32 %v17195_v12, 16 }
   0x7   :  { %15186 = vmatpush3.bf16.msra.mxu1 %v17181_v2  ;;  %v17192_v17 = vld [vmem:[%s20895_s1 + $0xb0] sm:$0xff]   ;;  %v1027_v20 = vshll.u32 %v17196_v13, 16  ;;  %v13047_v21 = vcombine.low %v4773_v15, %v4774_v16  ;;  %v17198_v22 = vld [vmem:[%s20896_s0 + $0x18] sm:$0xff]   ;;  %v17201_v31 = vld [vmem:[%s20896_s0 + $0x20] sm:$0xff]   ;;  %v1031_v35 = vshrl.u32 %v17196_v13, 16 }
   0x8   :  { %15770 = vmatpush3.bf16.msra.mxu0 %v17182_v3  ;;  %15187 = vmatprep.subr.bf16.mxu1 %v17183_v4  ;;  %v17199_v23 = vld [vmem:[%s20896_s0 + $0x10] sm:$0xff]   ;;  %v1024_v24 = vrot.slane %v1022_v19, 1  ;;  %v17193_v28 = vld [vmem:[%s20895_s1 + $0x78] sm:$0xff]   ;;  %v5768_v29 = vshll.u32 %v17198_v22, 16  ;;  %v5772_v38 = vshrl.u32 %v17198_v22, 16  ;;  %v5776_v39 = vshll.u32 %v17201_v31, 16 }
   0x9   :  { %15771 = vmatprep.subr.bf16.mxu0 %v17184_v5  ;;  %v1029_v25 = vrot.slane %v1027_v20, 1  ;;  %v5761_v26 = vshrl.u32 %v13047_v21, 16  ;;  %v5763_v27 = vshll.u32 %v13047_v21, 16  ;;  %v1035_v30 = vshll.u32 %v17199_v23, 16  ;;  %v17194_v32 = vld [vmem:[%s20895_s1 + $0xb8] sm:$0xff]   ;;  %v17200_v42 = vld [vmem:[%s20895_s1] sm:$0xff]  }
   0xa   :  { %v1025_v33 = vor.u32 %v1024_v24, %v1020_v18  ;;  %v5770_v36 = vrot.slane %v5768_v29, 1  ;;  %v5778_v43 = vrot.slane %v5776_v39, 1  ;;  %v17203_v44 = vld [vmem:[%s20896_s0 + $0x18] sm:$0xff]   ;;  %v1039_v45 = vshrl.u32 %v17199_v23, 16  ;;  %v17204_v46 = vld [vmem:[%s20896_s0 + $0x28] sm:$0xff]   ;;  %v17205_v50 = vld [vmem:[%s20896_s0 + $0x20] sm:$0xff]  }
   0xb   :  { %15188 = vmatpush3.bf16.msra.mxu1 %v17183_v4  ;;  %v5765_v34 = vrot.slane %v5763_v27, 1  ;;  %v1037_v37 = vrot.slane %v1035_v30, 1  ;;  %v1033_v48 = vor.u32 %v1031_v35, %v1029_v25  ;;  %v5780_v49 = vshrl.u32 %v17201_v31, 16  ;;  %v17202_v54 = vld [vmem:[%s20895_s1 + $0xc0] sm:$0xff]   ;;  %v17206_v57 = vld [vmem:[%s20896_s0 + $0x30] sm:$0xff]   ;;  %v17207_v1 = vld [vmem:[%s20896_s0 + $0x28] sm:$0xff]  }
   0xc   :  { %15772 = vmatpush3.bf16.msra.mxu0 %v17184_v5  ;;  %15189 = vmatprep.subr.bf16.mxu1 %v17185_v6  ;;  %v1030_v40 = vsel %vm1018_vm0, %v1025_v33, %v1029_v25  ;;  %v5774_v51 = vor.u32 %v5772_v38, %v5770_v36  ;;  %v1043_v52 = vshll.u32 %v17203_v44, 16  ;;  %v5784_v53 = vshll.u32 %v17204_v46, 16  ;;  %v17208_v4 = vld [vmem:[%s20896_s0 + $0x38] sm:$0xff]   ;;  %v17212_v21 = vld [vmem:[%s20896_s0 + $0x48] sm:$0xff]   ;;  %v17213_v35 = vld [vmem:[%s20896_s0 + $0x40] sm:$0xff]  }
   0xd   :  { %15773 = vmatprep.subr.bf16.mxu0 %v17186_v7  ;;  %v5766_v41 = vor.u32 %v5765_v34, %v5761_v26  ;;  %15199 = vmatprep.mubr.bf16.mxu1 %v1030_v40  ;;  %v1041_v55 = vor.u32 %v1039_v45, %v1037_v37  ;;  %v1051_v56 = vshll.u32 %v17205_v50, 16  ;;  %v5782_v59 = vor.u32 %v5780_v49, %v5778_v43  ;;  %v17211_v18 = vld [vmem:[%s20896_s0 + $0x38] sm:$0xff]   ;;  %v17214_v38 = vld [vmem:[%s20896_s0 + $0x50] sm:$0xff]  }
   0xe   :  { %v1045_v58 = vrot.slane %v1043_v52, 1  ;;  %v5786_v60 = vrot.slane %v5784_v53, 1  ;;  %v1038_v61 = vsel %vm1018_vm0, %v1033_v48, %v1037_v37  ;;  %v1047_v62 = vshrl.u32 %v17203_v44, 16  ;;  %v17216_v45 = vld [vmem:[%s20896_s0 + $0x58] sm:$0xff]  }
   0xf   :  { %15190 = vmatpush3.bf16.msra.mxu1 %v17185_v6  ;;  %v5771_v47 = vsel %vm1018_vm0, %v5766_v41, %v5770_v36  ;;  %v5788_v63 = vshrl.u32 %v17204_v46, 16  ;;  %v5792_v0 = vshll.u32 %v17206_v57, 16  ;;  %v5779_v2 = vsel %vm1018_vm0, %v5774_v51, %v5778_v43 }
  0x10   :  { %15774 = vmatpush3.bf16.msra.mxu0 %v17186_v7  ;;  %15191 = vmatprep.subr.bf16.mxu1 %v17187_v8  ;;  %v1055_v3 = vshrl.u32 %v17205_v50, 16  ;;  %v1046_v5 = vsel %vm1018_vm0, %v1041_v55, %v1045_v58  ;;  %v1053_v6 = vrot.slane %v1051_v56, 1  ;;  %v1059_v7 = vshll.u32 %v17207_v1, 16 }
  0x11   :  { %15775 = vmatprep.subr.bf16.mxu0 %v17188_v9  ;;  %15783 = vmatprep.mubr.bf16.mxu0 %v5771_v47  ;;  %v1049_v12 = vor.u32 %v1047_v62, %v1045_v58  ;;  %v5794_v13 = vrot.slane %v5792_v0, 1  ;;  %v5790_v15 = vor.u32 %v5788_v63, %v5786_v60  ;;  %v1063_v24 = vshrl.u32 %v17207_v1, 16  ;;  %v17218_v62 = vld [vmem:[%s20896_s0 + $0x60] sm:$0xff]  }
  0x12   :  { %v1057_v16 = vor.u32 %v1055_v3, %v1053_v6  ;;  %v5804_v25 = vshrl.u32 %v17208_v4, 16  ;;  %v1075_v30 = vshll.u32 %v17211_v18, 16  ;;  %v5816_v33 = vshll.u32 %v17212_v21, 16 }
  0x13   :  { %15192 = vmatpush3.bf16.msra.mxu1 %v17187_v8  ;;  %v5796_v8 = vshrl.u32 %v17206_v57, 16  ;;  %v1054_v23 = vsel %vm1018_vm0, %v1049_v12, %v1053_v6  ;;  %v5795_v27 = vsel %vm1018_vm0, %v5790_v15, %v5794_v13  ;;  %v1083_v46 = vshll.u32 %v17213_v35, 16 }
  0x14   :  { %15776 = vmatpush3.bf16.msra.mxu0 %v17188_v9  ;;  %15193 = vmatprep.subr.bf16.mxu1 %v17189_v10  ;;  %v5787_v9 = vsel %vm1018_vm0, %v5782_v59, %v5786_v60  ;;  %v1077_v41 = vrot.slane %v1075_v30, 1  ;;  %v5818_v44 = vrot.slane %v5816_v33, 1  ;;  %v1079_v48 = vshrl.u32 %v17211_v18, 16  ;;  %v17217_v59 = vld [vmem:[%s20896_s0 + $0x50] sm:$0xff]  }
  0x15   :  { %15777 = vmatprep.subr.bf16.mxu0 %v17190_v11  ;;  %v5798_v19 = vor.u32 %v5796_v8, %v5794_v13  ;;  %v5820_v49 = vshrl.u32 %v17212_v21, 16  ;;  %v5824_v50 = vshll.u32 %v17214_v38, 16  ;;  %v1087_v53 = vshrl.u32 %v17213_v35, 16 }
  0x16   :  { %v5828_v56 = vshrl.u32 %v17214_v38, 16  ;;  %v5832_v57 = vshll.u32 %v17216_v45, 16  ;;  %v1085_v58 = vrot.slane %v1083_v46, 1  ;;  %v1081_v60 = vor.u32 %v1079_v48, %v1077_v41  ;;  %v17235_v48 = vld [vmem:[%s20895_s1 + $0x8] sm:$0xff]  }
  0x17   :  { %15194 = vmatpush3.bf16.msra.mxu1 %v17189_v10  ;;  %v5800_v10 = vshll.u32 %v17208_v4, 16  ;;  %v5822_v63 = vor.u32 %v5820_v49, %v5818_v44  ;;  %v1103_v13 = vshrl.u32 %v17217_v59, 16 }
  0x18   :  { %15778 = vmatpush3.bf16.msra.mxu0 %v17190_v11  ;;  %15195 = vmatprep.subr.bf16.mxu1 %v17191_v14  ;;  %v17209_v11 = vld [vmem:[%s20896_s0 + $0x30] sm:$0xff]   ;;  %v1089_v0 = vor.u32 %v1087_v53, %v1085_v58  ;;  %v5834_v4 = vrot.slane %v5832_v57, 1  ;;  %v1086_v8 = vsel %vm1018_vm0, %v1081_v60, %v1085_v58 }
  0x19   :  { %15779 = vmatprep.subr.bf16.mxu0 %v17192_v17  ;;  %v5802_v20 = vrot.slane %v5800_v10, 1  ;;  %v1067_v22 = vshll.u32 %v17209_v11, 16  ;;  %v1071_v29 = vshrl.u32 %v17209_v11, 16  ;;  %v5840_v10 = vshll.u32 %v17218_v62, 16 }
  0x1b   :  { %15196 = vmatpush3.bf16.msra.mxu1 %v17191_v14  ;;  %v17210_v14 = vld [vmem:[%s20896_s0 + $0x40] sm:$0xff]   ;;  %v5803_v31 = vsel %vm1018_vm0, %v5798_v19, %v5802_v20  ;;  %v1069_v34 = vrot.slane %v1067_v22, 1  ;;  %v5806_v39 = vor.u32 %v5804_v25, %v5802_v20  ;;  %v5842_v21 = vrot.slane %v5840_v10, 1  ;;  %v17222_v22 = vld [vmem:[%s20896_s0 + $0x70] sm:$0xff]  }
  0x1c   :  { %15780 = vmatpush3.bf16.msra.mxu0 %v17192_v17  ;;  %15197 = vmatprep.subr.bf16.mxu1 %v17193_v28  ;;  %v1061_v17 = vrot.slane %v1059_v7, 1  ;;  %v5808_v26 = vshll.u32 %v17210_v14, 16  ;;  %v1099_v7 = vshll.u32 %v17217_v59, 16  ;;  %v17221_v19 = vld [vmem:[%s20896_s0 + $0x60] sm:$0xff]  }
  0x1d   :  { %15781 = vmatprep.subr.bf16.mxu0 %v17194_v32  ;;  %v1073_v40 = vor.u32 %v1071_v29, %v1069_v34  ;;  %v17224_v29 = vld [vmem:[%s20896_s0 + $0x78] sm:$0xff]  }
  0x1e   :  { %v1065_v36 = vor.u32 %v1063_v24, %v1061_v17  ;;  %v5810_v37 = vrot.slane %v5808_v26, 1  ;;  %v1101_v18 = vrot.slane %v1099_v7, 1  ;;  %v17223_v26 = vld [vmem:[%s20896_s0 + $0x68] sm:$0xff]   ;;  %v5868_v59 = vshrl.u32 %v17224_v29, 16 }
  0x1f   :  { %15198 = vmatpush3.bf16.msra.mxu1 %v17193_v28  ;;  %v1062_v28 = vsel %vm1018_vm0, %v1057_v16, %v1061_v17  ;;  %v1078_v52 = vsel %vm1018_vm0, %v1073_v40, %v1077_v41  ;;  %v5844_v16 = vshrl.u32 %v17218_v62, 16  ;;  %v1123_v38 = vshll.u32 %v17223_v26, 16 }
  0x20   :  { %15782 = vmatpush3.bf16.msra.mxu0 %v17194_v32  ;;  %15475 = vmatprep.subr.bf16.mxu1 %v17200_v42  ;;  %v5812_v32 = vshrl.u32 %v17210_v14, 16  ;;  %v1070_v47 = vsel %vm1018_vm0, %v1065_v36, %v1069_v34  ;;  %v5811_v51 = vsel %vm1018_vm0, %v5806_v39, %v5810_v37  ;;  %v1105_v24 = vor.u32 %v1103_v13, %v1101_v18 }
  0x21   :  { %16059 = vmatprep.subr.bf16.mxu0 %v17202_v54  ;;  %v5856_v34 = vshll.u32 %v17222_v22, 16  ;;  %v5860_v40 = vshrl.u32 %v17222_v22, 16  ;;  %v5864_v41 = vshll.u32 %v17224_v29, 16  ;;  %v1127_v58 = vshrl.u32 %v17223_v26, 16  ;;  %v17233_v29 = vld [vmem:[%s20896_s0 + $0x90] sm:$0xff]  }
  0x22   :  { %15200 = vmatmul.mubr.bf16.vlgmr.msra.gmra.mrb[0].mxu1 %v1038_v61  ;;  %v5814_v43 = vor.u32 %v5812_v32, %v5810_v37  ;;  %v5826_v61 = vrot.slane %v5824_v50, 1  ;;  %v1119_v37 = vshrl.u32 %v17221_v19, 16 }
  0x23   :  { %15784 = vmatmul.mubr.bf16.vlgmr.msra.gmra.mrb[0].mxu0 %v5779_v2  ;;  %15476 = vmatpush3.bf16.msra.mxu1 %v17200_v42  ;;  %v17215_v42 = vld [vmem:[%s20896_s0 + $0x48] sm:$0xff]   ;;  %v17219_v2 = vld [vmem:[%s20896_s0 + $0x58] sm:$0xff]   ;;  %v5858_v46 = vrot.slane %v5856_v34, 1 }
  0x24   :  { %16060 = vmatpush3.bf16.msra.mxu0 %v17202_v54  ;;  %15203 = vmatprep.mubr.bf16.mxu1 %v1046_v5  ;;  %v1091_v54 = vshll.u32 %v17215_v42, 16  ;;  %v5819_v55 = vsel %vm1018_vm0, %v5814_v43, %v5818_v44  ;;  %v5830_v3 = vor.u32 %v5828_v56, %v5826_v61  ;;  %v17220_v5 = vld [vmem:[%s20896_s0 + $0x68] sm:$0xff]   ;;  %v1095_v6 = vshrl.u32 %v17215_v42, 16  ;;  %v17225_v42 = vld [vmem:[%s20896_s0 + $0x70] sm:$0xff]   ;;  %v17226_v44 = vld [vmem:[%s20896_s0 + $0x80] sm:$0xff]  }
  0x25   :  { %15787 = vmatprep.mubr.bf16.mxu0 %v5787_v9  ;;  %v5836_v9 = vshrl.u32 %v17216_v45, 16  ;;  %v5827_v11 = vsel %vm1018_vm0, %v5822_v63, %v5826_v61  ;;  %v1107_v14 = vshll.u32 %v17219_v2, 16  ;;  %v5848_v17 = vshll.u32 %v17220_v5, 16  ;;  %15477 = vmatprep.subr.bf16.mxu1 %v17235_v48 }
  0x26   :  { %v1093_v1 = vrot.slane %v1091_v54, 1  ;;  %v5835_v15 = vsel %vm1018_vm0, %v5830_v3, %v5834_v4  ;;  %v1111_v30 = vshrl.u32 %v17219_v2, 16  ;;  %v5852_v33 = vshrl.u32 %v17220_v5, 16  ;;  %v17229_v5 = vld [vmem:[%s20896_s0 + $0x80] sm:$0xff]  }
  0x27   :  { %v1109_v25 = vrot.slane %v1107_v14, 1  ;;  %v5862_v53 = vor.u32 %v5860_v40, %v5858_v46  ;;  %v5866_v54 = vrot.slane %v5864_v41, 1  ;;  %v1131_v56 = vshll.u32 %v17225_v42, 16  ;;  %15478 = vmatpush3.bf16.msra.mxu1 %v17235_v48 }
  0x28   :  { %v1094_v12 = vsel %vm1018_vm0, %v1089_v0, %v1093_v1  ;;  %v1097_v20 = vor.u32 %v1095_v6, %v1093_v1  ;;  %v5872_v60 = vshll.u32 %v17226_v44, 16  ;;  %v1135_v63 = vshrl.u32 %v17225_v42, 16 }
  0x29   :  { %v1110_v36 = vsel %vm1018_vm0, %v1105_v24, %v1109_v25  ;;  %v1113_v45 = vor.u32 %v1111_v30, %v1109_v25  ;;  %v5867_v1 = vsel %vm1018_vm0, %v5862_v53, %v5866_v54  ;;  %v5876_v2 = vshrl.u32 %v17226_v44, 16  ;;  %v17239_v53 = vld [vmem:[%s20896_s0 + $0xa0] sm:$0xff]  }
  0x2a   :  { %15204 = vmatmul.mubr.bf16.gmra.mrb[4].mxu1 %v1054_v23  ;;  %v5838_v23 = vor.u32 %v5836_v9, %v5834_v4  ;;  %v1102_v32 = vsel %vm1018_vm0, %v1097_v20, %v1101_v18  ;;  %v1133_v4 = vrot.slane %v1131_v56, 1  ;;  %v5874_v7 = vrot.slane %v5872_v60, 1  ;;  %v17241_v60 = vld [vmem:[%s20896_s0 + $0xa8] sm:$0xff]  }
  0x2b   :  { %15788 = vmatmul.mubr.bf16.gmra.mrb[4].mxu0 %v5795_v27  ;;  %15207 = vmatprep.mubr.bf16.mxu1 %v1062_v28  ;;  %v5846_v27 = vor.u32 %v5844_v16, %v5842_v21  ;;  %v5850_v28 = vrot.slane %v5848_v17, 1  ;;  %v5870_v9 = vor.u32 %v5868_v59, %v5866_v54  ;;  %v1147_v16 = vshll.u32 %v17229_v5, 16 }
  0x2c   :  { %15791 = vmatprep.mubr.bf16.mxu0 %v5803_v31  ;;  %v1115_v31 = vshll.u32 %v17221_v19, 16  ;;  %v5843_v35 = vsel %vm1018_vm0, %v5838_v23, %v5842_v21  ;;  %v1137_v10 = vor.u32 %v1135_v63, %v1133_v4  ;;  %v5878_v13 = vor.u32 %v5876_v2, %v5874_v7  ;;  %v17242_v63 = vld [vmem:[%s20896_s0 + $0xb8] sm:$0xff]  }
  0x2d   :  { %v5851_v39 = vsel %vm1018_vm0, %v5846_v27, %v5850_v28  ;;  %v5854_v49 = vor.u32 %v5852_v33, %v5850_v28  ;;  %v5875_v21 = vsel %vm1018_vm0, %v5870_v9, %v5874_v7  ;;  %v1151_v23 = vshrl.u32 %v17229_v5, 16 }
  0x2e   :  { %v1117_v43 = vrot.slane %v1115_v31, 1  ;;  %v1149_v28 = vrot.slane %v1147_v16, 1  ;;  %v1163_v41 = vshll.u32 %v17233_v29, 16  ;;  %v1183_v7 = vshrl.u32 %v17239_v53, 16  ;;  %v17244_v16 = vld [vmem:[%s20896_s0 + $0xc0] sm:$0xff]  }
  0x2f   :  { %v5859_v61 = vsel %vm1018_vm0, %v5854_v49, %v5858_v46 }
  0x30   :  { %v1121_v50 = vor.u32 %v1119_v37, %v1117_v43  ;;  %v1118_v57 = vsel %vm1018_vm0, %v1113_v45, %v1117_v43  ;;  %v1153_v34 = vor.u32 %v1151_v23, %v1149_v28  ;;  %v17246_v23 = vld [vmem:[%s20896_s0 + $0xc8] sm:$0xff]  }
  0x32   :  { %15208 = vmatmul.mubr.bf16.gmra.mrb[8].mxu1 %v1070_v47  ;;  %v17227_v47 = vld [vmem:[%s20896_s0 + $0x78] sm:$0xff]  }
  0x33   :  { %15792 = vmatmul.mubr.bf16.gmra.mrb[8].mxu0 %v5811_v51  ;;  %15211 = vmatprep.mubr.bf16.mxu1 %v1078_v52  ;;  %v1125_v51 = vrot.slane %v1123_v38, 1  ;;  %v17236_v52 = vld [vmem:[%s20895_s1 + $0xc8] sm:$0xff]   ;;  %v1139_v0 = vshll.u32 %v17227_v47, 16  ;;  %v1143_v18 = vshrl.u32 %v17227_v47, 16  ;;  %v1167_v47 = vshrl.u32 %v17233_v29, 16 }
  0x34   :  { %15795 = vmatprep.mubr.bf16.mxu0 %v5819_v55  ;;  %v17228_v55 = vld [vmem:[%s20896_s0 + $0x88] sm:$0xff]   ;;  %16061 = vmatprep.subr.bf16.mxu0 %v17236_v52 }
  0x35   :  { %16062 = vmatpush3.bf16.msra.mxu0 %v17236_v52  ;;  %v1126_v62 = vsel %vm1018_vm0, %v1121_v50, %v1125_v51  ;;  %v5880_v3 = vshll.u32 %v17228_v55, 16  ;;  %v1129_v6 = vor.u32 %v1127_v58, %v1125_v51  ;;  %v5884_v19 = vshrl.u32 %v17228_v55, 16 }
  0x36   :  { %v1165_v52 = vrot.slane %v1163_v41, 1  ;;  %v17248_v41 = vld [vmem:[%s20896_s0 + $0xd0] sm:$0xff]  }
  0x37   :  { %v5882_v14 = vrot.slane %v5880_v3, 1  ;;  %v1134_v17 = vsel %vm1018_vm0, %v1129_v6, %v1133_v4 }
  0x38   :  { %v1169_v58 = vor.u32 %v1167_v47, %v1165_v52  ;;  %v17250_v47 = vld [vmem:[%s20896_s0 + $0xd8] sm:$0xff]  }
  0x39   :  { %v5883_v25 = vsel %vm1018_vm0, %v5878_v13, %v5882_v14  ;;  %v5886_v33 = vor.u32 %v5884_v19, %v5882_v14  ;;  %v17243_v13 = vld [vmem:[%s20896_s0 + $0xb0] sm:$0xff]  }
  0x3a   :  { %15212 = vmatmul.mubr.bf16.gmra.mrb[12].mxu1 %v1086_v8  ;;  %v17230_v8 = vld [vmem:[%s20896_s0 + $0x90] sm:$0xff]  }
  0x3b   :  { %15796 = vmatmul.mubr.bf16.gmra.mrb[12].mxu0 %v5827_v11  ;;  %15215 = vmatprep.mubr.bf16.mxu1 %v1094_v12  ;;  %v1141_v11 = vrot.slane %v1139_v0, 1  ;;  %v17231_v12 = vld [vmem:[%s20896_s0 + $0x88] sm:$0xff]   ;;  %v5888_v20 = vshll.u32 %v17230_v8, 16  ;;  %v5892_v26 = vshrl.u32 %v17230_v8, 16  ;;  %v1179_v0 = vshll.u32 %v17239_v53, 16 }
  0x3c   :  { %15799 = vmatprep.mubr.bf16.mxu0 %v5835_v15  ;;  %v17232_v15 = vld [vmem:[%s20896_s0 + $0x98] sm:$0xff]   ;;  %v1155_v24 = vshll.u32 %v17231_v12, 16  ;;  %v1159_v40 = vshrl.u32 %v17231_v12, 16  ;;  %v1187_v8 = vshll.u32 %v17241_v60, 16 }
  0x3d   :  { %v1142_v22 = vsel %vm1018_vm0, %v1137_v10, %v1141_v11  ;;  %v5896_v27 = vshll.u32 %v17232_v15, 16  ;;  %v1145_v30 = vor.u32 %v1143_v18, %v1141_v11  ;;  %v5890_v31 = vrot.slane %v5888_v20, 1  ;;  %v17245_v20 = vld [vmem:[%s20896_s0 + $0xb8] sm:$0xff]  }
  0x3e   :  { %v5900_v43 = vshrl.u32 %v17232_v15, 16  ;;  %v5928_v11 = vshll.u32 %v17242_v63, 16  ;;  %v1181_v12 = vrot.slane %v1179_v0, 1  ;;  %v1189_v19 = vrot.slane %v1187_v8, 1  ;;  %v17252_v0 = vld [vmem:[%s20896_s0 + $0xe0] sm:$0xff]  }
  0x3f   :  { %v5894_v37 = vor.u32 %v5892_v26, %v5890_v31  ;;  %v5898_v38 = vrot.slane %v5896_v27, 1  ;;  %v1150_v42 = vsel %vm1018_vm0, %v1145_v30, %v1149_v28  ;;  %v5891_v45 = vsel %vm1018_vm0, %v5886_v33, %v5890_v31 }
  0x40   :  { %v1185_v18 = vor.u32 %v1183_v7, %v1181_v12  ;;  %v5932_v27 = vshrl.u32 %v17242_v63, 16  ;;  %v5936_v28 = vshll.u32 %v17244_v16, 16  ;;  %v1199_v31 = vshrl.u32 %v17243_v13, 16 }
  0x41   :  { %v5899_v49 = vsel %vm1018_vm0, %v5894_v37, %v5898_v38  ;;  %v5902_v55 = vor.u32 %v5900_v43, %v5898_v38  ;;  %v17247_v37 = vld [vmem:[%s20896_s0 + $0xc0] sm:$0xff]  }
  0x42   :  { %15216 = vmatmul.mubr.bf16.gmra.mrb[16].mxu1 %v1102_v32  ;;  %v17234_v32 = vld [vmem:[%s20896_s0 + $0xa0] sm:$0xff]   ;;  %v1190_v30 = vsel %vm1018_vm0, %v1185_v18, %v1189_v19 }
  0x43   :  { %15800 = vmatmul.mubr.bf16.gmra.mrb[16].mxu0 %v5843_v35  ;;  %15219 = vmatprep.mubr.bf16.mxu1 %v1110_v36  ;;  %v1157_v35 = vrot.slane %v1155_v24, 1  ;;  %v17237_v36 = vld [vmem:[%s20896_s0 + $0x98] sm:$0xff]   ;;  %v5904_v44 = vshll.u32 %v17234_v32, 16  ;;  %v5908_v50 = vshrl.u32 %v17234_v32, 16  ;;  %v1191_v24 = vshrl.u32 %v17241_v60, 16 }
  0x44   :  { %15803 = vmatprep.mubr.bf16.mxu0 %v5851_v39  ;;  %v17238_v39 = vld [vmem:[%s20896_s0 + $0xa8] sm:$0xff]   ;;  %v1171_v48 = vshll.u32 %v17237_v36, 16  ;;  %v1175_v3 = vshrl.u32 %v17237_v36, 16  ;;  %v1203_v32 = vshll.u32 %v17245_v20, 16 }
  0x45   :  { %v1158_v46 = vsel %vm1018_vm0, %v1153_v34, %v1157_v35  ;;  %v5912_v51 = vshll.u32 %v17238_v39, 16  ;;  %v1161_v54 = vor.u32 %v1159_v40, %v1157_v35  ;;  %v5906_v56 = vrot.slane %v5904_v44, 1  ;;  %v17249_v44 = vld [vmem:[%s20896_s0 + $0xc8] sm:$0xff]  }
  0x46   :  { %v1173_v59 = vrot.slane %v1171_v48, 1  ;;  %v5916_v6 = vshrl.u32 %v17238_v39, 16  ;;  %v5940_v34 = vshrl.u32 %v17244_v16, 16  ;;  %v5944_v35 = vshll.u32 %v17246_v23, 16 }
  0x47   :  { %v5907_v2 = vsel %vm1018_vm0, %v5902_v55, %v5906_v56  ;;  %v1193_v38 = vor.u32 %v1191_v24, %v1189_v19  ;;  %v5938_v40 = vrot.slane %v5936_v28, 1  ;;  %v1205_v43 = vrot.slane %v1203_v32, 1 }
  0x48   :  { %v1174_v5 = vsel %vm1018_vm0, %v1169_v58, %v1173_v59  ;;  %v1177_v14 = vor.u32 %v1175_v3, %v1173_v59  ;;  %v1211_v48 = vshll.u32 %v17247_v37, 16  ;;  %v1215_v55 = vshrl.u32 %v17247_v37, 16 }
  0x49   :  { %v5956_v58 = vshrl.u32 %v17248_v41, 16  ;;  %v5960_v59 = vshll.u32 %v17250_v47, 16 }
  0x4a   :  { %15220 = vmatmul.mubr.bf16.gmra.mrb[20].mxu1 %v1118_v57  ;;  %v17240_v57 = vld [vmem:[%s20896_s0 + $0xb0] sm:$0xff]   ;;  %v1182_v26 = vsel %vm1018_vm0, %v1177_v14, %v1181_v12  ;;  %v1213_v60 = vrot.slane %v1211_v48, 1 }
  0x4b   :  { %15804 = vmatmul.mubr.bf16.gmra.mrb[20].mxu0 %v5859_v61  ;;  %15223 = vmatprep.mubr.bf16.mxu1 %v1126_v62  ;;  %v5910_v61 = vor.u32 %v5908_v50, %v5906_v56  ;;  %v5914_v62 = vrot.slane %v5912_v51, 1  ;;  %v5920_v4 = vshll.u32 %v17240_v57, 16  ;;  %v5924_v10 = vshrl.u32 %v17240_v57, 16  ;;  %v17274_v14 = vld [vmem:[%s20895_s1 + $0xd0] sm:$0xff]  }
  0x4c   :  { %15807 = vmatprep.mubr.bf16.mxu0 %v5867_v1  ;;  %v1166_v1 = vsel %vm1018_vm0, %v1161_v54, %v1165_v52  ;;  %v1207_v51 = vshrl.u32 %v17245_v20, 16  ;;  %v5952_v52 = vshll.u32 %v17248_v41, 16  ;;  %v5948_v54 = vshrl.u32 %v17246_v23, 16  ;;  %16063 = vmatprep.subr.bf16.mxu0 %v17274_v14  ;;  %v17255_v23 = vld [vmem:[%s20896_s0 + $0xe0] sm:$0xff]  }
  0x4d   :  { %v5915_v9 = vsel %vm1018_vm0, %v5910_v61, %v5914_v62  ;;  %v5922_v15 = vrot.slane %v5920_v4, 1  ;;  %v1219_v56 = vshll.u32 %v17249_v44, 16  ;;  %v17251_v61 = vld [vmem:[%s20896_s0 + $0xd0] sm:$0xff]   ;;  %v1223_v4 = vshrl.u32 %v17249_v44, 16  ;;  %16064 = vmatpush3.bf16.msra.mxu0 %v17274_v14  ;;  %v17265_v14 = vld [vmem:[%s20896_s0 + $0x108] sm:$0xff]  }
  0x4e   :  { %v5954_v63 = vrot.slane %v5952_v52, 1  ;;  %v5962_v8 = vrot.slane %v5960_v59, 1  ;;  %v5972_v20 = vshrl.u32 %v17252_v0, 16  ;;  %v1247_v41 = vshrl.u32 %v17255_v23, 16 }
  0x4f   :  { %v1221_v3 = vrot.slane %v1219_v56, 1 }
  0x50   :  { %v5958_v7 = vor.u32 %v5956_v58, %v5954_v63 }
  0x51   :  { %v1225_v24 = vor.u32 %v1223_v4, %v1221_v3 }
  0x52   :  { %15224 = vmatmul.mubr.bf16.gmra.mrb[24].mxu1 %v1134_v17  ;;  %v5918_v17 = vor.u32 %v5916_v6, %v5914_v62  ;;  %v1209_v62 = vor.u32 %v1207_v51, %v1205_v43  ;;  %v17254_v6 = vld [vmem:[%s20896_s0 + $0xe8] sm:$0xff]   ;;  %v5963_v19 = vsel %vm1018_vm0, %v5958_v7, %v5962_v8  ;;  %v17263_v7 = vld [vmem:[%s20896_s0 + $0x100] sm:$0xff]  }
  0x53   :  { %15808 = vmatmul.mubr.bf16.gmra.mrb[24].mxu0 %v5875_v21  ;;  %15227 = vmatprep.mubr.bf16.mxu1 %v1142_v22  ;;  %v5926_v21 = vor.u32 %v5924_v10, %v5922_v15  ;;  %v5930_v22 = vrot.slane %v5928_v11, 1  ;;  %v1227_v10 = vshll.u32 %v17251_v61, 16  ;;  %v5964_v11 = vshrl.u32 %v17250_v47, 16  ;;  %v17259_v47 = vld [vmem:[%s20896_s0 + $0xf0] sm:$0xff]  }
  0x54   :  { %15811 = vmatprep.mubr.bf16.mxu0 %v5883_v25  ;;  %v1195_v25 = vshll.u32 %v17243_v13, 16  ;;  %v5923_v29 = vsel %vm1018_vm0, %v5918_v17, %v5922_v15  ;;  %v1214_v12 = vsel %vm1018_vm0, %v1209_v62, %v1213_v60  ;;  %v5968_v13 = vshll.u32 %v17252_v0, 16 }
  0x55   :  { %v5931_v33 = vsel %vm1018_vm0, %v5926_v21, %v5930_v22  ;;  %v5934_v39 = vor.u32 %v5932_v27, %v5930_v22  ;;  %v1231_v17 = vshrl.u32 %v17251_v61, 16  ;;  %v5976_v21 = vshll.u32 %v17254_v6, 16 }
  0x56   :  { %v1197_v36 = vrot.slane %v1195_v25, 1  ;;  %v1229_v22 = vrot.slane %v1227_v10, 1  ;;  %v5970_v25 = vrot.slane %v5968_v13, 1  ;;  %v5966_v27 = vor.u32 %v5964_v11, %v5962_v8  ;;  %v17264_v10 = vld [vmem:[%s20896_s0 + $0x110] sm:$0xff]  }
  0x57   :  { %v5939_v50 = vsel %vm1018_vm0, %v5934_v39, %v5938_v40  ;;  %v5978_v32 = vrot.slane %v5976_v21, 1  ;;  %v5980_v37 = vshrl.u32 %v17254_v6, 16  ;;  %v1259_v58 = vshll.u32 %v17259_v47, 16 }
  0x58   :  { %v1233_v28 = vor.u32 %v1231_v17, %v1229_v22  ;;  %v5971_v39 = vsel %vm1018_vm0, %v5966_v27, %v5970_v25  ;;  %v17266_v17 = vld [vmem:[%s20896_s0 + $0x118] sm:$0xff]  }
  0x59   :  { %v5982_v51 = vor.u32 %v5980_v37, %v5978_v32  ;;  %v1261_v6 = vrot.slane %v1259_v58, 1  ;;  %v17272_v58 = vld [vmem:[%s20896_s0 + $0x130] sm:$0xff]  }
  0x5a   :  { %15228 = vmatmul.mubr.bf16.gmra.mrb[28].mxu1 %v1150_v42  ;;  %v1201_v42 = vor.u32 %v1199_v31, %v1197_v36  ;;  %v5974_v31 = vor.u32 %v5972_v20, %v5970_v25  ;;  %v1279_v25 = vshrl.u32 %v17263_v7, 16 }
  0x5b   :  { %15812 = vmatmul.mubr.bf16.gmra.mrb[28].mxu0 %v5891_v45  ;;  %15231 = vmatprep.mubr.bf16.mxu1 %v1158_v46  ;;  %v5942_v45 = vor.u32 %v5940_v34, %v5938_v40  ;;  %v5946_v46 = vrot.slane %v5944_v35, 1  ;;  %v1243_v35 = vshll.u32 %v17255_v23, 16 }
  0x5c   :  { %15815 = vmatprep.mubr.bf16.mxu0 %v5899_v49  ;;  %v1198_v49 = vsel %vm1018_vm0, %v1193_v38, %v1197_v36  ;;  %v1206_v53 = vsel %vm1018_vm0, %v1201_v42, %v1205_v43  ;;  %v1230_v36 = vsel %vm1018_vm0, %v1225_v24, %v1229_v22  ;;  %v5979_v43 = vsel %vm1018_vm0, %v5974_v31, %v5978_v32  ;;  %v17267_v31 = vld [vmem:[%s20896_s0 + $0x110] sm:$0xff]  }
  0x5d   :  { %v5947_v57 = vsel %vm1018_vm0, %v5942_v45, %v5946_v46  ;;  %v6016_v22 = vshll.u32 %v17264_v10, 16 }
  0x62   :  { %15232 = vmatmul.mubr.bf16.gmra.mrb[32].mxu1 %v1166_v1  ;;  %v5950_v1 = vor.u32 %v5948_v54, %v5946_v46  ;;  %v1245_v46 = vrot.slane %v1243_v35, 1  ;;  %v17261_v54 = vld [vmem:[%s20896_s0 + $0xf8] sm:$0xff]  }
  0x63   :  { %15816 = vmatmul.mubr.bf16.gmra.mrb[32].mxu0 %v5907_v2  ;;  %15235 = vmatprep.mubr.bf16.mxu1 %v1174_v5  ;;  %v1217_v2 = vor.u32 %v1215_v55, %v1213_v60  ;;  %v17253_v5 = vld [vmem:[%s20896_s0 + $0xd8] sm:$0xff]   ;;  %v1271_v20 = vshrl.u32 %v17261_v54, 16 }
  0x64   :  { %15819 = vmatprep.mubr.bf16.mxu0 %v5915_v9  ;;  %v17273_v9 = vld [vmem:[%s20895_s1 + $0x10] sm:$0xff]   ;;  %v5955_v15 = vsel %vm1018_vm0, %v5950_v1, %v5954_v63  ;;  %v1235_v18 = vshll.u32 %v17253_v5, 16  ;;  %v1239_v34 = vshrl.u32 %v17253_v5, 16  ;;  %v1249_v52 = vor.u32 %v1247_v41, %v1245_v46  ;;  %v17270_v41 = vld [vmem:[%s20896_s0 + $0x128] sm:$0xff]  }
  0x65   :  { %15479 = vmatprep.subr.bf16.mxu1 %v17273_v9  ;;  %v1222_v16 = vsel %vm1018_vm0, %v1217_v2, %v1221_v3  ;;  %v1263_v1 = vshrl.u32 %v17259_v47, 16  ;;  %v1267_v2 = vshll.u32 %v17261_v54, 16 }
  0x66   :  { %15480 = vmatpush3.bf16.msra.mxu1 %v17273_v9 }
  0x67   :  { %v1269_v13 = vrot.slane %v1267_v2, 1 }
  0x69   :  { %v1273_v32 = vor.u32 %v1271_v20, %v1269_v13  ;;  %v17308_v20 = vld [vmem:[%s20895_s1 + $0x18] sm:$0xff]  }
  0x6a   :  { %15236 = vmatmul.mubr.bf16.gmra.mrb[36].mxu1 %v1182_v26  ;;  %v17256_v26 = vld [vmem:[%s20896_s0 + $0xf0] sm:$0xff]   ;;  %15481 = vmatprep.subr.bf16.mxu1 %v17308_v20 }
  0x6b   :  { %15820 = vmatmul.mubr.bf16.gmra.mrb[36].mxu0 %v5923_v29  ;;  %15239 = vmatprep.mubr.bf16.mxu1 %v1190_v30  ;;  %v1237_v29 = vrot.slane %v1235_v18, 1  ;;  %v17257_v30 = vld [vmem:[%s20896_s0 + $0xe8] sm:$0xff]   ;;  %v5984_v38 = vshll.u32 %v17256_v26, 16  ;;  %v5988_v44 = vshrl.u32 %v17256_v26, 16  ;;  %v1275_v18 = vshll.u32 %v17263_v7, 16 }
  0x6c   :  { %15823 = vmatprep.mubr.bf16.mxu0 %v5931_v33  ;;  %v17258_v33 = vld [vmem:[%s20896_s0 + $0xf8] sm:$0xff]   ;;  %v1251_v42 = vshll.u32 %v17257_v30, 16  ;;  %v1255_v60 = vshrl.u32 %v17257_v30, 16  ;;  %v1283_v26 = vshll.u32 %v17265_v14, 16  ;;  %15482 = vmatpush3.bf16.msra.mxu1 %v17308_v20 }
  0x6d   :  { %v1238_v40 = vsel %vm1018_vm0, %v1233_v28, %v1237_v29  ;;  %v5992_v45 = vshll.u32 %v17258_v33, 16  ;;  %v1241_v48 = vor.u32 %v1239_v34, %v1237_v29  ;;  %v5996_v61 = vshrl.u32 %v17258_v33, 16  ;;  %v17268_v34 = vld [vmem:[%s20896_s0 + $0x120] sm:$0xff]  }
  0x6e   :  { %v6020_v28 = vshrl.u32 %v17264_v10, 16  ;;  %v6024_v29 = vshll.u32 %v17266_v17, 16  ;;  %v1277_v30 = vrot.slane %v1275_v18, 1  ;;  %v6018_v33 = vrot.slane %v6016_v22, 1 }
  0x6f   :  { %v5994_v56 = vrot.slane %v5992_v45, 1  ;;  %v1246_v59 = vsel %vm1018_vm0, %v1241_v48, %v1245_v46  ;;  %v1285_v37 = vrot.slane %v1283_v26, 1  ;;  %v6028_v45 = vshrl.u32 %v17266_v17, 16  ;;  %v17280_v26 = vld [vmem:[%s20896_s0 + $0x148] sm:$0xff]  }
  0x70   :  { %v6032_v46 = vshll.u32 %v17268_v34, 16 }
  0x71   :  { %v5998_v11 = vor.u32 %v5996_v61, %v5994_v56 }
  0x72   :  { %15240 = vmatmul.mubr.bf16.gmra.mrb[40].mxu1 %v1198_v49  ;;  %v5986_v49 = vrot.slane %v5984_v38, 1  ;;  %v17269_v38 = vld [vmem:[%s20896_s0 + $0x118] sm:$0xff]  }
  0x73   :  { %15824 = vmatmul.mubr.bf16.gmra.mrb[40].mxu0 %v5939_v50  ;;  %15243 = vmatprep.mubr.bf16.mxu1 %v1206_v53  ;;  %v17260_v50 = vld [vmem:[%s20896_s0 + $0x100] sm:$0xff]   ;;  %v1253_v53 = vrot.slane %v1251_v42, 1  ;;  %v1291_v42 = vshll.u32 %v17267_v31, 16 }
  0x74   :  { %15827 = vmatprep.mubr.bf16.mxu0 %v5947_v57  ;;  %v5990_v55 = vor.u32 %v5988_v44, %v5986_v49  ;;  %v17262_v57 = vld [vmem:[%s20896_s0 + $0x108] sm:$0xff]   ;;  %v6000_v62 = vshll.u32 %v17260_v50, 16  ;;  %v5987_v63 = vsel %vm1018_vm0, %v5982_v51, %v5986_v49  ;;  %v6004_v4 = vshrl.u32 %v17260_v50, 16 }
  0x75   :  { %v1254_v0 = vsel %vm1018_vm0, %v1249_v52, %v1253_v53  ;;  %v6008_v5 = vshll.u32 %v17262_v57, 16  ;;  %v1257_v8 = vor.u32 %v1255_v60, %v1253_v53  ;;  %v6012_v21 = vshrl.u32 %v17262_v57, 16 }
  0x76   :  { %v5995_v3 = vsel %vm1018_vm0, %v5990_v55, %v5994_v56  ;;  %v6002_v9 = vrot.slane %v6000_v62, 1  ;;  %v1287_v44 = vshrl.u32 %v17265_v14, 16  ;;  %v1295_v49 = vshrl.u32 %v17267_v31, 16  ;;  %v17271_v55 = vld [vmem:[%s20896_s0 + $0x120] sm:$0xff]   ;;  %v17275_v62 = vld [vmem:[%s20896_s0 + $0x128] sm:$0xff]  }
  0x77   :  { %v1299_v50 = vshll.u32 %v17269_v38, 16  ;;  %v6036_v52 = vshrl.u32 %v17268_v34, 16  ;;  %v6040_v53 = vshll.u32 %v17270_v41, 16  ;;  %v1293_v54 = vrot.slane %v1291_v42, 1 }
  0x78   :  { %v6003_v23 = vsel %vm1018_vm0, %v5998_v11, %v6002_v9  ;;  %v1289_v56 = vor.u32 %v1287_v44, %v1285_v37  ;;  %v6034_v57 = vrot.slane %v6032_v46, 1  ;;  %v1307_v2 = vshll.u32 %v17271_v55, 16  ;;  %v17282_v44 = vld [vmem:[%s20896_s0 + $0x150] sm:$0xff]  }
  0x79   :  { %v1297_v60 = vor.u32 %v1295_v49, %v1293_v54  ;;  %v1301_v61 = vrot.slane %v1299_v50, 1  ;;  %v1315_v10 = vshll.u32 %v17275_v62, 16  ;;  %v1319_v31 = vshrl.u32 %v17275_v62, 16 }
  0x7a   :  { %15244 = vmatmul.mubr.bf16.gmra.mrb[44].mxu1 %v1214_v12  ;;  %v1265_v12 = vor.u32 %v1263_v1, %v1261_v6  ;;  %v17276_v1 = vld [vmem:[%s20896_s0 + $0x138] sm:$0xff]   ;;  %v1309_v14 = vrot.slane %v1307_v2, 1  ;;  %v6084_v62 = vshrl.u32 %v17282_v44, 16 }
  0x7b   :  { %15828 = vmatmul.mubr.bf16.gmra.mrb[44].mxu0 %v5955_v15  ;;  %15247 = vmatprep.mubr.bf16.mxu1 %v1222_v16  ;;  %v6006_v15 = vor.u32 %v6004_v4, %v6002_v9  ;;  %v6010_v16 = vrot.slane %v6008_v5, 1  ;;  %v1303_v4 = vshrl.u32 %v17269_v38, 16  ;;  %v6044_v5 = vshrl.u32 %v17270_v41, 16  ;;  %v17281_v41 = vld [vmem:[%s20896_s0 + $0x140] sm:$0xff]  }
  0x7c   :  { %15831 = vmatprep.mubr.bf16.mxu0 %v5963_v19  ;;  %v1262_v19 = vsel %vm1018_vm0, %v1257_v8, %v1261_v6  ;;  %v1270_v24 = vsel %vm1018_vm0, %v1265_v12, %v1269_v13  ;;  %v6048_v6 = vshll.u32 %v17272_v58, 16  ;;  %v1302_v8 = vsel %vm1018_vm0, %v1297_v60, %v1301_v61 }
  0x7d   :  { %v6011_v27 = vsel %vm1018_vm0, %v6006_v15, %v6010_v16  ;;  %v6014_v35 = vor.u32 %v6012_v21, %v6010_v16  ;;  %v1311_v9 = vshrl.u32 %v17271_v55, 16  ;;  %v6052_v12 = vshrl.u32 %v17272_v58, 16  ;;  %v17277_v15 = vld [vmem:[%s20896_s0 + $0x130] sm:$0xff]  }
  0x7e   :  { %v6056_v13 = vshll.u32 %v17276_v1, 16  ;;  %v1305_v16 = vor.u32 %v1303_v4, %v1301_v61  ;;  %v6050_v18 = vrot.slane %v6048_v6, 1  ;;  %v1317_v22 = vrot.slane %v1315_v10, 1  ;;  %v17286_v4 = vld [vmem:[%s20896_s0 + $0x160] sm:$0xff]  }
  0x7f   :  { %v6019_v47 = vsel %vm1018_vm0, %v6014_v35, %v6018_v33  ;;  %v1313_v21 = vor.u32 %v1311_v9, %v1309_v14  ;;  %v6060_v34 = vshrl.u32 %v17276_v1, 16  ;;  %v1327_v35 = vshrl.u32 %v17277_v15, 16  ;;  %v17285_v1 = vld [vmem:[%s20896_s0 + $0x150] sm:$0xff]  }
  0x80   :  { %v1321_v42 = vor.u32 %v1319_v31, %v1317_v22  ;;  %v6076_v55 = vshrl.u32 %v17280_v26, 16 }
  0x82   :  { %15248 = vmatmul.mubr.bf16.gmra.mrb[48].mxu1 %v1230_v36  ;;  %v1281_v36 = vor.u32 %v1279_v25, %v1277_v30  ;;  %v6058_v25 = vrot.slane %v6056_v13, 1  ;;  %v1355_v13 = vshll.u32 %v17285_v1, 16 }
  0x83   :  { %15832 = vmatmul.mubr.bf16.gmra.mrb[48].mxu0 %v5971_v39  ;;  %15251 = vmatprep.mubr.bf16.mxu1 %v1238_v40  ;;  %v6022_v39 = vor.u32 %v6020_v28, %v6018_v33  ;;  %v6026_v40 = vrot.slane %v6024_v29, 1  ;;  %v17310_v28 = vld [vmem:[%s20895_s1 + $0xd8] sm:$0xff]   ;;  %v1310_v29 = vsel %vm1018_vm0, %v1305_v16, %v1309_v14  ;;  %v1318_v33 = vsel %vm1018_vm0, %v1313_v21, %v1317_v22 }
  0x84   :  { %15835 = vmatprep.mubr.bf16.mxu0 %v5979_v43  ;;  %v1278_v43 = vsel %vm1018_vm0, %v1273_v32, %v1277_v30  ;;  %v1286_v48 = vsel %vm1018_vm0, %v1281_v36, %v1285_v37  ;;  %16065 = vmatprep.subr.bf16.mxu0 %v17310_v28  ;;  %v6096_v16 = vshll.u32 %v17286_v4, 16  ;;  %v6100_v22 = vshrl.u32 %v17286_v4, 16 }
  0x85   :  { %v6027_v51 = vsel %vm1018_vm0, %v6022_v39, %v6026_v40  ;;  %v6072_v39 = vshll.u32 %v17280_v26, 16  ;;  %16066 = vmatpush3.bf16.msra.mxu0 %v17310_v28  ;;  %v17290_v28 = vld [vmem:[%s20896_s0 + $0x170] sm:$0xff]  }
  0x87   :  { %v6074_v50 = vrot.slane %v6072_v39, 1 }
  0x8a   :  { %15252 = vmatmul.mubr.bf16.gmra.mrb[52].mxu1 %v1246_v59  ;;  %v6030_v59 = vor.u32 %v6028_v45, %v6026_v40  ;;  %v6062_v45 = vor.u32 %v6060_v34, %v6058_v25 }
  0x8b   :  { %15836 = vmatmul.mubr.bf16.gmra.mrb[52].mxu0 %v5987_v63  ;;  %15255 = vmatprep.mubr.bf16.mxu1 %v1254_v0  ;;  %v6038_v63 = vor.u32 %v6036_v52, %v6034_v57  ;;  %v6042_v0 = vrot.slane %v6040_v53, 1  ;;  %v1339_v52 = vshll.u32 %v17281_v41, 16 }
  0x8c   :  { %15839 = vmatprep.mubr.bf16.mxu0 %v5995_v3  ;;  %v1294_v3 = vsel %vm1018_vm0, %v1289_v56, %v1293_v54  ;;  %v6035_v7 = vsel %vm1018_vm0, %v6030_v59, %v6034_v57  ;;  %v6080_v56 = vshll.u32 %v17282_v44, 16  ;;  %v1343_v59 = vshrl.u32 %v17281_v41, 16 }
  0x8d   :  { %v6043_v11 = vsel %vm1018_vm0, %v6038_v63, %v6042_v0  ;;  %v6046_v17 = vor.u32 %v6044_v5, %v6042_v0  ;;  %v1341_v0 = vrot.slane %v1339_v52, 1  ;;  %v6078_v5 = vor.u32 %v6076_v55, %v6074_v50  ;;  %v17294_v52 = vld [vmem:[%s20896_s0 + $0x180] sm:$0xff]  }
  0x8f   :  { %v6051_v30 = vsel %vm1018_vm0, %v6046_v17, %v6050_v18  ;;  %v1345_v6 = vor.u32 %v1343_v59, %v1341_v0  ;;  %v17296_v59 = vld [vmem:[%s20896_s0 + $0x188] sm:$0xff]  }
  0x92   :  { %15256 = vmatmul.mubr.bf16.gmra.mrb[56].mxu1 %v1262_v19  ;;  %v17278_v19 = vld [vmem:[%s20896_s0 + $0x140] sm:$0xff]  }
  0x93   :  { %15840 = vmatmul.mubr.bf16.gmra.mrb[56].mxu0 %v6003_v23  ;;  %15259 = vmatprep.mubr.bf16.mxu1 %v1270_v24  ;;  %v17279_v23 = vld [vmem:[%s20896_s0 + $0x138] sm:$0xff]   ;;  %v6054_v24 = vor.u32 %v6052_v12, %v6050_v18  ;;  %v6064_v32 = vshll.u32 %v17278_v19, 16  ;;  %v6068_v38 = vshrl.u32 %v17278_v19, 16  ;;  %v1359_v19 = vshrl.u32 %v17285_v1, 16 }
  0x94   :  { %15843 = vmatprep.mubr.bf16.mxu0 %v6011_v27  ;;  %v1323_v27 = vshll.u32 %v17277_v15, 16  ;;  %v1331_v36 = vshll.u32 %v17279_v23, 16  ;;  %v1335_v54 = vshrl.u32 %v17279_v23, 16 }
  0x95   :  { %v6059_v37 = vsel %vm1018_vm0, %v6054_v24, %v6058_v25  ;;  %v1357_v24 = vrot.slane %v1355_v13, 1  ;;  %v17289_v25 = vld [vmem:[%s20896_s0 + $0x160] sm:$0xff]   ;;  %v17298_v13 = vld [vmem:[%s20896_s0 + $0x190] sm:$0xff]  }
  0x96   :  { %v1325_v40 = vrot.slane %v1323_v27, 1  ;;  %v6098_v27 = vrot.slane %v6096_v16, 1  ;;  %v17299_v16 = vld [vmem:[%s20896_s0 + $0x188] sm:$0xff]  }
  0x98   :  { %v1329_v46 = vor.u32 %v1327_v35, %v1325_v40  ;;  %v1326_v53 = vsel %vm1018_vm0, %v1321_v42, %v1325_v40  ;;  %v17292_v35 = vld [vmem:[%s20896_s0 + $0x178] sm:$0xff]   ;;  %v6112_v40 = vshll.u32 %v17290_v28, 16 }
  0x9a   :  { %15260 = vmatmul.mubr.bf16.gmra.mrb[60].mxu1 %v1278_v43  ;;  %v6066_v43 = vrot.slane %v6064_v32, 1  ;;  %v17291_v32 = vld [vmem:[%s20896_s0 + $0x168] sm:$0xff]  }
  0x9b   :  { %15844 = vmatmul.mubr.bf16.gmra.mrb[60].mxu0 %v6019_v47  ;;  %15263 = vmatprep.mubr.bf16.mxu1 %v1286_v48  ;;  %v1333_v47 = vrot.slane %v1331_v36, 1  ;;  %v17283_v48 = vld [vmem:[%s20896_s0 + $0x148] sm:$0xff]   ;;  %v1379_v44 = vshll.u32 %v17291_v32, 16 }
  0x9c   :  { %15847 = vmatprep.mubr.bf16.mxu0 %v6027_v51  ;;  %v6070_v49 = vor.u32 %v6068_v38, %v6066_v43  ;;  %v17284_v51 = vld [vmem:[%s20896_s0 + $0x158] sm:$0xff]   ;;  %v6067_v57 = vsel %vm1018_vm0, %v6062_v45, %v6066_v43  ;;  %v1347_v60 = vshll.u32 %v17283_v48, 16  ;;  %v1351_v12 = vshrl.u32 %v17283_v48, 16 }
  0x9d   :  { %v1334_v58 = vsel %vm1018_vm0, %v1329_v46, %v1333_v47  ;;  %v6088_v63 = vshll.u32 %v17284_v51, 16  ;;  %v1337_v2 = vor.u32 %v1335_v54, %v1333_v47  ;;  %v6092_v15 = vshrl.u32 %v17284_v51, 16 }
  0x9e   :  { %v6075_v61 = vsel %vm1018_vm0, %v6070_v49, %v6074_v50  ;;  %v1375_v43 = vshrl.u32 %v17289_v25, 16  ;;  %v6116_v46 = vshrl.u32 %v17290_v28, 16  ;;  %v6120_v47 = vshll.u32 %v17292_v35, 16  ;;  %v17293_v49 = vld [vmem:[%s20896_s0 + $0x170] sm:$0xff]  }
  0x9f   :  { %v6090_v10 = vrot.slane %v6088_v63, 1  ;;  %v1342_v14 = vsel %vm1018_vm0, %v1337_v2, %v1341_v0  ;;  %v6114_v51 = vrot.slane %v6112_v40, 1  ;;  %v1381_v55 = vrot.slane %v1379_v44, 1 }
  0xa0   :  { %v6124_v63 = vshrl.u32 %v17292_v35, 16  ;;  %v6128_v0 = vshll.u32 %v17294_v52, 16  ;;  %v1411_v28 = vshll.u32 %v17299_v16, 16  ;;  %v18269_v35 = vld [vmem:[%s20896_s0 + $0x198] sm:$0xff]  }
  0xa2   :  { %15264 = vmatmul.mubr.bf16.gmra.mrb[64].mxu1 %v1294_v3  ;;  %v6082_v3 = vrot.slane %v6080_v56, 1  ;;  %v17295_v56 = vld [vmem:[%s20896_s0 + $0x178] sm:$0xff]  }
  0xa3   :  { %15848 = vmatmul.mubr.bf16.gmra.mrb[64].mxu0 %v6035_v7  ;;  %15267 = vmatprep.mubr.bf16.mxu1 %v1302_v8  ;;  %v1349_v7 = vrot.slane %v1347_v60, 1  ;;  %v17287_v8 = vld [vmem:[%s20896_s0 + $0x158] sm:$0xff]   ;;  %v1383_v60 = vshrl.u32 %v17291_v32, 16  ;;  %v1395_v4 = vshll.u32 %v17295_v56, 16 }
  0xa4   :  { %15851 = vmatprep.mubr.bf16.mxu0 %v6043_v11  ;;  %v6086_v9 = vor.u32 %v6084_v62, %v6082_v3  ;;  %v17288_v11 = vld [vmem:[%s20896_s0 + $0x168] sm:$0xff]   ;;  %v6083_v17 = vsel %vm1018_vm0, %v6078_v5, %v6082_v3  ;;  %v1363_v20 = vshll.u32 %v17287_v8, 16  ;;  %v1367_v36 = vshrl.u32 %v17287_v8, 16 }
  0xa5   :  { %v1350_v18 = vsel %vm1018_vm0, %v1345_v6, %v1349_v7  ;;  %v6104_v23 = vshll.u32 %v17288_v11, 16  ;;  %v1353_v26 = vor.u32 %v1351_v12, %v1349_v7  ;;  %v6108_v39 = vshrl.u32 %v17288_v11, 16 }
  0xa6   :  { %v6091_v21 = vsel %vm1018_vm0, %v6086_v9, %v6090_v10  ;;  %v1365_v31 = vrot.slane %v1363_v20, 1  ;;  %v1391_v3 = vshrl.u32 %v17293_v49, 16  ;;  %v6132_v6 = vshrl.u32 %v17294_v52, 16  ;;  %v17297_v9 = vld [vmem:[%s20896_s0 + $0x180] sm:$0xff]  }
  0xa7   :  { %v6106_v34 = vrot.slane %v6104_v23, 1  ;;  %v1358_v38 = vsel %vm1018_vm0, %v1353_v26, %v1357_v24  ;;  %v6136_v7 = vshll.u32 %v17296_v59, 16  ;;  %v6130_v12 = vrot.slane %v6128_v0, 1 }
  0xa8   :  { %v1369_v50 = vor.u32 %v1367_v36, %v1365_v31  ;;  %v1403_v20 = vshll.u32 %v17297_v9, 16  ;;  %v1399_v23 = vshrl.u32 %v17295_v56, 16  ;;  %v6140_v26 = vshrl.u32 %v17296_v59, 16  ;;  %v17305_v59 = vld [vmem:[%s20896_s0 + $0x1a0] sm:$0xff]  }
  0xaa   :  { %15268 = vmatmul.mubr.bf16.gmra.mrb[68].mxu1 %v1310_v29  ;;  %v6094_v29 = vor.u32 %v6092_v15, %v6090_v10  ;;  %v1385_v10 = vor.u32 %v1383_v60, %v1381_v55  ;;  %v1397_v15 = vrot.slane %v1395_v4, 1 }
  0xab   :  { %15852 = vmatmul.mubr.bf16.gmra.mrb[68].mxu0 %v6051_v30  ;;  %15271 = vmatprep.mubr.bf16.mxu1 %v1318_v33  ;;  %v1361_v30 = vor.u32 %v1359_v19, %v1357_v24  ;;  %v6102_v33 = vor.u32 %v6100_v22, %v6098_v27  ;;  %v17300_v19 = vld [vmem:[%s20896_s0 + $0x198] sm:$0xff]   ;;  %v6144_v24 = vshll.u32 %v17298_v13, 16 }
  0xac   :  { %15855 = vmatprep.mubr.bf16.mxu0 %v6059_v37  ;;  %v1371_v37 = vshll.u32 %v17289_v25, 16  ;;  %v6099_v41 = vsel %vm1018_vm0, %v6094_v29, %v6098_v27  ;;  %v1407_v27 = vshrl.u32 %v17297_v9, 16  ;;  %v17301_v29 = vld [vmem:[%s20896_s0 + $0x190] sm:$0xff]   ;;  %v6152_v32 = vshll.u32 %v17300_v19, 16 }
  0xad   :  { %v1366_v42 = vsel %vm1018_vm0, %v1361_v30, %v1365_v31  ;;  %v6107_v45 = vsel %vm1018_vm0, %v6102_v33, %v6106_v34  ;;  %v6148_v31 = vshrl.u32 %v17298_v13, 16  ;;  %v1405_v33 = vrot.slane %v1403_v20, 1 }
  0xae   :  { %v1373_v48 = vrot.slane %v1371_v37, 1  ;;  %v1401_v36 = vor.u32 %v1399_v23, %v1397_v15  ;;  %v6146_v37 = vrot.slane %v6144_v24, 1  ;;  %v6154_v44 = vrot.slane %v6152_v32, 1  ;;  %v17312_v23 = vld [vmem:[%s20896_s0 + $0x1c0] sm:$0xff]  }
  0xaf   :  { %v1409_v40 = vor.u32 %v1407_v27, %v1405_v33  ;;  %v1439_v13 = vshrl.u32 %v17305_v59, 16 }
  0xb0   :  { %v1377_v54 = vor.u32 %v1375_v43, %v1373_v48  ;;  %v1374_v62 = vsel %vm1018_vm0, %v1369_v50, %v1373_v48  ;;  %v6150_v43 = vor.u32 %v6148_v31, %v6146_v37  ;;  %v1415_v48 = vshrl.u32 %v17299_v16, 16 }
  0xb2   :  { %15272 = vmatmul.mubr.bf16.gmra.mrb[72].mxu1 %v1326_v53  ;;  %v6110_v53 = vor.u32 %v6108_v39, %v6106_v34  ;;  %v1382_v2 = vsel %vm1018_vm0, %v1377_v54, %v1381_v55  ;;  %v17302_v34 = vld [vmem:[%s20896_s0 + $0x1a0] sm:$0xff]   ;;  %v1427_v54 = vshll.u32 %v18269_v35, 16  ;;  %v6155_v55 = vsel %vm1018_vm0, %v6150_v43, %v6154_v44 }
  0xb3   :  { %15856 = vmatmul.mubr.bf16.gmra.mrb[72].mxu0 %v6067_v57  ;;  %15275 = vmatprep.mubr.bf16.mxu1 %v1334_v58  ;;  %v6118_v57 = vor.u32 %v6116_v46, %v6114_v51  ;;  %v6122_v58 = vrot.slane %v6120_v47, 1  ;;  %v1419_v46 = vshll.u32 %v17301_v29, 16  ;;  %v1406_v47 = vsel %vm1018_vm0, %v1401_v36, %v1405_v33  ;;  %v17315_v43 = vld [vmem:[%s20896_s0 + $0x1c0] sm:$0xff]  }
  0xb4   :  { %15859 = vmatprep.mubr.bf16.mxu0 %v6075_v61  ;;  %v1387_v61 = vshll.u32 %v17293_v49, 16  ;;  %v6115_v1 = vsel %vm1018_vm0, %v6110_v53, %v6114_v51  ;;  %v6156_v49 = vshrl.u32 %v17300_v19, 16  ;;  %v6160_v50 = vshll.u32 %v17302_v34, 16  ;;  %v17311_v19 = vld [vmem:[%s20896_s0 + $0x1b0] sm:$0xff]  }
  0xb5   :  { %v6123_v5 = vsel %vm1018_vm0, %v6118_v57, %v6122_v58  ;;  %v6126_v11 = vor.u32 %v6124_v63, %v6122_v58  ;;  %v1423_v53 = vshrl.u32 %v17301_v29, 16  ;;  %v6164_v56 = vshrl.u32 %v17302_v34, 16  ;;  %v17314_v29 = vld [vmem:[%s20896_s0 + $0x1c8] sm:$0xff]  }
  0xb6   :  { %v1389_v8 = vrot.slane %v1387_v61, 1  ;;  %v1421_v58 = vrot.slane %v1419_v46, 1  ;;  %v6162_v61 = vrot.slane %v6160_v50, 1  ;;  %v6158_v63 = vor.u32 %v6156_v49, %v6154_v44  ;;  %v17316_v46 = vld [vmem:[%s20896_s0 + $0x1d0] sm:$0xff]   ;;  %v17317_v50 = vld [vmem:[%s20896_s0 + $0x1c8] sm:$0xff]  }
  0xb7   :  { %v6131_v22 = vsel %vm1018_vm0, %v6126_v11, %v6130_v12  ;;  %v6192_v34 = vshll.u32 %v17312_v23, 16 }
  0xb8   :  { %v1425_v0 = vor.u32 %v1423_v53, %v1421_v58  ;;  %v6163_v11 = vsel %vm1018_vm0, %v6158_v63, %v6162_v61  ;;  %v17318_v53 = vld [vmem:[%s20896_s0 + $0x1d8] sm:$0xff]  }
  0xba   :  { %15276 = vmatmul.mubr.bf16.gmra.mrb[76].mxu1 %v1342_v14  ;;  %v1393_v14 = vor.u32 %v1391_v3, %v1389_v8  ;;  %v6166_v3 = vor.u32 %v6164_v56, %v6162_v61  ;;  %v1471_v61 = vshrl.u32 %v17315_v43, 16 }
  0xbb   :  { %15860 = vmatmul.mubr.bf16.gmra.mrb[76].mxu0 %v6083_v17  ;;  %15279 = vmatprep.mubr.bf16.mxu1 %v1350_v18  ;;  %v6134_v17 = vor.u32 %v6132_v6, %v6130_v12  ;;  %v6138_v18 = vrot.slane %v6136_v7, 1  ;;  %v1431_v6 = vshrl.u32 %v18269_v35, 16  ;;  %v1435_v7 = vshll.u32 %v17305_v59, 16 }
  0xbc   :  { %15863 = vmatprep.mubr.bf16.mxu0 %v6091_v21  ;;  %v1390_v21 = vsel %vm1018_vm0, %v1385_v10, %v1389_v8  ;;  %v1398_v25 = vsel %vm1018_vm0, %v1393_v14, %v1397_v15 }
  0xbd   :  { %v6139_v30 = vsel %vm1018_vm0, %v6134_v17, %v6138_v18  ;;  %v6142_v39 = vor.u32 %v6140_v26, %v6138_v18  ;;  %v1437_v18 = vrot.slane %v1435_v7, 1  ;;  %v17313_v26 = vld [vmem:[%s20896_s0 + $0x1b8] sm:$0xff]   ;;  %v17320_v7 = vld [vmem:[%s20896_s0 + $0x1e0] sm:$0xff]  }
  0xbf   :  { %v6147_v51 = vsel %vm1018_vm0, %v6142_v39, %v6146_v37  ;;  %v1441_v24 = vor.u32 %v1439_v13, %v1437_v18  ;;  %v1455_v37 = vshrl.u32 %v17311_v19, 16  ;;  %v17322_v13 = vld [vmem:[%s20896_s0 + $0x1e8] sm:$0xff]  }
  0xc2   :  { %15280 = vmatmul.mubr.bf16.gmra.mrb[80].mxu1 %v1358_v38  ;;  %v17345_v38 = vld [vmem:[%s20895_s1 + $0x20] sm:$0xff]  }
  0xc3   :  { %15864 = vmatmul.mubr.bf16.gmra.mrb[80].mxu0 %v6099_v41  ;;  %15283 = vmatprep.mubr.bf16.mxu1 %v1366_v42  ;;  %v1413_v41 = vrot.slane %v1411_v28, 1  ;;  %v17304_v42 = vld [vmem:[%s20896_s0 + $0x1a8] sm:$0xff]  }
  0xc4   :  { %15867 = vmatprep.mubr.bf16.mxu0 %v6107_v45  ;;  %15483 = vmatprep.subr.bf16.mxu1 %v17345_v38  ;;  %v17346_v45 = vld [vmem:[%s20895_s1 + $0xe0] sm:$0xff]   ;;  %v6168_v57 = vshll.u32 %v17304_v42, 16  ;;  %v6172_v9 = vshrl.u32 %v17304_v42, 16 }
  0xc5   :  { %15484 = vmatpush3.bf16.msra.mxu1 %v17345_v38  ;;  %16067 = vmatprep.subr.bf16.mxu0 %v17346_v45  ;;  %v1414_v52 = vsel %vm1018_vm0, %v1409_v40, %v1413_v41  ;;  %v1417_v60 = vor.u32 %v1415_v48, %v1413_v41  ;;  %v1459_v38 = vshll.u32 %v17313_v26, 16  ;;  %v6196_v40 = vshrl.u32 %v17312_v23, 16 }
  0xc6   :  { %16068 = vmatpush3.bf16.msra.mxu0 %v17346_v45  ;;  %v6170_v4 = vrot.slane %v6168_v57, 1  ;;  %v6200_v41 = vshll.u32 %v17314_v29, 16  ;;  %v6194_v45 = vrot.slane %v6192_v34, 1  ;;  %v6204_v57 = vshrl.u32 %v17314_v29, 16  ;;  %v17324_v29 = vld [vmem:[%s20896_s0 + $0x1f0] sm:$0xff]  }
  0xc7   :  { %v1422_v8 = vsel %vm1018_vm0, %v1417_v60, %v1421_v58  ;;  %v1461_v49 = vrot.slane %v1459_v38, 1  ;;  %v6208_v58 = vshll.u32 %v17316_v46, 16 }
  0xc8   :  { %v6171_v15 = vsel %vm1018_vm0, %v6166_v3, %v6170_v4  ;;  %v17319_v3 = vld [vmem:[%s20896_s0 + $0x1d0] sm:$0xff]  }
  0xca   :  { %15284 = vmatmul.mubr.bf16.gmra.mrb[84].mxu1 %v1374_v62  ;;  %v17306_v62 = vld [vmem:[%s20896_s0 + $0x1b0] sm:$0xff]  }
  0xcb   :  { %15868 = vmatmul.mubr.bf16.gmra.mrb[84].mxu0 %v6115_v1  ;;  %15287 = vmatprep.mubr.bf16.mxu1 %v1382_v2  ;;  %v1429_v1 = vrot.slane %v1427_v54, 1  ;;  %v17307_v2 = vld [vmem:[%s20896_s0 + $0x1a8] sm:$0xff]   ;;  %v6176_v10 = vshll.u32 %v17306_v62, 16  ;;  %v6180_v16 = vshrl.u32 %v17306_v62, 16  ;;  %v1463_v54 = vshrl.u32 %v17313_v26, 16 }
  0xcc   :  { %15871 = vmatprep.mubr.bf16.mxu0 %v6123_v5  ;;  %v17309_v5 = vld [vmem:[%s20896_s0 + $0x1b8] sm:$0xff]   ;;  %v1443_v14 = vshll.u32 %v17307_v2, 16  ;;  %v1447_v33 = vshrl.u32 %v17307_v2, 16  ;;  %v1475_v62 = vshll.u32 %v17317_v50, 16 }
  0xcd   :  { %v1430_v12 = vsel %vm1018_vm0, %v1425_v0, %v1429_v1  ;;  %v6184_v17 = vshll.u32 %v17309_v5, 16  ;;  %v1433_v20 = vor.u32 %v1431_v6, %v1429_v1  ;;  %v6188_v36 = vshrl.u32 %v17309_v5, 16 }
  0xce   :  { %v6212_v0 = vshrl.u32 %v17316_v46, 16  ;;  %v6216_v1 = vshll.u32 %v17318_v53, 16  ;;  %v6210_v6 = vrot.slane %v6208_v58, 1 }
  0xcf   :  { %v6186_v28 = vrot.slane %v6184_v17, 1  ;;  %v1438_v31 = vsel %vm1018_vm0, %v1433_v20, %v1437_v18  ;;  %v6224_v18 = vshll.u32 %v17320_v7, 16  ;;  %v6220_v20 = vshrl.u32 %v17318_v53, 16 }
  0xd2   :  { %15288 = vmatmul.mubr.bf16.gmra.mrb[88].mxu1 %v1390_v21  ;;  %v6174_v21 = vor.u32 %v6172_v9, %v6170_v4  ;;  %v1465_v4 = vor.u32 %v1463_v54, %v1461_v49  ;;  %v1477_v9 = vrot.slane %v1475_v62, 1  ;;  %v17328_v54 = vld [vmem:[%s20896_s0 + $0x200] sm:$0xff]  }
  0xd3   :  { %15872 = vmatmul.mubr.bf16.gmra.mrb[88].mxu0 %v6131_v22  ;;  %15291 = vmatprep.mubr.bf16.mxu1 %v1398_v25  ;;  %v6178_v22 = vrot.slane %v6176_v10, 1  ;;  %v1445_v25 = vrot.slane %v1443_v14, 1  ;;  %v17321_v10 = vld [vmem:[%s20896_s0 + $0x1d8] sm:$0xff]   ;;  %v1479_v14 = vshrl.u32 %v17317_v50, 16 }
  0xd4   :  { %15875 = vmatprep.mubr.bf16.mxu0 %v6139_v30  ;;  %v1451_v30 = vshll.u32 %v17311_v19, 16 }
  0xd5   :  { %v6182_v27 = vor.u32 %v6180_v16, %v6178_v22  ;;  %v6179_v32 = vsel %vm1018_vm0, %v6174_v21, %v6178_v22  ;;  %v1446_v35 = vsel %vm1018_vm0, %v1441_v24, %v1445_v25  ;;  %v1449_v44 = vor.u32 %v1447_v33, %v1445_v25 }
  0xd6   :  { %v1453_v42 = vrot.slane %v1451_v30, 1  ;;  %v1487_v21 = vshrl.u32 %v17319_v3, 16  ;;  %v1491_v22 = vshll.u32 %v17321_v10, 16  ;;  %v6228_v24 = vshrl.u32 %v17320_v7, 16 }
  0xd7   :  { %v6187_v39 = vsel %vm1018_vm0, %v6182_v27, %v6186_v28  ;;  %v6232_v25 = vshll.u32 %v17322_v13, 16  ;;  %v1481_v26 = vor.u32 %v1479_v14, %v1477_v9  ;;  %v6226_v30 = vrot.slane %v6224_v18, 1 }
  0xd8   :  { %v1457_v48 = vor.u32 %v1455_v37, %v1453_v42  ;;  %v1454_v56 = vsel %vm1018_vm0, %v1449_v44, %v1453_v42  ;;  %v1493_v34 = vrot.slane %v1491_v22, 1  ;;  %v6240_v42 = vshll.u32 %v17324_v29, 16 }
  0xd9   :  { %v6234_v37 = vrot.slane %v6232_v25, 1 }
  0xda   :  { %15292 = vmatmul.mubr.bf16.gmra.mrb[92].mxu1 %v1406_v47  ;;  %v6190_v47 = vor.u32 %v6188_v36, %v6186_v28  ;;  %v1462_v60 = vsel %vm1018_vm0, %v1457_v48, %v1461_v49  ;;  %v17323_v28 = vld [vmem:[%s20896_s0 + $0x1e0] sm:$0xff]   ;;  %v6230_v36 = vor.u32 %v6228_v24, %v6226_v30  ;;  %v6244_v49 = vshrl.u32 %v17324_v29, 16 }
  0xdb   :  { %15876 = vmatmul.mubr.bf16.gmra.mrb[92].mxu0 %v6147_v51  ;;  %15295 = vmatprep.mubr.bf16.mxu1 %v1414_v52  ;;  %v6198_v51 = vor.u32 %v6196_v40, %v6194_v45  ;;  %v6202_v52 = vrot.slane %v6200_v41, 1  ;;  %v1495_v40 = vshrl.u32 %v17321_v10, 16  ;;  %v6236_v41 = vshrl.u32 %v17322_v13, 16  ;;  %v17331_v13 = vld [vmem:[%s20896_s0 + $0x200] sm:$0xff]  }
  0xdc   :  { %15879 = vmatprep.mubr.bf16.mxu0 %v6155_v55  ;;  %v1467_v55 = vshll.u32 %v17315_v43, 16  ;;  %v6195_v59 = vsel %vm1018_vm0, %v6190_v47, %v6194_v45  ;;  %v1503_v43 = vshrl.u32 %v17323_v28, 16  ;;  %v6235_v48 = vsel %vm1018_vm0, %v6230_v36, %v6234_v37 }
  0xdd   :  { %v6203_v63 = vsel %vm1018_vm0, %v6198_v51, %v6202_v52  ;;  %v6206_v5 = vor.u32 %v6204_v57, %v6202_v52  ;;  %v17327_v51 = vld [vmem:[%s20896_s0 + $0x1f0] sm:$0xff]   ;;  %v1497_v52 = vor.u32 %v1495_v40, %v1493_v34  ;;  %v6242_v53 = vrot.slane %v6240_v42, 1  ;;  %v17336_v40 = vld [vmem:[%s20896_s0 + $0x220] sm:$0xff]  }
  0xde   :  { %v1469_v2 = vrot.slane %v1467_v55, 1  ;;  %v6238_v55 = vor.u32 %v6236_v41, %v6234_v37  ;;  %v1519_v7 = vshrl.u32 %v17327_v51, 16  ;;  %v6260_v10 = vshrl.u32 %v17328_v54, 16  ;;  %v17335_v37 = vld [vmem:[%s20896_s0 + $0x210] sm:$0xff]  }
  0xdf   :  { %v6211_v17 = vsel %vm1018_vm0, %v6206_v5, %v6210_v6  ;;  %v6246_v62 = vor.u32 %v6244_v49, %v6242_v53  ;;  %v1531_v24 = vshll.u32 %v17331_v13, 16 }
  0xe0   :  { %v1470_v16 = vsel %vm1018_vm0, %v1465_v4, %v1469_v2  ;;  %v6256_v4 = vshll.u32 %v17328_v54, 16  ;;  %v6243_v5 = vsel %vm1018_vm0, %v6238_v55, %v6242_v53  ;;  %v1551_v55 = vshrl.u32 %v17335_v37, 16 }
  0xe1   :  { %v1533_v36 = vrot.slane %v1531_v24, 1 }
  0xe2   :  { %15296 = vmatmul.mubr.bf16.gmra.mrb[96].mxu1 %v1422_v8  ;;  %v1473_v8 = vor.u32 %v1471_v61, %v1469_v2  ;;  %v17383_v61 = vld [vmem:[%s20895_s1 + $0x28] sm:$0xff]  }
  0xe3   :  { %15880 = vmatmul.mubr.bf16.gmra.mrb[96].mxu0 %v6163_v11  ;;  %15299 = vmatprep.mubr.bf16.mxu1 %v1430_v12  ;;  %v6214_v11 = vor.u32 %v6212_v0, %v6210_v6  ;;  %v6218_v12 = vrot.slane %v6216_v1, 1  ;;  %v1515_v0 = vshll.u32 %v17327_v51, 16  ;;  %v17384_v1 = vld [vmem:[%s20895_s1 + $0xe8] sm:$0xff]  }
  0xe4   :  { %15883 = vmatprep.mubr.bf16.mxu0 %v6171_v15  ;;  %v1483_v15 = vshll.u32 %v17319_v3, 16  ;;  %v1478_v19 = vsel %vm1018_vm0, %v1473_v8, %v1477_v9  ;;  %15485 = vmatprep.subr.bf16.mxu1 %v17383_v61 }
  0xe5   :  { %v6219_v23 = vsel %vm1018_vm0, %v6214_v11, %v6218_v12  ;;  %15486 = vmatpush3.bf16.msra.mxu1 %v17383_v61  ;;  %16069 = vmatprep.subr.bf16.mxu0 %v17384_v1  ;;  %v17339_v61 = vld [vmem:[%s20896_s0 + $0x220] sm:$0xff]  }
  0xe6   :  { %v1485_v27 = vrot.slane %v1483_v15, 1  ;;  %16070 = vmatpush3.bf16.msra.mxu0 %v17384_v1  ;;  %v6258_v15 = vrot.slane %v6256_v4, 1  ;;  %v17341_v4 = vld [vmem:[%s20896_s0 + $0x228] sm:$0xff]  }
  0xe8   :  { %v1489_v33 = vor.u32 %v1487_v21, %v1485_v27  ;;  %v1486_v38 = vsel %vm1018_vm0, %v1481_v26, %v1485_v27  ;;  %v6262_v21 = vor.u32 %v6260_v10, %v6258_v15 }
  0xea   :  { %15300 = vmatmul.mubr.bf16.gmra.mrb[100].mxu1 %v1438_v31  ;;  %v17325_v31 = vld [vmem:[%s20896_s0 + $0x1e8] sm:$0xff]   ;;  %v1494_v45 = vsel %vm1018_vm0, %v1489_v33, %v1493_v34 }
  0xeb   :  { %15884 = vmatmul.mubr.bf16.gmra.mrb[100].mxu0 %v6179_v32  ;;  %15303 = vmatprep.mubr.bf16.mxu1 %v1446_v35  ;;  %v6222_v32 = vor.u32 %v6220_v20, %v6218_v12  ;;  %v17326_v35 = vld [vmem:[%s20896_s0 + $0x1f8] sm:$0xff]   ;;  %v1507_v46 = vshll.u32 %v17325_v31, 16  ;;  %v1517_v12 = vrot.slane %v1515_v0, 1  ;;  %v17333_v20 = vld [vmem:[%s20896_s0 + $0x208] sm:$0xff]   ;;  %v17340_v0 = vld [vmem:[%s20896_s0 + $0x230] sm:$0xff]  }
  0xec   :  { %15887 = vmatprep.mubr.bf16.mxu0 %v6187_v39  ;;  %v1499_v39 = vshll.u32 %v17323_v28, 16  ;;  %v6248_v47 = vshll.u32 %v17326_v35, 16  ;;  %v6252_v3 = vshrl.u32 %v17326_v35, 16 }
  0xed   :  { %v6227_v44 = vsel %vm1018_vm0, %v6222_v32, %v6226_v30  ;;  %v1509_v57 = vrot.slane %v1507_v46, 1  ;;  %v1521_v18 = vor.u32 %v1519_v7, %v1517_v12  ;;  %v1539_v32 = vshll.u32 %v17333_v20, 16  ;;  %v17342_v7 = vld [vmem:[%s20896_s0 + $0x238] sm:$0xff]  }
  0xee   :  { %v1501_v50 = vrot.slane %v1499_v39, 1  ;;  %v6250_v58 = vrot.slane %v6248_v47, 1  ;;  %v17338_v47 = vld [vmem:[%s20896_s0 + $0x228] sm:$0xff]  }
  0xf0   :  { %v1502_v2 = vsel %vm1018_vm0, %v1497_v52, %v1501_v50  ;;  %v6251_v9 = vsel %vm1018_vm0, %v6246_v62, %v6250_v58  ;;  %v6288_v52 = vshll.u32 %v17336_v40, 16 }
  0xf2   :  { %15304 = vmatmul.mubr.bf16.gmra.mrb[104].mxu1 %v1454_v56  ;;  %v1505_v56 = vor.u32 %v1503_v43, %v1501_v50  ;;  %v1541_v43 = vrot.slane %v1539_v32, 1  ;;  %v1543_v50 = vshrl.u32 %v17333_v20, 16  ;;  %v17343_v20 = vld [vmem:[%s20896_s0 + $0x230] sm:$0xff]   ;;  %v1575_v32 = vshrl.u32 %v17341_v4, 16 }
  0xf3   :  { %15888 = vmatmul.mubr.bf16.gmra.mrb[104].mxu0 %v6195_v59  ;;  %15307 = vmatprep.mubr.bf16.mxu1 %v1462_v60  ;;  %v17329_v59 = vld [vmem:[%s20896_s0 + $0x1f8] sm:$0xff]   ;;  %v17330_v60 = vld [vmem:[%s20896_s0 + $0x208] sm:$0xff]  }
  0xf4   :  { %15891 = vmatprep.mubr.bf16.mxu0 %v6203_v63  ;;  %v1511_v63 = vshrl.u32 %v17325_v31, 16  ;;  %v1510_v6 = vsel %vm1018_vm0, %v1505_v56, %v1509_v57  ;;  %v1523_v8 = vshll.u32 %v17329_v59, 16  ;;  %v6264_v11 = vshll.u32 %v17330_v60, 16 }
  0xf5   :  { %v1527_v26 = vshrl.u32 %v17329_v59, 16  ;;  %v6268_v27 = vshrl.u32 %v17330_v60, 16  ;;  %v1535_v31 = vshrl.u32 %v17331_v13, 16  ;;  %v6296_v59 = vshll.u32 %v17338_v47, 16 }
  0xf6   :  { %v1513_v14 = vor.u32 %v1511_v63, %v1509_v57  ;;  %v6266_v22 = vrot.slane %v6264_v11, 1  ;;  %v1545_v62 = vor.u32 %v1543_v50, %v1541_v43  ;;  %v6290_v63 = vrot.slane %v6288_v52, 1 }
  0xf7   :  { %v1537_v42 = vor.u32 %v1535_v31, %v1533_v36  ;;  %v6300_v11 = vshrl.u32 %v17338_v47, 16 }
  0xf8   :  { %v1518_v25 = vsel %vm1018_vm0, %v1513_v14, %v1517_v12  ;;  %v6267_v33 = vsel %vm1018_vm0, %v6262_v21, %v6266_v22  ;;  %v6270_v41 = vor.u32 %v6268_v27, %v6266_v22  ;;  %v6304_v12 = vshll.u32 %v17340_v0, 16  ;;  %v17344_v22 = vld [vmem:[%s20896_s0 + $0x240] sm:$0xff]  }
  0xf9   :  { %v1542_v54 = vsel %vm1018_vm0, %v1537_v42, %v1541_v43 }
  0xfa   :  { %15308 = vmatmul.mubr.bf16.gmra.mrb[108].mxu1 %v1470_v16  ;;  %v17332_v16 = vld [vmem:[%s20896_s0 + $0x210] sm:$0xff]   ;;  %v6306_v24 = vrot.slane %v6304_v12, 1 }
  0xfb   :  { %15892 = vmatmul.mubr.bf16.gmra.mrb[108].mxu0 %v6211_v17  ;;  %15311 = vmatprep.mubr.bf16.mxu1 %v1478_v19  ;;  %v6254_v17 = vor.u32 %v6252_v3, %v6250_v58  ;;  %v1525_v19 = vrot.slane %v1523_v8, 1  ;;  %v6272_v28 = vshll.u32 %v17332_v16, 16  ;;  %v6276_v34 = vshrl.u32 %v17332_v16, 16 }
  0xfc   :  { %15895 = vmatprep.mubr.bf16.mxu0 %v6219_v23  ;;  %v17334_v23 = vld [vmem:[%s20896_s0 + $0x218] sm:$0xff]   ;;  %v6292_v58 = vshrl.u32 %v17336_v40, 16  ;;  %v1563_v8 = vshll.u32 %v17339_v61, 16  ;;  %v1571_v16 = vshll.u32 %v17341_v4, 16 }
  0xfd   :  { %v6259_v29 = vsel %vm1018_vm0, %v6254_v17, %v6258_v15  ;;  %v1526_v30 = vsel %vm1018_vm0, %v1521_v18, %v1525_v19  ;;  %v6280_v35 = vshll.u32 %v17334_v23, 16  ;;  %v6274_v39 = vrot.slane %v6272_v28, 1  ;;  %v17347_v28 = vld [vmem:[%s20896_s0 + $0x238] sm:$0xff]  }
  0xfe   :  { %v6284_v51 = vshrl.u32 %v17334_v23, 16  ;;  %v1567_v15 = vshrl.u32 %v17339_v61, 16  ;;  %v6308_v18 = vshrl.u32 %v17340_v0, 16  ;;  %v1565_v21 = vrot.slane %v1563_v8, 1  ;;  %v17354_v8 = vld [vmem:[%s20896_s0 + $0x260] sm:$0xff]  }
  0xff   :  { %v6282_v46 = vrot.slane %v6280_v35, 1  ;;  %v6275_v53 = vsel %vm1018_vm0, %v6270_v41, %v6274_v39  ;;  %v1573_v27 = vrot.slane %v1571_v16, 1  ;;  %v6320_v35 = vshll.u32 %v17344_v22, 16 }
 0x100   :  { %v1587_v41 = vshll.u32 %v17347_v28, 16 }
 0x101   :  { %v6286_v1 = vor.u32 %v6284_v51, %v6282_v46  ;;  %v6322_v47 = vrot.slane %v6320_v35, 1 }
 0x102   :  { %15312 = vmatmul.mubr.bf16.gmra.mrb[112].mxu1 %v1486_v38  ;;  %v1529_v38 = vor.u32 %v1527_v26, %v1525_v19  ;;  %v6312_v19 = vshll.u32 %v17342_v7, 16  ;;  %v1569_v26 = vor.u32 %v1567_v15, %v1565_v21  ;;  %v1589_v51 = vrot.slane %v1587_v41, 1 }
 0x103   :  { %15896 = vmatmul.mubr.bf16.gmra.mrb[112].mxu0 %v6227_v44  ;;  %15315 = vmatprep.mubr.bf16.mxu1 %v1494_v45  ;;  %v17337_v44 = vld [vmem:[%s20896_s0 + $0x218] sm:$0xff]   ;;  %v6278_v45 = vor.u32 %v6276_v34, %v6274_v39  ;;  %v6291_v13 = vsel %vm1018_vm0, %v6286_v1, %v6290_v63  ;;  %v6316_v34 = vshrl.u32 %v17342_v7, 16 }
 0x104   :  { %15899 = vmatprep.mubr.bf16.mxu0 %v6235_v48  ;;  %v1547_v48 = vshll.u32 %v17335_v37, 16  ;;  %v1534_v49 = vsel %vm1018_vm0, %v1529_v38, %v1533_v36  ;;  %v1555_v56 = vshll.u32 %v17337_v44, 16  ;;  %v1559_v10 = vshrl.u32 %v17337_v44, 16 }
 0x105   :  { %v6283_v57 = vsel %vm1018_vm0, %v6278_v45, %v6282_v46  ;;  %v6314_v31 = vrot.slane %v6312_v19, 1  ;;  %v1583_v37 = vshrl.u32 %v17343_v20, 16  ;;  %v6324_v38 = vshrl.u32 %v17344_v22, 16  ;;  %v17349_v45 = vld [vmem:[%s20896_s0 + $0x240] sm:$0xff]  }
 0x106   :  { %v1549_v60 = vrot.slane %v1547_v48, 1  ;;  %v1557_v3 = vrot.slane %v1555_v56, 1  ;;  %v1574_v40 = vsel %vm1018_vm0, %v1569_v26, %v1573_v27  ;;  %v1577_v46 = vor.u32 %v1575_v32, %v1573_v27  ;;  %v17350_v48 = vld [vmem:[%s20896_s0 + $0x250] sm:$0xff]  }
 0x107   :  { %v1591_v56 = vshrl.u32 %v17347_v28, 16  ;;  %v1599_v61 = vshrl.u32 %v17349_v45, 16  ;;  %v6356_v27 = vshrl.u32 %v17354_v8, 16 }
 0x108   :  { %v1561_v23 = vor.u32 %v1559_v10, %v1557_v3 }
 0x10a   :  { %15316 = vmatmul.mubr.bf16.gmra.mrb[116].mxu1 %v1502_v2  ;;  %v1553_v2 = vor.u32 %v1551_v55, %v1549_v60  ;;  %v1566_v36 = vsel %vm1018_vm0, %v1561_v23, %v1565_v21  ;;  %v6326_v55 = vor.u32 %v6324_v38, %v6322_v47 }
 0x10b   :  { %15900 = vmatmul.mubr.bf16.gmra.mrb[116].mxu0 %v6243_v5  ;;  %15319 = vmatprep.mubr.bf16.mxu1 %v1510_v6  ;;  %v6294_v5 = vor.u32 %v6292_v58, %v6290_v63  ;;  %v6298_v6 = vrot.slane %v6296_v59, 1 }
 0x10c   :  { %15903 = vmatprep.mubr.bf16.mxu0 %v6251_v9  ;;  %v1550_v9 = vsel %vm1018_vm0, %v1545_v62, %v1549_v60  ;;  %v1558_v14 = vsel %vm1018_vm0, %v1553_v2, %v1557_v3  ;;  %v6336_v60 = vshll.u32 %v17350_v48, 16  ;;  %v6340_v3 = vshrl.u32 %v17350_v48, 16 }
 0x10d   :  { %v6299_v17 = vsel %vm1018_vm0, %v6294_v5, %v6298_v6  ;;  %v17353_v5 = vld [vmem:[%s20896_s0 + $0x250] sm:$0xff]  }
 0x10e   :  { %v6338_v7 = vrot.slane %v6336_v60, 1  ;;  %v1615_v21 = vshrl.u32 %v17353_v5, 16 }
 0x110   :  { %v6342_v15 = vor.u32 %v6340_v3, %v6338_v7 }
 0x112   :  { %15320 = vmatmul.mubr.bf16.gmra.mrb[120].mxu1 %v1518_v25  ;;  %v6302_v25 = vor.u32 %v6300_v11, %v6298_v6  ;;  %v1593_v6 = vor.u32 %v1591_v56, %v1589_v51 }
 0x113   :  { %15904 = vmatmul.mubr.bf16.gmra.mrb[120].mxu0 %v6259_v29  ;;  %15323 = vmatprep.mubr.bf16.mxu1 %v1526_v30  ;;  %v17348_v29 = vld [vmem:[%s20896_s0 + $0x248] sm:$0xff]   ;;  %v6310_v30 = vor.u32 %v6308_v18, %v6306_v24 }
 0x114   :  { %15907 = vmatprep.mubr.bf16.mxu0 %v6267_v33  ;;  %v1579_v33 = vshll.u32 %v17343_v20, 16  ;;  %v6307_v39 = vsel %vm1018_vm0, %v6302_v25, %v6306_v24  ;;  %v6328_v42 = vshll.u32 %v17348_v29, 16  ;;  %v6332_v58 = vshrl.u32 %v17348_v29, 16  ;;  %v17357_v29 = vld [vmem:[%s20896_s0 + $0x260] sm:$0xff]  }
 0x115   :  { %v6315_v43 = vsel %vm1018_vm0, %v6310_v30, %v6314_v31  ;;  %v6352_v20 = vshll.u32 %v17354_v8, 16  ;;  %v17358_v30 = vld [vmem:[%s20896_s0 + $0x270] sm:$0xff]  }
 0x116   :  { %v1581_v44 = vrot.slane %v1579_v33, 1  ;;  %v6330_v52 = vrot.slane %v6328_v42, 1  ;;  %v17417_v33 = vld [vmem:[%s20895_s1 + $0x30] sm:$0xff]  }
 0x117   :  { %v6354_v32 = vrot.slane %v6352_v20, 1  ;;  %15487 = vmatprep.subr.bf16.mxu1 %v17417_v33 }
 0x118   :  { %v1585_v50 = vor.u32 %v1583_v37, %v1581_v44  ;;  %v1582_v59 = vsel %vm1018_vm0, %v1577_v46, %v1581_v44  ;;  %v6331_v2 = vsel %vm1018_vm0, %v6326_v55, %v6330_v52  ;;  %15488 = vmatpush3.bf16.msra.mxu1 %v17417_v33  ;;  %v6368_v46 = vshll.u32 %v17358_v30, 16  ;;  %v17361_v55 = vld [vmem:[%s20896_s0 + $0x270] sm:$0xff]  }
 0x119   :  { %v6358_v41 = vor.u32 %v6356_v27, %v6354_v32  ;;  %v1643_v3 = vshll.u32 %v17361_v55, 16 }
 0x11a   :  { %15324 = vmatmul.mubr.bf16.gmra.mrb[124].mxu1 %v1534_v49  ;;  %v6318_v49 = vor.u32 %v6316_v34, %v6314_v31  ;;  %v1590_v63 = vsel %vm1018_vm0, %v1585_v50, %v1589_v51  ;;  %v17418_v34 = vld [vmem:[%s20895_s1 + $0xf0] sm:$0xff]  }
 0x11b   :  { %15908 = vmatmul.mubr.bf16.gmra.mrb[124].mxu0 %v6275_v53  ;;  %15327 = vmatprep.mubr.bf16.mxu1 %v1542_v54  ;;  %v17351_v53 = vld [vmem:[%s20896_s0 + $0x248] sm:$0xff]   ;;  %v17352_v54 = vld [vmem:[%s20896_s0 + $0x258] sm:$0xff]  }
 0x11c   :  { %15911 = vmatprep.mubr.bf16.mxu0 %v6283_v57  ;;  %v1595_v57 = vshll.u32 %v17349_v45, 16  ;;  %v6323_v62 = vsel %vm1018_vm0, %v6318_v49, %v6322_v47  ;;  %v1603_v0 = vshll.u32 %v17351_v53, 16  ;;  %v6344_v1 = vshll.u32 %v17352_v54, 16  ;;  %16071 = vmatprep.subr.bf16.mxu0 %v17418_v34 }
 0x11d   :  { %v1607_v16 = vshrl.u32 %v17351_v53, 16  ;;  %v6348_v18 = vshrl.u32 %v17352_v54, 16  ;;  %16072 = vmatpush3.bf16.msra.mxu0 %v17418_v34  ;;  %v1631_v47 = vshrl.u32 %v17357_v29, 16  ;;  %v6372_v53 = vshrl.u32 %v17358_v30, 16 }
 0x11e   :  { %v1597_v4 = vrot.slane %v1595_v57, 1  ;;  %v1605_v11 = vrot.slane %v1603_v0, 1  ;;  %v6346_v12 = vrot.slane %v6344_v1, 1  ;;  %v6370_v57 = vrot.slane %v6368_v46, 1  ;;  %v17364_v0 = vld [vmem:[%s20896_s0 + $0x288] sm:$0xff]  }
 0x120   :  { %v1601_v10 = vor.u32 %v1599_v61, %v1597_v4  ;;  %v1598_v19 = vsel %vm1018_vm0, %v1593_v6, %v1597_v4  ;;  %v6347_v26 = vsel %vm1018_vm0, %v6342_v15, %v6346_v12  ;;  %v1609_v31 = vor.u32 %v1607_v16, %v1605_v11  ;;  %v17365_v15 = vld [vmem:[%s20896_s0 + $0x280] sm:$0xff]  }
 0x121   :  { %v6350_v35 = vor.u32 %v6348_v18, %v6346_v12  ;;  %v6374_v1 = vor.u32 %v6372_v53, %v6370_v57  ;;  %v17366_v18 = vld [vmem:[%s20896_s0 + $0x290] sm:$0xff]   ;;  %v1659_v27 = vshll.u32 %v17365_v15, 16 }
 0x122   :  { %15328 = vmatmul.mubr.bf16.gmra.mrb[128].mxu1 %v1550_v9  ;;  %v6334_v9 = vor.u32 %v6332_v58, %v6330_v52  ;;  %v1606_v23 = vsel %vm1018_vm0, %v1601_v10, %v1605_v11  ;;  %v17362_v58 = vld [vmem:[%s20896_s0 + $0x280] sm:$0xff]   ;;  %v6392_v11 = vshll.u32 %v17364_v0, 16  ;;  %v6400_v30 = vshll.u32 %v17366_v18, 16 }
 0x123   :  { %15912 = vmatmul.mubr.bf16.gmra.mrb[128].mxu0 %v6291_v13  ;;  %15331 = vmatprep.mubr.bf16.mxu1 %v1558_v14  ;;  %v17355_v13 = vld [vmem:[%s20896_s0 + $0x258] sm:$0xff]   ;;  %v17356_v14 = vld [vmem:[%s20896_s0 + $0x268] sm:$0xff]   ;;  %v6355_v48 = vsel %vm1018_vm0, %v6350_v35, %v6354_v32  ;;  %v6384_v6 = vshll.u32 %v17362_v58, 16 }
 0x124   :  { %15915 = vmatprep.mubr.bf16.mxu0 %v6299_v17  ;;  %v1611_v17 = vshll.u32 %v17353_v5, 16  ;;  %v6339_v22 = vsel %vm1018_vm0, %v6334_v9, %v6338_v7  ;;  %v1619_v24 = vshll.u32 %v17355_v13, 16  ;;  %v6360_v25 = vshll.u32 %v17356_v14, 16 }
 0x125   :  { %v1623_v42 = vshrl.u32 %v17355_v13, 16  ;;  %v6364_v44 = vshrl.u32 %v17356_v14, 16  ;;  %v1647_v7 = vshrl.u32 %v17361_v55, 16  ;;  %v6388_v13 = vshrl.u32 %v17362_v58, 16 }
 0x126   :  { %v1613_v28 = vrot.slane %v1611_v17, 1  ;;  %v1621_v37 = vrot.slane %v1619_v24, 1  ;;  %v6362_v38 = vrot.slane %v6360_v25, 1  ;;  %v1645_v14 = vrot.slane %v1643_v3, 1  ;;  %v17368_v24 = vld [vmem:[%s20896_s0 + $0x298] sm:$0xff]  }
 0x127   :  { %v6386_v17 = vrot.slane %v6384_v6, 1  ;;  %v6408_v35 = vshll.u32 %v17368_v24, 16 }
 0x128   :  { %v1614_v45 = vsel %vm1018_vm0, %v1609_v31, %v1613_v28  ;;  %v6363_v52 = vsel %vm1018_vm0, %v6358_v41, %v6362_v38  ;;  %v1625_v56 = vor.u32 %v1623_v42, %v1621_v37  ;;  %v1649_v20 = vor.u32 %v1647_v7, %v1645_v14  ;;  %v17370_v42 = vld [vmem:[%s20896_s0 + $0x2a0] sm:$0xff]   ;;  %v17375_v7 = vld [vmem:[%s20896_s0 + $0x2a8] sm:$0xff]  }
 0x129   :  { %v6390_v25 = vor.u32 %v6388_v13, %v6386_v17  ;;  %v1663_v31 = vshrl.u32 %v17365_v15, 16  ;;  %v6402_v41 = vrot.slane %v6400_v30, 1  ;;  %v6410_v46 = vrot.slane %v6408_v35, 1 }
 0x12a   :  { %15332 = vmatmul.mubr.bf16.gmra.mrb[132].mxu1 %v1566_v36  ;;  %v1617_v36 = vor.u32 %v1615_v21, %v1613_v28  ;;  %v6396_v28 = vshrl.u32 %v17364_v0, 16 }
 0x12b   :  { %15916 = vmatmul.mubr.bf16.gmra.mrb[132].mxu0 %v6307_v39  ;;  %15335 = vmatprep.mubr.bf16.mxu1 %v1574_v40  ;;  %v17359_v39 = vld [vmem:[%s20896_s0 + $0x268] sm:$0xff]   ;;  %v17360_v40 = vld [vmem:[%s20896_s0 + $0x278] sm:$0xff]  }
 0x12c   :  { %15919 = vmatprep.mubr.bf16.mxu0 %v6315_v43  ;;  %v1627_v43 = vshll.u32 %v17357_v29, 16  ;;  %v1622_v49 = vsel %vm1018_vm0, %v1617_v36, %v1621_v37  ;;  %v1635_v50 = vshll.u32 %v17359_v39, 16  ;;  %v6376_v51 = vshll.u32 %v17360_v40, 16 }
 0x12d   :  { %v6380_v4 = vshrl.u32 %v17360_v40, 16  ;;  %v6404_v37 = vshrl.u32 %v17366_v18, 16  ;;  %v1699_v18 = vshll.u32 %v17375_v7, 16 }
 0x12e   :  { %v1629_v54 = vrot.slane %v1627_v43, 1  ;;  %v1637_v61 = vrot.slane %v1635_v50, 1 }
 0x130   :  { %v1633_v60 = vor.u32 %v1631_v47, %v1629_v54  ;;  %v1630_v5 = vsel %vm1018_vm0, %v1625_v56, %v1629_v54  ;;  %v17371_v47 = vld [vmem:[%s20896_s0 + $0x298] sm:$0xff]   ;;  %v6416_v54 = vshll.u32 %v17370_v42, 16 }
 0x131   :  { %v1683_v58 = vshll.u32 %v17371_v47, 16 }
 0x132   :  { %15336 = vmatmul.mubr.bf16.gmra.mrb[136].mxu1 %v1582_v59  ;;  %v6366_v59 = vor.u32 %v6364_v44, %v6362_v38  ;;  %v1638_v9 = vsel %vm1018_vm0, %v1633_v60, %v1637_v61  ;;  %v1661_v38 = vrot.slane %v1659_v27, 1 }
 0x133   :  { %15920 = vmatmul.mubr.bf16.gmra.mrb[136].mxu0 %v6323_v62  ;;  %15339 = vmatprep.mubr.bf16.mxu1 %v1590_v63  ;;  %v6378_v62 = vrot.slane %v6376_v51, 1  ;;  %v17363_v63 = vld [vmem:[%s20896_s0 + $0x278] sm:$0xff]  }
 0x134   :  { %15923 = vmatprep.mubr.bf16.mxu0 %v6331_v2  ;;  %v1639_v2 = vshrl.u32 %v17359_v39, 16  ;;  %v6371_v8 = vsel %vm1018_vm0, %v6366_v59, %v6370_v57  ;;  %v1651_v10 = vshll.u32 %v17363_v63, 16  ;;  %v17369_v39 = vld [vmem:[%s20896_s0 + $0x290] sm:$0xff]   ;;  %v1665_v44 = vor.u32 %v1663_v31, %v1661_v38  ;;  %v17379_v31 = vld [vmem:[%s20896_s0 + $0x2b8] sm:$0xff]  }
 0x135   :  { %v6379_v12 = vsel %vm1018_vm0, %v6374_v1, %v6378_v62  ;;  %v1675_v51 = vshll.u32 %v17369_v39, 16  ;;  %v1679_v55 = vshrl.u32 %v17369_v39, 16  ;;  %v6418_v1 = vrot.slane %v6416_v54, 1 }
 0x136   :  { %v1641_v16 = vor.u32 %v1639_v2, %v1637_v61  ;;  %v1653_v21 = vrot.slane %v1651_v10, 1  ;;  %v6420_v61 = vshrl.u32 %v17370_v42, 16  ;;  %v17374_v2 = vld [vmem:[%s20896_s0 + $0x2b0] sm:$0xff]   ;;  %v1687_v10 = vshrl.u32 %v17371_v47, 16  ;;  %v17381_v47 = vld [vmem:[%s20896_s0 + $0x2c0] sm:$0xff]  }
 0x137   :  { %v1715_v42 = vshll.u32 %v17379_v31, 16 }
 0x138   :  { %v1646_v29 = vsel %vm1018_vm0, %v1641_v16, %v1645_v14  ;;  %v1654_v33 = vsel %vm1018_vm0, %v1649_v20, %v1653_v21  ;;  %v6432_v14 = vshll.u32 %v17374_v2, 16 }
 0x13a   :  { %15340 = vmatmul.mubr.bf16.gmra.mrb[140].mxu1 %v1598_v19  ;;  %v6382_v19 = vor.u32 %v6380_v4, %v6378_v62  ;;  %v1677_v62 = vrot.slane %v1675_v51, 1 }
 0x13b   :  { %15924 = vmatmul.mubr.bf16.gmra.mrb[140].mxu0 %v6339_v22  ;;  %15343 = vmatprep.mubr.bf16.mxu1 %v1606_v23  ;;  %v6394_v22 = vrot.slane %v6392_v11, 1  ;;  %v17367_v23 = vld [vmem:[%s20896_s0 + $0x288] sm:$0xff]  }
 0x13c   :  { %15927 = vmatprep.mubr.bf16.mxu0 %v6347_v26  ;;  %v1655_v26 = vshrl.u32 %v17363_v63, 16  ;;  %v6387_v32 = vsel %vm1018_vm0, %v6382_v19, %v6386_v17  ;;  %v1667_v34 = vshll.u32 %v17367_v23, 16  ;;  %v1671_v50 = vshrl.u32 %v17367_v23, 16  ;;  %v17373_v63 = vld [vmem:[%s20896_s0 + $0x2a0] sm:$0xff]   ;;  %v17377_v23 = vld [vmem:[%s20896_s0 + $0x2b0] sm:$0xff]  }
 0x13d   :  { %v6395_v36 = vsel %vm1018_vm0, %v6390_v25, %v6394_v22  ;;  %v6398_v43 = vor.u32 %v6396_v28, %v6394_v22  ;;  %v1681_v4 = vor.u32 %v1679_v55, %v1677_v62  ;;  %v1691_v11 = vshll.u32 %v17373_v63, 16  ;;  %v17385_v55 = vld [vmem:[%s20896_s0 + $0x2c8] sm:$0xff]  }
 0x13e   :  { %v1657_v40 = vor.u32 %v1655_v26, %v1653_v21  ;;  %v1695_v15 = vshrl.u32 %v17373_v63, 16  ;;  %v6436_v21 = vshrl.u32 %v17374_v2, 16  ;;  %v6434_v25 = vrot.slane %v6432_v14, 1  ;;  %v17378_v26 = vld [vmem:[%s20896_s0 + $0x2c0] sm:$0xff]  }
 0x13f   :  { %v6403_v56 = vsel %vm1018_vm0, %v6398_v43, %v6402_v41  ;;  %v1693_v22 = vrot.slane %v1691_v11, 1  ;;  %v1707_v35 = vshll.u32 %v17377_v23, 16  ;;  %v1711_v39 = vshrl.u32 %v17377_v23, 16 }
 0x140   :  { %v1662_v53 = vsel %vm1018_vm0, %v1657_v40, %v1661_v38  ;;  %v6448_v38 = vshll.u32 %v17378_v26, 16  ;;  %v1727_v63 = vshrl.u32 %v17381_v47, 16  ;;  %v1731_v2 = vshll.u32 %v17385_v55, 16 }
 0x141   :  { %v1697_v28 = vor.u32 %v1695_v15, %v1693_v22  ;;  %v17389_v15 = vld [vmem:[%s20896_s0 + $0x2d8] sm:$0xff]  }
 0x142   :  { %15344 = vmatmul.mubr.bf16.gmra.mrb[144].mxu1 %v1614_v45  ;;  %v1669_v45 = vrot.slane %v1667_v34, 1  ;;  %v1703_v34 = vshrl.u32 %v17375_v7, 16  ;;  %v17387_v7 = vld [vmem:[%s20896_s0 + $0x2d0] sm:$0xff]  }
 0x143   :  { %15928 = vmatmul.mubr.bf16.gmra.mrb[144].mxu0 %v6355_v48  ;;  %15347 = vmatprep.mubr.bf16.mxu1 %v1622_v49  ;;  %v17372_v48 = vld [vmem:[%s20896_s0 + $0x2a8] sm:$0xff]   ;;  %v6406_v49 = vor.u32 %v6404_v37, %v6402_v41  ;;  %v1743_v23 = vshrl.u32 %v17387_v7, 16 }
 0x144   :  { %15931 = vmatprep.mubr.bf16.mxu0 %v6363_v52  ;;  %v6412_v52 = vshrl.u32 %v17368_v24, 16  ;;  %v1670_v57 = vsel %vm1018_vm0, %v1665_v44, %v1669_v45  ;;  %v6424_v59 = vshll.u32 %v17372_v48, 16  ;;  %v1673_v0 = vor.u32 %v1671_v50, %v1669_v45  ;;  %v17382_v50 = vld [vmem:[%s20896_s0 + $0x2d0] sm:$0xff]  }
 0x145   :  { %v6411_v60 = vsel %vm1018_vm0, %v6406_v49, %v6410_v46  ;;  %v6452_v45 = vshrl.u32 %v17378_v26, 16  ;;  %v6450_v49 = vrot.slane %v6448_v38, 1  ;;  %v1747_v26 = vshll.u32 %v17389_v15, 16 }
 0x146   :  { %v6414_v3 = vor.u32 %v6412_v52, %v6410_v46  ;;  %v6426_v6 = vrot.slane %v6424_v59, 1  ;;  %v1678_v13 = vsel %vm1018_vm0, %v1673_v0, %v1677_v62  ;;  %v1709_v46 = vrot.slane %v1707_v35, 1 }
 0x147   :  { %v1723_v59 = vshll.u32 %v17381_v47, 16  ;;  %v6464_v62 = vshll.u32 %v17382_v50, 16 }
 0x148   :  { %v6419_v16 = vsel %vm1018_vm0, %v6414_v3, %v6418_v1  ;;  %v1713_v52 = vor.u32 %v1711_v39, %v1709_v46  ;;  %v17393_v39 = vld [vmem:[%s20896_s0 + $0x2e8] sm:$0xff]  }
 0x14a   :  { %15348 = vmatmul.mubr.bf16.gmra.mrb[148].mxu1 %v1630_v5  ;;  %v1685_v5 = vrot.slane %v1683_v58, 1  ;;  %v1719_v58 = vshrl.u32 %v17379_v31, 16  ;;  %v17391_v31 = vld [vmem:[%s20896_s0 + $0x2e0] sm:$0xff]  }
 0x14b   :  { %15932 = vmatmul.mubr.bf16.gmra.mrb[148].mxu0 %v6371_v8  ;;  %15351 = vmatprep.mubr.bf16.mxu1 %v1638_v9  ;;  %v17376_v8 = vld [vmem:[%s20896_s0 + $0x2b8] sm:$0xff]   ;;  %v6422_v9 = vor.u32 %v6420_v61, %v6418_v1  ;;  %v1759_v47 = vshrl.u32 %v17391_v31, 16 }
 0x14c   :  { %15935 = vmatprep.mubr.bf16.mxu0 %v6379_v12  ;;  %v6428_v12 = vshrl.u32 %v17372_v48, 16  ;;  %v1686_v17 = vsel %vm1018_vm0, %v1681_v4, %v1685_v5  ;;  %v6440_v19 = vshll.u32 %v17376_v8, 16  ;;  %v1689_v24 = vor.u32 %v1687_v10, %v1685_v5  ;;  %v17388_v10 = vld [vmem:[%s20896_s0 + $0x2e0] sm:$0xff]  }
 0x14d   :  { %v6427_v20 = vsel %vm1018_vm0, %v6422_v9, %v6426_v6  ;;  %v6468_v5 = vshrl.u32 %v17382_v50, 16  ;;  %v6466_v9 = vrot.slane %v6464_v62, 1  ;;  %v1763_v50 = vshll.u32 %v17393_v39, 16 }
 0x14e   :  { %v6430_v27 = vor.u32 %v6428_v12, %v6426_v6  ;;  %v6442_v30 = vrot.slane %v6440_v19, 1  ;;  %v1694_v37 = vsel %vm1018_vm0, %v1689_v24, %v1693_v22  ;;  %v1725_v6 = vrot.slane %v1723_v59, 1  ;;  %v17455_v59 = vld [vmem:[%s20895_s1 + $0x38] sm:$0xff]  }
 0x14f   :  { %v1739_v19 = vshll.u32 %v17387_v7, 16  ;;  %v6480_v22 = vshll.u32 %v17388_v10, 16  ;;  %15489 = vmatprep.subr.bf16.mxu1 %v17455_v59 }
 0x150   :  { %v6435_v40 = vsel %vm1018_vm0, %v6430_v27, %v6434_v25  ;;  %v1729_v12 = vor.u32 %v1727_v63, %v1725_v6  ;;  %v1765_v63 = vrot.slane %v1763_v50, 1  ;;  %15490 = vmatpush3.bf16.msra.mxu1 %v17455_v59 }
 0x152   :  { %15352 = vmatmul.mubr.bf16.gmra.mrb[152].mxu1 %v1646_v29  ;;  %v1701_v29 = vrot.slane %v1699_v18, 1  ;;  %v1735_v18 = vshrl.u32 %v17385_v55, 16  ;;  %v17395_v55 = vld [vmem:[%s20896_s0 + $0x2f0] sm:$0xff]  }
 0x153   :  { %15936 = vmatmul.mubr.bf16.gmra.mrb[152].mxu0 %v6387_v32  ;;  %15355 = vmatprep.mubr.bf16.mxu1 %v1654_v33  ;;  %v17380_v32 = vld [vmem:[%s20896_s0 + $0x2c8] sm:$0xff]   ;;  %v6438_v33 = vor.u32 %v6436_v21, %v6434_v25 }
 0x154   :  { %15939 = vmatprep.mubr.bf16.mxu0 %v6395_v36  ;;  %v6444_v36 = vshrl.u32 %v17376_v8, 16  ;;  %v1702_v41 = vsel %vm1018_vm0, %v1697_v28, %v1701_v29  ;;  %v6456_v43 = vshll.u32 %v17380_v32, 16  ;;  %v1705_v48 = vor.u32 %v1703_v34, %v1701_v29  ;;  %v17392_v34 = vld [vmem:[%s20896_s0 + $0x2f0] sm:$0xff]  }
 0x155   :  { %v6443_v44 = vsel %vm1018_vm0, %v6438_v33, %v6442_v30  ;;  %v6484_v29 = vshrl.u32 %v17388_v10, 16  ;;  %v6482_v33 = vrot.slane %v6480_v22, 1 }
 0x156   :  { %v6446_v51 = vor.u32 %v6444_v36, %v6442_v30  ;;  %v6458_v54 = vrot.slane %v6456_v43, 1  ;;  %v1710_v61 = vsel %vm1018_vm0, %v1705_v48, %v1709_v46  ;;  %v1741_v30 = vrot.slane %v1739_v19, 1 }
 0x157   :  { %v1755_v43 = vshll.u32 %v17391_v31, 16  ;;  %v6496_v46 = vshll.u32 %v17392_v34, 16 }
 0x158   :  { %v6451_v0 = vsel %vm1018_vm0, %v6446_v51, %v6450_v49  ;;  %v1745_v36 = vor.u32 %v1743_v23, %v1741_v30 }
 0x15a   :  { %15356 = vmatmul.mubr.bf16.gmra.mrb[156].mxu1 %v1662_v53  ;;  %v1717_v53 = vrot.slane %v1715_v42, 1  ;;  %v1751_v42 = vshrl.u32 %v17389_v15, 16 }
 0x15b   :  { %15940 = vmatmul.mubr.bf16.gmra.mrb[156].mxu0 %v6403_v56  ;;  %15359 = vmatprep.mubr.bf16.mxu1 %v1670_v57  ;;  %v17386_v56 = vld [vmem:[%s20896_s0 + $0x2d8] sm:$0xff]   ;;  %v6454_v57 = vor.u32 %v6452_v45, %v6450_v49 }
 0x15c   :  { %15943 = vmatprep.mubr.bf16.mxu0 %v6411_v60  ;;  %v6460_v60 = vshrl.u32 %v17380_v32, 16  ;;  %v1718_v1 = vsel %vm1018_vm0, %v1713_v52, %v1717_v53  ;;  %v6472_v3 = vshll.u32 %v17386_v56, 16  ;;  %v1721_v8 = vor.u32 %v1719_v58, %v1717_v53 }
 0x15d   :  { %v6459_v4 = vsel %vm1018_vm0, %v6454_v57, %v6458_v54  ;;  %v6500_v53 = vshrl.u32 %v17392_v34, 16  ;;  %v6498_v58 = vrot.slane %v6496_v46, 1 }
 0x15e   :  { %v6462_v11 = vor.u32 %v6460_v60, %v6458_v54  ;;  %v6474_v14 = vrot.slane %v6472_v3, 1  ;;  %v1726_v21 = vsel %vm1018_vm0, %v1721_v8, %v1725_v6  ;;  %v1757_v54 = vrot.slane %v1755_v43, 1  ;;  %v17456_v60 = vld [vmem:[%s20895_s1 + $0xf8] sm:$0xff]  }
 0x15f   :  { %v6502_v3 = vor.u32 %v6500_v53, %v6498_v58  ;;  %16073 = vmatprep.subr.bf16.mxu0 %v17456_v60 }
 0x160   :  { %v6467_v24 = vsel %vm1018_vm0, %v6462_v11, %v6466_v9  ;;  %v1761_v62 = vor.u32 %v1759_v47, %v1757_v54  ;;  %16074 = vmatpush3.bf16.msra.mxu0 %v17456_v60  ;;  %v1775_v11 = vshrl.u32 %v17395_v55, 16 }
 0x162   :  { %15360 = vmatmul.mubr.bf16.gmra.mrb[160].mxu1 %v1678_v13  ;;  %v1733_v13 = vrot.slane %v1731_v2, 1  ;;  %v17398_v2 = vld [vmem:[%s20896_s0 + $0x308] sm:$0xff]   ;;  %v1766_v10 = vsel %vm1018_vm0, %v1761_v62, %v1765_v63 }
 0x163   :  { %15944 = vmatmul.mubr.bf16.gmra.mrb[160].mxu0 %v6419_v16  ;;  %15363 = vmatprep.mubr.bf16.mxu1 %v1686_v17  ;;  %v17390_v16 = vld [vmem:[%s20896_s0 + $0x2e8] sm:$0xff]   ;;  %v6470_v17 = vor.u32 %v6468_v5, %v6466_v9  ;;  %v1771_v5 = vshll.u32 %v17395_v55, 16  ;;  %v6520_v15 = vshll.u32 %v17398_v2, 16  ;;  %v6524_v34 = vshrl.u32 %v17398_v2, 16 }
 0x164   :  { %15947 = vmatprep.mubr.bf16.mxu0 %v6427_v20  ;;  %v6476_v20 = vshrl.u32 %v17386_v56, 16  ;;  %v1734_v25 = vsel %vm1018_vm0, %v1729_v12, %v1733_v13  ;;  %v6488_v27 = vshll.u32 %v17390_v16, 16  ;;  %v1737_v32 = vor.u32 %v1735_v18, %v1733_v13  ;;  %v17396_v56 = vld [vmem:[%s20896_s0 + $0x300] sm:$0xff]  }
 0x165   :  { %v6475_v28 = vsel %vm1018_vm0, %v6470_v17, %v6474_v14  ;;  %v6512_v8 = vshll.u32 %v17396_v56, 16  ;;  %v17399_v17 = vld [vmem:[%s20896_s0 + $0x300] sm:$0xff]  }
 0x166   :  { %v6478_v35 = vor.u32 %v6476_v20, %v6474_v14  ;;  %v6490_v38 = vrot.slane %v6488_v27, 1  ;;  %v1742_v45 = vsel %vm1018_vm0, %v1737_v32, %v1741_v30  ;;  %v6516_v14 = vshrl.u32 %v17396_v56, 16  ;;  %v17402_v27 = vld [vmem:[%s20896_s0 + $0x318] sm:$0xff]  }
 0x167   :  { %v6514_v20 = vrot.slane %v6512_v8, 1  ;;  %v6540_v55 = vshrl.u32 %v17402_v27, 16  ;;  %v17409_v8 = vld [vmem:[%s20896_s0 + $0x328] sm:$0xff]  }
 0x168   :  { %v6483_v48 = vsel %vm1018_vm0, %v6478_v35, %v6482_v33  ;;  %v1791_v35 = vshrl.u32 %v17399_v17, 16 }
 0x16a   :  { %15364 = vmatmul.mubr.bf16.gmra.mrb[164].mxu1 %v1694_v37  ;;  %v1749_v37 = vrot.slane %v1747_v26, 1  ;;  %v6522_v26 = vrot.slane %v6520_v15, 1 }
 0x16b   :  { %15948 = vmatmul.mubr.bf16.gmra.mrb[164].mxu0 %v6435_v40  ;;  %15367 = vmatprep.mubr.bf16.mxu1 %v1702_v41  ;;  %v17394_v40 = vld [vmem:[%s20896_s0 + $0x2f8] sm:$0xff]   ;;  %v6486_v41 = vor.u32 %v6484_v29, %v6482_v33 }
 0x16c   :  { %15951 = vmatprep.mubr.bf16.mxu0 %v6443_v44  ;;  %v6492_v44 = vshrl.u32 %v17390_v16, 16  ;;  %v1750_v49 = vsel %vm1018_vm0, %v1745_v36, %v1749_v37  ;;  %v6504_v51 = vshll.u32 %v17394_v40, 16  ;;  %v1753_v57 = vor.u32 %v1751_v42, %v1749_v37 }
 0x16d   :  { %v6491_v52 = vsel %vm1018_vm0, %v6486_v41, %v6490_v38  ;;  %v6508_v7 = vshrl.u32 %v17394_v40, 16  ;;  %v1773_v16 = vrot.slane %v1771_v5, 1  ;;  %v17403_v41 = vld [vmem:[%s20896_s0 + $0x310] sm:$0xff]  }
 0x16e   :  { %v1758_v6 = vsel %vm1018_vm0, %v1753_v57, %v1757_v54  ;;  %v1807_v59 = vshrl.u32 %v17403_v41, 16  ;;  %v17408_v5 = vld [vmem:[%s20896_s0 + $0x330] sm:$0xff]  }
 0x16f   :  { %v1777_v22 = vor.u32 %v1775_v11, %v1773_v16  ;;  %v17410_v11 = vld [vmem:[%s20896_s0 + $0x338] sm:$0xff]  }
 0x172   :  { %15368 = vmatmul.mubr.bf16.gmra.mrb[168].mxu1 %v1710_v61  ;;  %v6494_v61 = vor.u32 %v6492_v44, %v6490_v38  ;;  %v17404_v44 = vld [vmem:[%s20896_s0 + $0x320] sm:$0xff]  }
 0x173   :  { %15952 = vmatmul.mubr.bf16.gmra.mrb[168].mxu0 %v6451_v0  ;;  %15371 = vmatprep.mubr.bf16.mxu1 %v1718_v1  ;;  %v6506_v0 = vrot.slane %v6504_v51, 1  ;;  %v17397_v1 = vld [vmem:[%s20896_s0 + $0x2f8] sm:$0xff]   ;;  %v17406_v51 = vld [vmem:[%s20896_s0 + $0x328] sm:$0xff]   ;;  %v6544_v56 = vshll.u32 %v17404_v44, 16  ;;  %v6548_v62 = vshrl.u32 %v17404_v44, 16 }
 0x174   :  { %15955 = vmatprep.mubr.bf16.mxu0 %v6459_v4  ;;  %v1767_v4 = vshrl.u32 %v17393_v39, 16  ;;  %v6499_v9 = vsel %vm1018_vm0, %v6494_v61, %v6498_v58  ;;  %v1779_v12 = vshll.u32 %v17397_v1, 16  ;;  %v1783_v31 = vshrl.u32 %v17397_v1, 16  ;;  %v17407_v1 = vld [vmem:[%s20896_s0 + $0x320] sm:$0xff]  }
 0x175   :  { %v6507_v13 = vsel %vm1018_vm0, %v6502_v3, %v6506_v0  ;;  %v6510_v19 = vor.u32 %v6508_v7, %v6506_v0  ;;  %v6536_v39 = vshll.u32 %v17402_v27, 16 }
 0x176   :  { %v1769_v18 = vor.u32 %v1767_v4, %v1765_v63  ;;  %v1781_v23 = vrot.slane %v1779_v12, 1  ;;  %v6552_v63 = vshll.u32 %v17406_v51, 16  ;;  %v6546_v4 = vrot.slane %v6544_v56, 1  ;;  %v17419_v56 = vld [vmem:[%s20896_s0 + $0x348] sm:$0xff]  }
 0x177   :  { %v6515_v30 = vsel %vm1018_vm0, %v6510_v19, %v6514_v20  ;;  %v6538_v50 = vrot.slane %v6536_v39, 1  ;;  %v1819_v12 = vshll.u32 %v17407_v1, 16  ;;  %v1823_v19 = vshrl.u32 %v17407_v1, 16 }
 0x178   :  { %v1774_v29 = vsel %vm1018_vm0, %v1769_v18, %v1773_v16  ;;  %v1782_v33 = vsel %vm1018_vm0, %v1777_v22, %v1781_v23  ;;  %v1785_v42 = vor.u32 %v1783_v31, %v1781_v23  ;;  %v6560_v16 = vshll.u32 %v17408_v5, 16 }
 0x179   :  { %v6542_v3 = vor.u32 %v6540_v55, %v6538_v50  ;;  %v6556_v18 = vshrl.u32 %v17406_v51, 16  ;;  %v6564_v22 = vshrl.u32 %v17408_v5, 16  ;;  %v6568_v23 = vshll.u32 %v17410_v11, 16 }
 0x17a   :  { %15372 = vmatmul.mubr.bf16.gmra.mrb[172].mxu1 %v1726_v21  ;;  %v17400_v21 = vld [vmem:[%s20896_s0 + $0x310] sm:$0xff]   ;;  %v6562_v27 = vrot.slane %v6560_v16, 1  ;;  %v6572_v39 = vshrl.u32 %v17410_v11, 16  ;;  %v17423_v16 = vld [vmem:[%s20896_s0 + $0x358] sm:$0xff]  }
 0x17b   :  { %15956 = vmatmul.mubr.bf16.gmra.mrb[172].mxu0 %v6467_v24  ;;  %15375 = vmatprep.mubr.bf16.mxu1 %v1734_v25  ;;  %v17401_v24 = vld [vmem:[%s20896_s0 + $0x308] sm:$0xff]   ;;  %v6518_v25 = vor.u32 %v6516_v14, %v6514_v20  ;;  %v6528_v32 = vshll.u32 %v17400_v21, 16  ;;  %v6532_v38 = vshrl.u32 %v17400_v21, 16  ;;  %v6547_v14 = vsel %vm1018_vm0, %v6542_v3, %v6546_v4 }
 0x17c   :  { %15959 = vmatprep.mubr.bf16.mxu0 %v6475_v28  ;;  %v1787_v28 = vshll.u32 %v17399_v17, 16  ;;  %v1795_v36 = vshll.u32 %v17401_v24, 16  ;;  %v1799_v54 = vshrl.u32 %v17401_v24, 16  ;;  %v1827_v20 = vshll.u32 %v17409_v8, 16 }
 0x17d   :  { %v6523_v37 = vsel %vm1018_vm0, %v6518_v25, %v6522_v26  ;;  %v6530_v43 = vrot.slane %v6528_v32, 1  ;;  %v1821_v24 = vrot.slane %v1819_v12, 1  ;;  %v17411_v25 = vld [vmem:[%s20896_s0 + $0x330] sm:$0xff]   ;;  %v17413_v32 = vld [vmem:[%s20896_s0 + $0x338] sm:$0xff]   ;;  %v17422_v12 = vld [vmem:[%s20896_s0 + $0x360] sm:$0xff]  }
 0x17e   :  { %v1789_v40 = vrot.slane %v1787_v28, 1  ;;  %v1797_v47 = vrot.slane %v1795_v36, 1  ;;  %v17412_v28 = vld [vmem:[%s20896_s0 + $0x340] sm:$0xff]   ;;  %v1829_v31 = vrot.slane %v1827_v20, 1  ;;  %v1835_v36 = vshll.u32 %v17411_v25, 16 }
 0x17f   :  { %v1843_v44 = vshll.u32 %v17413_v32, 16 }
 0x180   :  { %v1793_v46 = vor.u32 %v1791_v35, %v1789_v40  ;;  %v1790_v53 = vsel %vm1018_vm0, %v1785_v42, %v1789_v40  ;;  %v1801_v2 = vor.u32 %v1799_v54, %v1797_v47  ;;  %v17414_v35 = vld [vmem:[%s20896_s0 + $0x348] sm:$0xff]   ;;  %v6576_v40 = vshll.u32 %v17412_v28, 16 }
 0x181   :  { %v1845_v55 = vrot.slane %v1843_v44, 1 }
 0x182   :  { %15376 = vmatmul.mubr.bf16.gmra.mrb[176].mxu1 %v1742_v45  ;;  %v6526_v45 = vor.u32 %v6524_v34, %v6522_v26  ;;  %v1798_v58 = vsel %vm1018_vm0, %v1793_v46, %v1797_v47  ;;  %v6570_v34 = vrot.slane %v6568_v23, 1  ;;  %v6580_v46 = vshrl.u32 %v17412_v28, 16 }
 0x183   :  { %15960 = vmatmul.mubr.bf16.gmra.mrb[176].mxu0 %v6483_v48  ;;  %15379 = vmatprep.mubr.bf16.mxu1 %v1750_v49  ;;  %v17405_v48 = vld [vmem:[%s20896_s0 + $0x318] sm:$0xff]   ;;  %v6534_v49 = vor.u32 %v6532_v38, %v6530_v43  ;;  %v1831_v38 = vshrl.u32 %v17409_v8, 16  ;;  %v6584_v47 = vshll.u32 %v17414_v35, 16  ;;  %v1875_v28 = vshll.u32 %v17423_v16, 16 }
 0x184   :  { %15963 = vmatprep.mubr.bf16.mxu0 %v6491_v52  ;;  %v1803_v52 = vshll.u32 %v17403_v41, 16  ;;  %v6531_v57 = vsel %vm1018_vm0, %v6526_v45, %v6530_v43  ;;  %v1811_v60 = vshll.u32 %v17405_v48, 16  ;;  %v1815_v15 = vshrl.u32 %v17405_v48, 16 }
 0x185   :  { %v6539_v61 = vsel %vm1018_vm0, %v6534_v49, %v6538_v50  ;;  %v1839_v43 = vshrl.u32 %v17411_v25, 16  ;;  %v1837_v48 = vrot.slane %v1835_v36, 1  ;;  %v17415_v49 = vld [vmem:[%s20896_s0 + $0x340] sm:$0xff]   ;;  %v1833_v50 = vor.u32 %v1831_v38, %v1829_v31 }
 0x186   :  { %v1805_v0 = vrot.slane %v1803_v52, 1  ;;  %v1813_v7 = vrot.slane %v1811_v60, 1  ;;  %v6574_v51 = vor.u32 %v6572_v39, %v6570_v34  ;;  %v6578_v52 = vrot.slane %v6576_v40, 1  ;;  %v17427_v40 = vld [vmem:[%s20896_s0 + $0x368] sm:$0xff]  }
 0x187   :  { %v1841_v54 = vor.u32 %v1839_v43, %v1837_v48  ;;  %v1851_v60 = vshll.u32 %v17415_v49, 16  ;;  %v1855_v3 = vshrl.u32 %v17415_v49, 16  ;;  %v1877_v39 = vrot.slane %v1875_v28, 1  ;;  %v17428_v43 = vld [vmem:[%s20896_s0 + $0x378] sm:$0xff]  }
 0x188   :  { %v1817_v26 = vor.u32 %v1815_v15, %v1813_v7 }
 0x189   :  { %v1846_v1 = vsel %vm1018_vm0, %v1841_v54, %v1845_v55  ;;  %v1853_v8 = vrot.slane %v1851_v60, 1  ;;  %v17430_v60 = vld [vmem:[%s20896_s0 + $0x380] sm:$0xff]  }
 0x18a   :  { %15380 = vmatmul.mubr.bf16.gmra.mrb[180].mxu1 %v1758_v6  ;;  %v1809_v6 = vor.u32 %v1807_v59, %v1805_v0  ;;  %v17420_v59 = vld [vmem:[%s20896_s0 + $0x358] sm:$0xff]  }
 0x18b   :  { %15964 = vmatmul.mubr.bf16.gmra.mrb[180].mxu0 %v6499_v9  ;;  %15383 = vmatprep.mubr.bf16.mxu1 %v1766_v10  ;;  %v6550_v9 = vor.u32 %v6548_v62, %v6546_v4  ;;  %v6554_v10 = vrot.slane %v6552_v63, 1  ;;  %v6579_v62 = vsel %vm1018_vm0, %v6574_v51, %v6578_v52  ;;  %v1847_v63 = vshrl.u32 %v17413_v32, 16 }
 0x18c   :  { %15967 = vmatprep.mubr.bf16.mxu0 %v6507_v13  ;;  %v1806_v13 = vsel %vm1018_vm0, %v1801_v2, %v1805_v0  ;;  %v1814_v17 = vsel %vm1018_vm0, %v1809_v6, %v1813_v7  ;;  %v6588_v2 = vshrl.u32 %v17414_v35, 16  ;;  %v1859_v4 = vshll.u32 %v17419_v56, 16 }
 0x18d   :  { %v6555_v21 = vsel %vm1018_vm0, %v6550_v9, %v6554_v10  ;;  %v6600_v7 = vshll.u32 %v17420_v59, 16  ;;  %v17421_v9 = vld [vmem:[%s20896_s0 + $0x350] sm:$0xff]   ;;  %v6604_v23 = vshrl.u32 %v17420_v59, 16 }
 0x18e   :  { %v1861_v15 = vrot.slane %v1859_v4, 1  ;;  %v1867_v20 = vshll.u32 %v17421_v9, 16 }
 0x190   :  { %v1869_v32 = vrot.slane %v1867_v20, 1 }
 0x192   :  { %15384 = vmatmul.mubr.bf16.gmra.mrb[184].mxu1 %v1774_v29  ;;  %v6558_v29 = vor.u32 %v6556_v18, %v6554_v10  ;;  %v1849_v10 = vor.u32 %v1847_v63, %v1845_v55  ;;  %v6602_v18 = vrot.slane %v6600_v7, 1  ;;  %v6632_v55 = vshll.u32 %v17428_v43, 16 }
 0x193   :  { %15968 = vmatmul.mubr.bf16.gmra.mrb[184].mxu0 %v6515_v30  ;;  %15387 = vmatprep.mubr.bf16.mxu1 %v1782_v33  ;;  %v1825_v30 = vor.u32 %v1823_v19, %v1821_v24  ;;  %v6566_v33 = vor.u32 %v6564_v22, %v6562_v27  ;;  %v17424_v19 = vld [vmem:[%s20896_s0 + $0x368] sm:$0xff]   ;;  %v1863_v22 = vshrl.u32 %v17419_v56, 16  ;;  %v6636_v7 = vshrl.u32 %v17428_v43, 16 }
 0x194   :  { %15971 = vmatprep.mubr.bf16.mxu0 %v6523_v37  ;;  %v1822_v37 = vsel %vm1018_vm0, %v1817_v26, %v1821_v24  ;;  %v6563_v41 = vsel %vm1018_vm0, %v6558_v29, %v6562_v27  ;;  %v6608_v24 = vshll.u32 %v17422_v12, 16  ;;  %v1871_v27 = vshrl.u32 %v17421_v9, 16 }
 0x195   :  { %v1830_v42 = vsel %vm1018_vm0, %v1825_v30, %v1829_v31  ;;  %v6571_v45 = vsel %vm1018_vm0, %v6566_v33, %v6570_v34  ;;  %v6612_v30 = vshrl.u32 %v17422_v12, 16  ;;  %v6616_v31 = vshll.u32 %v17424_v19, 16  ;;  %v17425_v33 = vld [vmem:[%s20896_s0 + $0x360] sm:$0xff]  }
 0x196   :  { %v1865_v34 = vor.u32 %v1863_v22, %v1861_v15  ;;  %v6606_v35 = vor.u32 %v6604_v23, %v6602_v18  ;;  %v6610_v36 = vrot.slane %v6608_v24, 1  ;;  %v1873_v38 = vor.u32 %v1871_v27, %v1869_v32  ;;  %v17435_v24 = vld [vmem:[%s20896_s0 + $0x388] sm:$0xff]   ;;  %v17436_v27 = vld [vmem:[%s20896_s0 + $0x398] sm:$0xff]  }
 0x197   :  { %v1883_v44 = vshll.u32 %v17425_v33, 16  ;;  %v1887_v51 = vshrl.u32 %v17425_v33, 16 }
 0x198   :  { %v1878_v49 = vsel %vm1018_vm0, %v1873_v38, %v1877_v39 }
 0x199   :  { %v1885_v56 = vrot.slane %v1883_v44, 1  ;;  %v17438_v44 = vld [vmem:[%s20896_s0 + $0x3a0] sm:$0xff]  }
 0x19a   :  { %15388 = vmatmul.mubr.bf16.gmra.mrb[188].mxu1 %v1790_v53  ;;  %v17416_v53 = vld [vmem:[%s20896_s0 + $0x350] sm:$0xff]  }
 0x19b   :  { %15972 = vmatmul.mubr.bf16.gmra.mrb[188].mxu0 %v6531_v57  ;;  %15391 = vmatprep.mubr.bf16.mxu1 %v1798_v58  ;;  %v6582_v57 = vor.u32 %v6580_v46, %v6578_v52  ;;  %v6586_v58 = vrot.slane %v6584_v47, 1  ;;  %v6592_v0 = vshll.u32 %v17416_v53, 16  ;;  %v6596_v6 = vshrl.u32 %v17416_v53, 16 }
 0x19c   :  { %15975 = vmatprep.mubr.bf16.mxu0 %v6539_v61  ;;  %v1838_v61 = vsel %vm1018_vm0, %v1833_v50, %v1837_v48  ;;  %v6611_v46 = vsel %vm1018_vm0, %v6606_v35, %v6610_v36  ;;  %v1879_v47 = vshrl.u32 %v17423_v16, 16  ;;  %v6620_v50 = vshrl.u32 %v17424_v19, 16 }
 0x19d   :  { %v6587_v5 = vsel %vm1018_vm0, %v6582_v57, %v6586_v58  ;;  %v6594_v11 = vrot.slane %v6592_v0, 1  ;;  %v1891_v52 = vshll.u32 %v17427_v40, 16  ;;  %v17429_v57 = vld [vmem:[%s20896_s0 + $0x370] sm:$0xff]   ;;  %v17431_v0 = vld [vmem:[%s20896_s0 + $0x378] sm:$0xff]  }
 0x19e   :  { %v1899_v4 = vshll.u32 %v17429_v57, 16  ;;  %v1907_v12 = vshll.u32 %v17431_v0, 16 }
 0x19f   :  { %v1893_v63 = vrot.slane %v1891_v52, 1 }
 0x1a0   :  { %v1901_v16 = vrot.slane %v1899_v4, 1  ;;  %v1909_v23 = vrot.slane %v1907_v12, 1 }
 0x1a2   :  { %15392 = vmatmul.mubr.bf16.gmra.mrb[192].mxu1 %v1806_v13  ;;  %v6590_v13 = vor.u32 %v6588_v2, %v6586_v58  ;;  %v1881_v58 = vor.u32 %v1879_v47, %v1877_v39  ;;  %v6634_v2 = vrot.slane %v6632_v55, 1  ;;  %v6664_v39 = vshll.u32 %v17436_v27, 16 }
 0x1a3   :  { %15976 = vmatmul.mubr.bf16.gmra.mrb[192].mxu0 %v6547_v14  ;;  %15395 = vmatprep.mubr.bf16.mxu1 %v1814_v17  ;;  %v1857_v14 = vor.u32 %v1855_v3, %v1853_v8  ;;  %v6598_v17 = vor.u32 %v6596_v6, %v6594_v11  ;;  %v17432_v3 = vld [vmem:[%s20896_s0 + $0x388] sm:$0xff]   ;;  %v1895_v6 = vshrl.u32 %v17427_v40, 16  ;;  %v6668_v55 = vshrl.u32 %v17436_v27, 16 }
 0x1a4   :  { %15979 = vmatprep.mubr.bf16.mxu0 %v6555_v21  ;;  %v1854_v21 = vsel %vm1018_vm0, %v1849_v10, %v1853_v8  ;;  %v6595_v25 = vsel %vm1018_vm0, %v6590_v13, %v6594_v11  ;;  %v6640_v8 = vshll.u32 %v17430_v60, 16  ;;  %v1903_v11 = vshrl.u32 %v17429_v57, 16 }
 0x1a5   :  { %v1862_v26 = vsel %vm1018_vm0, %v1857_v14, %v1861_v15  ;;  %v6603_v29 = vsel %vm1018_vm0, %v6598_v17, %v6602_v18  ;;  %v6644_v14 = vshrl.u32 %v17430_v60, 16  ;;  %v6648_v15 = vshll.u32 %v17432_v3, 16  ;;  %v17433_v17 = vld [vmem:[%s20896_s0 + $0x380] sm:$0xff]  }
 0x1a6   :  { %v1897_v18 = vor.u32 %v1895_v6, %v1893_v63  ;;  %v6638_v19 = vor.u32 %v6636_v7, %v6634_v2  ;;  %v6642_v20 = vrot.slane %v6640_v8, 1  ;;  %v1905_v22 = vor.u32 %v1903_v11, %v1901_v16  ;;  %v17443_v8 = vld [vmem:[%s20896_s0 + $0x3a8] sm:$0xff]   ;;  %v17444_v11 = vld [vmem:[%s20896_s0 + $0x3b8] sm:$0xff]  }
 0x1a7   :  { %v1915_v28 = vshll.u32 %v17433_v17, 16  ;;  %v1919_v35 = vshrl.u32 %v17433_v17, 16 }
 0x1a8   :  { %v1910_v33 = vsel %vm1018_vm0, %v1905_v22, %v1909_v23 }
 0x1a9   :  { %v1917_v40 = vrot.slane %v1915_v28, 1  ;;  %v17446_v28 = vld [vmem:[%s20896_s0 + $0x3c0] sm:$0xff]  }
 0x1aa   :  { %15396 = vmatmul.mubr.bf16.gmra.mrb[196].mxu1 %v1822_v37  ;;  %v17426_v37 = vld [vmem:[%s20896_s0 + $0x370] sm:$0xff]  }
 0x1ab   :  { %15980 = vmatmul.mubr.bf16.gmra.mrb[196].mxu0 %v6563_v41  ;;  %15399 = vmatprep.mubr.bf16.mxu1 %v1830_v42  ;;  %v6614_v41 = vor.u32 %v6612_v30, %v6610_v36  ;;  %v6618_v42 = vrot.slane %v6616_v31, 1  ;;  %v6624_v48 = vshll.u32 %v17426_v37, 16  ;;  %v6628_v54 = vshrl.u32 %v17426_v37, 16 }
 0x1ac   :  { %15983 = vmatprep.mubr.bf16.mxu0 %v6571_v45  ;;  %v1870_v45 = vsel %vm1018_vm0, %v1865_v34, %v1869_v32  ;;  %v6643_v30 = vsel %vm1018_vm0, %v6638_v19, %v6642_v20  ;;  %v1911_v31 = vshrl.u32 %v17431_v0, 16  ;;  %v6652_v34 = vshrl.u32 %v17432_v3, 16 }
 0x1ad   :  { %v6619_v53 = vsel %vm1018_vm0, %v6614_v41, %v6618_v42  ;;  %v6626_v59 = vrot.slane %v6624_v48, 1  ;;  %v1923_v36 = vshll.u32 %v17435_v24, 16  ;;  %v17437_v41 = vld [vmem:[%s20896_s0 + $0x390] sm:$0xff]   ;;  %v17439_v48 = vld [vmem:[%s20896_s0 + $0x398] sm:$0xff]  }
 0x1ae   :  { %v1931_v52 = vshll.u32 %v17437_v41, 16  ;;  %v1939_v60 = vshll.u32 %v17439_v48, 16 }
 0x1af   :  { %v1925_v47 = vrot.slane %v1923_v36, 1 }
 0x1b0   :  { %v1933_v0 = vrot.slane %v1931_v52, 1  ;;  %v1941_v7 = vrot.slane %v1939_v60, 1 }
 0x1b2   :  { %15400 = vmatmul.mubr.bf16.gmra.mrb[200].mxu1 %v1838_v61  ;;  %v6622_v61 = vor.u32 %v6620_v50, %v6618_v42  ;;  %v1913_v42 = vor.u32 %v1911_v31, %v1909_v23  ;;  %v6666_v50 = vrot.slane %v6664_v39, 1  ;;  %v6696_v23 = vshll.u32 %v17444_v11, 16 }
 0x1b3   :  { %15984 = vmatmul.mubr.bf16.gmra.mrb[200].mxu0 %v6579_v62  ;;  %15403 = vmatprep.mubr.bf16.mxu1 %v1846_v1  ;;  %v1889_v62 = vor.u32 %v1887_v51, %v1885_v56  ;;  %v6630_v1 = vor.u32 %v6628_v54, %v6626_v59  ;;  %v17440_v51 = vld [vmem:[%s20896_s0 + $0x3a8] sm:$0xff]   ;;  %v1927_v54 = vshrl.u32 %v17435_v24, 16  ;;  %v6700_v39 = vshrl.u32 %v17444_v11, 16 }
 0x1b4   :  { %15987 = vmatprep.mubr.bf16.mxu0 %v6587_v5  ;;  %v1886_v5 = vsel %vm1018_vm0, %v1881_v58, %v1885_v56  ;;  %v6627_v9 = vsel %vm1018_vm0, %v6622_v61, %v6626_v59  ;;  %v6672_v56 = vshll.u32 %v17438_v44, 16  ;;  %v1935_v59 = vshrl.u32 %v17437_v41, 16 }
 0x1b5   :  { %v1894_v10 = vsel %vm1018_vm0, %v1889_v62, %v1893_v63  ;;  %v6635_v13 = vsel %vm1018_vm0, %v6630_v1, %v6634_v2  ;;  %v6676_v62 = vshrl.u32 %v17438_v44, 16  ;;  %v6680_v63 = vshll.u32 %v17440_v51, 16  ;;  %v17441_v1 = vld [vmem:[%s20896_s0 + $0x3a0] sm:$0xff]  }
 0x1b6   :  { %v1929_v2 = vor.u32 %v1927_v54, %v1925_v47  ;;  %v6670_v3 = vor.u32 %v6668_v55, %v6666_v50  ;;  %v6674_v4 = vrot.slane %v6672_v56, 1  ;;  %v1937_v6 = vor.u32 %v1935_v59, %v1933_v0  ;;  %v17451_v56 = vld [vmem:[%s20896_s0 + $0x3c8] sm:$0xff]   ;;  %v17452_v59 = vld [vmem:[%s20896_s0 + $0x3d8] sm:$0xff]  }
 0x1b7   :  { %v1947_v12 = vshll.u32 %v17441_v1, 16  ;;  %v1951_v19 = vshrl.u32 %v17441_v1, 16 }
 0x1b8   :  { %v1942_v17 = vsel %vm1018_vm0, %v1937_v6, %v1941_v7 }
 0x1b9   :  { %v1949_v24 = vrot.slane %v1947_v12, 1  ;;  %v17454_v12 = vld [vmem:[%s20896_s0 + $0x3e0] sm:$0xff]  }
 0x1ba   :  { %15404 = vmatmul.mubr.bf16.gmra.mrb[204].mxu1 %v1854_v21  ;;  %v17434_v21 = vld [vmem:[%s20896_s0 + $0x390] sm:$0xff]  }
 0x1bb   :  { %15988 = vmatmul.mubr.bf16.gmra.mrb[204].mxu0 %v6595_v25  ;;  %15407 = vmatprep.mubr.bf16.mxu1 %v1862_v26  ;;  %v6646_v25 = vor.u32 %v6644_v14, %v6642_v20  ;;  %v6650_v26 = vrot.slane %v6648_v15, 1  ;;  %v6656_v32 = vshll.u32 %v17434_v21, 16  ;;  %v6660_v38 = vshrl.u32 %v17434_v21, 16 }
 0x1bc   :  { %15991 = vmatprep.mubr.bf16.mxu0 %v6603_v29  ;;  %v1902_v29 = vsel %vm1018_vm0, %v1897_v18, %v1901_v16  ;;  %v6675_v14 = vsel %vm1018_vm0, %v6670_v3, %v6674_v4  ;;  %v1943_v15 = vshrl.u32 %v17439_v48, 16  ;;  %v6684_v18 = vshrl.u32 %v17440_v51, 16 }
 0x1bd   :  { %v6651_v37 = vsel %vm1018_vm0, %v6646_v25, %v6650_v26  ;;  %v6658_v43 = vrot.slane %v6656_v32, 1  ;;  %v1955_v20 = vshll.u32 %v17443_v8, 16  ;;  %v17445_v25 = vld [vmem:[%s20896_s0 + $0x3b0] sm:$0xff]   ;;  %v17447_v32 = vld [vmem:[%s20896_s0 + $0x3b8] sm:$0xff]  }
 0x1be   :  { %v1963_v36 = vshll.u32 %v17445_v25, 16  ;;  %v1971_v44 = vshll.u32 %v17447_v32, 16 }
 0x1bf   :  { %v1957_v31 = vrot.slane %v1955_v20, 1 }
 0x1c0   :  { %v1965_v48 = vrot.slane %v1963_v36, 1  ;;  %v1973_v55 = vrot.slane %v1971_v44, 1 }
 0x1c2   :  { %15408 = vmatmul.mubr.bf16.gmra.mrb[208].mxu1 %v1870_v45  ;;  %v6654_v45 = vor.u32 %v6652_v34, %v6650_v26  ;;  %v1945_v26 = vor.u32 %v1943_v15, %v1941_v7  ;;  %v6698_v34 = vrot.slane %v6696_v23, 1  ;;  %v6728_v7 = vshll.u32 %v17452_v59, 16 }
 0x1c3   :  { %15992 = vmatmul.mubr.bf16.gmra.mrb[208].mxu0 %v6611_v46  ;;  %15411 = vmatprep.mubr.bf16.mxu1 %v1878_v49  ;;  %v1921_v46 = vor.u32 %v1919_v35, %v1917_v40  ;;  %v6662_v49 = vor.u32 %v6660_v38, %v6658_v43  ;;  %v17448_v35 = vld [vmem:[%s20896_s0 + $0x3c8] sm:$0xff]   ;;  %v1959_v38 = vshrl.u32 %v17443_v8, 16  ;;  %v6732_v23 = vshrl.u32 %v17452_v59, 16 }
 0x1c4   :  { %15995 = vmatprep.mubr.bf16.mxu0 %v6619_v53  ;;  %v1918_v53 = vsel %vm1018_vm0, %v1913_v42, %v1917_v40  ;;  %v6659_v57 = vsel %vm1018_vm0, %v6654_v45, %v6658_v43  ;;  %v6704_v40 = vshll.u32 %v17446_v28, 16  ;;  %v1967_v43 = vshrl.u32 %v17445_v25, 16 }
 0x1c5   :  { %v1926_v58 = vsel %vm1018_vm0, %v1921_v46, %v1925_v47  ;;  %v6667_v61 = vsel %vm1018_vm0, %v6662_v49, %v6666_v50  ;;  %v6708_v46 = vshrl.u32 %v17446_v28, 16  ;;  %v6712_v47 = vshll.u32 %v17448_v35, 16  ;;  %v17449_v49 = vld [vmem:[%s20896_s0 + $0x3c0] sm:$0xff]  }
 0x1c6   :  { %v1961_v50 = vor.u32 %v1959_v38, %v1957_v31  ;;  %v6702_v51 = vor.u32 %v6700_v39, %v6698_v34  ;;  %v6706_v52 = vrot.slane %v6704_v40, 1  ;;  %v1969_v54 = vor.u32 %v1967_v43, %v1965_v48  ;;  %v17461_v40 = vld [vmem:[%s20896_s0 + $0x3e8] sm:$0xff]   ;;  %v17462_v43 = vld [vmem:[%s20896_s0 + $0x3f8] sm:$0xff]  }
 0x1c7   :  { %v1979_v60 = vshll.u32 %v17449_v49, 16  ;;  %v1983_v3 = vshrl.u32 %v17449_v49, 16 }
 0x1c8   :  { %v1974_v1 = vsel %vm1018_vm0, %v1969_v54, %v1973_v55 }
 0x1c9   :  { %v1981_v8 = vrot.slane %v1979_v60, 1  ;;  %v17464_v60 = vld [vmem:[%s20896_s0 + $0x400] sm:$0xff]  }
 0x1ca   :  { %15412 = vmatmul.mubr.bf16.gmra.mrb[212].mxu1 %v1886_v5  ;;  %v17442_v5 = vld [vmem:[%s20896_s0 + $0x3b0] sm:$0xff]  }
 0x1cb   :  { %15996 = vmatmul.mubr.bf16.gmra.mrb[212].mxu0 %v6627_v9  ;;  %15415 = vmatprep.mubr.bf16.mxu1 %v1894_v10  ;;  %v6678_v9 = vor.u32 %v6676_v62, %v6674_v4  ;;  %v6682_v10 = vrot.slane %v6680_v63, 1  ;;  %v6688_v16 = vshll.u32 %v17442_v5, 16  ;;  %v6692_v22 = vshrl.u32 %v17442_v5, 16 }
 0x1cc   :  { %15999 = vmatprep.mubr.bf16.mxu0 %v6635_v13  ;;  %v1934_v13 = vsel %vm1018_vm0, %v1929_v2, %v1933_v0  ;;  %v6707_v62 = vsel %vm1018_vm0, %v6702_v51, %v6706_v52  ;;  %v1975_v63 = vshrl.u32 %v17447_v32, 16  ;;  %v6716_v2 = vshrl.u32 %v17448_v35, 16 }
 0x1cd   :  { %v6683_v21 = vsel %vm1018_vm0, %v6678_v9, %v6682_v10  ;;  %v6690_v27 = vrot.slane %v6688_v16, 1  ;;  %v1987_v4 = vshll.u32 %v17451_v56, 16  ;;  %v17453_v9 = vld [vmem:[%s20896_s0 + $0x3d0] sm:$0xff]   ;;  %v17457_v16 = vld [vmem:[%s20896_s0 + $0x3d8] sm:$0xff]  }
 0x1ce   :  { %v1995_v20 = vshll.u32 %v17453_v9, 16  ;;  %v2003_v28 = vshll.u32 %v17457_v16, 16 }
 0x1cf   :  { %v1989_v15 = vrot.slane %v1987_v4, 1 }
 0x1d0   :  { %v1997_v32 = vrot.slane %v1995_v20, 1  ;;  %v2005_v39 = vrot.slane %v2003_v28, 1 }
 0x1d2   :  { %15416 = vmatmul.mubr.bf16.gmra.mrb[216].mxu1 %v1902_v29  ;;  %v6686_v29 = vor.u32 %v6684_v18, %v6682_v10  ;;  %v1977_v10 = vor.u32 %v1975_v63, %v1973_v55  ;;  %v6730_v18 = vrot.slane %v6728_v7, 1  ;;  %v6760_v55 = vshll.u32 %v17462_v43, 16 }
 0x1d3   :  { %16000 = vmatmul.mubr.bf16.gmra.mrb[216].mxu0 %v6643_v30  ;;  %15419 = vmatprep.mubr.bf16.mxu1 %v1910_v33  ;;  %v1953_v30 = vor.u32 %v1951_v19, %v1949_v24  ;;  %v6694_v33 = vor.u32 %v6692_v22, %v6690_v27  ;;  %v17458_v19 = vld [vmem:[%s20896_s0 + $0x3e8] sm:$0xff]   ;;  %v1991_v22 = vshrl.u32 %v17451_v56, 16  ;;  %v6764_v7 = vshrl.u32 %v17462_v43, 16 }
 0x1d4   :  { %16003 = vmatprep.mubr.bf16.mxu0 %v6651_v37  ;;  %v1950_v37 = vsel %vm1018_vm0, %v1945_v26, %v1949_v24  ;;  %v6691_v41 = vsel %vm1018_vm0, %v6686_v29, %v6690_v27  ;;  %v6736_v24 = vshll.u32 %v17454_v12, 16  ;;  %v1999_v27 = vshrl.u32 %v17453_v9, 16 }
 0x1d5   :  { %v1958_v42 = vsel %vm1018_vm0, %v1953_v30, %v1957_v31  ;;  %v6699_v45 = vsel %vm1018_vm0, %v6694_v33, %v6698_v34  ;;  %v6740_v30 = vshrl.u32 %v17454_v12, 16  ;;  %v6744_v31 = vshll.u32 %v17458_v19, 16  ;;  %v17459_v33 = vld [vmem:[%s20896_s0 + $0x3e0] sm:$0xff]  }
 0x1d6   :  { %v1993_v34 = vor.u32 %v1991_v22, %v1989_v15  ;;  %v6734_v35 = vor.u32 %v6732_v23, %v6730_v18  ;;  %v6738_v36 = vrot.slane %v6736_v24, 1  ;;  %v2001_v38 = vor.u32 %v1999_v27, %v1997_v32  ;;  %v17469_v24 = vld [vmem:[%s20896_s0 + $0x408] sm:$0xff]   ;;  %v17470_v27 = vld [vmem:[%s20896_s0 + $0x418] sm:$0xff]  }
 0x1d7   :  { %v2011_v44 = vshll.u32 %v17459_v33, 16  ;;  %v2015_v51 = vshrl.u32 %v17459_v33, 16 }
 0x1d8   :  { %v2006_v49 = vsel %vm1018_vm0, %v2001_v38, %v2005_v39 }
 0x1d9   :  { %v2013_v56 = vrot.slane %v2011_v44, 1  ;;  %v17472_v44 = vld [vmem:[%s20896_s0 + $0x420] sm:$0xff]  }
 0x1da   :  { %15420 = vmatmul.mubr.bf16.gmra.mrb[220].mxu1 %v1918_v53  ;;  %v17450_v53 = vld [vmem:[%s20896_s0 + $0x3d0] sm:$0xff]  }
 0x1db   :  { %16004 = vmatmul.mubr.bf16.gmra.mrb[220].mxu0 %v6659_v57  ;;  %15423 = vmatprep.mubr.bf16.mxu1 %v1926_v58  ;;  %v6710_v57 = vor.u32 %v6708_v46, %v6706_v52  ;;  %v6714_v58 = vrot.slane %v6712_v47, 1  ;;  %v6720_v0 = vshll.u32 %v17450_v53, 16  ;;  %v6724_v6 = vshrl.u32 %v17450_v53, 16 }
 0x1dc   :  { %16007 = vmatprep.mubr.bf16.mxu0 %v6667_v61  ;;  %v1966_v61 = vsel %vm1018_vm0, %v1961_v50, %v1965_v48  ;;  %v6739_v46 = vsel %vm1018_vm0, %v6734_v35, %v6738_v36  ;;  %v2007_v47 = vshrl.u32 %v17457_v16, 16  ;;  %v6748_v50 = vshrl.u32 %v17458_v19, 16 }
 0x1dd   :  { %v6715_v5 = vsel %vm1018_vm0, %v6710_v57, %v6714_v58  ;;  %v6722_v11 = vrot.slane %v6720_v0, 1  ;;  %v2019_v52 = vshll.u32 %v17461_v40, 16  ;;  %v17463_v57 = vld [vmem:[%s20896_s0 + $0x3f0] sm:$0xff]   ;;  %v17465_v0 = vld [vmem:[%s20896_s0 + $0x3f8] sm:$0xff]  }
 0x1de   :  { %v2027_v4 = vshll.u32 %v17463_v57, 16  ;;  %v2035_v12 = vshll.u32 %v17465_v0, 16 }
 0x1df   :  { %v2021_v63 = vrot.slane %v2019_v52, 1 }
 0x1e0   :  { %v2029_v16 = vrot.slane %v2027_v4, 1  ;;  %v2037_v23 = vrot.slane %v2035_v12, 1  ;;  %v18960_v12 = vld [vmem:[%s20896_s0 + $0x438] sm:$0xff]  }
 0x1e2   :  { %15424 = vmatmul.mubr.bf16.gmra.mrb[224].mxu1 %v1934_v13  ;;  %v6718_v13 = vor.u32 %v6716_v2, %v6714_v58  ;;  %v2009_v58 = vor.u32 %v2007_v47, %v2005_v39  ;;  %v6762_v2 = vrot.slane %v6760_v55, 1  ;;  %v6792_v39 = vshll.u32 %v17470_v27, 16 }
 0x1e3   :  { %16008 = vmatmul.mubr.bf16.gmra.mrb[224].mxu0 %v6675_v14  ;;  %15427 = vmatprep.mubr.bf16.mxu1 %v1942_v17  ;;  %v1985_v14 = vor.u32 %v1983_v3, %v1981_v8  ;;  %v6726_v17 = vor.u32 %v6724_v6, %v6722_v11  ;;  %v17466_v3 = vld [vmem:[%s20896_s0 + $0x408] sm:$0xff]   ;;  %v2023_v6 = vshrl.u32 %v17461_v40, 16  ;;  %v6796_v55 = vshrl.u32 %v17470_v27, 16 }
 0x1e4   :  { %16011 = vmatprep.mubr.bf16.mxu0 %v6683_v21  ;;  %v1982_v21 = vsel %vm1018_vm0, %v1977_v10, %v1981_v8  ;;  %v6723_v25 = vsel %vm1018_vm0, %v6718_v13, %v6722_v11  ;;  %v6768_v8 = vshll.u32 %v17464_v60, 16  ;;  %v2031_v11 = vshrl.u32 %v17463_v57, 16 }
 0x1e5   :  { %v1990_v26 = vsel %vm1018_vm0, %v1985_v14, %v1989_v15  ;;  %v6731_v29 = vsel %vm1018_vm0, %v6726_v17, %v6730_v18  ;;  %v6772_v14 = vshrl.u32 %v17464_v60, 16  ;;  %v6776_v15 = vshll.u32 %v17466_v3, 16  ;;  %v17467_v17 = vld [vmem:[%s20896_s0 + $0x400] sm:$0xff]  }
 0x1e6   :  { %v2025_v18 = vor.u32 %v2023_v6, %v2021_v63  ;;  %v6766_v19 = vor.u32 %v6764_v7, %v6762_v2  ;;  %v6770_v20 = vrot.slane %v6768_v8, 1  ;;  %v2033_v22 = vor.u32 %v2031_v11, %v2029_v16  ;;  %v18953_v8 = vld [vmem:[%s20896_s0 + $0x428] sm:$0xff]  }
 0x1e7   :  { %v2043_v28 = vshll.u32 %v17467_v17, 16  ;;  %v2047_v35 = vshrl.u32 %v17467_v17, 16  ;;  %v2083_v27 = vshll.u32 %v18953_v8, 16 }
 0x1e8   :  { %v2038_v33 = vsel %vm1018_vm0, %v2033_v22, %v2037_v23 }
 0x1e9   :  { %v2045_v40 = vrot.slane %v2043_v28, 1 }
 0x1ea   :  { %15428 = vmatmul.mubr.bf16.gmra.mrb[228].mxu1 %v1950_v37  ;;  %v17460_v37 = vld [vmem:[%s20896_s0 + $0x3f0] sm:$0xff]  }
 0x1eb   :  { %16012 = vmatmul.mubr.bf16.gmra.mrb[228].mxu0 %v6691_v41  ;;  %15431 = vmatprep.mubr.bf16.mxu1 %v1958_v42  ;;  %v6742_v41 = vor.u32 %v6740_v30, %v6738_v36  ;;  %v6746_v42 = vrot.slane %v6744_v31, 1  ;;  %v6752_v48 = vshll.u32 %v17460_v37, 16  ;;  %v6756_v54 = vshrl.u32 %v17460_v37, 16 }
 0x1ec   :  { %16015 = vmatprep.mubr.bf16.mxu0 %v6699_v45  ;;  %v1998_v45 = vsel %vm1018_vm0, %v1993_v34, %v1997_v32  ;;  %v6771_v30 = vsel %vm1018_vm0, %v6766_v19, %v6770_v20  ;;  %v2039_v31 = vshrl.u32 %v17465_v0, 16  ;;  %v6780_v34 = vshrl.u32 %v17466_v3, 16 }
 0x1ed   :  { %v6747_v53 = vsel %vm1018_vm0, %v6742_v41, %v6746_v42  ;;  %v6754_v59 = vrot.slane %v6752_v48, 1  ;;  %v2051_v36 = vshll.u32 %v17469_v24, 16  ;;  %v17471_v41 = vld [vmem:[%s20896_s0 + $0x410] sm:$0xff]   ;;  %v17473_v48 = vld [vmem:[%s20896_s0 + $0x418] sm:$0xff]  }
 0x1ee   :  { %v2059_v52 = vshll.u32 %v17471_v41, 16  ;;  %v2067_v60 = vshll.u32 %v17473_v48, 16 }
 0x1ef   :  { %v2053_v47 = vrot.slane %v2051_v36, 1  ;;  %v17480_v36 = vld [vmem:[%s20896_s0 + $0x440] sm:$0xff]  }
 0x1f0   :  { %v2061_v0 = vrot.slane %v2059_v52, 1  ;;  %v2069_v7 = vrot.slane %v2067_v60, 1  ;;  %v6828_v52 = vshrl.u32 %v18960_v12, 16 }
 0x1f2   :  { %15432 = vmatmul.mubr.bf16.gmra.mrb[232].mxu1 %v1966_v61  ;;  %v6750_v61 = vor.u32 %v6748_v50, %v6746_v42  ;;  %v2041_v42 = vor.u32 %v2039_v31, %v2037_v23  ;;  %v6794_v50 = vrot.slane %v6792_v39, 1  ;;  %v6824_v31 = vshll.u32 %v18960_v12, 16 }
 0x1f3   :  { %16016 = vmatmul.mubr.bf16.gmra.mrb[232].mxu0 %v6707_v62  ;;  %15435 = vmatprep.mubr.bf16.mxu1 %v1974_v1  ;;  %v2017_v62 = vor.u32 %v2015_v51, %v2013_v56  ;;  %v6758_v1 = vor.u32 %v6756_v54, %v6754_v59  ;;  %v17474_v51 = vld [vmem:[%s20896_s0 + $0x428] sm:$0xff]   ;;  %v2055_v54 = vshrl.u32 %v17469_v24, 16  ;;  %v2085_v39 = vrot.slane %v2083_v27, 1 }
 0x1f4   :  { %16019 = vmatprep.mubr.bf16.mxu0 %v6715_v5  ;;  %v2014_v5 = vsel %vm1018_vm0, %v2009_v58, %v2013_v56  ;;  %v6755_v9 = vsel %vm1018_vm0, %v6750_v61, %v6754_v59  ;;  %v6800_v56 = vshll.u32 %v17472_v44, 16  ;;  %v2063_v59 = vshrl.u32 %v17471_v41, 16 }
 0x1f5   :  { %v2022_v10 = vsel %vm1018_vm0, %v2017_v62, %v2021_v63  ;;  %v6763_v13 = vsel %vm1018_vm0, %v6758_v1, %v6762_v2  ;;  %v6804_v62 = vshrl.u32 %v17472_v44, 16  ;;  %v6808_v63 = vshll.u32 %v17474_v51, 16  ;;  %v17475_v1 = vld [vmem:[%s20896_s0 + $0x420] sm:$0xff]   ;;  %v18998_v44 = vld [vmem:[%s20896_s0 + $0x448] sm:$0xff]  }
 0x1f6   :  { %v2057_v2 = vor.u32 %v2055_v54, %v2053_v47  ;;  %v6798_v3 = vor.u32 %v6796_v55, %v6794_v50  ;;  %v6802_v4 = vrot.slane %v6800_v56, 1  ;;  %v2065_v6 = vor.u32 %v2063_v59, %v2061_v0 }
 0x1f7   :  { %v6810_v11 = vrot.slane %v6808_v63, 1  ;;  %v6840_v63 = vshll.u32 %v18998_v44, 16 }
 0x1f8   :  { %v6803_v19 = vsel %vm1018_vm0, %v6798_v3, %v6802_v4  ;;  %v2070_v24 = vsel %vm1018_vm0, %v2065_v6, %v2069_v7 }
 0x1f9   :  { %v6842_v12 = vrot.slane %v6840_v63, 1 }
 0x1fa   :  { %15436 = vmatmul.mubr.bf16.gmra.mrb[236].mxu1 %v1982_v21  ;;  %v17468_v21 = vld [vmem:[%s20896_s0 + $0x410] sm:$0xff]  }
 0x1fb   :  { %16020 = vmatmul.mubr.bf16.gmra.mrb[236].mxu0 %v6723_v25  ;;  %15439 = vmatprep.mubr.bf16.mxu1 %v1990_v26  ;;  %v6774_v25 = vor.u32 %v6772_v14, %v6770_v20  ;;  %v6778_v26 = vrot.slane %v6776_v15, 1  ;;  %v6784_v32 = vshll.u32 %v17468_v21, 16  ;;  %v6788_v38 = vshrl.u32 %v17468_v21, 16 }
 0x1fc   :  { %16023 = vmatprep.mubr.bf16.mxu0 %v6731_v29  ;;  %v2030_v29 = vsel %vm1018_vm0, %v2025_v18, %v2029_v16  ;;  %v2075_v15 = vshll.u32 %v17475_v1, 16  ;;  %v2062_v18 = vsel %vm1018_vm0, %v2057_v2, %v2061_v0  ;;  %v2071_v20 = vshrl.u32 %v17473_v48, 16 }
 0x1fd   :  { %v6779_v37 = vsel %vm1018_vm0, %v6774_v25, %v6778_v26  ;;  %v6786_v43 = vrot.slane %v6784_v32, 1  ;;  %v6812_v25 = vshrl.u32 %v17474_v51, 16  ;;  %v2087_v51 = vshrl.u32 %v18953_v8, 16  ;;  %v17485_v8 = vld [vmem:[%s20896_s0 + $0x448] sm:$0xff]  }
 0x1fe   :  { %v2077_v32 = vrot.slane %v2075_v15, 1  ;;  %v17486_v15 = vld [vmem:[%s20896_s0 + $0x458] sm:$0xff]  }
 0x1ff   :  { %v2089_v2 = vor.u32 %v2087_v51, %v2085_v39 }
 0x202   :  { %15440 = vmatmul.mubr.bf16.gmra.mrb[240].mxu1 %v1998_v45  ;;  %v6782_v45 = vor.u32 %v6780_v34, %v6778_v26  ;;  %v2079_v26 = vshrl.u32 %v17475_v1, 16  ;;  %v2073_v34 = vor.u32 %v2071_v20, %v2069_v7  ;;  %v17483_v1 = vld [vmem:[%s20896_s0 + $0x440] sm:$0xff]  }
 0x203   :  { %16024 = vmatmul.mubr.bf16.gmra.mrb[240].mxu0 %v6739_v46  ;;  %15443 = vmatprep.mubr.bf16.mxu1 %v2006_v49  ;;  %v2049_v46 = vor.u32 %v2047_v35, %v2045_v40  ;;  %v6790_v49 = vor.u32 %v6788_v38, %v6786_v43  ;;  %v2107_v20 = vshll.u32 %v17483_v1, 16 }
 0x204   :  { %16027 = vmatprep.mubr.bf16.mxu0 %v6747_v53  ;;  %v2046_v53 = vsel %vm1018_vm0, %v2041_v42, %v2045_v40  ;;  %v6787_v57 = vsel %vm1018_vm0, %v6782_v45, %v6786_v43  ;;  %v2081_v38 = vor.u32 %v2079_v26, %v2077_v32  ;;  %v18991_v40 = vld [vmem:[%s20896_s0 + $0x438] sm:$0xff]   ;;  %v6826_v43 = vrot.slane %v6824_v31, 1 }
 0x205   :  { %v2054_v58 = vsel %vm1018_vm0, %v2049_v46, %v2053_v47  ;;  %v6795_v61 = vsel %vm1018_vm0, %v6790_v49, %v6794_v50  ;;  %v2078_v50 = vsel %vm1018_vm0, %v2073_v34, %v2077_v32  ;;  %v2099_v59 = vshll.u32 %v18991_v40, 16 }
 0x206   :  { %v6830_v3 = vor.u32 %v6828_v52, %v6826_v43  ;;  %v2103_v27 = vshrl.u32 %v18991_v40, 16  ;;  %v2111_v34 = vshrl.u32 %v17483_v1, 16  ;;  %v17488_v52 = vld [vmem:[%s20896_s0 + $0x460] ss:$0 sps:$4 sm:$0x11]   ;;  %v2119_v1 = vshrl.u32 %v17485_v8, 16 }
 0x207   :  { %v2101_v7 = vrot.slane %v2099_v59, 1 }
 0x209   :  { %v2105_v40 = vor.u32 %v2103_v27, %v2101_v7 }
 0x20a   :  { %15444 = vmatmul.mubr.bf16.gmra.mrb[244].mxu1 %v2014_v5  ;;  %v17476_v5 = vld [vmem:[%s20896_s0 + $0x430] sm:$0xff]  }
 0x20b   :  { %16028 = vmatmul.mubr.bf16.gmra.mrb[244].mxu0 %v6755_v9  ;;  %15447 = vmatprep.mubr.bf16.mxu1 %v2022_v10  ;;  %v6806_v10 = vor.u32 %v6804_v62, %v6802_v4  ;;  %v6816_v21 = vshll.u32 %v17476_v5, 16  ;;  %v6836_v62 = vshrl.u32 %v17480_v36, 16 }
 0x20c   :  { %16031 = vmatprep.mubr.bf16.mxu0 %v6763_v13 }
 0x20d   :  { %v6818_v35 = vrot.slane %v6816_v21, 1 }
 0x212   :  { %15448 = vmatmul.mubr.bf16.gmra.mrb[248].mxu1 %v2030_v29  ;;  %v6811_v29 = vsel %vm1018_vm0, %v6806_v10, %v6810_v11 }
 0x213   :  { %16032 = vmatmul.mubr.bf16.gmra.mrb[248].mxu0 %v6771_v30  ;;  %15451 = vmatprep.mubr.bf16.mxu1 %v2038_v33  ;;  %v6820_v30 = vshrl.u32 %v17476_v5, 16  ;;  %v17479_v33 = vld [vmem:[%s20896_s0 + $0x430] sm:$0xff]  }
 0x214   :  { %16035 = vmatprep.mubr.bf16.mxu0 %v6779_v37  ;;  %v6814_v37 = vor.u32 %v6812_v25, %v6810_v11  ;;  %v2091_v47 = vshll.u32 %v17479_v33, 16  ;;  %v17484_v5 = vld [vmem:[%s20896_s0 + $0x450] sm:$0xff]  }
 0x215   :  { %v6822_v42 = vor.u32 %v6820_v30, %v6818_v35 }
 0x216   :  { %v6819_v56 = vsel %vm1018_vm0, %v6814_v37, %v6818_v35  ;;  %v2093_v0 = vrot.slane %v2091_v47, 1  ;;  %v2115_v35 = vshll.u32 %v17485_v8, 16  ;;  %v17487_v47 = vld [vmem:[%s20896_s0 + $0x450] ss:$0 sps:$4 sm:$0x11]  }
 0x218   :  { %v2094_v25 = vsel %vm1018_vm0, %v2089_v2, %v2093_v0  ;;  %v2117_v51 = vrot.slane %v2115_v35, 1  ;;  %v2123_v2 = vshll.u32 %v17487_v47, 16 }
 0x21a   :  { %15452 = vmatmul.mubr.bf16.gmra.mrb[252].mxu1 %v2046_v53  ;;  %v6832_v53 = vshll.u32 %v17480_v36, 16  ;;  %v2125_v27 = vrot.slane %v2123_v2, 1 }
 0x21b   :  { %16036 = vmatmul.mubr.bf16.gmra.mrb[252].mxu0 %v6787_v57  ;;  %15455 = vmatprep.mubr.bf16.mxu1 %v2054_v58  ;;  %v2086_v57 = vsel %vm1018_vm0, %v2081_v38, %v2085_v39  ;;  %v2095_v58 = vshrl.u32 %v17479_v33, 16  ;;  %v6844_v33 = vshrl.u32 %v18998_v44, 16  ;;  %v6852_v38 = vshrl.u32 %v17484_v5, 16 }
 0x21c   :  { %16039 = vmatprep.mubr.bf16.mxu0 %v6795_v61  ;;  %v6827_v61 = vsel %vm1018_vm0, %v6822_v42, %v6826_v43  ;;  %v6834_v4 = vrot.slane %v6832_v53, 1  ;;  %v6856_v39 = vshll.u32 %v17486_v15, 16  ;;  %v2109_v42 = vrot.slane %v2107_v20, 1 }
 0x21d   :  { %v18955_v9 = vpop.f32.mrb[148].mxu1  ;;  %v2097_v6 = vor.u32 %v2095_v58, %v2093_v0 }
 0x21e   :  { %v18962_v13 = vpop.f32.mrb[148].mxu0  ;;  %v18964_v14 = vpop.f32.mrb[149].mxu1  ;;  %v6838_v11 = vor.u32 %v6836_v62, %v6834_v4  ;;  %v6835_v26 = vsel %vm1018_vm0, %v6830_v3, %v6834_v4  ;;  %v2113_v44 = vor.u32 %v2111_v34, %v2109_v42  ;;  %v2110_v0 = vsel %vm1018_vm0, %v2105_v40, %v2109_v42  ;;  %v17491_v34 = vld [vmem:[%s20896_s0 + $0x18] sm:$0xff]  }
 0x21f   :  { %v18966_v16 = vpop.f32.mrb[149].mxu0  ;;  %v18968_v17 = vpop.f32.mrb[150].mxu1  ;;  %v2102_v32 = vsel %vm1018_vm0, %v2097_v6, %v2101_v7  ;;  %v6860_v7 = vshrl.u32 %v17486_v15, 16  ;;  %v8490_v35 = vrot.slane %v17491_v34, 1  ;;  %v17502_v34 = vld [vmem:[%s20896_s0 + $0x48] sm:$0xff]  }
 0x220   :  { %v18972_v22 = vpop.f32.mrb[150].mxu0  ;;  %v18974_v23 = vpop.f32.mrb[151].mxu1  ;;  %v6843_v37 = vsel %vm1018_vm0, %v6838_v11, %v6842_v12  ;;  %v2118_v6 = vsel %vm1018_vm0, %v2113_v44, %v2117_v51  ;;  %v6864_v11 = vshll.u32 %v17488_v52, 16  ;;  %v17492_v52 = vld [vmem:[%s20896_s0] sm:$0xff]  }
 0x221   :  { %v18978_v28 = vpop.f32.mrb[151].mxu0 }
 0x222   :  { %15456 = vmatmul.mubr.bf16.gmra.mrb[148].mxu1 %v2062_v18 }
 0x223   :  { %16040 = vmatmul.mubr.bf16.gmra.mrb[148].mxu0 %v6803_v19  ;;  %15459 = vmatprep.mubr.bf16.mxu1 %v2070_v24 }
 0x224   :  { %16043 = vmatprep.mubr.bf16.mxu0 %v6811_v29  ;;  %v6848_v29 = vshll.u32 %v17484_v5, 16 }
 0x225   :  { %v18993_v41 = vpop.f32.mrb[152].mxu1 }
 0x226   :  { %v19000_v45 = vpop.f32.mrb[152].mxu0  ;;  %v19002_v46 = vpop.f32.mrb[153].mxu1  ;;  %v6850_v43 = vrot.slane %v6848_v29, 1 }
 0x227   :  { %v19004_v48 = vpop.f32.mrb[153].mxu0  ;;  %v19006_v49 = vpop.f32.mrb[154].mxu1 }
 0x228   :  { %v19011_v54 = vpop.f32.mrb[154].mxu0  ;;  %v19013_v55 = vpop.f32.mrb[155].mxu1 }
 0x229   :  { %v19018_v60 = vpop.f32.mrb[155].mxu0 }
 0x22a   :  { %15460 = vmatmul.mubr.bf16.gmra.mrb[152].mxu1 %v2078_v50  ;;  %v6846_v50 = vor.u32 %v6844_v33, %v6842_v12 }
 0x22b   :  { %16044 = vmatmul.mubr.bf16.gmra.mrb[152].mxu0 %v6819_v56  ;;  %15463 = vmatprep.mubr.bf16.mxu1 %v2086_v57  ;;  %v6854_v56 = vor.u32 %v6852_v38, %v6850_v43  ;;  %v6858_v57 = vrot.slane %v6856_v39, 1 }
 0x22c   :  { %16047 = vmatprep.mubr.bf16.mxu0 %v6827_v61  ;;  %v8467_v61 = vld [vmem:[%s20896_s0 + $0x10] sm:$0xe]  ;;  %v6851_v5 = vsel %vm1018_vm0, %v6846_v50, %v6850_v43 }
 0x22d   :  { %v19031_v10 = vpop.f32.mrb[156].mxu1  ;;  %v6859_v20 = vsel %vm1018_vm0, %v6854_v56, %v6858_v57  ;;  %v6862_v29 = vor.u32 %v6860_v7, %v6858_v57  ;;  %v17493_v56 = vld [vmem:[%s20896_s0 + $0x20] sm:$0xff]   ;;  %v17497_v7 = vld [vmem:[%s20896_s0 + $0x30] sm:$0xff]  }
 0x22e   :  { %v19036_v18 = vpop.f32.mrb[156].mxu0  ;;  %v19038_v19 = vpop.f32.mrb[157].mxu1  ;;  %v8492_v57 = vrot.slane %v17493_v56, 1  ;;  %v17505_v56 = vld [vmem:[%s20896_s0 + $0x50] sm:$0xff]  }
 0x22f   :  { %v19040_v21 = vpop.f32.mrb[157].mxu0  ;;  %v19042_v24 = vpop.f32.mrb[158].mxu1 }
 0x230   :  { %v19047_v30 = vpop.f32.mrb[158].mxu0  ;;  %v19049_v31 = vpop.f32.mrb[159].mxu1 }
 0x231   :  { %v19053_v36 = vpop.f32.mrb[159].mxu0 }
 0x232   :  { %15464 = vmatmul.mubr.bf16.gmra.mrb[156].mxu1 %v2094_v25  ;;  %v17490_v25 = vld [vmem:[%s20896_s0 + $0x14] sm:$0xf] }
 0x233   :  { %16048 = vmatmul.mubr.bf16.gmra.mrb[156].mxu0 %v6835_v26  ;;  %15467 = vmatprep.mubr.bf16.mxu1 %v2102_v32  ;;  %v13210_v8 = vcombine.low %v8467_v61, %v17490_v25  ;;  %v2121_v26 = vor.u32 %v2119_v1, %v2117_v51  ;;  %v6866_v32 = vrot.slane %v6864_v11, 1  ;;  %v17494_v61 = vld [vmem:[%s20896_s0 + $0x28] sm:$0xff]   ;;  %v8493_v1 = vsel %vm8488_vm1, %v8490_v35, %v8492_v57 }
 0x234   :  { %16051 = vmatprep.mubr.bf16.mxu0 %v6843_v37  ;;  %v8496_v11 = vrot.slane %v17497_v7, 1  ;;  %v17509_v7 = vld [vmem:[%s20896_s0 + $0x60] sm:$0xff]  }
 0x235   :  { %v19062_v53 = vpop.f32.mrb[160].mxu1  ;;  %v8489_v15 = vrot.slane %v13210_v8, 1  ;;  %v2126_v40 = vsel %vm1018_vm0, %v2121_v26, %v2125_v27  ;;  %v6867_v50 = vsel %vm1018_vm0, %v6862_v29, %v6866_v32  ;;  %v17499_v27 = vld [vmem:[%s20896_s0 + $0x18] sm:$0xff]   ;;  %v17500_v29 = vld [vmem:[%s20896_s0 + $0x20] sm:$0xff]  }
 0x236   :  { %v19064_v58 = vpop.f32.mrb[160].mxu0  ;;  %v19066_v59 = vpop.f32.mrb[161].mxu1  ;;  %v17501_v32 = vld [vmem:[%s20896_s0 + $0x40] sm:$0xff]  }
 0x237   :  { %v19071_v62 = vpop.f32.mrb[161].mxu0  ;;  %v19073_v63 = vpop.f32.mrb[162].mxu1  ;;  %v8491_v51 = vsel %vm8488_vm1, %v8489_v15, %v8490_v35  ;;  %v8500_v15 = vrot.slane %v17501_v32, 1  ;;  %v8502_v35 = vrot.slane %v17502_v34, 1  ;;  %v17513_v32 = vld [vmem:[%s20896_s0 + $0x70] sm:$0xff]   ;;  %v17514_v34 = vld [vmem:[%s20896_s0 + $0x78] sm:$0xff]  }
 0x238   :  { %v19076_v3 = vpop.f32.mrb[162].mxu0  ;;  %v19078_v4 = vpop.f32.mrb[163].mxu1 }
 0x239   :  { %v19082_v12 = vpop.f32.mrb[163].mxu0 }
 0x23a   :  { %15468 = vmatmul.mubr.bf16.gmra.mrb[160].mxu1 %v2110_v0  ;;  %v8494_v0 = vrot.slane %v17494_v61, 1  ;;  %v17506_v61 = vld [vmem:[%s20896_s0 + $0x58] sm:$0xff]  }
 0x23b   :  { %16052 = vmatmul.mubr.bf16.gmra.mrb[160].mxu0 %v6851_v5  ;;  %15471 = vmatprep.mubr.bf16.mxu1 %v2118_v6  ;;  %v17495_v5 = vld [vmem:[%s20896_s0 + $0x8] sm:$0xff]   ;;  %v17496_v6 = vld [vmem:[%s20896_s0 + $0x10] sm:$0xff]  }
 0x23c   :  { %16055 = vmatprep.mubr.bf16.mxu0 %v6859_v20  ;;  %v8495_v2 = vsel %vm8488_vm1, %v8492_v57, %v8494_v0  ;;  %v17498_v20 = vld [vmem:[%s20896_s0 + $0x38] sm:$0xff]   ;;  %v8497_v8 = vsel %vm8488_vm1, %v8494_v0, %v8496_v11  ;;  %v8504_v57 = vrot.slane %v17505_v56, 1  ;;  %v8506_v0 = vrot.slane %v17506_v61, 1  ;;  %v17517_v56 = vld [vmem:[%s20896_s0 + $0x80] sm:$0xff]   ;;  %v17518_v61 = vld [vmem:[%s20896_s0 + $0x88] sm:$0xff]  }
 0x23d   :  { %v19088_v33 = vpop.f32.mrb[164].mxu1  ;;  %v8498_v25 = vrot.slane %v17498_v20, 1  ;;  %v17510_v20 = vld [vmem:[%s20896_s0 + $0x68] sm:$0xff]  }
 0x23e   :  { %v19093_v37 = vpop.f32.mrb[164].mxu0  ;;  %v19095_v38 = vpop.f32.mrb[165].mxu1 }
 0x23f   :  { %20899 = vst [vmem:[#allocation2_spill] sm:$0xff] %v19093_v37  ;;  %20900 = vst [vmem:[#allocation3_spill] sm:$0xff] %v19095_v38  ;;  %v19097_v39 = vpop.f32.mrb[165].mxu0  ;;  %v19099_v42 = vpop.f32.mrb[166].mxu1  ;;  %v8499_v26 = vsel %vm8488_vm1, %v8496_v11, %v8498_v25  ;;  %v8508_v11 = vrot.slane %v17509_v7, 1  ;;  %v17521_v7 = vld [vmem:[%s20896_s0 + $0x90] sm:$0xff]  }
 0x240   :  { %20901 = vst [vmem:[#allocation4_spill] sm:$0xff] %v19097_v39  ;;  %20902 = vst [vmem:[#allocation5_spill] sm:$0xff] %v19099_v42  ;;  %v19102_v43 = vpop.f32.mrb[166].mxu0  ;;  %v19104_v47 = vpop.f32.mrb[167].mxu1 }
 0x241   :  { %20903 = vst [vmem:[#allocation6_spill] sm:$0xff] %v19102_v43  ;;  %20904 = vst [vmem:[#allocation7_spill] sm:$0xff] %v19104_v47  ;;  %v19107_v44 = vpop.f32.mrb[167].mxu0 }
 0x242   :  { %20905 = vst [vmem:[#allocation8_spill] sm:$0xff] %v19107_v44  ;;  %15472 = vmatmul.mubr.bf16.gmra.mrb[164].mxu1 %v2126_v40  ;;  %v8501_v40 = vsel %vm8488_vm1, %v8498_v25, %v8500_v15  ;;  %v8510_v25 = vrot.slane %v17510_v20, 1  ;;  %v17522_v20 = vld [vmem:[%s20896_s0 + $0x98] sm:$0xff]  }
 0x243   :  { %16056 = vmatmul.mubr.bf16.gmra.mrb[164].mxu0 %v6867_v50  ;;  %15491 = vmatprep.mubr.bf16.mxu1 %v17492_v52  ;;  %v8503_v50 = vsel %vm8488_vm1, %v8500_v15, %v8502_v35  ;;  %v17504_v52 = vld [vmem:[%s20896_s0 + $0x30] sm:$0xff]   ;;  %v8512_v15 = vrot.slane %v17513_v32, 1  ;;  %v17525_v32 = vld [vmem:[%s20896_s0 + $0xa0] sm:$0xff]  }
 0x244   :  { %16075 = vmatprep.mubr.bf16.mxu0 %v8491_v51  ;;  %v17503_v51 = vld [vmem:[%s20896_s0 + $0x28] sm:$0xff]  }
 0x24a   :  { %15492 = vmatmul.mubr.bf16.vlgmr.msra.gmra.mrb[0].mxu1 %v17495_v5  ;;  %v17507_v5 = vld [vmem:[%s20896_s0 + $0x38] sm:$0xff]  }
 0x24b   :  { %16076 = vmatmul.mubr.bf16.vlgmr.msra.gmra.mrb[0].mxu0 %v8493_v1  ;;  %15495 = vmatprep.mubr.bf16.mxu1 %v17496_v6  ;;  %v8505_v1 = vsel %vm8488_vm1, %v8502_v35, %v8504_v57  ;;  %v17508_v6 = vld [vmem:[%s20896_s0 + $0x40] sm:$0xff]   ;;  %v8514_v35 = vrot.slane %v17514_v34, 1  ;;  %v17526_v34 = vld [vmem:[%s20896_s0 + $0xa8] sm:$0xff]  }
 0x24c   :  { %16079 = vmatprep.mubr.bf16.mxu0 %v8495_v2  ;;  %v8507_v2 = vsel %vm8488_vm1, %v8504_v57, %v8506_v0  ;;  %v8516_v57 = vrot.slane %v17517_v56, 1  ;;  %v17529_v56 = vld [vmem:[%s20896_s0 + $0xb0] sm:$0xff]  }
 0x252   :  { %15496 = vmatmul.mubr.bf16.gmra.mrb[4].mxu1 %v17499_v27  ;;  %v17511_v27 = vld [vmem:[%s20896_s0 + $0x48] sm:$0xff]  }
 0x253   :  { %16080 = vmatmul.mubr.bf16.gmra.mrb[4].mxu0 %v8497_v8  ;;  %15499 = vmatprep.mubr.bf16.mxu1 %v17500_v29  ;;  %v8509_v8 = vsel %vm8488_vm1, %v8506_v0, %v8508_v11  ;;  %v17512_v29 = vld [vmem:[%s20896_s0 + $0x50] sm:$0xff]   ;;  %v8518_v0 = vrot.slane %v17518_v61, 1  ;;  %v17530_v61 = vld [vmem:[%s20896_s0 + $0xb8] sm:$0xff]  }
 0x254   :  { %16083 = vmatprep.mubr.bf16.mxu0 %v8499_v26  ;;  %v8511_v26 = vsel %vm8488_vm1, %v8508_v11, %v8510_v25  ;;  %v8520_v11 = vrot.slane %v17521_v7, 1  ;;  %v17533_v7 = vld [vmem:[%s20896_s0 + $0xc0] sm:$0xff]  }
 0x25a   :  { %15500 = vmatmul.mubr.bf16.gmra.mrb[8].mxu1 %v17503_v51  ;;  %v17515_v51 = vld [vmem:[%s20896_s0 + $0x58] sm:$0xff]  }
 0x25b   :  { %16084 = vmatmul.mubr.bf16.gmra.mrb[8].mxu0 %v8501_v40  ;;  %15503 = vmatprep.mubr.bf16.mxu1 %v17504_v52  ;;  %v8513_v40 = vsel %vm8488_vm1, %v8510_v25, %v8512_v15  ;;  %v17516_v52 = vld [vmem:[%s20896_s0 + $0x60] sm:$0xff]   ;;  %v8522_v25 = vrot.slane %v17522_v20, 1  ;;  %v17534_v20 = vld [vmem:[%s20896_s0 + $0xc8] sm:$0xff]  }
 0x25c   :  { %16087 = vmatprep.mubr.bf16.mxu0 %v8503_v50  ;;  %v8515_v50 = vsel %vm8488_vm1, %v8512_v15, %v8514_v35  ;;  %v8524_v15 = vrot.slane %v17525_v32, 1  ;;  %v17537_v32 = vld [vmem:[%s20896_s0 + $0xd0] sm:$0xff]  }
 0x262   :  { %15504 = vmatmul.mubr.bf16.gmra.mrb[12].mxu1 %v17507_v5  ;;  %v17519_v5 = vld [vmem:[%s20896_s0 + $0x68] sm:$0xff]  }
 0x263   :  { %16088 = vmatmul.mubr.bf16.gmra.mrb[12].mxu0 %v8505_v1  ;;  %15507 = vmatprep.mubr.bf16.mxu1 %v17508_v6  ;;  %v8517_v1 = vsel %vm8488_vm1, %v8514_v35, %v8516_v57  ;;  %v17520_v6 = vld [vmem:[%s20896_s0 + $0x70] sm:$0xff]   ;;  %v8526_v35 = vrot.slane %v17526_v34, 1  ;;  %v17538_v34 = vld [vmem:[%s20896_s0 + $0xd8] sm:$0xff]  }
 0x264   :  { %16091 = vmatprep.mubr.bf16.mxu0 %v8507_v2  ;;  %v8519_v2 = vsel %vm8488_vm1, %v8516_v57, %v8518_v0  ;;  %v8528_v57 = vrot.slane %v17529_v56, 1  ;;  %v17541_v56 = vld [vmem:[%s20896_s0 + $0xe0] sm:$0xff]  }
 0x26a   :  { %15508 = vmatmul.mubr.bf16.gmra.mrb[16].mxu1 %v17511_v27  ;;  %v17523_v27 = vld [vmem:[%s20896_s0 + $0x78] sm:$0xff]  }
 0x26b   :  { %16092 = vmatmul.mubr.bf16.gmra.mrb[16].mxu0 %v8509_v8  ;;  %15511 = vmatprep.mubr.bf16.mxu1 %v17512_v29  ;;  %v8521_v8 = vsel %vm8488_vm1, %v8518_v0, %v8520_v11  ;;  %v17524_v29 = vld [vmem:[%s20896_s0 + $0x80] sm:$0xff]   ;;  %v8530_v0 = vrot.slane %v17530_v61, 1  ;;  %v17542_v61 = vld [vmem:[%s20896_s0 + $0xe8] sm:$0xff]  }
 0x26c   :  { %16095 = vmatprep.mubr.bf16.mxu0 %v8511_v26  ;;  %v8523_v26 = vsel %vm8488_vm1, %v8520_v11, %v8522_v25  ;;  %v8532_v11 = vrot.slane %v17533_v7, 1  ;;  %v17545_v7 = vld [vmem:[%s20896_s0 + $0xf0] sm:$0xff]  }
 0x272   :  { %15512 = vmatmul.mubr.bf16.gmra.mrb[20].mxu1 %v17515_v51  ;;  %v17527_v51 = vld [vmem:[%s20896_s0 + $0x88] sm:$0xff]  }
 0x273   :  { %16096 = vmatmul.mubr.bf16.gmra.mrb[20].mxu0 %v8513_v40  ;;  %15515 = vmatprep.mubr.bf16.mxu1 %v17516_v52  ;;  %v8525_v40 = vsel %vm8488_vm1, %v8522_v25, %v8524_v15  ;;  %v17528_v52 = vld [vmem:[%s20896_s0 + $0x90] sm:$0xff]   ;;  %v8534_v25 = vrot.slane %v17534_v20, 1  ;;  %v17546_v20 = vld [vmem:[%s20896_s0 + $0xf8] sm:$0xff]  }
 0x274   :  { %16099 = vmatprep.mubr.bf16.mxu0 %v8515_v50  ;;  %v8527_v50 = vsel %vm8488_vm1, %v8524_v15, %v8526_v35  ;;  %v8536_v15 = vrot.slane %v17537_v32, 1  ;;  %v17549_v32 = vld [vmem:[%s20896_s0 + $0x100] sm:$0xff]  }
 0x27a   :  { %15516 = vmatmul.mubr.bf16.gmra.mrb[24].mxu1 %v17519_v5  ;;  %v17531_v5 = vld [vmem:[%s20896_s0 + $0x98] sm:$0xff]  }
 0x27b   :  { %16100 = vmatmul.mubr.bf16.gmra.mrb[24].mxu0 %v8517_v1  ;;  %15519 = vmatprep.mubr.bf16.mxu1 %v17520_v6  ;;  %v8529_v1 = vsel %vm8488_vm1, %v8526_v35, %v8528_v57  ;;  %v17532_v6 = vld [vmem:[%s20896_s0 + $0xa0] sm:$0xff]   ;;  %v8538_v35 = vrot.slane %v17538_v34, 1  ;;  %v17550_v34 = vld [vmem:[%s20896_s0 + $0x108] sm:$0xff]  }
 0x27c   :  { %16103 = vmatprep.mubr.bf16.mxu0 %v8519_v2  ;;  %v8531_v2 = vsel %vm8488_vm1, %v8528_v57, %v8530_v0  ;;  %v8540_v57 = vrot.slane %v17541_v56, 1  ;;  %v17553_v56 = vld [vmem:[%s20896_s0 + $0x110] sm:$0xff]  }
 0x282   :  { %15520 = vmatmul.mubr.bf16.gmra.mrb[28].mxu1 %v17523_v27  ;;  %v17535_v27 = vld [vmem:[%s20896_s0 + $0xa8] sm:$0xff]  }
 0x283   :  { %16104 = vmatmul.mubr.bf16.gmra.mrb[28].mxu0 %v8521_v8  ;;  %15523 = vmatprep.mubr.bf16.mxu1 %v17524_v29  ;;  %v8533_v8 = vsel %vm8488_vm1, %v8530_v0, %v8532_v11  ;;  %v17536_v29 = vld [vmem:[%s20896_s0 + $0xb0] sm:$0xff]   ;;  %v8542_v0 = vrot.slane %v17542_v61, 1  ;;  %v17554_v61 = vld [vmem:[%s20896_s0 + $0x118] sm:$0xff]  }
 0x284   :  { %16107 = vmatprep.mubr.bf16.mxu0 %v8523_v26  ;;  %v8535_v26 = vsel %vm8488_vm1, %v8532_v11, %v8534_v25  ;;  %v8544_v11 = vrot.slane %v17545_v7, 1  ;;  %v17557_v7 = vld [vmem:[%s20896_s0 + $0x120] sm:$0xff]  }
 0x28a   :  { %15524 = vmatmul.mubr.bf16.gmra.mrb[32].mxu1 %v17527_v51  ;;  %v17539_v51 = vld [vmem:[%s20896_s0 + $0xb8] sm:$0xff]  }
 0x28b   :  { %16108 = vmatmul.mubr.bf16.gmra.mrb[32].mxu0 %v8525_v40  ;;  %15527 = vmatprep.mubr.bf16.mxu1 %v17528_v52  ;;  %v8537_v40 = vsel %vm8488_vm1, %v8534_v25, %v8536_v15  ;;  %v17540_v52 = vld [vmem:[%s20896_s0 + $0xc0] sm:$0xff]   ;;  %v8546_v25 = vrot.slane %v17546_v20, 1  ;;  %v17558_v20 = vld [vmem:[%s20896_s0 + $0x128] sm:$0xff]  }
 0x28c   :  { %16111 = vmatprep.mubr.bf16.mxu0 %v8527_v50  ;;  %v8539_v50 = vsel %vm8488_vm1, %v8536_v15, %v8538_v35  ;;  %v8548_v15 = vrot.slane %v17549_v32, 1  ;;  %v17561_v32 = vld [vmem:[%s20896_s0 + $0x130] sm:$0xff]  }
 0x292   :  { %15528 = vmatmul.mubr.bf16.gmra.mrb[36].mxu1 %v17531_v5  ;;  %v17543_v5 = vld [vmem:[%s20896_s0 + $0xc8] sm:$0xff]  }
 0x293   :  { %16112 = vmatmul.mubr.bf16.gmra.mrb[36].mxu0 %v8529_v1  ;;  %15531 = vmatprep.mubr.bf16.mxu1 %v17532_v6  ;;  %v8541_v1 = vsel %vm8488_vm1, %v8538_v35, %v8540_v57  ;;  %v17544_v6 = vld [vmem:[%s20896_s0 + $0xd0] sm:$0xff]   ;;  %v8550_v35 = vrot.slane %v17550_v34, 1  ;;  %v17562_v34 = vld [vmem:[%s20896_s0 + $0x138] sm:$0xff]  }
 0x294   :  { %16115 = vmatprep.mubr.bf16.mxu0 %v8531_v2  ;;  %v8543_v2 = vsel %vm8488_vm1, %v8540_v57, %v8542_v0  ;;  %v8552_v57 = vrot.slane %v17553_v56, 1  ;;  %v17565_v56 = vld [vmem:[%s20896_s0 + $0x140] sm:$0xff]  }
 0x29a   :  { %15532 = vmatmul.mubr.bf16.gmra.mrb[40].mxu1 %v17535_v27  ;;  %v17547_v27 = vld [vmem:[%s20896_s0 + $0xd8] sm:$0xff]  }
 0x29b   :  { %16116 = vmatmul.mubr.bf16.gmra.mrb[40].mxu0 %v8533_v8  ;;  %15535 = vmatprep.mubr.bf16.mxu1 %v17536_v29  ;;  %v8545_v8 = vsel %vm8488_vm1, %v8542_v0, %v8544_v11  ;;  %v17548_v29 = vld [vmem:[%s20896_s0 + $0xe0] sm:$0xff]   ;;  %v8554_v0 = vrot.slane %v17554_v61, 1  ;;  %v17566_v61 = vld [vmem:[%s20896_s0 + $0x148] sm:$0xff]  }
 0x29c   :  { %16119 = vmatprep.mubr.bf16.mxu0 %v8535_v26  ;;  %v8547_v26 = vsel %vm8488_vm1, %v8544_v11, %v8546_v25  ;;  %v8556_v11 = vrot.slane %v17557_v7, 1  ;;  %v17569_v7 = vld [vmem:[%s20896_s0 + $0x150] sm:$0xff]  }
 0x2a2   :  { %15536 = vmatmul.mubr.bf16.gmra.mrb[44].mxu1 %v17539_v51  ;;  %v17551_v51 = vld [vmem:[%s20896_s0 + $0xe8] sm:$0xff]  }
 0x2a3   :  { %16120 = vmatmul.mubr.bf16.gmra.mrb[44].mxu0 %v8537_v40  ;;  %15539 = vmatprep.mubr.bf16.mxu1 %v17540_v52  ;;  %v8549_v40 = vsel %vm8488_vm1, %v8546_v25, %v8548_v15  ;;  %v17552_v52 = vld [vmem:[%s20896_s0 + $0xf0] sm:$0xff]   ;;  %v8558_v25 = vrot.slane %v17558_v20, 1  ;;  %v17570_v20 = vld [vmem:[%s20896_s0 + $0x158] sm:$0xff]  }
 0x2a4   :  { %16123 = vmatprep.mubr.bf16.mxu0 %v8539_v50  ;;  %v8551_v50 = vsel %vm8488_vm1, %v8548_v15, %v8550_v35  ;;  %v8560_v15 = vrot.slane %v17561_v32, 1  ;;  %v17573_v32 = vld [vmem:[%s20896_s0 + $0x160] sm:$0xff]  }
 0x2aa   :  { %15540 = vmatmul.mubr.bf16.gmra.mrb[48].mxu1 %v17543_v5  ;;  %v17555_v5 = vld [vmem:[%s20896_s0 + $0xf8] sm:$0xff]  }
 0x2ab   :  { %16124 = vmatmul.mubr.bf16.gmra.mrb[48].mxu0 %v8541_v1  ;;  %15543 = vmatprep.mubr.bf16.mxu1 %v17544_v6  ;;  %v8553_v1 = vsel %vm8488_vm1, %v8550_v35, %v8552_v57  ;;  %v17556_v6 = vld [vmem:[%s20896_s0 + $0x100] sm:$0xff]   ;;  %v8562_v35 = vrot.slane %v17562_v34, 1  ;;  %v17574_v34 = vld [vmem:[%s20896_s0 + $0x168] sm:$0xff]  }
 0x2ac   :  { %16127 = vmatprep.mubr.bf16.mxu0 %v8543_v2  ;;  %v8555_v2 = vsel %vm8488_vm1, %v8552_v57, %v8554_v0  ;;  %v8564_v57 = vrot.slane %v17565_v56, 1  ;;  %v17577_v56 = vld [vmem:[%s20896_s0 + $0x170] sm:$0xff]  }
 0x2b2   :  { %15544 = vmatmul.mubr.bf16.gmra.mrb[52].mxu1 %v17547_v27  ;;  %v17559_v27 = vld [vmem:[%s20896_s0 + $0x108] sm:$0xff]  }
 0x2b3   :  { %16128 = vmatmul.mubr.bf16.gmra.mrb[52].mxu0 %v8545_v8  ;;  %15547 = vmatprep.mubr.bf16.mxu1 %v17548_v29  ;;  %v8557_v8 = vsel %vm8488_vm1, %v8554_v0, %v8556_v11  ;;  %v17560_v29 = vld [vmem:[%s20896_s0 + $0x110] sm:$0xff]   ;;  %v8566_v0 = vrot.slane %v17566_v61, 1  ;;  %v17578_v61 = vld [vmem:[%s20896_s0 + $0x178] sm:$0xff]  }
 0x2b4   :  { %16131 = vmatprep.mubr.bf16.mxu0 %v8547_v26  ;;  %v8559_v26 = vsel %vm8488_vm1, %v8556_v11, %v8558_v25  ;;  %v8568_v11 = vrot.slane %v17569_v7, 1  ;;  %v17581_v7 = vld [vmem:[%s20896_s0 + $0x180] sm:$0xff]  }
 0x2ba   :  { %15548 = vmatmul.mubr.bf16.gmra.mrb[56].mxu1 %v17551_v51  ;;  %v17563_v51 = vld [vmem:[%s20896_s0 + $0x118] sm:$0xff]  }
 0x2bb   :  { %16132 = vmatmul.mubr.bf16.gmra.mrb[56].mxu0 %v8549_v40  ;;  %15551 = vmatprep.mubr.bf16.mxu1 %v17552_v52  ;;  %v8561_v40 = vsel %vm8488_vm1, %v8558_v25, %v8560_v15  ;;  %v17564_v52 = vld [vmem:[%s20896_s0 + $0x120] sm:$0xff]   ;;  %v8570_v25 = vrot.slane %v17570_v20, 1  ;;  %v17582_v20 = vld [vmem:[%s20896_s0 + $0x188] sm:$0xff]  }
 0x2bc   :  { %16135 = vmatprep.mubr.bf16.mxu0 %v8551_v50  ;;  %v8563_v50 = vsel %vm8488_vm1, %v8560_v15, %v8562_v35  ;;  %v8572_v15 = vrot.slane %v17573_v32, 1  ;;  %v17585_v32 = vld [vmem:[%s20896_s0 + $0x190] sm:$0xff]  }
 0x2c2   :  { %15552 = vmatmul.mubr.bf16.gmra.mrb[60].mxu1 %v17555_v5  ;;  %v17567_v5 = vld [vmem:[%s20896_s0 + $0x128] sm:$0xff]  }
 0x2c3   :  { %16136 = vmatmul.mubr.bf16.gmra.mrb[60].mxu0 %v8553_v1  ;;  %15555 = vmatprep.mubr.bf16.mxu1 %v17556_v6  ;;  %v8565_v1 = vsel %vm8488_vm1, %v8562_v35, %v8564_v57  ;;  %v17568_v6 = vld [vmem:[%s20896_s0 + $0x130] sm:$0xff]   ;;  %v8574_v35 = vrot.slane %v17574_v34, 1  ;;  %v17586_v34 = vld [vmem:[%s20896_s0 + $0x198] sm:$0xff]  }
 0x2c4   :  { %16139 = vmatprep.mubr.bf16.mxu0 %v8555_v2  ;;  %v8567_v2 = vsel %vm8488_vm1, %v8564_v57, %v8566_v0  ;;  %v8576_v57 = vrot.slane %v17577_v56, 1  ;;  %v17589_v56 = vld [vmem:[%s20896_s0 + $0x1a0] sm:$0xff]  }
 0x2ca   :  { %15556 = vmatmul.mubr.bf16.gmra.mrb[64].mxu1 %v17559_v27  ;;  %v17571_v27 = vld [vmem:[%s20896_s0 + $0x138] sm:$0xff]  }
 0x2cb   :  { %16140 = vmatmul.mubr.bf16.gmra.mrb[64].mxu0 %v8557_v8  ;;  %15559 = vmatprep.mubr.bf16.mxu1 %v17560_v29  ;;  %v8569_v8 = vsel %vm8488_vm1, %v8566_v0, %v8568_v11  ;;  %v17572_v29 = vld [vmem:[%s20896_s0 + $0x140] sm:$0xff]   ;;  %v8578_v0 = vrot.slane %v17578_v61, 1  ;;  %v17590_v61 = vld [vmem:[%s20896_s0 + $0x1a8] sm:$0xff]  }
 0x2cc   :  { %16143 = vmatprep.mubr.bf16.mxu0 %v8559_v26  ;;  %v8571_v26 = vsel %vm8488_vm1, %v8568_v11, %v8570_v25  ;;  %v8580_v11 = vrot.slane %v17581_v7, 1  ;;  %v17593_v7 = vld [vmem:[%s20896_s0 + $0x1b0] sm:$0xff]  }
 0x2d2   :  { %15560 = vmatmul.mubr.bf16.gmra.mrb[68].mxu1 %v17563_v51  ;;  %v17575_v51 = vld [vmem:[%s20896_s0 + $0x148] sm:$0xff]  }
 0x2d3   :  { %16144 = vmatmul.mubr.bf16.gmra.mrb[68].mxu0 %v8561_v40  ;;  %15563 = vmatprep.mubr.bf16.mxu1 %v17564_v52  ;;  %v8573_v40 = vsel %vm8488_vm1, %v8570_v25, %v8572_v15  ;;  %v17576_v52 = vld [vmem:[%s20896_s0 + $0x150] sm:$0xff]   ;;  %v8582_v25 = vrot.slane %v17582_v20, 1  ;;  %v17594_v20 = vld [vmem:[%s20896_s0 + $0x1b8] sm:$0xff]  }
 0x2d4   :  { %16147 = vmatprep.mubr.bf16.mxu0 %v8563_v50  ;;  %v8575_v50 = vsel %vm8488_vm1, %v8572_v15, %v8574_v35  ;;  %v8584_v15 = vrot.slane %v17585_v32, 1  ;;  %v17597_v32 = vld [vmem:[%s20896_s0 + $0x1c0] sm:$0xff]  }
 0x2da   :  { %15564 = vmatmul.mubr.bf16.gmra.mrb[72].mxu1 %v17567_v5  ;;  %v17579_v5 = vld [vmem:[%s20896_s0 + $0x158] sm:$0xff]  }
 0x2db   :  { %16148 = vmatmul.mubr.bf16.gmra.mrb[72].mxu0 %v8565_v1  ;;  %15567 = vmatprep.mubr.bf16.mxu1 %v17568_v6  ;;  %v8577_v1 = vsel %vm8488_vm1, %v8574_v35, %v8576_v57  ;;  %v17580_v6 = vld [vmem:[%s20896_s0 + $0x160] sm:$0xff]   ;;  %v8586_v35 = vrot.slane %v17586_v34, 1  ;;  %v17598_v34 = vld [vmem:[%s20896_s0 + $0x1c8] sm:$0xff]  }
 0x2dc   :  { %16151 = vmatprep.mubr.bf16.mxu0 %v8567_v2  ;;  %v8579_v2 = vsel %vm8488_vm1, %v8576_v57, %v8578_v0  ;;  %v8588_v57 = vrot.slane %v17589_v56, 1  ;;  %v17601_v56 = vld [vmem:[%s20896_s0 + $0x1d0] sm:$0xff]  }
 0x2e2   :  { %15568 = vmatmul.mubr.bf16.gmra.mrb[76].mxu1 %v17571_v27  ;;  %v17583_v27 = vld [vmem:[%s20896_s0 + $0x168] sm:$0xff]  }
 0x2e3   :  { %16152 = vmatmul.mubr.bf16.gmra.mrb[76].mxu0 %v8569_v8  ;;  %15571 = vmatprep.mubr.bf16.mxu1 %v17572_v29  ;;  %v8581_v8 = vsel %vm8488_vm1, %v8578_v0, %v8580_v11  ;;  %v17584_v29 = vld [vmem:[%s20896_s0 + $0x170] sm:$0xff]   ;;  %v8590_v0 = vrot.slane %v17590_v61, 1 }
 0x2e4   :  { %16155 = vmatprep.mubr.bf16.mxu0 %v8571_v26  ;;  %v8583_v26 = vsel %vm8488_vm1, %v8580_v11, %v8582_v25  ;;  %v8592_v11 = vrot.slane %v17593_v7, 1 }
 0x2ea   :  { %15572 = vmatmul.mubr.bf16.gmra.mrb[80].mxu1 %v17575_v51  ;;  %v17587_v51 = vld [vmem:[%s20896_s0 + $0x178] sm:$0xff]  }
 0x2eb   :  { %16156 = vmatmul.mubr.bf16.gmra.mrb[80].mxu0 %v8573_v40  ;;  %15575 = vmatprep.mubr.bf16.mxu1 %v17576_v52  ;;  %v8585_v40 = vsel %vm8488_vm1, %v8582_v25, %v8584_v15  ;;  %v17588_v52 = vld [vmem:[%s20896_s0 + $0x180] sm:$0xff]   ;;  %v8594_v25 = vrot.slane %v17594_v20, 1 }
 0x2ec   :  { %16159 = vmatprep.mubr.bf16.mxu0 %v8575_v50  ;;  %v8587_v50 = vsel %vm8488_vm1, %v8584_v15, %v8586_v35  ;;  %v8596_v15 = vrot.slane %v17597_v32, 1 }
 0x2f2   :  { %15576 = vmatmul.mubr.bf16.gmra.mrb[84].mxu1 %v17579_v5  ;;  %v17591_v5 = vld [vmem:[%s20896_s0 + $0x188] sm:$0xff]  }
 0x2f3   :  { %16160 = vmatmul.mubr.bf16.gmra.mrb[84].mxu0 %v8577_v1  ;;  %15579 = vmatprep.mubr.bf16.mxu1 %v17580_v6  ;;  %v8589_v1 = vsel %vm8488_vm1, %v8586_v35, %v8588_v57  ;;  %v17592_v6 = vld [vmem:[%s20896_s0 + $0x190] sm:$0xff]   ;;  %v8598_v35 = vrot.slane %v17598_v34, 1 }
 0x2f4   :  { %16163 = vmatprep.mubr.bf16.mxu0 %v8579_v2  ;;  %v8591_v2 = vsel %vm8488_vm1, %v8588_v57, %v8590_v0  ;;  %v8600_v57 = vrot.slane %v17601_v56, 1 }
 0x2fa   :  { %15580 = vmatmul.mubr.bf16.gmra.mrb[88].mxu1 %v17583_v27  ;;  %v17595_v27 = vld [vmem:[%s20896_s0 + $0x198] sm:$0xff]  }
 0x2fb   :  { %16164 = vmatmul.mubr.bf16.gmra.mrb[88].mxu0 %v8581_v8  ;;  %15583 = vmatprep.mubr.bf16.mxu1 %v17584_v29  ;;  %v8593_v8 = vsel %vm8488_vm1, %v8590_v0, %v8592_v11  ;;  %v17596_v29 = vld [vmem:[%s20896_s0 + $0x1a0] sm:$0xff]   ;;  %v17602_v0 = vld [vmem:[%s20896_s0 + $0x1d8] sm:$0xff]  }
 0x2fc   :  { %16167 = vmatprep.mubr.bf16.mxu0 %v8583_v26  ;;  %v8595_v26 = vsel %vm8488_vm1, %v8592_v11, %v8594_v25 }
 0x302   :  { %15584 = vmatmul.mubr.bf16.gmra.mrb[92].mxu1 %v17587_v51  ;;  %v17599_v51 = vld [vmem:[%s20896_s0 + $0x1a8] sm:$0xff]  }
 0x303   :  { %16168 = vmatmul.mubr.bf16.gmra.mrb[92].mxu0 %v8585_v40  ;;  %15587 = vmatprep.mubr.bf16.mxu1 %v17588_v52  ;;  %v8597_v40 = vsel %vm8488_vm1, %v8594_v25, %v8596_v15  ;;  %v17600_v52 = vld [vmem:[%s20896_s0 + $0x1b0] sm:$0xff]  }
 0x304   :  { %16171 = vmatprep.mubr.bf16.mxu0 %v8587_v50  ;;  %v8599_v50 = vsel %vm8488_vm1, %v8596_v15, %v8598_v35 }
 0x30a   :  { %15588 = vmatmul.mubr.bf16.gmra.mrb[96].mxu1 %v17591_v5  ;;  %v19500_v5 = vld [vmem:[%s20897_s2] ss:$0 sm:$0xff] }
 0x30b   :  { %16172 = vmatmul.mubr.bf16.gmra.mrb[96].mxu0 %v8589_v1  ;;  %15591 = vmatprep.mubr.bf16.mxu1 %v17592_v6  ;;  %v8602_v1 = vrot.slane %v17602_v0, 1 }
 0x30c   :  { %16175 = vmatprep.mubr.bf16.mxu0 %v8591_v2 }
 0x30d   :  { %v8603_v34 = vsel %vm8488_vm1, %v8600_v57, %v8602_v1 }
 0x312   :  { %15592 = vmatmul.mubr.bf16.gmra.mrb[100].mxu1 %v17595_v27  ;;  %v8601_v27 = vsel %vm8488_vm1, %v8598_v35, %v8600_v57  ;;  %v17604_v35 = vld [vmem:[%s20896_s0 + $0x1c0] sm:$0xff]  }
 0x313   :  { %16176 = vmatmul.mubr.bf16.gmra.mrb[100].mxu0 %v8593_v8  ;;  %15595 = vmatprep.mubr.bf16.mxu1 %v17596_v29  ;;  %v17605_v57 = vld [vmem:[%s20896_s0 + $0x1e0] sm:$0xff]  }
 0x314   :  { %16179 = vmatprep.mubr.bf16.mxu0 %v8595_v26 }
 0x31a   :  { %15596 = vmatmul.mubr.bf16.gmra.mrb[104].mxu1 %v17599_v51  ;;  %v17603_v51 = vld [vmem:[%s20896_s0 + $0x1b8] sm:$0xff]  }
 0x31b   :  { %16180 = vmatmul.mubr.bf16.gmra.mrb[104].mxu0 %v8597_v40  ;;  %15599 = vmatprep.mubr.bf16.mxu1 %v17600_v52 }
 0x31c   :  { %16183 = vmatprep.mubr.bf16.mxu0 %v8599_v50 }
 0x31d   :  { %v15493_v61 = vpop.f32.mrb[0].mxu1 }
 0x31e   :  { %v16077_v2 = vpop.f32.mrb[0].mxu0  ;;  %v3670_v6 = vpop.f32.mrb[1].mxu1 }
 0x31f   :  { %v16351_v7 = vadd.f32 %v16077_v2, %v15493_v61  ;;  %v8986_v11 = vpop.f32.mrb[1].mxu0  ;;  %v15494_v20 = vpop.f32.mrb[2].mxu1  ;;  %v8604_v61 = vrot.slane %v17605_v57, 1 }
 0x320   :  { %v16352_v25 = vadd.f32 %v8986_v11, %v3670_v6  ;;  %v16078_v8 = vpop.f32.mrb[2].mxu0  ;;  %v3673_v26 = vpop.f32.mrb[3].mxu1  ;;  %v17606_v11 = vld [vmem:[%s20896_s0 + $0x1e8] sm:$0xff]  }
 0x321   :  { %v10374_v29 = vadd.f32 %v16351_v7, %v19500_v5  ;;  %v16353_v32 = vadd.f32 %v16078_v8, %v15494_v20  ;;  %v8989_v15 = vpop.f32.mrb[3].mxu0  ;;  %v8606_v20 = vrot.slane %v17606_v11, 1 }
 0x322   :  { %v10372_v40 = vadd.f32 %v16352_v25, %v19500_v5  ;;  %v16354_v50 = vadd.f32 %v8989_v15, %v3673_v26  ;;  %15600 = vmatmul.mubr.bf16.gmra.mrb[108].mxu1 %v17603_v51 }
 0x323   :  { %v10926_v52 = vmul.f32 0.2, %v10374_v29  ;;  %v10375_v56 = vadd.f32 %v16353_v32, %v19500_v5  ;;  %16184 = vmatmul.mubr.bf16.gmra.mrb[108].mxu0 %v8601_v27  ;;  %15603 = vmatprep.mubr.bf16.mxu1 %v17604_v35  ;;  %vm10650_vm2 = vcmp.ge.f32.partialorder %v10374_v29, 0.0 }
 0x324   :  { %v10924_v0 = vmul.f32 0.2, %v10372_v40  ;;  %v10373_v2 = vadd.f32 %v16354_v50, %v19500_v5  ;;  %16187 = vmatprep.mubr.bf16.mxu0 %v8603_v34  ;;  %vm10648_vm3 = vcmp.ge.f32.partialorder %v10372_v40, 0.0  ;;  %v8605_v34 = vsel %vm8488_vm1, %v8602_v1, %v8604_v61 }
 0x325   :  { %vm10651_vm4 = vcmp.ge.f32.partialorder %v10375_v56, 0.0  ;;  %v10927_v6 = vmul.f32 0.2, %v10375_v56  ;;  %v15497_v7 = vpop.f32.mrb[4].mxu1  ;;  %v11202_v27 = vsel %vm10650_vm2, %v10374_v29, %v10926_v52  ;;  %v8607_v29 = vsel %vm8488_vm1, %v8604_v61, %v8606_v20 }
 0x326   :  { %vm10649_vm5 = vcmp.ge.f32.partialorder %v10373_v2, 0.0  ;;  %v10925_v25 = vmul.f32 0.2, %v10373_v2  ;;  %v16081_v8 = vpop.f32.mrb[4].mxu0  ;;  %v3686_v26 = vpop.f32.mrb[5].mxu1  ;;  %v11200_v50 = vsel %vm10648_vm3, %v10372_v40, %v10924_v0  ;;  %v17607_v40 = vld [vmem:[%s20896_s0 + $0x1c8] sm:$0xff]  }
 0x327   :  { %v11203_v32 = vsel %vm10651_vm4, %v10375_v56, %v10927_v6  ;;  %v16355_v15 = vadd.f32 %v16081_v8, %v15497_v7  ;;  %v9002_v51 = vpop.f32.mrb[5].mxu0  ;;  %v15498_v35 = vpop.f32.mrb[6].mxu1  ;;  %v17608_v56 = vld [vmem:[%s20896_s0 + $0x1d0] sm:$0xff]   ;;  %v17610_v0 = vld [vmem:[%s20896_s0 + $0x1f8] sm:$0xff]  }
 0x328   :  { %v13780_v57 = vpack.c.bf16 %v11203_v32, %v11202_v27  ;;  %v11201_v44 = vsel %vm10649_vm5, %v10373_v2, %v10925_v25  ;;  %v16356_v47 = vadd.f32 %v9002_v51, %v3686_v26  ;;  %v16082_v43 = vpop.f32.mrb[6].mxu0  ;;  %v3689_v39 = vpop.f32.mrb[7].mxu1  ;;  %v8610_v2 = vrot.slane %v17610_v0, 1 }
 0x329   :  { %v13775_v42 = vpack.c.bf16 %v11201_v44, %v11200_v50  ;;  %v10378_v11 = vadd.f32 %v16355_v15, %v19500_v5  ;;  %v16357_v37 = vadd.f32 %v16082_v43, %v15498_v35  ;;  %v9005_v38 = vpop.f32.mrb[7].mxu0 }
 0x32a   :  { %14462 = vst [vmem:[%s20898_s3 + $0x8] sm:$0xff] %v13780_v57   ;;  %v10376_v1 = vadd.f32 %v16356_v47, %v19500_v5  ;;  %v16358_v52 = vadd.f32 %v9005_v38, %v3689_v39  ;;  %15604 = vmatmul.mubr.bf16.gmra.mrb[112].mxu1 %v17607_v40  ;;  %v17609_v38 = vld [vmem:[%s20896_s0 + $0x1f0] sm:$0xff]  }
 0x32b   :  { %13776 = vst [vmem:[%s20898_s3] sm:$0xff] %v13775_v42   ;;  %v10930_v43 = vmul.f32 0.2, %v10378_v11  ;;  %v10379_v44 = vadd.f32 %v16357_v37, %v19500_v5  ;;  %16188 = vmatmul.mubr.bf16.gmra.mrb[112].mxu0 %v8605_v34  ;;  %15607 = vmatprep.mubr.bf16.mxu1 %v17608_v56  ;;  %v8608_v39 = vrot.slane %v17609_v38, 1  ;;  %vm10654_vm6 = vcmp.ge.f32.partialorder %v10378_v11, 0.0 }
 0x32c   :  { %v10928_v47 = vmul.f32 0.2, %v10376_v1  ;;  %v10377_v61 = vadd.f32 %v16358_v52, %v19500_v5  ;;  %16191 = vmatprep.mubr.bf16.mxu0 %v8607_v29  ;;  %vm10652_vm7 = vcmp.ge.f32.partialorder %v10376_v1, 0.0 }
 0x32d   :  { %vm10655_vm8 = vcmp.ge.f32.partialorder %v10379_v44, 0.0  ;;  %v10931_v42 = vmul.f32 0.2, %v10379_v44  ;;  %v15501_v37 = vpop.f32.mrb[8].mxu1  ;;  %v11206_v8 = vsel %vm10654_vm6, %v10378_v11, %v10930_v43  ;;  %v8609_v51 = vsel %vm8488_vm1, %v8606_v20, %v8608_v39 }
 0x32e   :  { %vm10653_vm9 = vcmp.ge.f32.partialorder %v10377_v61, 0.0  ;;  %v10929_v6 = vmul.f32 0.2, %v10377_v61  ;;  %v16085_v7 = vpop.f32.mrb[8].mxu0  ;;  %v3702_v25 = vpop.f32.mrb[9].mxu1  ;;  %v11204_v35 = vsel %vm10652_vm7, %v10376_v1, %v10928_v47  ;;  %v8611_v11 = vsel %vm8488_vm1, %v8608_v39, %v8610_v2  ;;  %v17611_v1 = vld [vmem:[%s20896_s0 + $0x1d8] sm:$0xff]  }
 0x32f   :  { %v11207_v26 = vsel %vm10655_vm8, %v10379_v44, %v10931_v42  ;;  %v16359_v27 = vadd.f32 %v16085_v7, %v15501_v37  ;;  %v9018_v32 = vpop.f32.mrb[9].mxu0  ;;  %v15502_v15 = vpop.f32.mrb[10].mxu1  ;;  %v17612_v39 = vld [vmem:[%s20896_s0 + $0x1e0] sm:$0xff]  }
 0x330   :  { %v13790_v34 = vpack.c.bf16 %v11207_v26, %v11206_v8  ;;  %v11205_v50 = vsel %vm10653_vm9, %v10377_v61, %v10929_v6  ;;  %v16360_v57 = vadd.f32 %v9018_v32, %v3702_v25  ;;  %v16086_v29 = vpop.f32.mrb[10].mxu0  ;;  %v3705_v52 = vpop.f32.mrb[11].mxu1  ;;  %v17613_v61 = vld [vmem:[%s20896_s0 + $0x200] sm:$0xff]   ;;  %v17614_v8 = vld [vmem:[%s20896_s0 + $0x208] sm:$0xff]  }
 0x331   :  { %v13785_v40 = vpack.c.bf16 %v11205_v50, %v11204_v35  ;;  %v10382_v56 = vadd.f32 %v16359_v27, %v19500_v5  ;;  %v16361_v38 = vadd.f32 %v16086_v29, %v15502_v15  ;;  %v9021_v0 = vpop.f32.mrb[11].mxu0  ;;  %v8612_v42 = vrot.slane %v17613_v61, 1 }
 0x332   :  { %14464 = vst [vmem:[%s20898_s3 + $0x18] sm:$0xff] %v13790_v34   ;;  %v10380_v20 = vadd.f32 %v16360_v57, %v19500_v5  ;;  %v16362_v43 = vadd.f32 %v9021_v0, %v3705_v52  ;;  %15608 = vmatmul.mubr.bf16.gmra.mrb[116].mxu1 %v17611_v1  ;;  %v8614_v26 = vrot.slane %v17614_v8, 1 }
 0x333   :  { %14463 = vst [vmem:[%s20898_s3 + $0x10] sm:$0xff] %v13785_v40   ;;  %v10934_v44 = vmul.f32 0.2, %v10382_v56  ;;  %v10383_v47 = vadd.f32 %v16361_v38, %v19500_v5  ;;  %16192 = vmatmul.mubr.bf16.gmra.mrb[116].mxu0 %v8609_v51  ;;  %15611 = vmatprep.mubr.bf16.mxu1 %v17612_v39  ;;  %vm10658_vm10 = vcmp.ge.f32.partialorder %v10382_v56, 0.0  ;;  %v8613_v29 = vsel %vm8488_vm1, %v8610_v2, %v8612_v42 }
 0x334   :  { %v10932_v37 = vmul.f32 0.2, %v10380_v20  ;;  %v10381_v6 = vadd.f32 %v16362_v43, %v19500_v5  ;;  %16195 = vmatprep.mubr.bf16.mxu0 %v8611_v11  ;;  %vm10656_vm11 = vcmp.ge.f32.partialorder %v10380_v20, 0.0 }
 0x335   :  { %vm10659_vm12 = vcmp.ge.f32.partialorder %v10383_v47, 0.0  ;;  %v10935_v7 = vmul.f32 0.2, %v10383_v47  ;;  %v15505_v25 = vpop.f32.mrb[12].mxu1  ;;  %v11210_v51 = vsel %vm10658_vm10, %v10382_v56, %v10934_v44  ;;  %v8615_v56 = vsel %vm8488_vm1, %v8612_v42, %v8614_v26  ;;  %v17616_v42 = vld [vmem:[%s20896_s0 + $0x1f0] sm:$0xff]  }
 0x336   :  { %vm10657_vm13 = vcmp.ge.f32.partialorder %v10381_v6, 0.0  ;;  %v10933_v27 = vmul.f32 0.2, %v10381_v6  ;;  %v16089_v32 = vpop.f32.mrb[12].mxu0  ;;  %v3718_v15 = vpop.f32.mrb[13].mxu1  ;;  %v11208_v52 = vsel %vm10656_vm11, %v10380_v20, %v10932_v37  ;;  %v17615_v20 = vld [vmem:[%s20896_s0 + $0x1e8] sm:$0xff]  }
 0x337   :  { %v11211_v35 = vsel %vm10659_vm12, %v10383_v47, %v10935_v7  ;;  %v16363_v34 = vadd.f32 %v16089_v32, %v15505_v25  ;;  %v9034_v50 = vpop.f32.mrb[13].mxu0  ;;  %v15506_v57 = vpop.f32.mrb[14].mxu1 }
 0x338   :  { %v13800_v40 = vpack.c.bf16 %v11211_v35, %v11210_v51  ;;  %v11209_v38 = vsel %vm10657_vm13, %v10381_v6, %v10933_v27  ;;  %v16364_v0 = vadd.f32 %v9034_v50, %v3718_v15  ;;  %v16090_v11 = vpop.f32.mrb[14].mxu0  ;;  %v3721_v43 = vpop.f32.mrb[15].mxu1  ;;  %v17617_v6 = vld [vmem:[%s20896_s0 + $0x210] sm:$0xff]   ;;  %v17618_v51 = vld [vmem:[%s20896_s0 + $0x218] sm:$0xff]  }
 0x339   :  { %v13795_v1 = vpack.c.bf16 %v11209_v38, %v11208_v52  ;;  %v10386_v39 = vadd.f32 %v16363_v34, %v19500_v5  ;;  %v16365_v61 = vadd.f32 %v16090_v11, %v15506_v57  ;;  %v9037_v8 = vpop.f32.mrb[15].mxu0  ;;  %v8616_v7 = vrot.slane %v17617_v6, 1 }
 0x33a   :  { %14466 = vst [vmem:[%s20898_s3 + $0x28] sm:$0xff] %v13800_v40   ;;  %v10384_v2 = vadd.f32 %v16364_v0, %v19500_v5  ;;  %v16366_v44 = vadd.f32 %v9037_v8, %v3721_v43  ;;  %15612 = vmatmul.mubr.bf16.gmra.mrb[120].mxu1 %v17615_v20  ;;  %v8618_v35 = vrot.slane %v17618_v51, 1 }
 0x33b   :  { %14465 = vst [vmem:[%s20898_s3 + $0x20] sm:$0xff] %v13795_v1   ;;  %v10938_v47 = vmul.f32 0.2, %v10386_v39  ;;  %v10387_v37 = vadd.f32 %v16365_v61, %v19500_v5  ;;  %16196 = vmatmul.mubr.bf16.gmra.mrb[120].mxu0 %v8613_v29  ;;  %15615 = vmatprep.mubr.bf16.mxu1 %v17616_v42  ;;  %vm10662_vm14 = vcmp.ge.f32.partialorder %v10386_v39, 0.0  ;;  %v8617_v11 = vsel %vm8488_vm1, %v8614_v26, %v8616_v7 }
 0x33c   :  { %v10936_v25 = vmul.f32 0.2, %v10384_v2  ;;  %v10385_v27 = vadd.f32 %v16366_v44, %v19500_v5  ;;  %16199 = vmatprep.mubr.bf16.mxu0 %v8615_v56  ;;  %vm10660_vm15 = vcmp.ge.f32.partialorder %v10384_v2, 0.0 }
 0x33d   :  { %vm10663_vm0 = vcmp.ge.f32.partialorder %v10387_v37, 0.0  ;;  %v10939_v32 = vmul.f32 0.2, %v10387_v37  ;;  %v15509_v15 = vpop.f32.mrb[16].mxu1  ;;  %v11214_v29 = vsel %vm10662_vm14, %v10386_v39, %v10938_v47  ;;  %v8619_v39 = vsel %vm8488_vm1, %v8616_v7, %v8618_v35  ;;  %v17620_v7 = vld [vmem:[%s20896_s0 + $0x200] sm:$0xff]  }
 0x33e   :  { %vm10661_vm2 = vcmp.ge.f32.partialorder %v10385_v27, 0.0  ;;  %v10937_v34 = vmul.f32 0.2, %v10385_v27  ;;  %v16093_v50 = vpop.f32.mrb[16].mxu0  ;;  %v3734_v57 = vpop.f32.mrb[17].mxu1  ;;  %v11212_v43 = vsel %vm10660_vm15, %v10384_v2, %v10936_v25  ;;  %v17619_v2 = vld [vmem:[%s20896_s0 + $0x1f8] sm:$0xff]  }
 0x33f   :  { %v11215_v52 = vsel %vm10663_vm0, %v10387_v37, %v10939_v32  ;;  %v16367_v40 = vadd.f32 %v16093_v50, %v15509_v15  ;;  %v9050_v38 = vpop.f32.mrb[17].mxu0  ;;  %v15510_v0 = vpop.f32.mrb[18].mxu1 }
 0x340   :  { %v13810_v1 = vpack.c.bf16 %v11215_v52, %v11214_v29  ;;  %v11213_v61 = vsel %vm10661_vm2, %v10385_v27, %v10937_v34  ;;  %v16368_v8 = vadd.f32 %v9050_v38, %v3734_v57  ;;  %v16094_v56 = vpop.f32.mrb[18].mxu0  ;;  %v3737_v44 = vpop.f32.mrb[19].mxu1  ;;  %v17621_v27 = vld [vmem:[%s20896_s0 + $0x220] sm:$0xff]   ;;  %v17622_v29 = vld [vmem:[%s20896_s0 + $0x228] sm:$0xff]  }
 0x341   :  { %v13805_v20 = vpack.c.bf16 %v11213_v61, %v11212_v43  ;;  %v10390_v42 = vadd.f32 %v16367_v40, %v19500_v5  ;;  %v16369_v6 = vadd.f32 %v16094_v56, %v15510_v0  ;;  %v9053_v51 = vpop.f32.mrb[19].mxu0  ;;  %v8620_v32 = vrot.slane %v17621_v27, 1 }
 0x342   :  { %14468 = vst [vmem:[%s20898_s3 + $0x38] sm:$0xff] %v13810_v1   ;;  %v10388_v26 = vadd.f32 %v16368_v8, %v19500_v5  ;;  %v16370_v47 = vadd.f32 %v9053_v51, %v3737_v44  ;;  %15616 = vmatmul.mubr.bf16.gmra.mrb[124].mxu1 %v17619_v2  ;;  %v8622_v52 = vrot.slane %v17622_v29, 1 }
 0x343   :  { %14467 = vst [vmem:[%s20898_s3 + $0x30] sm:$0xff] %v13805_v20   ;;  %v10942_v37 = vmul.f32 0.2, %v10390_v42  ;;  %v10391_v25 = vadd.f32 %v16369_v6, %v19500_v5  ;;  %16200 = vmatmul.mubr.bf16.gmra.mrb[124].mxu0 %v8617_v11  ;;  %15619 = vmatprep.mubr.bf16.mxu1 %v17620_v7  ;;  %vm10666_vm3 = vcmp.ge.f32.partialorder %v10390_v42, 0.0  ;;  %v8621_v56 = vsel %vm8488_vm1, %v8618_v35, %v8620_v32 }
 0x344   :  { %v10940_v15 = vmul.f32 0.2, %v10388_v26  ;;  %v10389_v34 = vadd.f32 %v16370_v47, %v19500_v5  ;;  %16203 = vmatprep.mubr.bf16.mxu0 %v8619_v39  ;;  %vm10664_vm4 = vcmp.ge.f32.partialorder %v10388_v26, 0.0 }
 0x345   :  { %vm10667_vm5 = vcmp.ge.f32.partialorder %v10391_v25, 0.0  ;;  %v10943_v50 = vmul.f32 0.2, %v10391_v25  ;;  %v15513_v57 = vpop.f32.mrb[20].mxu1  ;;  %v11218_v11 = vsel %vm10666_vm3, %v10390_v42, %v10942_v37  ;;  %v8623_v42 = vsel %vm8488_vm1, %v8620_v32, %v8622_v52  ;;  %v17624_v32 = vld [vmem:[%s20896_s0 + $0x210] sm:$0xff]  }
 0x346   :  { %vm10665_vm6 = vcmp.ge.f32.partialorder %v10389_v34, 0.0  ;;  %v10941_v40 = vmul.f32 0.2, %v10389_v34  ;;  %v16097_v38 = vpop.f32.mrb[20].mxu0  ;;  %v3750_v0 = vpop.f32.mrb[21].mxu1  ;;  %v11216_v44 = vsel %vm10664_vm4, %v10388_v26, %v10940_v15  ;;  %v17623_v26 = vld [vmem:[%s20896_s0 + $0x208] sm:$0xff]  }
 0x347   :  { %v11219_v43 = vsel %vm10667_vm5, %v10391_v25, %v10943_v50  ;;  %v16371_v1 = vadd.f32 %v16097_v38, %v15513_v57  ;;  %v9066_v61 = vpop.f32.mrb[21].mxu0  ;;  %v15514_v8 = vpop.f32.mrb[22].mxu1 }
 0x348   :  { %v13820_v20 = vpack.c.bf16 %v11219_v43, %v11218_v11  ;;  %v11217_v6 = vsel %vm10665_vm6, %v10389_v34, %v10941_v40  ;;  %v16372_v51 = vadd.f32 %v9066_v61, %v3750_v0  ;;  %v16098_v39 = vpop.f32.mrb[22].mxu0  ;;  %v3753_v47 = vpop.f32.mrb[23].mxu1  ;;  %v17625_v34 = vld [vmem:[%s20896_s0 + $0x230] sm:$0xff]   ;;  %v17626_v11 = vld [vmem:[%s20896_s0 + $0x238] sm:$0xff]  }
 0x349   :  { %v13815_v2 = vpack.c.bf16 %v11217_v6, %v11216_v44  ;;  %v10394_v7 = vadd.f32 %v16371_v1, %v19500_v5  ;;  %v16373_v27 = vadd.f32 %v16098_v39, %v15514_v8  ;;  %v9069_v29 = vpop.f32.mrb[23].mxu0  ;;  %v8624_v50 = vrot.slane %v17625_v34, 1 }
 0x34a   :  { %14470 = vst [vmem:[%s20898_s3 + $0x48] sm:$0xff] %v13820_v20   ;;  %v10392_v35 = vadd.f32 %v16372_v51, %v19500_v5  ;;  %v16374_v37 = vadd.f32 %v9069_v29, %v3753_v47  ;;  %15620 = vmatmul.mubr.bf16.gmra.mrb[128].mxu1 %v17623_v26  ;;  %v8626_v43 = vrot.slane %v17626_v11, 1 }
 0x34b   :  { %14469 = vst [vmem:[%s20898_s3 + $0x40] sm:$0xff] %v13815_v2   ;;  %v10946_v25 = vmul.f32 0.2, %v10394_v7  ;;  %v10395_v15 = vadd.f32 %v16373_v27, %v19500_v5  ;;  %16204 = vmatmul.mubr.bf16.gmra.mrb[128].mxu0 %v8621_v56  ;;  %15623 = vmatprep.mubr.bf16.mxu1 %v17624_v32  ;;  %vm10670_vm7 = vcmp.ge.f32.partialorder %v10394_v7, 0.0  ;;  %v8625_v39 = vsel %vm8488_vm1, %v8622_v52, %v8624_v50 }
 0x34c   :  { %v10944_v57 = vmul.f32 0.2, %v10392_v35  ;;  %v10393_v40 = vadd.f32 %v16374_v37, %v19500_v5  ;;  %16207 = vmatprep.mubr.bf16.mxu0 %v8623_v42  ;;  %vm10668_vm8 = vcmp.ge.f32.partialorder %v10392_v35, 0.0 }
 0x34d   :  { %vm10671_vm9 = vcmp.ge.f32.partialorder %v10395_v15, 0.0  ;;  %v10947_v38 = vmul.f32 0.2, %v10395_v15  ;;  %v15517_v0 = vpop.f32.mrb[24].mxu1  ;;  %v11222_v56 = vsel %vm10670_vm7, %v10394_v7, %v10946_v25  ;;  %v8627_v7 = vsel %vm8488_vm1, %v8624_v50, %v8626_v43  ;;  %v17628_v50 = vld [vmem:[%s20896_s0 + $0x220] sm:$0xff]  }
 0x34e   :  { %vm10669_vm10 = vcmp.ge.f32.partialorder %v10393_v40, 0.0  ;;  %v10945_v1 = vmul.f32 0.2, %v10393_v40  ;;  %v16101_v61 = vpop.f32.mrb[24].mxu0  ;;  %v3766_v8 = vpop.f32.mrb[25].mxu1  ;;  %v11220_v47 = vsel %vm10668_vm8, %v10392_v35, %v10944_v57  ;;  %v17627_v35 = vld [vmem:[%s20896_s0 + $0x218] sm:$0xff]  }
 0x34f   :  { %v11223_v44 = vsel %vm10671_vm9, %v10395_v15, %v10947_v38  ;;  %v16375_v20 = vadd.f32 %v16101_v61, %v15517_v0  ;;  %v9082_v6 = vpop.f32.mrb[25].mxu0  ;;  %v15518_v51 = vpop.f32.mrb[26].mxu1 }
 0x350   :  { %v13830_v2 = vpack.c.bf16 %v11223_v44, %v11222_v56  ;;  %v11221_v27 = vsel %vm10669_vm10, %v10393_v40, %v10945_v1  ;;  %v16376_v29 = vadd.f32 %v9082_v6, %v3766_v8  ;;  %v16102_v42 = vpop.f32.mrb[26].mxu0  ;;  %v3769_v37 = vpop.f32.mrb[27].mxu1  ;;  %v17629_v40 = vld [vmem:[%s20896_s0 + $0x240] sm:$0xff]   ;;  %v17630_v56 = vld [vmem:[%s20896_s0 + $0x248] sm:$0xff]  }
 0x351   :  { %v13825_v26 = vpack.c.bf16 %v11221_v27, %v11220_v47  ;;  %v10398_v32 = vadd.f32 %v16375_v20, %v19500_v5  ;;  %v16377_v34 = vadd.f32 %v16102_v42, %v15518_v51  ;;  %v9085_v11 = vpop.f32.mrb[27].mxu0  ;;  %v8628_v38 = vrot.slane %v17629_v40, 1 }
 0x352   :  { %14472 = vst [vmem:[%s20898_s3 + $0x58] sm:$0xff] %v13830_v2   ;;  %v10396_v52 = vadd.f32 %v16376_v29, %v19500_v5  ;;  %v16378_v25 = vadd.f32 %v9085_v11, %v3769_v37  ;;  %15624 = vmatmul.mubr.bf16.gmra.mrb[132].mxu1 %v17627_v35  ;;  %v8630_v44 = vrot.slane %v17630_v56, 1 }
 0x353   :  { %14471 = vst [vmem:[%s20898_s3 + $0x50] sm:$0xff] %v13825_v26   ;;  %v10950_v15 = vmul.f32 0.2, %v10398_v32  ;;  %v10399_v57 = vadd.f32 %v16377_v34, %v19500_v5  ;;  %16208 = vmatmul.mubr.bf16.gmra.mrb[132].mxu0 %v8625_v39  ;;  %15627 = vmatprep.mubr.bf16.mxu1 %v17628_v50  ;;  %vm10674_vm11 = vcmp.ge.f32.partialorder %v10398_v32, 0.0  ;;  %v8629_v42 = vsel %vm8488_vm1, %v8626_v43, %v8628_v38 }
 0x354   :  { %v10948_v0 = vmul.f32 0.2, %v10396_v52  ;;  %v10397_v1 = vadd.f32 %v16378_v25, %v19500_v5  ;;  %16211 = vmatprep.mubr.bf16.mxu0 %v8627_v7  ;;  %vm10672_vm12 = vcmp.ge.f32.partialorder %v10396_v52, 0.0 }
 0x355   :  { %vm10675_vm13 = vcmp.ge.f32.partialorder %v10399_v57, 0.0  ;;  %v10951_v61 = vmul.f32 0.2, %v10399_v57  ;;  %v15521_v8 = vpop.f32.mrb[28].mxu1  ;;  %v11226_v39 = vsel %vm10674_vm11, %v10398_v32, %v10950_v15  ;;  %v8631_v32 = vsel %vm8488_vm1, %v8628_v38, %v8630_v44  ;;  %v17632_v38 = vld [vmem:[%s20896_s0 + $0x230] sm:$0xff]  }
 0x356   :  { %vm10673_vm14 = vcmp.ge.f32.partialorder %v10397_v1, 0.0  ;;  %v10949_v20 = vmul.f32 0.2, %v10397_v1  ;;  %v16105_v6 = vpop.f32.mrb[28].mxu0  ;;  %v3782_v51 = vpop.f32.mrb[29].mxu1  ;;  %v11224_v37 = vsel %vm10672_vm12, %v10396_v52, %v10948_v0  ;;  %v17631_v52 = vld [vmem:[%s20896_s0 + $0x228] sm:$0xff]  }
 0x357   :  { %v11227_v47 = vsel %vm10675_vm13, %v10399_v57, %v10951_v61  ;;  %v16379_v2 = vadd.f32 %v16105_v6, %v15521_v8  ;;  %v9098_v27 = vpop.f32.mrb[29].mxu0  ;;  %v15522_v29 = vpop.f32.mrb[30].mxu1 }
 0x358   :  { %v13840_v26 = vpack.c.bf16 %v11227_v47, %v11226_v39  ;;  %v11225_v34 = vsel %vm10673_vm14, %v10397_v1, %v10949_v20  ;;  %v16380_v11 = vadd.f32 %v9098_v27, %v3782_v51  ;;  %v16106_v7 = vpop.f32.mrb[30].mxu0  ;;  %v3785_v25 = vpop.f32.mrb[31].mxu1  ;;  %v17633_v1 = vld [vmem:[%s20896_s0 + $0x250] sm:$0xff]   ;;  %v17634_v39 = vld [vmem:[%s20896_s0 + $0x258] sm:$0xff]  }
 0x359   :  { %v13835_v35 = vpack.c.bf16 %v11225_v34, %v11224_v37  ;;  %v10402_v50 = vadd.f32 %v16379_v2, %v19500_v5  ;;  %v16381_v40 = vadd.f32 %v16106_v7, %v15522_v29  ;;  %v9101_v56 = vpop.f32.mrb[31].mxu0  ;;  %v8632_v61 = vrot.slane %v17633_v1, 1 }
 0x35a   :  { %14474 = vst [vmem:[%s20898_s3 + $0x68] sm:$0xff] %v13840_v26   ;;  %v10400_v43 = vadd.f32 %v16380_v11, %v19500_v5  ;;  %v16382_v15 = vadd.f32 %v9101_v56, %v3785_v25  ;;  %15628 = vmatmul.mubr.bf16.gmra.mrb[136].mxu1 %v17631_v52  ;;  %v8634_v47 = vrot.slane %v17634_v39, 1 }
 0x35b   :  { %14473 = vst [vmem:[%s20898_s3 + $0x60] sm:$0xff] %v13835_v35   ;;  %v10954_v57 = vmul.f32 0.2, %v10402_v50  ;;  %v10403_v0 = vadd.f32 %v16381_v40, %v19500_v5  ;;  %16212 = vmatmul.mubr.bf16.gmra.mrb[136].mxu0 %v8629_v42  ;;  %15631 = vmatprep.mubr.bf16.mxu1 %v17632_v38  ;;  %vm10678_vm15 = vcmp.ge.f32.partialorder %v10402_v50, 0.0  ;;  %v8633_v7 = vsel %vm8488_vm1, %v8630_v44, %v8632_v61 }
 0x35c   :  { %v10952_v8 = vmul.f32 0.2, %v10400_v43  ;;  %v10401_v20 = vadd.f32 %v16382_v15, %v19500_v5  ;;  %16215 = vmatprep.mubr.bf16.mxu0 %v8631_v32  ;;  %vm10676_vm0 = vcmp.ge.f32.partialorder %v10400_v43, 0.0 }
 0x35d   :  { %vm10679_vm2 = vcmp.ge.f32.partialorder %v10403_v0, 0.0  ;;  %v10955_v6 = vmul.f32 0.2, %v10403_v0  ;;  %v15525_v51 = vpop.f32.mrb[32].mxu1  ;;  %v11230_v42 = vsel %vm10678_vm15, %v10402_v50, %v10954_v57  ;;  %v8635_v50 = vsel %vm8488_vm1, %v8632_v61, %v8634_v47  ;;  %v17636_v61 = vld [vmem:[%s20896_s0 + $0x240] sm:$0xff]  }
 0x35e   :  { %vm10677_vm3 = vcmp.ge.f32.partialorder %v10401_v20, 0.0  ;;  %v10953_v2 = vmul.f32 0.2, %v10401_v20  ;;  %v16109_v27 = vpop.f32.mrb[32].mxu0  ;;  %v3798_v29 = vpop.f32.mrb[33].mxu1  ;;  %v11228_v25 = vsel %vm10676_vm0, %v10400_v43, %v10952_v8  ;;  %v17635_v43 = vld [vmem:[%s20896_s0 + $0x238] sm:$0xff]  }
 0x35f   :  { %v11231_v37 = vsel %vm10679_vm2, %v10403_v0, %v10955_v6  ;;  %v16383_v26 = vadd.f32 %v16109_v27, %v15525_v51  ;;  %v9114_v34 = vpop.f32.mrb[33].mxu0  ;;  %v15526_v11 = vpop.f32.mrb[34].mxu1 }
 0x360   :  { %v13850_v35 = vpack.c.bf16 %v11231_v37, %v11230_v42  ;;  %v11229_v40 = vsel %vm10677_vm3, %v10401_v20, %v10953_v2  ;;  %v16384_v56 = vadd.f32 %v9114_v34, %v3798_v29  ;;  %v16110_v32 = vpop.f32.mrb[34].mxu0  ;;  %v3801_v15 = vpop.f32.mrb[35].mxu1  ;;  %v17637_v20 = vld [vmem:[%s20896_s0 + $0x260] sm:$0xff]   ;;  %v17638_v42 = vld [vmem:[%s20896_s0 + $0x268] sm:$0xff]  }
 0x361   :  { %v13845_v52 = vpack.c.bf16 %v11229_v40, %v11228_v25  ;;  %v10406_v38 = vadd.f32 %v16383_v26, %v19500_v5  ;;  %v16385_v1 = vadd.f32 %v16110_v32, %v15526_v11  ;;  %v9117_v39 = vpop.f32.mrb[35].mxu0  ;;  %v8636_v6 = vrot.slane %v17637_v20, 1 }
 0x362   :  { %14476 = vst [vmem:[%s20898_s3 + $0x78] sm:$0xff] %v13850_v35   ;;  %v10404_v44 = vadd.f32 %v16384_v56, %v19500_v5  ;;  %v16386_v57 = vadd.f32 %v9117_v39, %v3801_v15  ;;  %15632 = vmatmul.mubr.bf16.gmra.mrb[140].mxu1 %v17635_v43  ;;  %v8638_v37 = vrot.slane %v17638_v42, 1 }
 0x363   :  { %14475 = vst [vmem:[%s20898_s3 + $0x70] sm:$0xff] %v13845_v52   ;;  %v10958_v0 = vmul.f32 0.2, %v10406_v38  ;;  %v10407_v8 = vadd.f32 %v16385_v1, %v19500_v5  ;;  %16216 = vmatmul.mubr.bf16.gmra.mrb[140].mxu0 %v8633_v7  ;;  %15635 = vmatprep.mubr.bf16.mxu1 %v17636_v61  ;;  %vm10682_vm4 = vcmp.ge.f32.partialorder %v10406_v38, 0.0  ;;  %v8637_v32 = vsel %vm8488_vm1, %v8634_v47, %v8636_v6 }
 0x364   :  { %v10956_v51 = vmul.f32 0.2, %v10404_v44  ;;  %v10405_v2 = vadd.f32 %v16386_v57, %v19500_v5  ;;  %16219 = vmatprep.mubr.bf16.mxu0 %v8635_v50  ;;  %vm10680_vm5 = vcmp.ge.f32.partialorder %v10404_v44, 0.0 }
 0x365   :  { %vm10683_vm6 = vcmp.ge.f32.partialorder %v10407_v8, 0.0  ;;  %v10959_v27 = vmul.f32 0.2, %v10407_v8  ;;  %v15529_v29 = vpop.f32.mrb[36].mxu1  ;;  %v11234_v7 = vsel %vm10682_vm4, %v10406_v38, %v10958_v0  ;;  %v8639_v38 = vsel %vm8488_vm1, %v8636_v6, %v8638_v37  ;;  %v17640_v6 = vld [vmem:[%s20896_s0 + $0x250] sm:$0xff]  }
 0x366   :  { %vm10681_vm7 = vcmp.ge.f32.partialorder %v10405_v2, 0.0  ;;  %v10957_v26 = vmul.f32 0.2, %v10405_v2  ;;  %v16113_v34 = vpop.f32.mrb[36].mxu0  ;;  %v3814_v11 = vpop.f32.mrb[37].mxu1  ;;  %v11232_v15 = vsel %vm10680_vm5, %v10404_v44, %v10956_v51  ;;  %v17639_v44 = vld [vmem:[%s20896_s0 + $0x248] sm:$0xff]  }
 0x367   :  { %v11235_v25 = vsel %vm10683_vm6, %v10407_v8, %v10959_v27  ;;  %v16387_v35 = vadd.f32 %v16113_v34, %v15529_v29  ;;  %v9130_v40 = vpop.f32.mrb[37].mxu0  ;;  %v15530_v56 = vpop.f32.mrb[38].mxu1 }
 0x368   :  { %v13860_v52 = vpack.c.bf16 %v11235_v25, %v11234_v7  ;;  %v11233_v1 = vsel %vm10681_vm7, %v10405_v2, %v10957_v26  ;;  %v16388_v39 = vadd.f32 %v9130_v40, %v3814_v11  ;;  %v16114_v50 = vpop.f32.mrb[38].mxu0  ;;  %v3817_v57 = vpop.f32.mrb[39].mxu1  ;;  %v17641_v2 = vld [vmem:[%s20896_s0 + $0x270] sm:$0xff]   ;;  %v17642_v7 = vld [vmem:[%s20896_s0 + $0x278] sm:$0xff]  }
 0x369   :  { %v13855_v43 = vpack.c.bf16 %v11233_v1, %v11232_v15  ;;  %v10410_v61 = vadd.f32 %v16387_v35, %v19500_v5  ;;  %v16389_v20 = vadd.f32 %v16114_v50, %v15530_v56  ;;  %v9133_v42 = vpop.f32.mrb[39].mxu0  ;;  %v8640_v27 = vrot.slane %v17641_v2, 1 }
 0x36a   :  { %14478 = vst [vmem:[%s20898_s3 + $0x88] sm:$0xff] %v13860_v52   ;;  %v10408_v47 = vadd.f32 %v16388_v39, %v19500_v5  ;;  %v16390_v0 = vadd.f32 %v9133_v42, %v3817_v57  ;;  %15636 = vmatmul.mubr.bf16.gmra.mrb[144].mxu1 %v17639_v44  ;;  %v8642_v25 = vrot.slane %v17642_v7, 1 }
 0x36b   :  { %14477 = vst [vmem:[%s20898_s3 + $0x80] sm:$0xff] %v13855_v43   ;;  %v10962_v8 = vmul.f32 0.2, %v10410_v61  ;;  %v10411_v51 = vadd.f32 %v16389_v20, %v19500_v5  ;;  %16220 = vmatmul.mubr.bf16.gmra.mrb[144].mxu0 %v8637_v32  ;;  %15639 = vmatprep.mubr.bf16.mxu1 %v17640_v6  ;;  %vm10686_vm8 = vcmp.ge.f32.partialorder %v10410_v61, 0.0  ;;  %v8641_v50 = vsel %vm8488_vm1, %v8638_v37, %v8640_v27 }
 0x36c   :  { %v10960_v29 = vmul.f32 0.2, %v10408_v47  ;;  %v10409_v26 = vadd.f32 %v16390_v0, %v19500_v5  ;;  %16223 = vmatprep.mubr.bf16.mxu0 %v8639_v38  ;;  %vm10684_vm9 = vcmp.ge.f32.partialorder %v10408_v47, 0.0 }
 0x36d   :  { %vm10687_vm10 = vcmp.ge.f32.partialorder %v10411_v51, 0.0  ;;  %v10963_v34 = vmul.f32 0.2, %v10411_v51  ;;  %v15533_v11 = vpop.f32.mrb[40].mxu1  ;;  %v11238_v32 = vsel %vm10686_vm8, %v10410_v61, %v10962_v8  ;;  %v8643_v61 = vsel %vm8488_vm1, %v8640_v27, %v8642_v25  ;;  %v17644_v27 = vld [vmem:[%s20896_s0 + $0x260] sm:$0xff]  }
 0x36e   :  { %vm10685_vm11 = vcmp.ge.f32.partialorder %v10409_v26, 0.0  ;;  %v10961_v35 = vmul.f32 0.2, %v10409_v26  ;;  %v16117_v40 = vpop.f32.mrb[40].mxu0  ;;  %v3830_v56 = vpop.f32.mrb[41].mxu1  ;;  %v11236_v57 = vsel %vm10684_vm9, %v10408_v47, %v10960_v29  ;;  %v17643_v47 = vld [vmem:[%s20896_s0 + $0x258] sm:$0xff]  }
 0x36f   :  { %v11239_v15 = vsel %vm10687_vm10, %v10411_v51, %v10963_v34  ;;  %v16391_v52 = vadd.f32 %v16117_v40, %v15533_v11  ;;  %v9146_v1 = vpop.f32.mrb[41].mxu0  ;;  %v15534_v39 = vpop.f32.mrb[42].mxu1 }
 0x370   :  { %v13870_v43 = vpack.c.bf16 %v11239_v15, %v11238_v32  ;;  %v11237_v20 = vsel %vm10685_vm11, %v10409_v26, %v10961_v35  ;;  %v16392_v42 = vadd.f32 %v9146_v1, %v3830_v56  ;;  %v16118_v38 = vpop.f32.mrb[42].mxu0  ;;  %v3833_v0 = vpop.f32.mrb[43].mxu1  ;;  %v17645_v26 = vld [vmem:[%s20896_s0 + $0x280] sm:$0xff]   ;;  %v17646_v32 = vld [vmem:[%s20896_s0 + $0x288] sm:$0xff]  }
 0x371   :  { %v13865_v44 = vpack.c.bf16 %v11237_v20, %v11236_v57  ;;  %v10414_v6 = vadd.f32 %v16391_v52, %v19500_v5  ;;  %v16393_v2 = vadd.f32 %v16118_v38, %v15534_v39  ;;  %v9149_v7 = vpop.f32.mrb[43].mxu0  ;;  %v8644_v34 = vrot.slane %v17645_v26, 1 }
 0x372   :  { %14480 = vst [vmem:[%s20898_s3 + $0x98] sm:$0xff] %v13870_v43   ;;  %v10412_v37 = vadd.f32 %v16392_v42, %v19500_v5  ;;  %v16394_v8 = vadd.f32 %v9149_v7, %v3833_v0  ;;  %15640 = vmatmul.mubr.bf16.gmra.mrb[40].mxu1 %v17643_v47  ;;  %v8646_v15 = vrot.slane %v17646_v32, 1 }
 0x373   :  { %14479 = vst [vmem:[%s20898_s3 + $0x90] sm:$0xff] %v13865_v44   ;;  %v10966_v51 = vmul.f32 0.2, %v10414_v6  ;;  %v10415_v29 = vadd.f32 %v16393_v2, %v19500_v5  ;;  %16224 = vmatmul.mubr.bf16.gmra.mrb[0].mxu0 %v8641_v50  ;;  %15643 = vmatprep.mubr.bf16.mxu1 %v17644_v27  ;;  %vm10690_vm12 = vcmp.ge.f32.partialorder %v10414_v6, 0.0  ;;  %v8645_v38 = vsel %vm8488_vm1, %v8642_v25, %v8644_v34 }
 0x374   :  { %v10964_v11 = vmul.f32 0.2, %v10412_v37  ;;  %v10413_v35 = vadd.f32 %v16394_v8, %v19500_v5  ;;  %16227 = vmatprep.mubr.bf16.mxu0 %v8643_v61  ;;  %vm10688_vm13 = vcmp.ge.f32.partialorder %v10412_v37, 0.0 }
 0x375   :  { %vm10691_vm14 = vcmp.ge.f32.partialorder %v10415_v29, 0.0  ;;  %v10967_v40 = vmul.f32 0.2, %v10415_v29  ;;  %v15537_v56 = vpop.f32.mrb[44].mxu1  ;;  %v11242_v50 = vsel %vm10690_vm12, %v10414_v6, %v10966_v51  ;;  %v8647_v6 = vsel %vm8488_vm1, %v8644_v34, %v8646_v15  ;;  %v17648_v34 = vld [vmem:[%s20896_s0 + $0x270] sm:$0xff]  }
 0x376   :  { %vm10689_vm15 = vcmp.ge.f32.partialorder %v10413_v35, 0.0  ;;  %v10965_v52 = vmul.f32 0.2, %v10413_v35  ;;  %v16121_v1 = vpop.f32.mrb[44].mxu0  ;;  %v3846_v39 = vpop.f32.mrb[45].mxu1  ;;  %v11240_v0 = vsel %vm10688_vm13, %v10412_v37, %v10964_v11  ;;  %v17647_v37 = vld [vmem:[%s20896_s0 + $0x268] sm:$0xff]  }
 0x377   :  { %v11243_v57 = vsel %vm10691_vm14, %v10415_v29, %v10967_v40  ;;  %v16395_v43 = vadd.f32 %v16121_v1, %v15537_v56  ;;  %v9162_v20 = vpop.f32.mrb[45].mxu0  ;;  %v15538_v42 = vpop.f32.mrb[46].mxu1 }
 0x378   :  { %v13880_v44 = vpack.c.bf16 %v11243_v57, %v11242_v50  ;;  %v11241_v2 = vsel %vm10689_vm15, %v10413_v35, %v10965_v52  ;;  %v16396_v7 = vadd.f32 %v9162_v20, %v3846_v39  ;;  %v16122_v61 = vpop.f32.mrb[46].mxu0  ;;  %v3849_v8 = vpop.f32.mrb[47].mxu1  ;;  %v17649_v35 = vld [vmem:[%s20896_s0 + $0x290] sm:$0xff]   ;;  %v17650_v50 = vld [vmem:[%s20896_s0 + $0x298] sm:$0xff]  }
 0x379   :  { %v13875_v47 = vpack.c.bf16 %v11241_v2, %v11240_v0  ;;  %v10418_v27 = vadd.f32 %v16395_v43, %v19500_v5  ;;  %v16397_v26 = vadd.f32 %v16122_v61, %v15538_v42  ;;  %v9165_v32 = vpop.f32.mrb[47].mxu0  ;;  %v8648_v40 = vrot.slane %v17649_v35, 1 }
 0x37a   :  { %14482 = vst [vmem:[%s20898_s3 + $0xa8] sm:$0xff] %v13880_v44   ;;  %v10416_v25 = vadd.f32 %v16396_v7, %v19500_v5  ;;  %v16398_v51 = vadd.f32 %v9165_v32, %v3849_v8  ;;  %15644 = vmatmul.mubr.bf16.gmra.mrb[44].mxu1 %v17647_v37  ;;  %v8650_v57 = vrot.slane %v17650_v50, 1 }
 0x37b   :  { %14481 = vst [vmem:[%s20898_s3 + $0xa0] sm:$0xff] %v13875_v47   ;;  %v10970_v29 = vmul.f32 0.2, %v10418_v27  ;;  %v10419_v11 = vadd.f32 %v16397_v26, %v19500_v5  ;;  %16228 = vmatmul.mubr.bf16.gmra.mrb[4].mxu0 %v8645_v38  ;;  %15647 = vmatprep.mubr.bf16.mxu1 %v17648_v34  ;;  %vm10694_vm0 = vcmp.ge.f32.partialorder %v10418_v27, 0.0  ;;  %v8649_v61 = vsel %vm8488_vm1, %v8646_v15, %v8648_v40 }
 0x37c   :  { %v10968_v56 = vmul.f32 0.2, %v10416_v25  ;;  %v10417_v52 = vadd.f32 %v16398_v51, %v19500_v5  ;;  %16231 = vmatprep.mubr.bf16.mxu0 %v8647_v6  ;;  %vm10692_vm2 = vcmp.ge.f32.partialorder %v10416_v25, 0.0 }
 0x37d   :  { %vm10695_vm3 = vcmp.ge.f32.partialorder %v10419_v11, 0.0  ;;  %v10971_v1 = vmul.f32 0.2, %v10419_v11  ;;  %v15541_v39 = vpop.f32.mrb[48].mxu1  ;;  %v11246_v38 = vsel %vm10694_vm0, %v10418_v27, %v10970_v29  ;;  %v8651_v27 = vsel %vm8488_vm1, %v8648_v40, %v8650_v57  ;;  %v17652_v40 = vld [vmem:[%s20896_s0 + $0x280] sm:$0xff]  }
 0x37e   :  { %vm10693_vm4 = vcmp.ge.f32.partialorder %v10417_v52, 0.0  ;;  %v10969_v43 = vmul.f32 0.2, %v10417_v52  ;;  %v16125_v20 = vpop.f32.mrb[48].mxu0  ;;  %v3862_v42 = vpop.f32.mrb[49].mxu1  ;;  %v11244_v8 = vsel %vm10692_vm2, %v10416_v25, %v10968_v56  ;;  %v17651_v25 = vld [vmem:[%s20896_s0 + $0x278] sm:$0xff]  }
 0x37f   :  { %v11247_v0 = vsel %vm10695_vm3, %v10419_v11, %v10971_v1  ;;  %v16399_v44 = vadd.f32 %v16125_v20, %v15541_v39  ;;  %v9178_v2 = vpop.f32.mrb[49].mxu0  ;;  %v15542_v7 = vpop.f32.mrb[50].mxu1 }
 0x380   :  { %v13890_v47 = vpack.c.bf16 %v11247_v0, %v11246_v38  ;;  %v11245_v26 = vsel %vm10693_vm4, %v10417_v52, %v10969_v43  ;;  %v16400_v32 = vadd.f32 %v9178_v2, %v3862_v42  ;;  %v16126_v6 = vpop.f32.mrb[50].mxu0  ;;  %v3865_v51 = vpop.f32.mrb[51].mxu1  ;;  %v17653_v52 = vld [vmem:[%s20896_s0 + $0x2a0] sm:$0xff]   ;;  %v17654_v38 = vld [vmem:[%s20896_s0 + $0x2a8] sm:$0xff]  }
 0x381   :  { %v13885_v37 = vpack.c.bf16 %v11245_v26, %v11244_v8  ;;  %v10422_v34 = vadd.f32 %v16399_v44, %v19500_v5  ;;  %v16401_v35 = vadd.f32 %v16126_v6, %v15542_v7  ;;  %v9181_v50 = vpop.f32.mrb[51].mxu0  ;;  %v8652_v1 = vrot.slane %v17653_v52, 1  ;;  %v17656_v52 = vld [vmem:[%s20896_s0 + $0x288] sm:$0xff]  }
 0x382   :  { %14484 = vst [vmem:[%s20898_s3 + $0xb8] sm:$0xff] %v13890_v47   ;;  %v10420_v15 = vadd.f32 %v16400_v32, %v19500_v5  ;;  %v16402_v29 = vadd.f32 %v9181_v50, %v3865_v51  ;;  %15648 = vmatmul.mubr.bf16.gmra.mrb[48].mxu1 %v17651_v25  ;;  %v8654_v0 = vrot.slane %v17654_v38, 1  ;;  %v19825_v25 = vld [vmem:[%s20897_s2] ss:$0 sm:$0xff] }
 0x383   :  { %14483 = vst [vmem:[%s20898_s3 + $0xb0] sm:$0xff] %v13885_v37   ;;  %v10974_v11 = vmul.f32 0.2, %v10422_v34  ;;  %v10423_v56 = vadd.f32 %v16401_v35, %v19500_v5  ;;  %16232 = vmatmul.mubr.bf16.gmra.mrb[8].mxu0 %v8649_v61  ;;  %15651 = vmatprep.mubr.bf16.mxu1 %v17652_v40  ;;  %vm10698_vm5 = vcmp.ge.f32.partialorder %v10422_v34, 0.0 }
 0x384   :  { %v10972_v39 = vmul.f32 0.2, %v10420_v15  ;;  %v10421_v43 = vadd.f32 %v16402_v29, %v19500_v5  ;;  %16235 = vmatprep.mubr.bf16.mxu0 %v8651_v27  ;;  %vm10696_vm6 = vcmp.ge.f32.partialorder %v10420_v15, 0.0  ;;  %v8653_v5 = vsel %vm8488_vm1, %v8650_v57, %v8652_v1 }
 0x385   :  { %vm10699_vm7 = vcmp.ge.f32.partialorder %v10423_v56, 0.0  ;;  %v10975_v20 = vmul.f32 0.2, %v10423_v56  ;;  %v15545_v42 = vpop.f32.mrb[52].mxu1  ;;  %v11250_v61 = vsel %vm10698_vm5, %v10422_v34, %v10974_v11  ;;  %v8655_v40 = vsel %vm8488_vm1, %v8652_v1, %v8654_v0  ;;  %v17657_v1 = vld [vmem:[%s20896_s0 + $0x290] sm:$0xff]  }
 0x386   :  { %vm10697_vm8 = vcmp.ge.f32.partialorder %v10421_v43, 0.0  ;;  %v10973_v44 = vmul.f32 0.2, %v10421_v43  ;;  %v16129_v2 = vpop.f32.mrb[52].mxu0  ;;  %v3878_v7 = vpop.f32.mrb[53].mxu1  ;;  %v11248_v6 = vsel %vm10696_vm6, %v10420_v15, %v10972_v39 }
 0x387   :  { %v11251_v8 = vsel %vm10699_vm7, %v10423_v56, %v10975_v20  ;;  %v16403_v47 = vadd.f32 %v16129_v2, %v15545_v42  ;;  %v9194_v26 = vpop.f32.mrb[53].mxu0  ;;  %v15546_v32 = vpop.f32.mrb[54].mxu1  ;;  %v17658_v20 = vld [vmem:[%s20896_s0 + $0x2b0] sm:$0xff]  }
 0x388   :  { %v13900_v51 = vpack.c.bf16 %v11251_v8, %v11250_v61  ;;  %v11249_v37 = vsel %vm10697_vm8, %v10421_v43, %v10973_v44  ;;  %v16404_v35 = vadd.f32 %v9194_v26, %v3878_v7  ;;  %v16130_v50 = vpop.f32.mrb[54].mxu0  ;;  %v3881_v27 = vpop.f32.mrb[55].mxu1  ;;  %v8656_v42 = vrot.slane %v17658_v20, 1  ;;  %v17659_v61 = vld [vmem:[%s20896_s0 + $0x2b8] sm:$0xff]  }
 0x389   :  { %v13895_v29 = vpack.c.bf16 %v11249_v37, %v11248_v6  ;;  %v10426_v34 = vadd.f32 %v19825_v25, %v16403_v47  ;;  %v16405_v11 = vadd.f32 %v16130_v50, %v15546_v32  ;;  %v9197_v56 = vpop.f32.mrb[55].mxu0  ;;  %v8658_v8 = vrot.slane %v17659_v61, 1 }
 0x38a   :  { %14486 = vst [vmem:[%s20898_s3 + $0xc8] sm:$0xff] %v13900_v51   ;;  %v10424_v57 = vadd.f32 %v19825_v25, %v16404_v35  ;;  %v16406_v15 = vadd.f32 %v9197_v56, %v3881_v27  ;;  %15652 = vmatmul.mubr.bf16.gmra.mrb[52].mxu1 %v17656_v52  ;;  %v8657_v50 = vsel %vm8488_vm1, %v8654_v0, %v8656_v42 }
 0x38b   :  { %14485 = vst [vmem:[%s20898_s3 + $0xc0] sm:$0xff] %v13895_v29   ;;  %v10978_v39 = vmul.f32 0.2, %v10426_v34  ;;  %v10427_v43 = vadd.f32 %v19825_v25, %v16405_v11  ;;  %16236 = vmatmul.mubr.bf16.gmra.mrb[12].mxu0 %v8653_v5  ;;  %15655 = vmatprep.mubr.bf16.mxu1 %v17657_v1  ;;  %vm10702_vm9 = vcmp.ge.f32.partialorder %v10426_v34, 0.0 }
 0x38c   :  { %v10976_v38 = vmul.f32 0.2, %v10424_v57  ;;  %v10425_v44 = vadd.f32 %v19825_v25, %v16406_v15  ;;  %16239 = vmatprep.mubr.bf16.mxu0 %v8655_v40  ;;  %vm10700_vm10 = vcmp.ge.f32.partialorder %v10424_v57, 0.0 }
 0x38d   :  { %vm10703_vm11 = vcmp.ge.f32.partialorder %v10427_v43, 0.0  ;;  %v10979_v2 = vmul.f32 0.2, %v10427_v43  ;;  %v15549_v7 = vpop.f32.mrb[56].mxu1  ;;  %v11254_v5 = vsel %vm10702_vm9, %v10426_v34, %v10978_v39  ;;  %v8659_v34 = vsel %vm8488_vm1, %v8656_v42, %v8658_v8  ;;  %v17661_v42 = vld [vmem:[%s20896_s0 + $0x2a0] sm:$0xff]  }
 0x38e   :  { %vm10701_vm12 = vcmp.ge.f32.partialorder %v10425_v44, 0.0  ;;  %v10977_v47 = vmul.f32 0.2, %v10425_v44  ;;  %v16133_v26 = vpop.f32.mrb[56].mxu0  ;;  %v3894_v32 = vpop.f32.mrb[57].mxu1  ;;  %v11252_v27 = vsel %vm10700_vm10, %v10424_v57, %v10976_v38  ;;  %v17660_v57 = vld [vmem:[%s20896_s0 + $0x298] sm:$0xff]  }
 0x38f   :  { %v11255_v6 = vsel %vm10703_vm11, %v10427_v43, %v10979_v2  ;;  %v16407_v51 = vadd.f32 %v16133_v26, %v15549_v7  ;;  %v9210_v37 = vpop.f32.mrb[57].mxu0  ;;  %v15550_v35 = vpop.f32.mrb[58].mxu1 }
 0x390   :  { %v13910_v29 = vpack.c.bf16 %v11255_v6, %v11254_v5  ;;  %v11253_v11 = vsel %vm10701_vm12, %v10425_v44, %v10977_v47  ;;  %v16408_v56 = vadd.f32 %v9210_v37, %v3894_v32  ;;  %v16134_v40 = vpop.f32.mrb[58].mxu0  ;;  %v3897_v15 = vpop.f32.mrb[59].mxu1  ;;  %v17662_v44 = vld [vmem:[%s20896_s0 + $0x2c0] sm:$0xff]   ;;  %v17663_v5 = vld [vmem:[%s20896_s0 + $0x2c8] sm:$0xff]  }
 0x391   :  { %v13905_v52 = vpack.c.bf16 %v11253_v11, %v11252_v27  ;;  %v10430_v1 = vadd.f32 %v19825_v25, %v16407_v51  ;;  %v16409_v20 = vadd.f32 %v16134_v40, %v15550_v35  ;;  %v9213_v61 = vpop.f32.mrb[59].mxu0  ;;  %v8660_v2 = vrot.slane %v17662_v44, 1 }
 0x392   :  { %14488 = vst [vmem:[%s20898_s3 + $0xd8] sm:$0xff] %v13910_v29   ;;  %v10428_v0 = vadd.f32 %v19825_v25, %v16408_v56  ;;  %v16410_v39 = vadd.f32 %v9213_v61, %v3897_v15  ;;  %15656 = vmatmul.mubr.bf16.gmra.mrb[56].mxu1 %v17660_v57  ;;  %v8662_v6 = vrot.slane %v17663_v5, 1 }
 0x393   :  { %14487 = vst [vmem:[%s20898_s3 + $0xd0] sm:$0xff] %v13905_v52   ;;  %v10982_v43 = vmul.f32 0.2, %v10430_v1  ;;  %v10431_v38 = vadd.f32 %v19825_v25, %v16409_v20  ;;  %16240 = vmatmul.mubr.bf16.gmra.mrb[16].mxu0 %v8657_v50  ;;  %15659 = vmatprep.mubr.bf16.mxu1 %v17661_v42  ;;  %vm10706_vm13 = vcmp.ge.f32.partialorder %v10430_v1, 0.0  ;;  %v8661_v40 = vsel %vm8488_vm1, %v8658_v8, %v8660_v2 }
 0x394   :  { %v10980_v7 = vmul.f32 0.2, %v10428_v0  ;;  %v10429_v47 = vadd.f32 %v19825_v25, %v16410_v39  ;;  %16243 = vmatprep.mubr.bf16.mxu0 %v8659_v34  ;;  %vm10704_vm14 = vcmp.ge.f32.partialorder %v10428_v0, 0.0 }
 0x395   :  { %vm10707_vm15 = vcmp.ge.f32.partialorder %v10431_v38, 0.0  ;;  %v10983_v26 = vmul.f32 0.2, %v10431_v38  ;;  %v15553_v32 = vpop.f32.mrb[60].mxu1  ;;  %v11258_v50 = vsel %vm10706_vm13, %v10430_v1, %v10982_v43  ;;  %v8663_v1 = vsel %vm8488_vm1, %v8660_v2, %v8662_v6  ;;  %v17665_v2 = vld [vmem:[%s20896_s0 + $0x2b0] sm:$0xff]  }
 0x396   :  { %vm10705_vm0 = vcmp.ge.f32.partialorder %v10429_v47, 0.0  ;;  %v10981_v51 = vmul.f32 0.2, %v10429_v47  ;;  %v16137_v37 = vpop.f32.mrb[60].mxu0  ;;  %v3910_v35 = vpop.f32.mrb[61].mxu1  ;;  %v11256_v15 = vsel %vm10704_vm14, %v10428_v0, %v10980_v7  ;;  %v17664_v0 = vld [vmem:[%s20896_s0 + $0x2a8] sm:$0xff]  }
 0x397   :  { %v11259_v27 = vsel %vm10707_vm15, %v10431_v38, %v10983_v26  ;;  %v16411_v29 = vadd.f32 %v16137_v37, %v15553_v32  ;;  %v9226_v11 = vpop.f32.mrb[61].mxu0  ;;  %v15554_v56 = vpop.f32.mrb[62].mxu1 }
 0x398   :  { %v13920_v52 = vpack.c.bf16 %v11259_v27, %v11258_v50  ;;  %v11257_v20 = vsel %vm10705_vm0, %v10429_v47, %v10981_v51  ;;  %v16412_v61 = vadd.f32 %v9226_v11, %v3910_v35  ;;  %v16138_v34 = vpop.f32.mrb[62].mxu0  ;;  %v3913_v39 = vpop.f32.mrb[63].mxu1  ;;  %v17666_v47 = vld [vmem:[%s20896_s0 + $0x2d0] sm:$0xff]   ;;  %v17667_v50 = vld [vmem:[%s20896_s0 + $0x2d8] sm:$0xff]  }
 0x399   :  { %v13915_v57 = vpack.c.bf16 %v11257_v20, %v11256_v15  ;;  %v10434_v42 = vadd.f32 %v19825_v25, %v16411_v29  ;;  %v16413_v44 = vadd.f32 %v16138_v34, %v15554_v56  ;;  %v9229_v5 = vpop.f32.mrb[63].mxu0  ;;  %v8664_v26 = vrot.slane %v17666_v47, 1 }
 0x39a   :  { %14490 = vst [vmem:[%s20898_s3 + $0xe8] sm:$0xff] %v13920_v52   ;;  %v10432_v8 = vadd.f32 %v19825_v25, %v16412_v61  ;;  %v16414_v43 = vadd.f32 %v9229_v5, %v3913_v39  ;;  %15660 = vmatmul.mubr.bf16.gmra.mrb[168].mxu1 %v17664_v0  ;;  %v8666_v27 = vrot.slane %v17667_v50, 1 }
 0x39b   :  { %14489 = vst [vmem:[%s20898_s3 + $0xe0] sm:$0xff] %v13915_v57   ;;  %v10986_v38 = vmul.f32 0.2, %v10434_v42  ;;  %v10435_v7 = vadd.f32 %v19825_v25, %v16413_v44  ;;  %16244 = vmatmul.mubr.bf16.gmra.mrb[168].mxu0 %v8661_v40  ;;  %15663 = vmatprep.mubr.bf16.mxu1 %v17665_v2  ;;  %vm10710_vm2 = vcmp.ge.f32.partialorder %v10434_v42, 0.0  ;;  %v8665_v34 = vsel %vm8488_vm1, %v8662_v6, %v8664_v26 }
 0x39c   :  { %v10984_v32 = vmul.f32 0.2, %v10432_v8  ;;  %v10433_v51 = vadd.f32 %v19825_v25, %v16414_v43  ;;  %16247 = vmatprep.mubr.bf16.mxu0 %v8663_v1  ;;  %vm10708_vm3 = vcmp.ge.f32.partialorder %v10432_v8, 0.0 }
 0x39d   :  { %vm10711_vm4 = vcmp.ge.f32.partialorder %v10435_v7, 0.0  ;;  %v10987_v37 = vmul.f32 0.2, %v10435_v7  ;;  %v15557_v35 = vpop.f32.mrb[64].mxu1  ;;  %v11262_v40 = vsel %vm10710_vm2, %v10434_v42, %v10986_v38  ;;  %v8667_v42 = vsel %vm8488_vm1, %v8664_v26, %v8666_v27  ;;  %v17669_v26 = vld [vmem:[%s20896_s0 + $0x2c0] sm:$0xff]  }
 0x39e   :  { %vm10709_vm5 = vcmp.ge.f32.partialorder %v10433_v51, 0.0  ;;  %v10985_v29 = vmul.f32 0.2, %v10433_v51  ;;  %v16141_v11 = vpop.f32.mrb[64].mxu0  ;;  %v3926_v56 = vpop.f32.mrb[65].mxu1  ;;  %v11260_v39 = vsel %vm10708_vm3, %v10432_v8, %v10984_v32  ;;  %v17668_v8 = vld [vmem:[%s20896_s0 + $0x2b8] sm:$0xff]  }
 0x39f   :  { %v11263_v15 = vsel %vm10711_vm4, %v10435_v7, %v10987_v37  ;;  %v16415_v52 = vadd.f32 %v16141_v11, %v15557_v35  ;;  %v9242_v20 = vpop.f32.mrb[65].mxu0  ;;  %v15558_v61 = vpop.f32.mrb[66].mxu1 }
 0x3a0   :  { %v13930_v57 = vpack.c.bf16 %v11263_v15, %v11262_v40  ;;  %v11261_v44 = vsel %vm10709_vm5, %v10433_v51, %v10985_v29  ;;  %v16416_v5 = vadd.f32 %v9242_v20, %v3926_v56  ;;  %v16142_v1 = vpop.f32.mrb[66].mxu0  ;;  %v3929_v43 = vpop.f32.mrb[67].mxu1  ;;  %v17670_v51 = vld [vmem:[%s20896_s0 + $0x2e0] sm:$0xff]   ;;  %v17671_v40 = vld [vmem:[%s20896_s0 + $0x2e8] sm:$0xff]  }
 0x3a1   :  { %v13925_v0 = vpack.c.bf16 %v11261_v44, %v11260_v39  ;;  %v10438_v2 = vadd.f32 %v19825_v25, %v16415_v52  ;;  %v16417_v47 = vadd.f32 %v16142_v1, %v15558_v61  ;;  %v9245_v50 = vpop.f32.mrb[67].mxu0  ;;  %v8668_v37 = vrot.slane %v17670_v51, 1 }
 0x3a2   :  { %14492 = vst [vmem:[%s20898_s3 + $0xf8] sm:$0xff] %v13930_v57   ;;  %v10436_v6 = vadd.f32 %v19825_v25, %v16416_v5  ;;  %v16418_v38 = vadd.f32 %v9245_v50, %v3929_v43  ;;  %15664 = vmatmul.mubr.bf16.gmra.mrb[172].mxu1 %v17668_v8  ;;  %v8670_v15 = vrot.slane %v17671_v40, 1 }
 0x3a3   :  { %14491 = vst [vmem:[%s20898_s3 + $0xf0] sm:$0xff] %v13925_v0   ;;  %v10990_v7 = vmul.f32 0.2, %v10438_v2  ;;  %v10439_v32 = vadd.f32 %v19825_v25, %v16417_v47  ;;  %16248 = vmatmul.mubr.bf16.gmra.mrb[172].mxu0 %v8665_v34  ;;  %15667 = vmatprep.mubr.bf16.mxu1 %v17669_v26  ;;  %vm10714_vm6 = vcmp.ge.f32.partialorder %v10438_v2, 0.0  ;;  %v8669_v1 = vsel %vm8488_vm1, %v8666_v27, %v8668_v37 }
 0x3a4   :  { %v10988_v35 = vmul.f32 0.2, %v10436_v6  ;;  %v10437_v29 = vadd.f32 %v19825_v25, %v16418_v38  ;;  %16251 = vmatprep.mubr.bf16.mxu0 %v8667_v42  ;;  %vm10712_vm7 = vcmp.ge.f32.partialorder %v10436_v6, 0.0 }
 0x3a5   :  { %vm10715_vm8 = vcmp.ge.f32.partialorder %v10439_v32, 0.0  ;;  %v10991_v11 = vmul.f32 0.2, %v10439_v32  ;;  %v15561_v56 = vpop.f32.mrb[68].mxu1  ;;  %v11266_v34 = vsel %vm10714_vm6, %v10438_v2, %v10990_v7  ;;  %v8671_v2 = vsel %vm8488_vm1, %v8668_v37, %v8670_v15  ;;  %v17673_v37 = vld [vmem:[%s20896_s0 + $0x2d0] sm:$0xff]  }
 0x3a6   :  { %vm10713_vm9 = vcmp.ge.f32.partialorder %v10437_v29, 0.0  ;;  %v10989_v52 = vmul.f32 0.2, %v10437_v29  ;;  %v16145_v20 = vpop.f32.mrb[68].mxu0  ;;  %v3942_v61 = vpop.f32.mrb[69].mxu1  ;;  %v11264_v43 = vsel %vm10712_vm7, %v10436_v6, %v10988_v35  ;;  %v17672_v6 = vld [vmem:[%s20896_s0 + $0x2c8] sm:$0xff]  }
 0x3a7   :  { %v11267_v39 = vsel %vm10715_vm8, %v10439_v32, %v10991_v11  ;;  %v16419_v57 = vadd.f32 %v16145_v20, %v15561_v56  ;;  %v9258_v44 = vpop.f32.mrb[69].mxu0  ;;  %v15562_v5 = vpop.f32.mrb[70].mxu1 }
 0x3a8   :  { %v13940_v0 = vpack.c.bf16 %v11267_v39, %v11266_v34  ;;  %v11265_v47 = vsel %vm10713_vm9, %v10437_v29, %v10989_v52  ;;  %v16420_v50 = vadd.f32 %v9258_v44, %v3942_v61  ;;  %v16146_v42 = vpop.f32.mrb[70].mxu0  ;;  %v3945_v38 = vpop.f32.mrb[71].mxu1  ;;  %v17674_v29 = vld [vmem:[%s20896_s0 + $0x2f0] sm:$0xff]   ;;  %v17675_v34 = vld [vmem:[%s20896_s0 + $0x2f8] sm:$0xff]  }
 0x3a9   :  { %v13935_v8 = vpack.c.bf16 %v11265_v47, %v11264_v43  ;;  %v10442_v26 = vadd.f32 %v19825_v25, %v16419_v57  ;;  %v16421_v51 = vadd.f32 %v16146_v42, %v15562_v5  ;;  %v9261_v40 = vpop.f32.mrb[71].mxu0  ;;  %v8672_v11 = vrot.slane %v17674_v29, 1 }
 0x3aa   :  { %14494 = vst [vmem:[%s20898_s3 + $0x108] sm:$0xff] %v13940_v0   ;;  %v10440_v27 = vadd.f32 %v19825_v25, %v16420_v50  ;;  %v16422_v7 = vadd.f32 %v9261_v40, %v3945_v38  ;;  %15668 = vmatmul.mubr.bf16.gmra.mrb[176].mxu1 %v17672_v6  ;;  %v8674_v39 = vrot.slane %v17675_v34, 1 }
 0x3ab   :  { %14493 = vst [vmem:[%s20898_s3 + $0x100] sm:$0xff] %v13935_v8   ;;  %v10994_v32 = vmul.f32 0.2, %v10442_v26  ;;  %v10443_v35 = vadd.f32 %v19825_v25, %v16421_v51  ;;  %16252 = vmatmul.mubr.bf16.gmra.mrb[176].mxu0 %v8669_v1  ;;  %15671 = vmatprep.mubr.bf16.mxu1 %v17673_v37  ;;  %vm10718_vm10 = vcmp.ge.f32.partialorder %v10442_v26, 0.0  ;;  %v8673_v42 = vsel %vm8488_vm1, %v8670_v15, %v8672_v11 }
 0x3ac   :  { %v10992_v56 = vmul.f32 0.2, %v10440_v27  ;;  %v10441_v52 = vadd.f32 %v19825_v25, %v16422_v7  ;;  %16255 = vmatprep.mubr.bf16.mxu0 %v8671_v2  ;;  %vm10716_vm11 = vcmp.ge.f32.partialorder %v10440_v27, 0.0 }
 0x3ad   :  { %vm10719_vm12 = vcmp.ge.f32.partialorder %v10443_v35, 0.0  ;;  %v10995_v20 = vmul.f32 0.2, %v10443_v35  ;;  %v15565_v61 = vpop.f32.mrb[72].mxu1  ;;  %v11270_v1 = vsel %vm10718_vm10, %v10442_v26, %v10994_v32  ;;  %v8675_v26 = vsel %vm8488_vm1, %v8672_v11, %v8674_v39  ;;  %v17677_v11 = vld [vmem:[%s20896_s0 + $0x2e0] sm:$0xff]  }
 0x3ae   :  { %vm10717_vm13 = vcmp.ge.f32.partialorder %v10441_v52, 0.0  ;;  %v10993_v57 = vmul.f32 0.2, %v10441_v52  ;;  %v16149_v44 = vpop.f32.mrb[72].mxu0  ;;  %v3958_v5 = vpop.f32.mrb[73].mxu1  ;;  %v11268_v38 = vsel %vm10716_vm11, %v10440_v27, %v10992_v56  ;;  %v17676_v27 = vld [vmem:[%s20896_s0 + $0x2d8] sm:$0xff]  }
 0x3af   :  { %v11271_v43 = vsel %vm10719_vm12, %v10443_v35, %v10995_v20  ;;  %v16423_v0 = vadd.f32 %v16149_v44, %v15565_v61  ;;  %v9274_v47 = vpop.f32.mrb[73].mxu0  ;;  %v15566_v50 = vpop.f32.mrb[74].mxu1 }
 0x3b0   :  { %v13950_v8 = vpack.c.bf16 %v11271_v43, %v11270_v1  ;;  %v11269_v51 = vsel %vm10717_vm13, %v10441_v52, %v10993_v57  ;;  %v16424_v40 = vadd.f32 %v9274_v47, %v3958_v5  ;;  %v16150_v2 = vpop.f32.mrb[74].mxu0  ;;  %v3961_v7 = vpop.f32.mrb[75].mxu1  ;;  %v17678_v52 = vld [vmem:[%s20896_s0 + $0x300] sm:$0xff]   ;;  %v17679_v1 = vld [vmem:[%s20896_s0 + $0x308] sm:$0xff]  }
 0x3b1   :  { %v13945_v6 = vpack.c.bf16 %v11269_v51, %v11268_v38  ;;  %v10446_v37 = vadd.f32 %v19825_v25, %v16423_v0  ;;  %v16425_v29 = vadd.f32 %v16150_v2, %v15566_v50  ;;  %v9277_v34 = vpop.f32.mrb[75].mxu0  ;;  %v8676_v20 = vrot.slane %v17678_v52, 1 }
 0x3b2   :  { %14496 = vst [vmem:[%s20898_s3 + $0x118] sm:$0xff] %v13950_v8   ;;  %v10444_v15 = vadd.f32 %v19825_v25, %v16424_v40  ;;  %v16426_v32 = vadd.f32 %v9277_v34, %v3961_v7  ;;  %15672 = vmatmul.mubr.bf16.gmra.mrb[180].mxu1 %v17676_v27  ;;  %v8678_v43 = vrot.slane %v17679_v1, 1 }
 0x3b3   :  { %14495 = vst [vmem:[%s20898_s3 + $0x110] sm:$0xff] %v13945_v6   ;;  %v10998_v35 = vmul.f32 0.2, %v10446_v37  ;;  %v10447_v56 = vadd.f32 %v19825_v25, %v16425_v29  ;;  %16256 = vmatmul.mubr.bf16.gmra.mrb[180].mxu0 %v8673_v42  ;;  %15675 = vmatprep.mubr.bf16.mxu1 %v17677_v11  ;;  %vm10722_vm14 = vcmp.ge.f32.partialorder %v10446_v37, 0.0  ;;  %v8677_v2 = vsel %vm8488_vm1, %v8674_v39, %v8676_v20 }
 0x3b4   :  { %v10996_v61 = vmul.f32 0.2, %v10444_v15  ;;  %v10445_v57 = vadd.f32 %v19825_v25, %v16426_v32  ;;  %16259 = vmatprep.mubr.bf16.mxu0 %v8675_v26  ;;  %vm10720_vm15 = vcmp.ge.f32.partialorder %v10444_v15, 0.0 }
 0x3b5   :  { %vm10723_vm0 = vcmp.ge.f32.partialorder %v10447_v56, 0.0  ;;  %v10999_v44 = vmul.f32 0.2, %v10447_v56  ;;  %v15569_v5 = vpop.f32.mrb[76].mxu1  ;;  %v11274_v42 = vsel %vm10722_vm14, %v10446_v37, %v10998_v35  ;;  %v8679_v37 = vsel %vm8488_vm1, %v8676_v20, %v8678_v43  ;;  %v17681_v20 = vld [vmem:[%s20896_s0 + $0x2f0] sm:$0xff]  }
 0x3b6   :  { %vm10721_vm2 = vcmp.ge.f32.partialorder %v10445_v57, 0.0  ;;  %v10997_v0 = vmul.f32 0.2, %v10445_v57  ;;  %v16153_v47 = vpop.f32.mrb[76].mxu0  ;;  %v3974_v50 = vpop.f32.mrb[77].mxu1  ;;  %v11272_v7 = vsel %vm10720_vm15, %v10444_v15, %v10996_v61  ;;  %v17680_v15 = vld [vmem:[%s20896_s0 + $0x2e8] sm:$0xff]  }
 0x3b7   :  { %v11275_v38 = vsel %vm10723_vm0, %v10447_v56, %v10999_v44  ;;  %v16427_v8 = vadd.f32 %v16153_v47, %v15569_v5  ;;  %v9290_v51 = vpop.f32.mrb[77].mxu0  ;;  %v15570_v40 = vpop.f32.mrb[78].mxu1 }
 0x3b8   :  { %v13960_v6 = vpack.c.bf16 %v11275_v38, %v11274_v42  ;;  %v11273_v29 = vsel %vm10721_vm2, %v10445_v57, %v10997_v0  ;;  %v16428_v34 = vadd.f32 %v9290_v51, %v3974_v50  ;;  %v16154_v26 = vpop.f32.mrb[78].mxu0  ;;  %v3977_v32 = vpop.f32.mrb[79].mxu1  ;;  %v17682_v57 = vld [vmem:[%s20896_s0 + $0x310] sm:$0xff]   ;;  %v17683_v42 = vld [vmem:[%s20896_s0 + $0x318] sm:$0xff]  }
 0x3b9   :  { %v13955_v27 = vpack.c.bf16 %v11273_v29, %v11272_v7  ;;  %v10450_v11 = vadd.f32 %v19825_v25, %v16427_v8  ;;  %v16429_v52 = vadd.f32 %v16154_v26, %v15570_v40  ;;  %v9293_v1 = vpop.f32.mrb[79].mxu0  ;;  %v8680_v44 = vrot.slane %v17682_v57, 1 }
 0x3ba   :  { %14498 = vst [vmem:[%s20898_s3 + $0x128] sm:$0xff] %v13960_v6   ;;  %v10448_v39 = vadd.f32 %v19825_v25, %v16428_v34  ;;  %v16430_v35 = vadd.f32 %v9293_v1, %v3977_v32  ;;  %15676 = vmatmul.mubr.bf16.gmra.mrb[184].mxu1 %v17680_v15  ;;  %v8682_v38 = vrot.slane %v17683_v42, 1 }
 0x3bb   :  { %14497 = vst [vmem:[%s20898_s3 + $0x120] sm:$0xff] %v13955_v27   ;;  %v11002_v56 = vmul.f32 0.2, %v10450_v11  ;;  %v10451_v61 = vadd.f32 %v19825_v25, %v16429_v52  ;;  %16260 = vmatmul.mubr.bf16.gmra.mrb[184].mxu0 %v8677_v2  ;;  %15679 = vmatprep.mubr.bf16.mxu1 %v17681_v20  ;;  %vm10726_vm3 = vcmp.ge.f32.partialorder %v10450_v11, 0.0  ;;  %v8681_v26 = vsel %vm8488_vm1, %v8678_v43, %v8680_v44 }
 0x3bc   :  { %v11000_v5 = vmul.f32 0.2, %v10448_v39  ;;  %v10449_v0 = vadd.f32 %v19825_v25, %v16430_v35  ;;  %16263 = vmatprep.mubr.bf16.mxu0 %v8679_v37  ;;  %vm10724_vm4 = vcmp.ge.f32.partialorder %v10448_v39, 0.0 }
 0x3bd   :  { %vm10727_vm5 = vcmp.ge.f32.partialorder %v10451_v61, 0.0  ;;  %v11003_v47 = vmul.f32 0.2, %v10451_v61  ;;  %v15573_v50 = vpop.f32.mrb[80].mxu1  ;;  %v11278_v2 = vsel %vm10726_vm3, %v10450_v11, %v11002_v56  ;;  %v8683_v11 = vsel %vm8488_vm1, %v8680_v44, %v8682_v38  ;;  %v17685_v44 = vld [vmem:[%s20896_s0 + $0x300] sm:$0xff]  }
 0x3be   :  { %vm10725_vm6 = vcmp.ge.f32.partialorder %v10449_v0, 0.0  ;;  %v11001_v8 = vmul.f32 0.2, %v10449_v0  ;;  %v16157_v51 = vpop.f32.mrb[80].mxu0  ;;  %v3990_v40 = vpop.f32.mrb[81].mxu1  ;;  %v11276_v32 = vsel %vm10724_vm4, %v10448_v39, %v11000_v5  ;;  %v17684_v39 = vld [vmem:[%s20896_s0 + $0x2f8] sm:$0xff]  }
 0x3bf   :  { %v11279_v7 = vsel %vm10727_vm5, %v10451_v61, %v11003_v47  ;;  %v16431_v6 = vadd.f32 %v16157_v51, %v15573_v50  ;;  %v9306_v29 = vpop.f32.mrb[81].mxu0  ;;  %v15574_v34 = vpop.f32.mrb[82].mxu1 }
 0x3c0   :  { %v13970_v27 = vpack.c.bf16 %v11279_v7, %v11278_v2  ;;  %v11277_v52 = vsel %vm10725_vm6, %v10449_v0, %v11001_v8  ;;  %v16432_v1 = vadd.f32 %v9306_v29, %v3990_v40  ;;  %v16158_v37 = vpop.f32.mrb[82].mxu0  ;;  %v3993_v35 = vpop.f32.mrb[83].mxu1  ;;  %v17686_v0 = vld [vmem:[%s20896_s0 + $0x320] sm:$0xff]   ;;  %v17687_v2 = vld [vmem:[%s20896_s0 + $0x328] sm:$0xff]  }
 0x3c1   :  { %v13965_v15 = vpack.c.bf16 %v11277_v52, %v11276_v32  ;;  %v10454_v20 = vadd.f32 %v19825_v25, %v16431_v6  ;;  %v16433_v57 = vadd.f32 %v16158_v37, %v15574_v34  ;;  %v9309_v42 = vpop.f32.mrb[83].mxu0  ;;  %v8684_v47 = vrot.slane %v17686_v0, 1 }
 0x3c2   :  { %14500 = vst [vmem:[%s20898_s3 + $0x138] sm:$0xff] %v13970_v27   ;;  %v10452_v43 = vadd.f32 %v19825_v25, %v16432_v1  ;;  %v16434_v56 = vadd.f32 %v9309_v42, %v3993_v35  ;;  %15680 = vmatmul.mubr.bf16.gmra.mrb[188].mxu1 %v17684_v39  ;;  %v8686_v7 = vrot.slane %v17687_v2, 1 }
 0x3c3   :  { %14499 = vst [vmem:[%s20898_s3 + $0x130] sm:$0xff] %v13965_v15   ;;  %v11006_v61 = vmul.f32 0.2, %v10454_v20  ;;  %v10455_v5 = vadd.f32 %v19825_v25, %v16433_v57  ;;  %16264 = vmatmul.mubr.bf16.gmra.mrb[188].mxu0 %v8681_v26  ;;  %15683 = vmatprep.mubr.bf16.mxu1 %v17685_v44  ;;  %vm10730_vm7 = vcmp.ge.f32.partialorder %v10454_v20, 0.0  ;;  %v8685_v37 = vsel %vm8488_vm1, %v8682_v38, %v8684_v47 }
 0x3c4   :  { %v11004_v50 = vmul.f32 0.2, %v10452_v43  ;;  %v10453_v8 = vadd.f32 %v19825_v25, %v16434_v56  ;;  %16267 = vmatprep.mubr.bf16.mxu0 %v8683_v11  ;;  %vm10728_vm8 = vcmp.ge.f32.partialorder %v10452_v43, 0.0 }
 0x3c5   :  { %vm10731_vm9 = vcmp.ge.f32.partialorder %v10455_v5, 0.0  ;;  %v11007_v51 = vmul.f32 0.2, %v10455_v5  ;;  %v15577_v40 = vpop.f32.mrb[84].mxu1  ;;  %v11282_v26 = vsel %vm10730_vm7, %v10454_v20, %v11006_v61  ;;  %v8687_v20 = vsel %vm8488_vm1, %v8684_v47, %v8686_v7  ;;  %v17689_v47 = vld [vmem:[%s20896_s0 + $0x310] sm:$0xff]  }
 0x3c6   :  { %vm10729_vm10 = vcmp.ge.f32.partialorder %v10453_v8, 0.0  ;;  %v11005_v6 = vmul.f32 0.2, %v10453_v8  ;;  %v16161_v29 = vpop.f32.mrb[84].mxu0  ;;  %v4006_v34 = vpop.f32.mrb[85].mxu1  ;;  %v11280_v35 = vsel %vm10728_vm8, %v10452_v43, %v11004_v50  ;;  %v17688_v43 = vld [vmem:[%s20896_s0 + $0x308] sm:$0xff]  }
 0x3c7   :  { %v11283_v32 = vsel %vm10731_vm9, %v10455_v5, %v11007_v51  ;;  %v16435_v27 = vadd.f32 %v16161_v29, %v15577_v40  ;;  %v9322_v52 = vpop.f32.mrb[85].mxu0  ;;  %v15578_v1 = vpop.f32.mrb[86].mxu1 }
 0x3c8   :  { %v13980_v15 = vpack.c.bf16 %v11283_v32, %v11282_v26  ;;  %v11281_v57 = vsel %vm10729_vm10, %v10453_v8, %v11005_v6  ;;  %v16436_v42 = vadd.f32 %v9322_v52, %v4006_v34  ;;  %v16162_v11 = vpop.f32.mrb[86].mxu0  ;;  %v4009_v56 = vpop.f32.mrb[87].mxu1  ;;  %v17690_v8 = vld [vmem:[%s20896_s0 + $0x330] sm:$0xff]   ;;  %v17691_v26 = vld [vmem:[%s20896_s0 + $0x338] sm:$0xff]  }
 0x3c9   :  { %v13975_v39 = vpack.c.bf16 %v11281_v57, %v11280_v35  ;;  %v10458_v44 = vadd.f32 %v19825_v25, %v16435_v27  ;;  %v16437_v0 = vadd.f32 %v16162_v11, %v15578_v1  ;;  %v9325_v2 = vpop.f32.mrb[87].mxu0  ;;  %v8688_v51 = vrot.slane %v17690_v8, 1 }
 0x3ca   :  { %14502 = vst [vmem:[%s20898_s3 + $0x148] sm:$0xff] %v13980_v15   ;;  %v10456_v38 = vadd.f32 %v19825_v25, %v16436_v42  ;;  %v16438_v61 = vadd.f32 %v9325_v2, %v4009_v56  ;;  %15684 = vmatmul.mubr.bf16.gmra.mrb[192].mxu1 %v17688_v43  ;;  %v8690_v32 = vrot.slane %v17691_v26, 1 }
 0x3cb   :  { %14501 = vst [vmem:[%s20898_s3 + $0x140] sm:$0xff] %v13975_v39   ;;  %v11010_v5 = vmul.f32 0.2, %v10458_v44  ;;  %v10459_v50 = vadd.f32 %v19825_v25, %v16437_v0  ;;  %16268 = vmatmul.mubr.bf16.gmra.mrb[192].mxu0 %v8685_v37  ;;  %15687 = vmatprep.mubr.bf16.mxu1 %v17689_v47  ;;  %vm10734_vm11 = vcmp.ge.f32.partialorder %v10458_v44, 0.0  ;;  %v8689_v11 = vsel %vm8488_vm1, %v8686_v7, %v8688_v51 }
 0x3cc   :  { %v11008_v40 = vmul.f32 0.2, %v10456_v38  ;;  %v10457_v6 = vadd.f32 %v19825_v25, %v16438_v61  ;;  %16271 = vmatprep.mubr.bf16.mxu0 %v8687_v20  ;;  %vm10732_vm12 = vcmp.ge.f32.partialorder %v10456_v38, 0.0 }
 0x3cd   :  { %vm10735_vm13 = vcmp.ge.f32.partialorder %v10459_v50, 0.0  ;;  %v11011_v29 = vmul.f32 0.2, %v10459_v50  ;;  %v15581_v34 = vpop.f32.mrb[88].mxu1  ;;  %v11286_v37 = vsel %vm10734_vm11, %v10458_v44, %v11010_v5  ;;  %v8691_v44 = vsel %vm8488_vm1, %v8688_v51, %v8690_v32  ;;  %v17693_v51 = vld [vmem:[%s20896_s0 + $0x320] sm:$0xff]  }
 0x3ce   :  { %vm10733_vm14 = vcmp.ge.f32.partialorder %v10457_v6, 0.0  ;;  %v11009_v27 = vmul.f32 0.2, %v10457_v6  ;;  %v16165_v52 = vpop.f32.mrb[88].mxu0  ;;  %v4022_v1 = vpop.f32.mrb[89].mxu1  ;;  %v11284_v56 = vsel %vm10732_vm12, %v10456_v38, %v11008_v40  ;;  %v17692_v38 = vld [vmem:[%s20896_s0 + $0x318] sm:$0xff]  }
 0x3cf   :  { %v11287_v35 = vsel %vm10735_vm13, %v10459_v50, %v11011_v29  ;;  %v16439_v15 = vadd.f32 %v16165_v52, %v15581_v34  ;;  %v9338_v57 = vpop.f32.mrb[89].mxu0  ;;  %v15582_v42 = vpop.f32.mrb[90].mxu1 }
 0x3d0   :  { %v13990_v39 = vpack.c.bf16 %v11287_v35, %v11286_v37  ;;  %v11285_v0 = vsel %vm10733_vm14, %v10457_v6, %v11009_v27  ;;  %v16440_v2 = vadd.f32 %v9338_v57, %v4022_v1  ;;  %v16166_v20 = vpop.f32.mrb[90].mxu0  ;;  %v4025_v61 = vpop.f32.mrb[91].mxu1  ;;  %v17694_v6 = vld [vmem:[%s20896_s0 + $0x340] sm:$0xff]   ;;  %v17695_v37 = vld [vmem:[%s20896_s0 + $0x348] sm:$0xff]  }
 0x3d1   :  { %v13985_v43 = vpack.c.bf16 %v11285_v0, %v11284_v56  ;;  %v10462_v47 = vadd.f32 %v19825_v25, %v16439_v15  ;;  %v16441_v8 = vadd.f32 %v16166_v20, %v15582_v42  ;;  %v9341_v26 = vpop.f32.mrb[91].mxu0  ;;  %v8692_v29 = vrot.slane %v17694_v6, 1 }
 0x3d2   :  { %14504 = vst [vmem:[%s20898_s3 + $0x158] sm:$0xff] %v13990_v39   ;;  %v10460_v7 = vadd.f32 %v19825_v25, %v16440_v2  ;;  %v16442_v5 = vadd.f32 %v9341_v26, %v4025_v61  ;;  %15688 = vmatmul.mubr.bf16.gmra.mrb[196].mxu1 %v17692_v38  ;;  %v8694_v35 = vrot.slane %v17695_v37, 1 }
 0x3d3   :  { %14503 = vst [vmem:[%s20898_s3 + $0x150] sm:$0xff] %v13985_v43   ;;  %v11014_v50 = vmul.f32 0.2, %v10462_v47  ;;  %v10463_v40 = vadd.f32 %v19825_v25, %v16441_v8  ;;  %16272 = vmatmul.mubr.bf16.gmra.mrb[196].mxu0 %v8689_v11  ;;  %15691 = vmatprep.mubr.bf16.mxu1 %v17693_v51  ;;  %vm10738_vm15 = vcmp.ge.f32.partialorder %v10462_v47, 0.0  ;;  %v8693_v20 = vsel %vm8488_vm1, %v8690_v32, %v8692_v29 }
 0x3d4   :  { %v11012_v34 = vmul.f32 0.2, %v10460_v7  ;;  %v10461_v27 = vadd.f32 %v19825_v25, %v16442_v5  ;;  %16275 = vmatprep.mubr.bf16.mxu0 %v8691_v44  ;;  %vm10736_vm0 = vcmp.ge.f32.partialorder %v10460_v7, 0.0 }
 0x3d5   :  { %vm10739_vm2 = vcmp.ge.f32.partialorder %v10463_v40, 0.0  ;;  %v11015_v52 = vmul.f32 0.2, %v10463_v40  ;;  %v15585_v1 = vpop.f32.mrb[92].mxu1  ;;  %v11290_v11 = vsel %vm10738_vm15, %v10462_v47, %v11014_v50  ;;  %v8695_v47 = vsel %vm8488_vm1, %v8692_v29, %v8694_v35  ;;  %v17697_v29 = vld [vmem:[%s20896_s0 + $0x330] sm:$0xff]  }
 0x3d6   :  { %vm10737_vm3 = vcmp.ge.f32.partialorder %v10461_v27, 0.0  ;;  %v11013_v15 = vmul.f32 0.2, %v10461_v27  ;;  %v16169_v57 = vpop.f32.mrb[92].mxu0  ;;  %v4038_v42 = vpop.f32.mrb[93].mxu1  ;;  %v11288_v61 = vsel %vm10736_vm0, %v10460_v7, %v11012_v34  ;;  %v17696_v7 = vld [vmem:[%s20896_s0 + $0x328] sm:$0xff]  }
 0x3d7   :  { %v11291_v56 = vsel %vm10739_vm2, %v10463_v40, %v11015_v52  ;;  %v16443_v39 = vadd.f32 %v16169_v57, %v15585_v1  ;;  %v9354_v0 = vpop.f32.mrb[93].mxu0  ;;  %v15586_v2 = vpop.f32.mrb[94].mxu1 }
 0x3d8   :  { %v14000_v43 = vpack.c.bf16 %v11291_v56, %v11290_v11  ;;  %v11289_v8 = vsel %vm10737_vm3, %v10461_v27, %v11013_v15  ;;  %v16444_v26 = vadd.f32 %v9354_v0, %v4038_v42  ;;  %v16170_v44 = vpop.f32.mrb[94].mxu0  ;;  %v4041_v5 = vpop.f32.mrb[95].mxu1  ;;  %v17698_v27 = vld [vmem:[%s20896_s0 + $0x350] sm:$0xff]   ;;  %v17699_v11 = vld [vmem:[%s20896_s0 + $0x358] sm:$0xff]  }
 0x3d9   :  { %v13995_v38 = vpack.c.bf16 %v11289_v8, %v11288_v61  ;;  %v10466_v51 = vadd.f32 %v19825_v25, %v16443_v39  ;;  %v16445_v6 = vadd.f32 %v16170_v44, %v15586_v2  ;;  %v9357_v37 = vpop.f32.mrb[95].mxu0  ;;  %v8696_v52 = vrot.slane %v17698_v27, 1 }
 0x3da   :  { %14506 = vst [vmem:[%s20898_s3 + $0x168] sm:$0xff] %v14000_v43   ;;  %v10464_v32 = vadd.f32 %v19825_v25, %v16444_v26  ;;  %v16446_v50 = vadd.f32 %v9357_v37, %v4041_v5  ;;  %15692 = vmatmul.mubr.bf16.gmra.mrb[200].mxu1 %v17696_v7  ;;  %v8698_v56 = vrot.slane %v17699_v11, 1 }
 0x3db   :  { %14505 = vst [vmem:[%s20898_s3 + $0x160] sm:$0xff] %v13995_v38   ;;  %v11018_v40 = vmul.f32 0.2, %v10466_v51  ;;  %v10467_v34 = vadd.f32 %v19825_v25, %v16445_v6  ;;  %16276 = vmatmul.mubr.bf16.gmra.mrb[200].mxu0 %v8693_v20  ;;  %15695 = vmatprep.mubr.bf16.mxu1 %v17697_v29  ;;  %vm10742_vm4 = vcmp.ge.f32.partialorder %v10466_v51, 0.0  ;;  %v8697_v44 = vsel %vm8488_vm1, %v8694_v35, %v8696_v52 }
 0x3dc   :  { %v11016_v1 = vmul.f32 0.2, %v10464_v32  ;;  %v10465_v15 = vadd.f32 %v19825_v25, %v16446_v50  ;;  %16279 = vmatprep.mubr.bf16.mxu0 %v8695_v47  ;;  %vm10740_vm5 = vcmp.ge.f32.partialorder %v10464_v32, 0.0 }
 0x3dd   :  { %vm10743_vm6 = vcmp.ge.f32.partialorder %v10467_v34, 0.0  ;;  %v11019_v57 = vmul.f32 0.2, %v10467_v34  ;;  %v15589_v42 = vpop.f32.mrb[96].mxu1  ;;  %v11294_v20 = vsel %vm10742_vm4, %v10466_v51, %v11018_v40  ;;  %v8699_v51 = vsel %vm8488_vm1, %v8696_v52, %v8698_v56  ;;  %v17701_v52 = vld [vmem:[%s20896_s0 + $0x340] sm:$0xff]  }
 0x3de   :  { %vm10741_vm7 = vcmp.ge.f32.partialorder %v10465_v15, 0.0  ;;  %v11017_v39 = vmul.f32 0.2, %v10465_v15  ;;  %v16173_v0 = vpop.f32.mrb[96].mxu0  ;;  %v4054_v2 = vpop.f32.mrb[97].mxu1  ;;  %v11292_v5 = vsel %vm10740_vm5, %v10464_v32, %v11016_v1  ;;  %v17700_v32 = vld [vmem:[%s20896_s0 + $0x338] sm:$0xff]  }
 0x3df   :  { %v11295_v61 = vsel %vm10743_vm6, %v10467_v34, %v11019_v57  ;;  %v16447_v43 = vadd.f32 %v16173_v0, %v15589_v42  ;;  %v9370_v8 = vpop.f32.mrb[97].mxu0  ;;  %v15590_v26 = vpop.f32.mrb[98].mxu1 }
 0x3e0   :  { %v14010_v38 = vpack.c.bf16 %v11295_v61, %v11294_v20  ;;  %v11293_v6 = vsel %vm10741_vm7, %v10465_v15, %v11017_v39  ;;  %v16448_v37 = vadd.f32 %v9370_v8, %v4054_v2  ;;  %v16174_v47 = vpop.f32.mrb[98].mxu0  ;;  %v4057_v50 = vpop.f32.mrb[99].mxu1  ;;  %v17702_v15 = vld [vmem:[%s20896_s0 + $0x360] sm:$0xff]   ;;  %v17703_v20 = vld [vmem:[%s20896_s0 + $0x368] sm:$0xff]  }
 0x3e1   :  { %v14005_v7 = vpack.c.bf16 %v11293_v6, %v11292_v5  ;;  %v10470_v29 = vadd.f32 %v19825_v25, %v16447_v43  ;;  %v16449_v27 = vadd.f32 %v16174_v47, %v15590_v26  ;;  %v9373_v11 = vpop.f32.mrb[99].mxu0  ;;  %v8700_v57 = vrot.slane %v17702_v15, 1 }
 0x3e2   :  { %14508 = vst [vmem:[%s20898_s3 + $0x178] sm:$0xff] %v14010_v38   ;;  %v10468_v35 = vadd.f32 %v19825_v25, %v16448_v37  ;;  %v16450_v40 = vadd.f32 %v9373_v11, %v4057_v50  ;;  %15696 = vmatmul.mubr.bf16.gmra.mrb[204].mxu1 %v17700_v32  ;;  %v8702_v61 = vrot.slane %v17703_v20, 1 }
 0x3e3   :  { %14507 = vst [vmem:[%s20898_s3 + $0x170] sm:$0xff] %v14005_v7   ;;  %v11022_v34 = vmul.f32 0.2, %v10470_v29  ;;  %v10471_v1 = vadd.f32 %v19825_v25, %v16449_v27  ;;  %16280 = vmatmul.mubr.bf16.gmra.mrb[204].mxu0 %v8697_v44  ;;  %15699 = vmatprep.mubr.bf16.mxu1 %v17701_v52  ;;  %vm10746_vm8 = vcmp.ge.f32.partialorder %v10470_v29, 0.0  ;;  %v8701_v47 = vsel %vm8488_vm1, %v8698_v56, %v8700_v57 }
 0x3e4   :  { %v11020_v42 = vmul.f32 0.2, %v10468_v35  ;;  %v10469_v39 = vadd.f32 %v19825_v25, %v16450_v40  ;;  %16283 = vmatprep.mubr.bf16.mxu0 %v8699_v51  ;;  %vm10744_vm9 = vcmp.ge.f32.partialorder %v10468_v35, 0.0 }
 0x3e5   :  { %vm10747_vm10 = vcmp.ge.f32.partialorder %v10471_v1, 0.0  ;;  %v11023_v0 = vmul.f32 0.2, %v10471_v1  ;;  %v15593_v2 = vpop.f32.mrb[100].mxu1  ;;  %v11298_v44 = vsel %vm10746_vm8, %v10470_v29, %v11022_v34  ;;  %v8703_v29 = vsel %vm8488_vm1, %v8700_v57, %v8702_v61  ;;  %v17705_v57 = vld [vmem:[%s20896_s0 + $0x350] sm:$0xff]  }
 0x3e6   :  { %vm10745_vm11 = vcmp.ge.f32.partialorder %v10469_v39, 0.0  ;;  %v11021_v43 = vmul.f32 0.2, %v10469_v39  ;;  %v16177_v8 = vpop.f32.mrb[100].mxu0  ;;  %v4070_v26 = vpop.f32.mrb[101].mxu1  ;;  %v11296_v50 = vsel %vm10744_vm9, %v10468_v35, %v11020_v42  ;;  %v17704_v35 = vld [vmem:[%s20896_s0 + $0x348] sm:$0xff]  }
 0x3e7   :  { %v11299_v5 = vsel %vm10747_vm10, %v10471_v1, %v11023_v0  ;;  %v16451_v38 = vadd.f32 %v16177_v8, %v15593_v2  ;;  %v9386_v6 = vpop.f32.mrb[101].mxu0  ;;  %v15594_v37 = vpop.f32.mrb[102].mxu1 }
 0x3e8   :  { %v14020_v7 = vpack.c.bf16 %v11299_v5, %v11298_v44  ;;  %v11297_v27 = vsel %vm10745_vm11, %v10469_v39, %v11021_v43  ;;  %v16452_v11 = vadd.f32 %v9386_v6, %v4070_v26  ;;  %v16178_v51 = vpop.f32.mrb[102].mxu0  ;;  %v4073_v40 = vpop.f32.mrb[103].mxu1  ;;  %v17706_v39 = vld [vmem:[%s20896_s0 + $0x370] sm:$0xff]   ;;  %v17707_v44 = vld [vmem:[%s20896_s0 + $0x378] sm:$0xff]  }
 0x3e9   :  { %v14015_v32 = vpack.c.bf16 %v11297_v27, %v11296_v50  ;;  %v10474_v52 = vadd.f32 %v19825_v25, %v16451_v38  ;;  %v16453_v15 = vadd.f32 %v16178_v51, %v15594_v37  ;;  %v9389_v20 = vpop.f32.mrb[103].mxu0  ;;  %v8704_v0 = vrot.slane %v17706_v39, 1  ;;  %v17709_v39 = vld [vmem:[%s20896_s0 + $0x358] sm:$0xff]  }
 0x3ea   :  { %14510 = vst [vmem:[%s20898_s3 + $0x188] sm:$0xff] %v14020_v7   ;;  %v10472_v56 = vadd.f32 %v19825_v25, %v16452_v11  ;;  %v16454_v34 = vadd.f32 %v9389_v20, %v4073_v40  ;;  %15700 = vmatmul.mubr.bf16.gmra.mrb[208].mxu1 %v17704_v35  ;;  %v8706_v5 = vrot.slane %v17707_v44, 1  ;;  %v20155_v35 = vld [vmem:[%s20897_s2] ss:$0 sm:$0xff] }
 0x3eb   :  { %14509 = vst [vmem:[%s20898_s3 + $0x180] sm:$0xff] %v14015_v32   ;;  %v11026_v1 = vmul.f32 0.2, %v10474_v52  ;;  %v10475_v42 = vadd.f32 %v19825_v25, %v16453_v15  ;;  %16284 = vmatmul.mubr.bf16.gmra.mrb[208].mxu0 %v8701_v47  ;;  %15703 = vmatprep.mubr.bf16.mxu1 %v17705_v57  ;;  %vm10750_vm12 = vcmp.ge.f32.partialorder %v10474_v52, 0.0 }
 0x3ec   :  { %v11024_v2 = vmul.f32 0.2, %v10472_v56  ;;  %v10473_v43 = vadd.f32 %v19825_v25, %v16454_v34  ;;  %16287 = vmatprep.mubr.bf16.mxu0 %v8703_v29  ;;  %vm10748_vm13 = vcmp.ge.f32.partialorder %v10472_v56, 0.0  ;;  %v8705_v25 = vsel %vm8488_vm1, %v8702_v61, %v8704_v0 }
 0x3ed   :  { %vm10751_vm14 = vcmp.ge.f32.partialorder %v10475_v42, 0.0  ;;  %v11027_v8 = vmul.f32 0.2, %v10475_v42  ;;  %v15597_v26 = vpop.f32.mrb[104].mxu1  ;;  %v11302_v47 = vsel %vm10750_vm12, %v10474_v52, %v11026_v1  ;;  %v8707_v57 = vsel %vm8488_vm1, %v8704_v0, %v8706_v5  ;;  %v17710_v0 = vld [vmem:[%s20896_s0 + $0x360] sm:$0xff]  }
 0x3ee   :  { %vm10749_vm15 = vcmp.ge.f32.partialorder %v10473_v43, 0.0  ;;  %v11025_v38 = vmul.f32 0.2, %v10473_v43  ;;  %v16181_v6 = vpop.f32.mrb[104].mxu0  ;;  %v4086_v37 = vpop.f32.mrb[105].mxu1  ;;  %v11300_v51 = vsel %vm10748_vm13, %v10472_v56, %v11024_v2 }
 0x3ef   :  { %v11303_v50 = vsel %vm10751_vm14, %v10475_v42, %v11027_v8  ;;  %v16455_v7 = vadd.f32 %v16181_v6, %v15597_v26  ;;  %v9402_v27 = vpop.f32.mrb[105].mxu0  ;;  %v15598_v11 = vpop.f32.mrb[106].mxu1  ;;  %v17711_v8 = vld [vmem:[%s20896_s0 + $0x380] sm:$0xff]  }
 0x3f0   :  { %v14030_v40 = vpack.c.bf16 %v11303_v50, %v11302_v47  ;;  %v11301_v32 = vsel %vm10749_vm15, %v10473_v43, %v11025_v38  ;;  %v16456_v15 = vadd.f32 %v9402_v27, %v4086_v37  ;;  %v16182_v20 = vpop.f32.mrb[106].mxu0  ;;  %v4089_v29 = vpop.f32.mrb[107].mxu1  ;;  %v8708_v26 = vrot.slane %v17711_v8, 1  ;;  %v17712_v47 = vld [vmem:[%s20896_s0 + $0x388] sm:$0xff]  }
 0x3f1   :  { %v14025_v34 = vpack.c.bf16 %v11301_v32, %v11300_v51  ;;  %v10478_v52 = vadd.f32 %v20155_v35, %v16455_v7  ;;  %v16457_v1 = vadd.f32 %v16182_v20, %v15598_v11  ;;  %v9405_v42 = vpop.f32.mrb[107].mxu0  ;;  %v8710_v50 = vrot.slane %v17712_v47, 1 }
 0x3f2   :  { %14512 = vst [vmem:[%s20898_s3 + $0x198] sm:$0xff] %v14030_v40   ;;  %v10476_v61 = vadd.f32 %v20155_v35, %v16456_v15  ;;  %v16458_v56 = vadd.f32 %v9405_v42, %v4089_v29  ;;  %15704 = vmatmul.mubr.bf16.gmra.mrb[212].mxu1 %v17709_v39  ;;  %v8709_v20 = vsel %vm8488_vm1, %v8706_v5, %v8708_v26 }
 0x3f3   :  { %14511 = vst [vmem:[%s20898_s3 + $0x190] sm:$0xff] %v14025_v34   ;;  %v11030_v2 = vmul.f32 0.2, %v10478_v52  ;;  %v10479_v43 = vadd.f32 %v20155_v35, %v16457_v1  ;;  %16288 = vmatmul.mubr.bf16.gmra.mrb[212].mxu0 %v8705_v25  ;;  %15707 = vmatprep.mubr.bf16.mxu1 %v17710_v0  ;;  %vm10754_vm0 = vcmp.ge.f32.partialorder %v10478_v52, 0.0 }
 0x3f4   :  { %v11028_v44 = vmul.f32 0.2, %v10476_v61  ;;  %v10477_v38 = vadd.f32 %v20155_v35, %v16458_v56  ;;  %16291 = vmatprep.mubr.bf16.mxu0 %v8707_v57  ;;  %vm10752_vm2 = vcmp.ge.f32.partialorder %v10476_v61, 0.0 }
 0x3f5   :  { %vm10755_vm3 = vcmp.ge.f32.partialorder %v10479_v43, 0.0  ;;  %v11031_v6 = vmul.f32 0.2, %v10479_v43  ;;  %v15601_v37 = vpop.f32.mrb[108].mxu1  ;;  %v11306_v25 = vsel %vm10754_vm0, %v10478_v52, %v11030_v2  ;;  %v8711_v52 = vsel %vm8488_vm1, %v8708_v26, %v8710_v50  ;;  %v17714_v26 = vld [vmem:[%s20896_s0 + $0x370] sm:$0xff]  }
 0x3f6   :  { %vm10753_vm4 = vcmp.ge.f32.partialorder %v10477_v38, 0.0  ;;  %v11029_v7 = vmul.f32 0.2, %v10477_v38  ;;  %v16185_v27 = vpop.f32.mrb[108].mxu0  ;;  %v4102_v11 = vpop.f32.mrb[109].mxu1  ;;  %v11304_v29 = vsel %vm10752_vm2, %v10476_v61, %v11028_v44  ;;  %v17713_v61 = vld [vmem:[%s20896_s0 + $0x368] sm:$0xff]  }
 0x3f7   :  { %v11307_v51 = vsel %vm10755_vm3, %v10479_v43, %v11031_v6  ;;  %v16459_v40 = vadd.f32 %v16185_v27, %v15601_v37  ;;  %v9418_v32 = vpop.f32.mrb[109].mxu0  ;;  %v15602_v15 = vpop.f32.mrb[110].mxu1 }
 0x3f8   :  { %v14040_v34 = vpack.c.bf16 %v11307_v51, %v11306_v25  ;;  %v11305_v1 = vsel %vm10753_vm4, %v10477_v38, %v11029_v7  ;;  %v16460_v42 = vadd.f32 %v9418_v32, %v4102_v11  ;;  %v16186_v57 = vpop.f32.mrb[110].mxu0  ;;  %v4105_v56 = vpop.f32.mrb[111].mxu1  ;;  %v17715_v38 = vld [vmem:[%s20896_s0 + $0x390] sm:$0xff]   ;;  %v17716_v25 = vld [vmem:[%s20896_s0 + $0x398] sm:$0xff]  }
 0x3f9   :  { %v14035_v39 = vpack.c.bf16 %v11305_v1, %v11304_v29  ;;  %v10482_v0 = vadd.f32 %v20155_v35, %v16459_v40  ;;  %v16461_v8 = vadd.f32 %v16186_v57, %v15602_v15  ;;  %v9421_v47 = vpop.f32.mrb[111].mxu0  ;;  %v8712_v6 = vrot.slane %v17715_v38, 1 }
 0x3fa   :  { %14514 = vst [vmem:[%s20898_s3 + $0x1a8] sm:$0xff] %v14040_v34   ;;  %v10480_v5 = vadd.f32 %v20155_v35, %v16460_v42  ;;  %v16462_v2 = vadd.f32 %v9421_v47, %v4105_v56  ;;  %15708 = vmatmul.mubr.bf16.gmra.mrb[216].mxu1 %v17713_v61  ;;  %v8714_v51 = vrot.slane %v17716_v25, 1 }
 0x3fb   :  { %14513 = vst [vmem:[%s20898_s3 + $0x1a0] sm:$0xff] %v14035_v39   ;;  %v11034_v43 = vmul.f32 0.2, %v10482_v0  ;;  %v10483_v44 = vadd.f32 %v20155_v35, %v16461_v8  ;;  %16292 = vmatmul.mubr.bf16.gmra.mrb[216].mxu0 %v8709_v20  ;;  %15711 = vmatprep.mubr.bf16.mxu1 %v17714_v26  ;;  %vm10758_vm5 = vcmp.ge.f32.partialorder %v10482_v0, 0.0  ;;  %v8713_v57 = vsel %vm8488_vm1, %v8710_v50, %v8712_v6 }
 0x3fc   :  { %v11032_v37 = vmul.f32 0.2, %v10480_v5  ;;  %v10481_v7 = vadd.f32 %v20155_v35, %v16462_v2  ;;  %16295 = vmatprep.mubr.bf16.mxu0 %v8711_v52  ;;  %vm10756_vm6 = vcmp.ge.f32.partialorder %v10480_v5, 0.0 }
 0x3fd   :  { %vm10759_vm7 = vcmp.ge.f32.partialorder %v10483_v44, 0.0  ;;  %v11035_v27 = vmul.f32 0.2, %v10483_v44  ;;  %v15605_v11 = vpop.f32.mrb[112].mxu1  ;;  %v11310_v20 = vsel %vm10758_vm5, %v10482_v0, %v11034_v43  ;;  %v8715_v0 = vsel %vm8488_vm1, %v8712_v6, %v8714_v51  ;;  %v17718_v6 = vld [vmem:[%s20896_s0 + $0x380] sm:$0xff]  }
 0x3fe   :  { %vm10757_vm8 = vcmp.ge.f32.partialorder %v10481_v7, 0.0  ;;  %v11033_v40 = vmul.f32 0.2, %v10481_v7  ;;  %v16189_v32 = vpop.f32.mrb[112].mxu0  ;;  %v4118_v15 = vpop.f32.mrb[113].mxu1  ;;  %v11308_v56 = vsel %vm10756_vm6, %v10480_v5, %v11032_v37  ;;  %v17717_v5 = vld [vmem:[%s20896_s0 + $0x378] sm:$0xff]  }
 0x3ff   :  { %v11311_v29 = vsel %vm10759_vm7, %v10483_v44, %v11035_v27  ;;  %v16463_v34 = vadd.f32 %v16189_v32, %v15605_v11  ;;  %v9434_v1 = vpop.f32.mrb[113].mxu0  ;;  %v15606_v42 = vpop.f32.mrb[114].mxu1 }
 0x400   :  { %v14050_v39 = vpack.c.bf16 %v11311_v29, %v11310_v20  ;;  %v11309_v8 = vsel %vm10757_vm8, %v10481_v7, %v11033_v40  ;;  %v16464_v47 = vadd.f32 %v9434_v1, %v4118_v15  ;;  %v16190_v52 = vpop.f32.mrb[114].mxu0  ;;  %v4121_v2 = vpop.f32.mrb[115].mxu1  ;;  %v17719_v7 = vld [vmem:[%s20896_s0 + $0x3a0] sm:$0xff]   ;;  %v17720_v20 = vld [vmem:[%s20896_s0 + $0x3a8] sm:$0xff]  }
 0x401   :  { %v14045_v61 = vpack.c.bf16 %v11309_v8, %v11308_v56  ;;  %v10486_v26 = vadd.f32 %v20155_v35, %v16463_v34  ;;  %v16465_v38 = vadd.f32 %v16190_v52, %v15606_v42  ;;  %v9437_v25 = vpop.f32.mrb[115].mxu0  ;;  %v8716_v27 = vrot.slane %v17719_v7, 1 }
 0x402   :  { %14516 = vst [vmem:[%s20898_s3 + $0x1b8] sm:$0xff] %v14050_v39   ;;  %v10484_v50 = vadd.f32 %v20155_v35, %v16464_v47  ;;  %v16466_v43 = vadd.f32 %v9437_v25, %v4121_v2  ;;  %15712 = vmatmul.mubr.bf16.gmra.mrb[220].mxu1 %v17717_v5  ;;  %v8718_v29 = vrot.slane %v17720_v20, 1 }
 0x403   :  { %14515 = vst [vmem:[%s20898_s3 + $0x1b0] sm:$0xff] %v14045_v61   ;;  %v11038_v44 = vmul.f32 0.2, %v10486_v26  ;;  %v10487_v37 = vadd.f32 %v20155_v35, %v16465_v38  ;;  %16296 = vmatmul.mubr.bf16.gmra.mrb[220].mxu0 %v8713_v57  ;;  %15715 = vmatprep.mubr.bf16.mxu1 %v17718_v6  ;;  %vm10762_vm9 = vcmp.ge.f32.partialorder %v10486_v26, 0.0  ;;  %v8717_v52 = vsel %vm8488_vm1, %v8714_v51, %v8716_v27 }
 0x404   :  { %v11036_v11 = vmul.f32 0.2, %v10484_v50  ;;  %v10485_v40 = vadd.f32 %v20155_v35, %v16466_v43  ;;  %16299 = vmatprep.mubr.bf16.mxu0 %v8715_v0  ;;  %vm10760_vm10 = vcmp.ge.f32.partialorder %v10484_v50, 0.0 }
 0x405   :  { %vm10763_vm11 = vcmp.ge.f32.partialorder %v10487_v37, 0.0  ;;  %v11039_v32 = vmul.f32 0.2, %v10487_v37  ;;  %v15609_v15 = vpop.f32.mrb[116].mxu1  ;;  %v11314_v57 = vsel %vm10762_vm9, %v10486_v26, %v11038_v44  ;;  %v8719_v26 = vsel %vm8488_vm1, %v8716_v27, %v8718_v29  ;;  %v17722_v27 = vld [vmem:[%s20896_s0 + $0x390] sm:$0xff]  }
 0x406   :  { %vm10761_vm12 = vcmp.ge.f32.partialorder %v10485_v40, 0.0  ;;  %v11037_v34 = vmul.f32 0.2, %v10485_v40  ;;  %v16193_v1 = vpop.f32.mrb[116].mxu0  ;;  %v4134_v42 = vpop.f32.mrb[117].mxu1  ;;  %v11312_v2 = vsel %vm10760_vm10, %v10484_v50, %v11036_v11  ;;  %v17721_v50 = vld [vmem:[%s20896_s0 + $0x388] sm:$0xff]  }
 0x407   :  { %v11315_v56 = vsel %vm10763_vm11, %v10487_v37, %v11039_v32  ;;  %v16467_v39 = vadd.f32 %v16193_v1, %v15609_v15  ;;  %v9450_v8 = vpop.f32.mrb[117].mxu0  ;;  %v15610_v47 = vpop.f32.mrb[118].mxu1 }
 0x408   :  { %v14060_v61 = vpack.c.bf16 %v11315_v56, %v11314_v57  ;;  %v11313_v38 = vsel %vm10761_vm12, %v10485_v40, %v11037_v34  ;;  %v16468_v25 = vadd.f32 %v9450_v8, %v4134_v42  ;;  %v16194_v0 = vpop.f32.mrb[118].mxu0  ;;  %v4137_v43 = vpop.f32.mrb[119].mxu1  ;;  %v17723_v40 = vld [vmem:[%s20896_s0 + $0x3b0] sm:$0xff]   ;;  %v17724_v57 = vld [vmem:[%s20896_s0 + $0x3b8] sm:$0xff]  }
 0x409   :  { %v14055_v5 = vpack.c.bf16 %v11313_v38, %v11312_v2  ;;  %v10490_v6 = vadd.f32 %v20155_v35, %v16467_v39  ;;  %v16469_v7 = vadd.f32 %v16194_v0, %v15610_v47  ;;  %v9453_v20 = vpop.f32.mrb[119].mxu0  ;;  %v8720_v32 = vrot.slane %v17723_v40, 1 }
 0x40a   :  { %14518 = vst [vmem:[%s20898_s3 + $0x1c8] sm:$0xff] %v14060_v61   ;;  %v10488_v51 = vadd.f32 %v20155_v35, %v16468_v25  ;;  %v16470_v44 = vadd.f32 %v9453_v20, %v4137_v43  ;;  %15716 = vmatmul.mubr.bf16.gmra.mrb[224].mxu1 %v17721_v50  ;;  %v8722_v56 = vrot.slane %v17724_v57, 1 }
 0x40b   :  { %14517 = vst [vmem:[%s20898_s3 + $0x1c0] sm:$0xff] %v14055_v5   ;;  %v11042_v37 = vmul.f32 0.2, %v10490_v6  ;;  %v10491_v11 = vadd.f32 %v20155_v35, %v16469_v7  ;;  %16300 = vmatmul.mubr.bf16.gmra.mrb[224].mxu0 %v8717_v52  ;;  %15719 = vmatprep.mubr.bf16.mxu1 %v17722_v27  ;;  %vm10766_vm13 = vcmp.ge.f32.partialorder %v10490_v6, 0.0  ;;  %v8721_v0 = vsel %vm8488_vm1, %v8718_v29, %v8720_v32 }
 0x40c   :  { %v11040_v15 = vmul.f32 0.2, %v10488_v51  ;;  %v10489_v34 = vadd.f32 %v20155_v35, %v16470_v44  ;;  %16303 = vmatprep.mubr.bf16.mxu0 %v8719_v26  ;;  %vm10764_vm14 = vcmp.ge.f32.partialorder %v10488_v51, 0.0 }
 0x40d   :  { %vm10767_vm15 = vcmp.ge.f32.partialorder %v10491_v11, 0.0  ;;  %v11043_v1 = vmul.f32 0.2, %v10491_v11  ;;  %v15613_v42 = vpop.f32.mrb[120].mxu1  ;;  %v11318_v52 = vsel %vm10766_vm13, %v10490_v6, %v11042_v37  ;;  %v8723_v6 = vsel %vm8488_vm1, %v8720_v32, %v8722_v56  ;;  %v17726_v32 = vld [vmem:[%s20896_s0 + $0x3a0] sm:$0xff]  }
 0x40e   :  { %vm10765_vm0 = vcmp.ge.f32.partialorder %v10489_v34, 0.0  ;;  %v11041_v39 = vmul.f32 0.2, %v10489_v34  ;;  %v16197_v8 = vpop.f32.mrb[120].mxu0  ;;  %v4150_v47 = vpop.f32.mrb[121].mxu1  ;;  %v11316_v43 = vsel %vm10764_vm14, %v10488_v51, %v11040_v15  ;;  %v17725_v51 = vld [vmem:[%s20896_s0 + $0x398] sm:$0xff]  }
 0x40f   :  { %v11319_v2 = vsel %vm10767_vm15, %v10491_v11, %v11043_v1  ;;  %v16471_v61 = vadd.f32 %v16197_v8, %v15613_v42  ;;  %v9466_v38 = vpop.f32.mrb[121].mxu0  ;;  %v15614_v25 = vpop.f32.mrb[122].mxu1 }
 0x410   :  { %v14070_v5 = vpack.c.bf16 %v11319_v2, %v11318_v52  ;;  %v11317_v7 = vsel %vm10765_vm0, %v10489_v34, %v11041_v39  ;;  %v16472_v20 = vadd.f32 %v9466_v38, %v4150_v47  ;;  %v16198_v26 = vpop.f32.mrb[122].mxu0  ;;  %v4153_v44 = vpop.f32.mrb[123].mxu1  ;;  %v17727_v34 = vld [vmem:[%s20896_s0 + $0x3c0] sm:$0xff]   ;;  %v17728_v52 = vld [vmem:[%s20896_s0 + $0x3c8] sm:$0xff]  }
 0x411   :  { %v14065_v50 = vpack.c.bf16 %v11317_v7, %v11316_v43  ;;  %v10494_v27 = vadd.f32 %v20155_v35, %v16471_v61  ;;  %v16473_v40 = vadd.f32 %v16198_v26, %v15614_v25  ;;  %v9469_v57 = vpop.f32.mrb[123].mxu0  ;;  %v8724_v1 = vrot.slane %v17727_v34, 1 }
 0x412   :  { %14520 = vst [vmem:[%s20898_s3 + $0x1d8] sm:$0xff] %v14070_v5   ;;  %v10492_v29 = vadd.f32 %v20155_v35, %v16472_v20  ;;  %v16474_v37 = vadd.f32 %v9469_v57, %v4153_v44  ;;  %15720 = vmatmul.mubr.bf16.gmra.mrb[228].mxu1 %v17725_v51  ;;  %v8726_v2 = vrot.slane %v17728_v52, 1 }
 0x413   :  { %14519 = vst [vmem:[%s20898_s3 + $0x1d0] sm:$0xff] %v14065_v50   ;;  %v11046_v11 = vmul.f32 0.2, %v10494_v27  ;;  %v10495_v15 = vadd.f32 %v20155_v35, %v16473_v40  ;;  %16304 = vmatmul.mubr.bf16.gmra.mrb[228].mxu0 %v8721_v0  ;;  %15723 = vmatprep.mubr.bf16.mxu1 %v17726_v32  ;;  %vm10770_vm2 = vcmp.ge.f32.partialorder %v10494_v27, 0.0  ;;  %v8725_v26 = vsel %vm8488_vm1, %v8722_v56, %v8724_v1 }
 0x414   :  { %v11044_v42 = vmul.f32 0.2, %v10492_v29  ;;  %v10493_v39 = vadd.f32 %v20155_v35, %v16474_v37  ;;  %16307 = vmatprep.mubr.bf16.mxu0 %v8723_v6  ;;  %vm10768_vm3 = vcmp.ge.f32.partialorder %v10492_v29, 0.0 }
 0x415   :  { %vm10771_vm4 = vcmp.ge.f32.partialorder %v10495_v15, 0.0  ;;  %v11047_v8 = vmul.f32 0.2, %v10495_v15  ;;  %v15617_v47 = vpop.f32.mrb[124].mxu1  ;;  %v11322_v0 = vsel %vm10770_vm2, %v10494_v27, %v11046_v11  ;;  %v8727_v27 = vsel %vm8488_vm1, %v8724_v1, %v8726_v2  ;;  %v17730_v1 = vld [vmem:[%s20896_s0 + $0x3b0] sm:$0xff]  }
 0x416   :  { %vm10769_vm5 = vcmp.ge.f32.partialorder %v10493_v39, 0.0  ;;  %v11045_v61 = vmul.f32 0.2, %v10493_v39  ;;  %v16201_v38 = vpop.f32.mrb[124].mxu0  ;;  %v4166_v25 = vpop.f32.mrb[125].mxu1  ;;  %v11320_v44 = vsel %vm10768_vm3, %v10492_v29, %v11044_v42  ;;  %v17729_v29 = vld [vmem:[%s20896_s0 + $0x3a8] sm:$0xff]  }
 0x417   :  { %v11323_v43 = vsel %vm10771_vm4, %v10495_v15, %v11047_v8  ;;  %v16475_v5 = vadd.f32 %v16201_v38, %v15617_v47  ;;  %v9482_v7 = vpop.f32.mrb[125].mxu0  ;;  %v15618_v20 = vpop.f32.mrb[126].mxu1 }
 0x418   :  { %v14080_v50 = vpack.c.bf16 %v11323_v43, %v11322_v0  ;;  %v11321_v40 = vsel %vm10769_vm5, %v10493_v39, %v11045_v61  ;;  %v16476_v57 = vadd.f32 %v9482_v7, %v4166_v25  ;;  %v16202_v6 = vpop.f32.mrb[126].mxu0  ;;  %v4169_v37 = vpop.f32.mrb[127].mxu1  ;;  %v17731_v39 = vld [vmem:[%s20896_s0 + $0x3d0] sm:$0xff]   ;;  %v17732_v0 = vld [vmem:[%s20896_s0 + $0x3d8] sm:$0xff]  }
 0x419   :  { %v14075_v51 = vpack.c.bf16 %v11321_v40, %v11320_v44  ;;  %v10498_v32 = vadd.f32 %v20155_v35, %v16475_v5  ;;  %v16477_v34 = vadd.f32 %v16202_v6, %v15618_v20  ;;  %v9485_v52 = vpop.f32.mrb[127].mxu0  ;;  %v8728_v8 = vrot.slane %v17731_v39, 1 }
 0x41a   :  { %14522 = vst [vmem:[%s20898_s3 + $0x1e8] sm:$0xff] %v14080_v50   ;;  %v10496_v56 = vadd.f32 %v20155_v35, %v16476_v57  ;;  %v16478_v11 = vadd.f32 %v9485_v52, %v4169_v37  ;;  %15724 = vmatmul.mubr.bf16.gmra.mrb[232].mxu1 %v17729_v29  ;;  %v8730_v43 = vrot.slane %v17732_v0, 1 }
 0x41b   :  { %14521 = vst [vmem:[%s20898_s3 + $0x1e0] sm:$0xff] %v14075_v51   ;;  %v11050_v15 = vmul.f32 0.2, %v10498_v32  ;;  %v10499_v42 = vadd.f32 %v20155_v35, %v16477_v34  ;;  %16308 = vmatmul.mubr.bf16.gmra.mrb[232].mxu0 %v8725_v26  ;;  %15727 = vmatprep.mubr.bf16.mxu1 %v17730_v1  ;;  %vm10774_vm6 = vcmp.ge.f32.partialorder %v10498_v32, 0.0  ;;  %v8729_v6 = vsel %vm8488_vm1, %v8726_v2, %v8728_v8 }
 0x41c   :  { %v11048_v47 = vmul.f32 0.2, %v10496_v56  ;;  %v10497_v61 = vadd.f32 %v20155_v35, %v16478_v11  ;;  %16311 = vmatprep.mubr.bf16.mxu0 %v8727_v27  ;;  %vm10772_vm7 = vcmp.ge.f32.partialorder %v10496_v56, 0.0 }
 0x41d   :  { %vm10775_vm8 = vcmp.ge.f32.partialorder %v10499_v42, 0.0  ;;  %v11051_v38 = vmul.f32 0.2, %v10499_v42  ;;  %v15621_v25 = vpop.f32.mrb[128].mxu1  ;;  %v11326_v26 = vsel %vm10774_vm6, %v10498_v32, %v11050_v15  ;;  %v8731_v32 = vsel %vm8488_vm1, %v8728_v8, %v8730_v43  ;;  %v17734_v8 = vld [vmem:[%s20896_s0 + $0x3c0] sm:$0xff]  }
 0x41e   :  { %vm10773_vm9 = vcmp.ge.f32.partialorder %v10497_v61, 0.0  ;;  %v11049_v5 = vmul.f32 0.2, %v10497_v61  ;;  %v16205_v7 = vpop.f32.mrb[128].mxu0  ;;  %v4182_v20 = vpop.f32.mrb[129].mxu1  ;;  %v11324_v37 = vsel %vm10772_vm7, %v10496_v56, %v11048_v47  ;;  %v17733_v56 = vld [vmem:[%s20896_s0 + $0x3b8] sm:$0xff]  }
 0x41f   :  { %v11327_v44 = vsel %vm10775_vm8, %v10499_v42, %v11051_v38  ;;  %v16479_v50 = vadd.f32 %v16205_v7, %v15621_v25  ;;  %v9498_v40 = vpop.f32.mrb[129].mxu0  ;;  %v15622_v57 = vpop.f32.mrb[130].mxu1 }
 0x420   :  { %v14090_v51 = vpack.c.bf16 %v11327_v44, %v11326_v26  ;;  %v11325_v34 = vsel %vm10773_vm9, %v10497_v61, %v11049_v5  ;;  %v16480_v52 = vadd.f32 %v9498_v40, %v4182_v20  ;;  %v16206_v27 = vpop.f32.mrb[130].mxu0  ;;  %v4185_v11 = vpop.f32.mrb[131].mxu1  ;;  %v17735_v61 = vld [vmem:[%s20896_s0 + $0x3e0] sm:$0xff]   ;;  %v17736_v26 = vld [vmem:[%s20896_s0 + $0x3e8] sm:$0xff]  }
 0x421   :  { %v14085_v29 = vpack.c.bf16 %v11325_v34, %v11324_v37  ;;  %v10502_v1 = vadd.f32 %v20155_v35, %v16479_v50  ;;  %v16481_v39 = vadd.f32 %v16206_v27, %v15622_v57  ;;  %v9501_v0 = vpop.f32.mrb[131].mxu0  ;;  %v8732_v38 = vrot.slane %v17735_v61, 1 }
 0x422   :  { %14524 = vst [vmem:[%s20898_s3 + $0x1f8] sm:$0xff] %v14090_v51   ;;  %v10500_v2 = vadd.f32 %v20155_v35, %v16480_v52  ;;  %v16482_v15 = vadd.f32 %v9501_v0, %v4185_v11  ;;  %15728 = vmatmul.mubr.bf16.gmra.mrb[236].mxu1 %v17733_v56  ;;  %v8734_v44 = vrot.slane %v17736_v26, 1 }
 0x423   :  { %14523 = vst [vmem:[%s20898_s3 + $0x1f0] sm:$0xff] %v14085_v29   ;;  %v11054_v42 = vmul.f32 0.2, %v10502_v1  ;;  %v10503_v47 = vadd.f32 %v20155_v35, %v16481_v39  ;;  %16312 = vmatmul.mubr.bf16.gmra.mrb[236].mxu0 %v8729_v6  ;;  %15731 = vmatprep.mubr.bf16.mxu1 %v17734_v8  ;;  %vm10778_vm10 = vcmp.ge.f32.partialorder %v10502_v1, 0.0  ;;  %v8733_v27 = vsel %vm8488_vm1, %v8730_v43, %v8732_v38 }
 0x424   :  { %v11052_v25 = vmul.f32 0.2, %v10500_v2  ;;  %v10501_v5 = vadd.f32 %v20155_v35, %v16482_v15  ;;  %16315 = vmatprep.mubr.bf16.mxu0 %v8731_v32  ;;  %vm10776_vm11 = vcmp.ge.f32.partialorder %v10500_v2, 0.0 }
 0x425   :  { %vm10779_vm12 = vcmp.ge.f32.partialorder %v10503_v47, 0.0  ;;  %v11055_v7 = vmul.f32 0.2, %v10503_v47  ;;  %v15625_v20 = vpop.f32.mrb[132].mxu1  ;;  %v11330_v6 = vsel %vm10778_vm10, %v10502_v1, %v11054_v42  ;;  %v8735_v1 = vsel %vm8488_vm1, %v8732_v38, %v8734_v44  ;;  %v17738_v38 = vld [vmem:[%s20896_s0 + $0x3d0] sm:$0xff]  }
 0x426   :  { %vm10777_vm13 = vcmp.ge.f32.partialorder %v10501_v5, 0.0  ;;  %v11053_v50 = vmul.f32 0.2, %v10501_v5  ;;  %v16209_v40 = vpop.f32.mrb[132].mxu0  ;;  %v4198_v57 = vpop.f32.mrb[133].mxu1  ;;  %v11328_v11 = vsel %vm10776_vm11, %v10500_v2, %v11052_v25  ;;  %v17737_v2 = vld [vmem:[%s20896_s0 + $0x3c8] sm:$0xff]  }
 0x427   :  { %v11331_v37 = vsel %vm10779_vm12, %v10503_v47, %v11055_v7  ;;  %v16483_v51 = vadd.f32 %v16209_v40, %v15625_v20  ;;  %v9514_v34 = vpop.f32.mrb[133].mxu0  ;;  %v15626_v52 = vpop.f32.mrb[134].mxu1 }
 0x428   :  { %v14100_v29 = vpack.c.bf16 %v11331_v37, %v11330_v6  ;;  %v11329_v39 = vsel %vm10777_vm13, %v10501_v5, %v11053_v50  ;;  %v16484_v0 = vadd.f32 %v9514_v34, %v4198_v57  ;;  %v16210_v32 = vpop.f32.mrb[134].mxu0  ;;  %v4201_v15 = vpop.f32.mrb[135].mxu1  ;;  %v17739_v5 = vld [vmem:[%s20896_s0 + $0x3f0] sm:$0xff]   ;;  %v17740_v6 = vld [vmem:[%s20896_s0 + $0x3f8] sm:$0xff]  }
 0x429   :  { %v14095_v56 = vpack.c.bf16 %v11329_v39, %v11328_v11  ;;  %v10506_v8 = vadd.f32 %v20155_v35, %v16483_v51  ;;  %v16485_v61 = vadd.f32 %v16210_v32, %v15626_v52  ;;  %v9517_v26 = vpop.f32.mrb[135].mxu0  ;;  %v8736_v7 = vrot.slane %v17739_v5, 1 }
 0x42a   :  { %14526 = vst [vmem:[%s20898_s3 + $0x208] sm:$0xff] %v14100_v29   ;;  %v10504_v43 = vadd.f32 %v20155_v35, %v16484_v0  ;;  %v16486_v42 = vadd.f32 %v9517_v26, %v4201_v15  ;;  %15732 = vmatmul.mubr.bf16.gmra.mrb[240].mxu1 %v17737_v2  ;;  %v8738_v37 = vrot.slane %v17740_v6, 1 }
 0x42b   :  { %14525 = vst [vmem:[%s20898_s3 + $0x200] sm:$0xff] %v14095_v56   ;;  %v11058_v47 = vmul.f32 0.2, %v10506_v8  ;;  %v10507_v25 = vadd.f32 %v20155_v35, %v16485_v61  ;;  %16316 = vmatmul.mubr.bf16.gmra.mrb[240].mxu0 %v8733_v27  ;;  %15735 = vmatprep.mubr.bf16.mxu1 %v17738_v38  ;;  %vm10782_vm14 = vcmp.ge.f32.partialorder %v10506_v8, 0.0  ;;  %v8737_v32 = vsel %vm8488_vm1, %v8734_v44, %v8736_v7 }
 0x42c   :  { %v11056_v20 = vmul.f32 0.2, %v10504_v43  ;;  %v10505_v50 = vadd.f32 %v20155_v35, %v16486_v42  ;;  %16319 = vmatprep.mubr.bf16.mxu0 %v8735_v1  ;;  %vm10780_vm15 = vcmp.ge.f32.partialorder %v10504_v43, 0.0 }
 0x42d   :  { %vm10783_vm0 = vcmp.ge.f32.partialorder %v10507_v25, 0.0  ;;  %v11059_v40 = vmul.f32 0.2, %v10507_v25  ;;  %v15629_v57 = vpop.f32.mrb[136].mxu1  ;;  %v11334_v27 = vsel %vm10782_vm14, %v10506_v8, %v11058_v47  ;;  %v8739_v8 = vsel %vm8488_vm1, %v8736_v7, %v8738_v37  ;;  %v17742_v7 = vld [vmem:[%s20896_s0 + $0x3e0] sm:$0xff]  }
 0x42e   :  { %vm10781_vm2 = vcmp.ge.f32.partialorder %v10505_v50, 0.0  ;;  %v11057_v51 = vmul.f32 0.2, %v10505_v50  ;;  %v16213_v34 = vpop.f32.mrb[136].mxu0  ;;  %v4214_v52 = vpop.f32.mrb[137].mxu1  ;;  %v11332_v15 = vsel %vm10780_vm15, %v10504_v43, %v11056_v20  ;;  %v17741_v43 = vld [vmem:[%s20896_s0 + $0x3d8] sm:$0xff]  }
 0x42f   :  { %v11335_v11 = vsel %vm10783_vm0, %v10507_v25, %v11059_v40  ;;  %v16487_v29 = vadd.f32 %v16213_v34, %v15629_v57  ;;  %v9530_v39 = vpop.f32.mrb[137].mxu0  ;;  %v15630_v0 = vpop.f32.mrb[138].mxu1 }
 0x430   :  { %v14110_v56 = vpack.c.bf16 %v11335_v11, %v11334_v27  ;;  %v11333_v61 = vsel %vm10781_vm2, %v10505_v50, %v11057_v51  ;;  %v16488_v26 = vadd.f32 %v9530_v39, %v4214_v52  ;;  %v16214_v1 = vpop.f32.mrb[138].mxu0  ;;  %v4217_v42 = vpop.f32.mrb[139].mxu1  ;;  %v17743_v50 = vld [vmem:[%s20896_s0 + $0x400] sm:$0xff]   ;;  %v17744_v27 = vld [vmem:[%s20896_s0 + $0x408] sm:$0xff]  }
 0x431   :  { %v14105_v2 = vpack.c.bf16 %v11333_v61, %v11332_v15  ;;  %v10510_v38 = vadd.f32 %v20155_v35, %v16487_v29  ;;  %v16489_v5 = vadd.f32 %v16214_v1, %v15630_v0  ;;  %v9533_v6 = vpop.f32.mrb[139].mxu0  ;;  %v8740_v40 = vrot.slane %v17743_v50, 1 }
 0x432   :  { %14528 = vst [vmem:[%s20898_s3 + $0x218] sm:$0xff] %v14110_v56   ;;  %v10508_v44 = vadd.f32 %v20155_v35, %v16488_v26  ;;  %v16490_v47 = vadd.f32 %v9533_v6, %v4217_v42  ;;  %15736 = vmatmul.mubr.bf16.gmra.mrb[244].mxu1 %v17741_v43  ;;  %v8742_v11 = vrot.slane %v17744_v27, 1 }
 0x433   :  { %14527 = vst [vmem:[%s20898_s3 + $0x210] sm:$0xff] %v14105_v2   ;;  %v11062_v25 = vmul.f32 0.2, %v10510_v38  ;;  %v10511_v20 = vadd.f32 %v20155_v35, %v16489_v5  ;;  %16320 = vmatmul.mubr.bf16.gmra.mrb[244].mxu0 %v8737_v32  ;;  %15739 = vmatprep.mubr.bf16.mxu1 %v17742_v7  ;;  %vm10786_vm3 = vcmp.ge.f32.partialorder %v10510_v38, 0.0  ;;  %v8741_v1 = vsel %vm8488_vm1, %v8738_v37, %v8740_v40 }
 0x434   :  { %v11060_v57 = vmul.f32 0.2, %v10508_v44  ;;  %v10509_v51 = vadd.f32 %v20155_v35, %v16490_v47  ;;  %16323 = vmatprep.mubr.bf16.mxu0 %v8739_v8  ;;  %vm10784_vm4 = vcmp.ge.f32.partialorder %v10508_v44, 0.0 }
 0x435   :  { %vm10787_vm5 = vcmp.ge.f32.partialorder %v10511_v20, 0.0  ;;  %v11063_v34 = vmul.f32 0.2, %v10511_v20  ;;  %v15633_v52 = vpop.f32.mrb[140].mxu1  ;;  %v11338_v32 = vsel %vm10786_vm3, %v10510_v38, %v11062_v25  ;;  %v8743_v38 = vsel %vm8488_vm1, %v8740_v40, %v8742_v11 }
 0x436   :  { %vm10785_vm6 = vcmp.ge.f32.partialorder %v10509_v51, 0.0  ;;  %v11061_v29 = vmul.f32 0.2, %v10509_v51  ;;  %v16217_v39 = vpop.f32.mrb[140].mxu0  ;;  %v4230_v0 = vpop.f32.mrb[141].mxu1  ;;  %v11336_v42 = vsel %vm10784_vm4, %v10508_v44, %v11060_v57  ;;  %v17745_v44 = vld [vmem:[%s20896_s0 + $0x3e8] sm:$0xff]  }
 0x437   :  { %v11339_v15 = vsel %vm10787_vm5, %v10511_v20, %v11063_v34  ;;  %v16491_v56 = vadd.f32 %v16217_v39, %v15633_v52  ;;  %v9546_v61 = vpop.f32.mrb[141].mxu0  ;;  %v15634_v26 = vpop.f32.mrb[142].mxu1  ;;  %v17746_v20 = vld [vmem:[%s20896_s0 + $0x410] sm:$0xff]  }
 0x438   :  { %v14120_v2 = vpack.c.bf16 %v11339_v15, %v11338_v32  ;;  %v11337_v5 = vsel %vm10785_vm6, %v10509_v51, %v11061_v29  ;;  %v16492_v6 = vadd.f32 %v9546_v61, %v4230_v0  ;;  %v16218_v8 = vpop.f32.mrb[142].mxu0  ;;  %v4233_v47 = vpop.f32.mrb[143].mxu1  ;;  %v8744_v57 = vrot.slane %v17746_v20, 1  ;;  %v17747_v34 = vld [vmem:[%s20896_s0 + $0x3f0] sm:$0xff]   ;;  %v17748_v32 = vld [vmem:[%s20896_s0 + $0x418] sm:$0xff]  }
 0x439   :  { %v14115_v43 = vpack.c.bf16 %v11337_v5, %v11336_v42  ;;  %v10514_v7 = vadd.f32 %v20155_v35, %v16491_v56  ;;  %v16493_v50 = vadd.f32 %v16218_v8, %v15634_v26  ;;  %v9549_v27 = vpop.f32.mrb[143].mxu0  ;;  %v8746_v15 = vrot.slane %v17748_v32, 1 }
 0x43a   :  { %14530 = vst [vmem:[%s20898_s3 + $0x228] sm:$0xff] %v14120_v2   ;;  %v10512_v37 = vadd.f32 %v20155_v35, %v16492_v6  ;;  %v16494_v25 = vadd.f32 %v9549_v27, %v4233_v47  ;;  %15740 = vmatmul.mubr.bf16.gmra.mrb[248].mxu1 %v17745_v44  ;;  %v17749_v47 = vld [vmem:[%s20896_s0 + $0x420] sm:$0xff]  }
 0x43b   :  { %14529 = vst [vmem:[%s20898_s3 + $0x220] sm:$0xff] %v14115_v43   ;;  %v11066_v40 = vmul.f32 0.2, %v10514_v7  ;;  %v10515_v51 = vadd.f32 %v20155_v35, %v16493_v50  ;;  %16324 = vmatmul.mubr.bf16.gmra.mrb[248].mxu0 %v8741_v1  ;;  %15743 = vmatprep.mubr.bf16.mxu1 %v17747_v34  ;;  %vm10790_vm7 = vcmp.ge.f32.partialorder %v10514_v7, 0.0  ;;  %v8745_v1 = vsel %vm8488_vm1, %v8742_v11, %v8744_v57 }
 0x43c   :  { %v11064_v52 = vmul.f32 0.2, %v10512_v37  ;;  %v10513_v29 = vadd.f32 %v20155_v35, %v16494_v25  ;;  %16327 = vmatprep.mubr.bf16.mxu0 %v8743_v38  ;;  %vm10788_vm8 = vcmp.ge.f32.partialorder %v10512_v37, 0.0  ;;  %v8748_v43 = vrot.slane %v17749_v47, 1 }
 0x43d   :  { %vm10791_vm9 = vcmp.ge.f32.partialorder %v10515_v51, 0.0  ;;  %v11067_v39 = vmul.f32 0.2, %v10515_v51  ;;  %v15637_v0 = vpop.f32.mrb[144].mxu1  ;;  %v11342_v42 = vsel %vm10790_vm7, %v10514_v7, %v11066_v40 }
 0x43e   :  { %vm10789_vm10 = vcmp.ge.f32.partialorder %v10513_v29, 0.0  ;;  %v11065_v56 = vmul.f32 0.2, %v10513_v29  ;;  %v16221_v61 = vpop.f32.mrb[144].mxu0  ;;  %v4246_v26 = vpop.f32.mrb[145].mxu1  ;;  %v11340_v50 = vsel %vm10788_vm8, %v10512_v37, %v11064_v52  ;;  %v17750_v37 = vld [vmem:[%s20896_s0 + $0x3f8] sm:$0xff]  }
 0x43f   :  { %v11343_v2 = vsel %vm10791_vm9, %v10515_v51, %v11067_v39  ;;  %v16495_v5 = vadd.f32 %v16221_v61, %v15637_v0  ;;  %v9562_v6 = vpop.f32.mrb[145].mxu0  ;;  %v15638_v8 = vpop.f32.mrb[146].mxu1  ;;  %v8747_v51 = vsel %vm8488_vm1, %v8744_v57, %v8746_v15  ;;  %v17751_v52 = vld [vmem:[%s20896_s0 + $0x428] sm:$0xff]  }
 0x440   :  { %v14130_v27 = vpack.c.bf16 %v11343_v2, %v11342_v42  ;;  %v11341_v38 = vsel %vm10789_vm10, %v10513_v29, %v11065_v56  ;;  %v16496_v25 = vadd.f32 %v9562_v6, %v4246_v26  ;;  %v16222_v44 = vpop.f32.mrb[146].mxu0  ;;  %v4249_v20 = vpop.f32.mrb[147].mxu1  ;;  %v8750_v29 = vrot.slane %v17751_v52, 1  ;;  %v17752_v56 = vld [vmem:[%s20896_s0 + $0x400] sm:$0xff]  }
 0x441   :  { %v14125_v34 = vpack.c.bf16 %v11341_v38, %v11340_v50  ;;  %v10518_v11 = vadd.f32 %v20155_v35, %v16495_v5  ;;  %v16497_v7 = vadd.f32 %v16222_v44, %v15638_v8  ;;  %v9565_v40 = vpop.f32.mrb[147].mxu0  ;;  %v8749_v5 = vsel %vm8488_vm1, %v8746_v15, %v8748_v43 }
 0x442   :  { %14532 = vst [vmem:[%s20898_s3 + $0x238] sm:$0xff] %v14130_v27   ;;  %v10516_v39 = vadd.f32 %v20155_v35, %v16496_v25  ;;  %v16498_v0 = vadd.f32 %v9565_v40, %v4249_v20  ;;  %15744 = vmatmul.mubr.bf16.gmra.mrb[252].mxu1 %v17750_v37  ;;  %v8751_v38 = vsel %vm8488_vm1, %v8748_v43, %v8750_v29 }
 0x443   :  { %14531 = vst [vmem:[%s20898_s3 + $0x230] sm:$0xff] %v14125_v34   ;;  %v11070_v57 = vmul.f32 0.2, %v10518_v11  ;;  %v10519_v32 = vadd.f32 %v20155_v35, %v16497_v7  ;;  %16328 = vmatmul.mubr.bf16.gmra.mrb[252].mxu0 %v8745_v1  ;;  %15747 = vmatprep.mubr.bf16.mxu1 %v17752_v56  ;;  %vm10794_vm11 = vcmp.ge.f32.partialorder %v10518_v11, 0.0  ;;  %v17753_v1 = vld [vmem:[%s20896_s0 + $0x430] sm:$0xff]  }
 0x444   :  { %vm10792_vm12 = vcmp.ge.f32.partialorder %v10516_v39, 0.0  ;;  %v11068_v61 = vmul.f32 0.2, %v10516_v39  ;;  %v10517_v26 = vadd.f32 %v20155_v35, %v16498_v0  ;;  %16331 = vmatprep.mubr.bf16.mxu0 %v8747_v51  ;;  %v8752_v6 = vrot.slane %v17753_v1, 1 }
 0x445   :  { %vm10795_vm13 = vcmp.ge.f32.partialorder %v10519_v32, 0.0  ;;  %v11071_v42 = vmul.f32 0.2, %v10519_v32  ;;  %v15641_v2 = vpop.f32.mrb[40].mxu1  ;;  %v11346_v25 = vsel %vm10794_vm11, %v10518_v11, %v11070_v57 }
 0x446   :  { %vm10793_vm14 = vcmp.ge.f32.partialorder %v10517_v26, 0.0  ;;  %v11069_v8 = vmul.f32 0.2, %v10517_v26  ;;  %v4271_v47 = vadd.f32 %v15641_v2, %v18955_v9  ;;  %v16225_v50 = vpop.f32.mrb[0].mxu0  ;;  %v4262_v27 = vpop.f32.mrb[41].mxu1  ;;  %v11344_v44 = vsel %vm10792_vm12, %v10516_v39, %v11068_v61  ;;  %v17756_v61 = vld [vmem:[%s20896_s0 + $0x410] sm:$0xff]  }
 0x447   :  { %v11347_v20 = vsel %vm10795_vm13, %v10519_v32, %v11071_v42  ;;  %v4263_v15 = vadd.f32 %v4262_v27, %v18964_v14  ;;  %v9578_v34 = vpop.f32.mrb[1].mxu0  ;;  %v15642_v7 = vpop.f32.mrb[42].mxu1  ;;  %v20446_v14 = vld [vmem:[%s20896_s0 + $0x438] sm:$0xff]   ;;  %v8753_v42 = vsel %vm8488_vm1, %v8750_v29, %v8752_v6 }
 0x448   :  { %v14140_v40 = vpack.c.bf16 %v11347_v20, %v11346_v25  ;;  %v11345_v51 = vsel %vm10793_vm14, %v10517_v26, %v11069_v8  ;;  %v8341_v0 = vadd.f32 %v18962_v13, %v4271_v47  ;;  %v4274_v37 = vadd.f32 %v15642_v7, %v18968_v17  ;;  %v16226_v9 = vpop.f32.mrb[2].mxu0  ;;  %v4265_v52 = vpop.f32.mrb[43].mxu1 }
 0x449   :  { %v14135_v56 = vpack.c.bf16 %v11345_v51, %v11344_v44  ;;  %v8339_v43 = vadd.f32 %v18966_v16, %v4263_v15  ;;  %v4266_v11 = vadd.f32 %v4265_v52, %v18974_v23  ;;  %v9581_v57 = vpop.f32.mrb[3].mxu0  ;;  %v8754_v39 = vrot.slane %v20446_v14, 1  ;;  %v17755_v16 = vld [vmem:[%s20896_s0 + $0x408] sm:$0xff]  }
 0x44a   :  { %14534 = vst [vmem:[%s20898_s3 + $0x248] sm:$0xff] %v14140_v40   ;;  %v10239_v13 = vadd.f32 %v16225_v50, %v8341_v0  ;;  %v8342_v17 = vadd.f32 %v18972_v22, %v4274_v37  ;;  %15748 = vmatmul.mubr.bf16.gmra.mrb[148].mxu1 %v17755_v16 }
 0x44b   :  { %14533 = vst [vmem:[%s20898_s3 + $0x240] sm:$0xff] %v14135_v56   ;;  %v10237_v23 = vadd.f32 %v9578_v34, %v8339_v43  ;;  %v8340_v32 = vadd.f32 %v18978_v28, %v4266_v11  ;;  %16332 = vmatmul.mubr.bf16.gmra.mrb[148].mxu0 %v8749_v5  ;;  %15751 = vmatprep.mubr.bf16.mxu1 %v17756_v61  ;;  %v20472_v5 = vld [vmem:[%s20896_s0 + $0x440] sm:$0xff]  }
 0x44c   :  { %v10522_v22 = vadd.f32 %v20155_v35, %v10239_v13  ;;  %v10240_v26 = vadd.f32 %v16226_v9, %v8342_v17  ;;  %16335 = vmatprep.mubr.bf16.mxu0 %v8751_v38  ;;  %v8755_v28 = vsel %vm8488_vm1, %v8752_v6, %v8754_v39  ;;  %v8756_v47 = vrot.slane %v20472_v5, 1  ;;  %v17758_v13 = vld [vmem:[%s20896_s0 + $0x418] sm:$0xff]  }
 0x44d   :  { %v10520_v2 = vadd.f32 %v20155_v35, %v10237_v23  ;;  %v10238_v1 = vadd.f32 %v9581_v57, %v8340_v32  ;;  %v15645_v8 = vpop.f32.mrb[44].mxu1 }
 0x44e   :  { %vm10798_vm15 = vcmp.ge.f32.partialorder %v10522_v22, 0.0  ;;  %v11074_v50 = vmul.f32 0.2, %v10522_v22  ;;  %v10523_v29 = vadd.f32 %v20155_v35, %v10240_v26  ;;  %v4287_v27 = vadd.f32 %v15645_v8, %v18993_v41  ;;  %v16229_v38 = vpop.f32.mrb[4].mxu0  ;;  %v4278_v25 = vpop.f32.mrb[45].mxu1 }
 0x44f   :  { %vm10796_vm0 = vcmp.ge.f32.partialorder %v10520_v2, 0.0  ;;  %v11072_v44 = vmul.f32 0.2, %v10520_v2  ;;  %v10521_v20 = vadd.f32 %v20155_v35, %v10238_v1  ;;  %v4279_v6 = vadd.f32 %v4278_v25, %v19002_v46  ;;  %v9594_v15 = vpop.f32.mrb[5].mxu0  ;;  %v15646_v34 = vpop.f32.mrb[46].mxu1  ;;  %v20508_v1 = vld [vmem:[%s20896_s0 + $0x450] sm:$0xff]  }
 0x450   :  { %v11350_v7 = vsel %vm10798_vm15, %v10522_v22, %v11074_v50  ;;  %vm10799_vm2 = vcmp.ge.f32.partialorder %v10523_v29, 0.0  ;;  %v11075_v40 = vmul.f32 0.2, %v10523_v29  ;;  %v8345_v51 = vadd.f32 %v19000_v45, %v4287_v27  ;;  %v16230_v0 = vpop.f32.mrb[6].mxu0  ;;  %v4281_v37 = vpop.f32.mrb[47].mxu1 }
 0x451   :  { %v11348_v9 = vsel %vm10796_vm0, %v10520_v2, %v11072_v44  ;;  %vm10797_vm3 = vcmp.ge.f32.partialorder %v10521_v20, 0.0  ;;  %v11073_v41 = vmul.f32 0.2, %v10521_v20  ;;  %v8343_v52 = vadd.f32 %v19004_v48, %v4279_v6  ;;  %v9597_v56 = vpop.f32.mrb[7].mxu0  ;;  %v17759_v48 = vld [vmem:[%s20896_s0 + $0x420] sm:$0xff]  }
 0x452   :  { %v11351_v43 = vsel %vm10799_vm2, %v10523_v29, %v11075_v40  ;;  %v10243_v11 = vadd.f32 %v16229_v38, %v8345_v51  ;;  %v4290_v57 = vadd.f32 %v15646_v34, %v19006_v49  ;;  %v4282_v46 = vadd.f32 %v4281_v37, %v19013_v55  ;;  %15752 = vmatmul.mubr.bf16.gmra.mrb[152].mxu1 %v17758_v13  ;;  %v20492_v49 = vld [vmem:[%s20896_s0 + $0x448] sm:$0xff]   ;;  %v20522_v25 = vld [vmem:[%s20897_s2] ss:$0 sm:$0xff] }
 0x453   :  { %v14150_v45 = vpack.c.bf16 %v11351_v43, %v11350_v7  ;;  %v11349_v17 = vsel %vm10797_vm3, %v10521_v20, %v11073_v41  ;;  %v10241_v16 = vadd.f32 %v9594_v15, %v8343_v52  ;;  %16336 = vmatmul.mubr.bf16.gmra.mrb[152].mxu0 %v8753_v42  ;;  %15755 = vmatprep.mubr.bf16.mxu1 %v17759_v48  ;;  %v8758_v55 = vrot.slane %v20492_v49, 1  ;;  %v17763_v37 = vld [vmem:[%s20896_s0 + $0x428] sm:$0xff]   ;;  %v17765_v43 = vld [vmem:[%s20896_s0 + $0x458] sm:$0xff]  }
 0x454   :  { %v14145_v23 = vpack.c.bf16 %v11349_v17, %v11348_v9  ;;  %v10526_v32 = vadd.f32 %v20155_v35, %v10243_v11  ;;  %v8346_v61 = vadd.f32 %v19011_v54, %v4290_v57  ;;  %v8344_v22 = vadd.f32 %v19018_v60, %v4282_v46  ;;  %16339 = vmatprep.mubr.bf16.mxu0 %v8755_v28 }
 0x455   :  { %14536 = vst [vmem:[%s20898_s3 + $0x258] sm:$0xff] %v14150_v45   ;;  %v10524_v26 = vadd.f32 %v20155_v35, %v10241_v16  ;;  %v15649_v42 = vpop.f32.mrb[48].mxu1  ;;  %v8757_v2 = vsel %vm8488_vm1, %v8754_v39, %v8756_v47  ;;  %v8760_v54 = vrot.slane %v20508_v1, 1  ;;  %v8759_v27 = vsel %vm8488_vm1, %v8756_v47, %v8758_v55 }
 0x456   :  { %14535 = vst [vmem:[%s20898_s3 + $0x250] sm:$0xff] %v14145_v23   ;;  %vm10802_vm4 = vcmp.ge.f32.partialorder %v10526_v32, 0.0  ;;  %v11078_v60 = vmul.f32 0.2, %v10526_v32  ;;  %v10244_v8 = vadd.f32 %v16230_v0, %v8346_v61  ;;  %v10242_v35 = vadd.f32 %v9597_v56, %v8344_v22  ;;  %v16233_v28 = vpop.f32.mrb[8].mxu0  ;;  %v4294_v5 = vpop.f32.mrb[49].mxu1 }
 0x457   :  { %vm10800_vm5 = vcmp.ge.f32.partialorder %v10524_v26, 0.0  ;;  %v4303_v14 = vadd.f32 %v15649_v42, %v19031_v10  ;;  %v4295_v39 = vadd.f32 %v4294_v5, %v19038_v19  ;;  %v9610_v50 = vpop.f32.mrb[9].mxu0  ;;  %v15650_v29 = vpop.f32.mrb[50].mxu1  ;;  %v11076_v38 = vmul.f32 0.2, %v10524_v26  ;;  %v17764_v56 = vld [vmem:[%s20896_s0 + $0x430] sm:$0xff]  }
 0x458   :  { %v10527_v44 = vadd.f32 %v20522_v25, %v10244_v8  ;;  %v10525_v20 = vadd.f32 %v20522_v25, %v10242_v35  ;;  %v4306_v10 = vadd.f32 %v15650_v29, %v19042_v24  ;;  %v16234_v6 = vpop.f32.mrb[10].mxu0  ;;  %v4297_v19 = vpop.f32.mrb[51].mxu1  ;;  %v11354_v15 = vsel %vm10802_vm4, %v10526_v32, %v11078_v60 }
 0x459   :  { %v8349_v34 = vadd.f32 %v19036_v18, %v4303_v14  ;;  %v8347_v47 = vadd.f32 %v19040_v21, %v4295_v39  ;;  %v4298_v7 = vadd.f32 %v4297_v19, %v19049_v31  ;;  %v9613_v40 = vpop.f32.mrb[11].mxu0  ;;  %v11352_v21 = vsel %vm10800_vm5, %v10524_v26, %v11076_v38 }
 0x45a   :  { %vm10803_vm6 = vcmp.ge.f32.partialorder %v10527_v44, 0.0  ;;  %v11079_v51 = vmul.f32 0.2, %v10527_v44  ;;  %vm10801_vm7 = vcmp.ge.f32.partialorder %v10525_v20, 0.0  ;;  %v11077_v0 = vmul.f32 0.2, %v10525_v20  ;;  %15756 = vmatmul.mubr.bf16.gmra.mrb[156].mxu1 %v17763_v37 }
 0x45b   :  { %v10247_v24 = vadd.f32 %v16233_v28, %v8349_v34  ;;  %v10245_v9 = vadd.f32 %v9610_v50, %v8347_v47  ;;  %v8350_v41 = vadd.f32 %v19047_v30, %v4306_v10  ;;  %v8348_v18 = vadd.f32 %v19053_v36, %v4298_v7  ;;  %16340 = vmatmul.mubr.bf16.gmra.mrb[156].mxu0 %v8757_v2  ;;  %v17768_v10 = vld [vmem:[%s20896_s0 + $0x440] sm:$0xff]  }
 0x45c   :  { %v11355_v31 = vsel %vm10803_vm6, %v10527_v44, %v11079_v51  ;;  %v11353_v52 = vsel %vm10801_vm7, %v10525_v20, %v11077_v0  ;;  %15759 = vmatprep.mubr.bf16.mxu1 %v17764_v56  ;;  %16343 = vmatprep.mubr.bf16.mxu0 %v8759_v27  ;;  %v8762_v11 = vrot.slane %v17765_v43, 1  ;;  %v8761_v32 = vsel %vm8488_vm1, %v8758_v55, %v8760_v54 }
 0x45d   :  { %v14160_v57 = vpack.c.bf16 %v11355_v31, %v11354_v15  ;;  %v14155_v30 = vpack.c.bf16 %v11353_v52, %v11352_v21  ;;  %v10530_v36 = vadd.f32 %v20522_v25, %v10247_v24  ;;  %v10528_v46 = vadd.f32 %v20522_v25, %v10245_v9  ;;  %v15653_v13 = vpop.f32.mrb[52].mxu1  ;;  %v20906_v24 = vld [vmem:[#allocation3_spill] sm:$0xff]  ;;  %v20907_v21 = vld [vmem:[#allocation2_spill] sm:$0xff]  ;;  %v20908_v52 = vld [vmem:[#allocation5_spill] sm:$0xff] }
 0x45e   :  { %v10248_v45 = vadd.f32 %v16234_v6, %v8350_v41  ;;  %v10246_v17 = vadd.f32 %v9613_v40, %v8348_v18  ;;  %v4319_v16 = vadd.f32 %v15653_v13, %v19062_v53  ;;  %v16237_v48 = vpop.f32.mrb[12].mxu0  ;;  %v4310_v23 = vpop.f32.mrb[53].mxu1  ;;  %v17766_v53 = vld [vmem:[%s20896_s0 + $0x460] ss:$0 sps:$4 sm:$0x11]   ;;  %v8763_v39 = vsel %vm8488_vm1, %v8760_v54, %v8762_v11 }
 0x45f   :  { %14538 = vst [vmem:[%s20898_s3 + $0x268] sm:$0xff] %v14160_v57   ;;  %14537 = vst [vmem:[%s20898_s3 + $0x260] sm:$0xff] %v14155_v30   ;;  %vm10806_vm8 = vcmp.ge.f32.partialorder %v10530_v36, 0.0  ;;  %v11082_v61 = vmul.f32 0.2, %v10530_v36  ;;  %v8764_v26 = vrot.slane %v17766_v53, 1  ;;  %v4311_v2 = vadd.f32 %v4310_v23, %v19066_v59 }
 0x460   :  { %v11080_v22 = vmul.f32 0.2, %v10528_v46  ;;  %v10531_v49 = vadd.f32 %v20522_v25, %v10248_v45  ;;  %v10529_v55 = vadd.f32 %v20522_v25, %v10246_v17  ;;  %v8353_v42 = vadd.f32 %v19064_v58, %v4319_v16  ;;  %v9626_v60 = vpop.f32.mrb[13].mxu0  ;;  %v15654_v8 = vpop.f32.mrb[54].mxu1  ;;  %v17767_v58 = vld [vmem:[%s20896_s0 + $0x438] sm:$0xff]  }
 0x461   :  { %v11358_v35 = vsel %vm10806_vm8, %v10530_v36, %v11082_v61  ;;  %vm10804_vm9 = vcmp.ge.f32.partialorder %v10528_v46, 0.0  ;;  %v4322_v28 = vadd.f32 %v15654_v8, %v19073_v63  ;;  %v16238_v5 = vpop.f32.mrb[14].mxu0  ;;  %v4313_v14 = vpop.f32.mrb[55].mxu1  ;;  %v8351_v27 = vadd.f32 %v19071_v62, %v4311_v2  ;;  %v20909_v36 = vld [vmem:[#allocation4_spill] sm:$0xff] }
 0x462   :  { %vm10807_vm10 = vcmp.ge.f32.partialorder %v10531_v49, 0.0  ;;  %v11083_v50 = vmul.f32 0.2, %v10531_v49  ;;  %vm10805_vm11 = vcmp.ge.f32.partialorder %v10529_v55, 0.0  ;;  %v11081_v29 = vmul.f32 0.2, %v10529_v55  ;;  %15760 = vmatmul.mubr.bf16.gmra.mrb[160].mxu1 %v17767_v58 }
 0x463   :  { %v10251_v59 = vadd.f32 %v16237_v48, %v8353_v42  ;;  %v8354_v63 = vadd.f32 %v19076_v3, %v4322_v28  ;;  %v4314_v38 = vadd.f32 %v4313_v14, %v19078_v4  ;;  %v9629_v44 = vpop.f32.mrb[15].mxu0  ;;  %16344 = vmatmul.mubr.bf16.gmra.mrb[160].mxu0 %v8761_v32  ;;  %v11356_v1 = vsel %vm10804_vm9, %v10528_v46, %v11080_v22  ;;  %v17769_v48 = vld [vmem:[%s20896_s0 + $0x448] sm:$0xff]   ;;  %v20910_v32 = vld [vmem:[#allocation6_spill] sm:$0xff]  ;;  %v20912_v8 = vld [vmem:[#allocation8_spill] sm:$0xff] }
 0x464   :  { %v11359_v54 = vsel %vm10807_vm10, %v10531_v49, %v11083_v50  ;;  %v11357_v20 = vsel %vm10805_vm11, %v10529_v55, %v11081_v29  ;;  %15763 = vmatprep.mubr.bf16.mxu1 %v17768_v10  ;;  %16347 = vmatprep.mubr.bf16.mxu0 %v8763_v39  ;;  %v10249_v15 = vadd.f32 %v9626_v60, %v8351_v27  ;;  %v20911_v22 = vld [vmem:[#allocation7_spill] sm:$0xff] }
 0x465   :  { %v14170_v6 = vpack.c.bf16 %v11359_v54, %v11358_v35  ;;  %v14165_v19 = vpack.c.bf16 %v11357_v20, %v11356_v1  ;;  %v10534_v62 = vadd.f32 %v20522_v25, %v10251_v59  ;;  %v15657_v3 = vpop.f32.mrb[56].mxu1  ;;  %v10252_v34 = vadd.f32 %v16238_v5, %v8354_v63 }
 0x466   :  { %v8352_v4 = vadd.f32 %v19082_v12, %v4314_v38  ;;  %v4335_v47 = vadd.f32 %v15657_v3, %v19088_v33  ;;  %v16241_v7 = vpop.f32.mrb[16].mxu0  ;;  %v4326_v40 = vpop.f32.mrb[57].mxu1  ;;  %v8765_v51 = vsel %vm8488_vm1, %v8762_v11, %v8764_v26  ;;  %v10532_v37 = vadd.f32 %v20522_v25, %v10249_v15 }
 0x467   :  { %14540 = vst [vmem:[%s20898_s3 + $0x278] sm:$0xff] %v14170_v6   ;;  %14539 = vst [vmem:[%s20898_s3 + $0x270] sm:$0xff] %v14165_v19   ;;  %vm10810_vm12 = vcmp.ge.f32.partialorder %v10534_v62, 0.0  ;;  %v11086_v0 = vmul.f32 0.2, %v10534_v62  ;;  %v4327_v12 = vadd.f32 %v4326_v40, %v20906_v24  ;;  %v9642_v9 = vpop.f32.mrb[17].mxu0  ;;  %v10535_v41 = vadd.f32 %v20522_v25, %v10252_v34 }
 0x468   :  { %v15658_v33 = vpop.f32.mrb[58].mxu1  ;;  %v10250_v18 = vadd.f32 %v9629_v44, %v8352_v4  ;;  %v8357_v31 = vadd.f32 %v20907_v21, %v4335_v47  ;;  %v16242_v43 = vpop.f32.mrb[18].mxu0  ;;  %v11084_v30 = vmul.f32 0.2, %v10532_v37  ;;  %vm10808_vm13 = vcmp.ge.f32.partialorder %v10532_v37, 0.0 }
 0x469   :  { %v4338_v56 = vadd.f32 %v15658_v33, %v20908_v52  ;;  %v4329_v11 = vpop.f32.mrb[59].mxu1  ;;  %v11362_v57 = vsel %vm10810_vm12, %v10534_v62, %v11086_v0  ;;  %v8355_v46 = vadd.f32 %v20909_v36, %v4327_v12  ;;  %v9645_v13 = vpop.f32.mrb[19].mxu0  ;;  %vm10811_vm1 = vcmp.ge.f32.partialorder %v10535_v41, 0.0 }
 0x46a   :  { %v11087_v45 = vmul.f32 0.2, %v10535_v41  ;;  %v10533_v17 = vadd.f32 %v20522_v25, %v10250_v18  ;;  %v10255_v16 = vadd.f32 %v16241_v7, %v8357_v31  ;;  %15764 = vmatmul.mubr.bf16.gmra.mrb[164].mxu1 %v17769_v48  ;;  %v4330_v53 = vadd.f32 %v4329_v11, %v20911_v22 }
 0x46b   :  { %v10253_v23 = vadd.f32 %v9642_v9, %v8355_v46  ;;  %v8358_v61 = vadd.f32 %v20910_v32, %v4338_v56  ;;  %16348 = vmatmul.mubr.bf16.gmra.mrb[164].mxu0 %v8765_v51  ;;  %v11360_v5 = vsel %vm10808_vm13, %v10532_v37, %v11084_v30 }
 0x46c   :  { %v11363_v26 = vsel %vm10811_vm1, %v10535_v41, %v11087_v45  ;;  %vm10809_vm14 = vcmp.ge.f32.partialorder %v10533_v17, 0.0  ;;  %v11085_v49 = vmul.f32 0.2, %v10533_v17  ;;  %v10538_v55 = vadd.f32 %v20522_v25, %v10255_v16 }
 0x46d   :  { %v14180_v42 = vpack.c.bf16 %v11363_v26, %v11362_v57  ;;  %v10536_v2 = vadd.f32 %v20522_v25, %v10253_v23  ;;  %v10256_v60 = vadd.f32 %v16242_v43, %v8358_v61  ;;  %v8356_v35 = vadd.f32 %v20912_v8, %v4330_v53  ;;  %v15661_v28 = vpop.f32.mrb[168].mxu1 }
 0x46e   :  { %v11361_v14 = vsel %vm10809_vm14, %v10533_v17, %v11085_v49  ;;  %v16245_v39 = vpop.f32.mrb[168].mxu0  ;;  %v4342_v50 = vpop.f32.mrb[169].mxu1  ;;  %vm10814_vm15 = vcmp.ge.f32.partialorder %v10538_v55, 0.0  ;;  %v11090_v58 = vmul.f32 0.2, %v10538_v55 }
 0x46f   :  { %14542 = vst [vmem:[%s20898_s3 + $0x288] sm:$0xff] %v14180_v42   ;;  %v14175_v29 = vpack.c.bf16 %v11361_v14, %v11360_v5  ;;  %v10539_v59 = vadd.f32 %v20522_v25, %v10256_v60  ;;  %v9658_v27 = vpop.f32.mrb[169].mxu0  ;;  %v15662_v63 = vpop.f32.mrb[170].mxu1  ;;  %vm10812_vm0 = vcmp.ge.f32.partialorder %v10536_v2, 0.0  ;;  %v10254_v38 = vadd.f32 %v9645_v13, %v8356_v35 }
 0x470   :  { %v16559_v44 = vadd.f32 %v16245_v39, %v15661_v28  ;;  %v16560_v1 = vadd.f32 %v9658_v27, %v4342_v50  ;;  %v16246_v54 = vpop.f32.mrb[170].mxu0  ;;  %v4345_v20 = vpop.f32.mrb[171].mxu1  ;;  %v11088_v10 = vmul.f32 0.2, %v10536_v2  ;;  %v11366_v47 = vsel %vm10814_vm15, %v10538_v55, %v11090_v58 }
 0x471   :  { %14541 = vst [vmem:[%s20898_s3 + $0x280] sm:$0xff] %v14175_v29   ;;  %vm10815_vm2 = vcmp.ge.f32.partialorder %v10539_v59, 0.0  ;;  %v11091_v6 = vmul.f32 0.2, %v10539_v59  ;;  %v16561_v19 = vadd.f32 %v16246_v54, %v15662_v63  ;;  %v9661_v62 = vpop.f32.mrb[171].mxu0  ;;  %v10537_v15 = vadd.f32 %v20522_v25, %v10254_v38 }
 0x472   :  { %v10542_v3 = vadd.f32 %v20522_v25, %v16559_v44  ;;  %v10540_v34 = vadd.f32 %v20522_v25, %v16560_v1  ;;  %v16562_v4 = vadd.f32 %v9661_v62, %v4345_v20  ;;  %v11364_v37 = vsel %vm10812_vm0, %v10536_v2, %v11088_v10 }
 0x473   :  { %v11367_v7 = vsel %vm10815_vm2, %v10539_v59, %v11091_v6  ;;  %v10543_v40 = vadd.f32 %v20522_v25, %v16561_v19  ;;  %vm10813_vm3 = vcmp.ge.f32.partialorder %v10537_v15, 0.0  ;;  %v11089_v0 = vmul.f32 0.2, %v10537_v15 }
 0x474   :  { %v14190_v51 = vpack.c.bf16 %v11367_v7, %v11366_v47  ;;  %vm10818_vm4 = vcmp.ge.f32.partialorder %v10542_v3, 0.0  ;;  %v11094_v24 = vmul.f32 0.2, %v10542_v3  ;;  %v11092_v9 = vmul.f32 0.2, %v10540_v34 }
 0x475   :  { %vm10819_vm5 = vcmp.ge.f32.partialorder %v10543_v40, 0.0  ;;  %v11365_v12 = vsel %vm10813_vm3, %v10537_v15, %v11089_v0  ;;  %v11095_v33 = vmul.f32 0.2, %v10543_v40  ;;  %v10541_v41 = vadd.f32 %v20522_v25, %v16562_v4  ;;  %v15665_v18 = vpop.f32.mrb[172].mxu1 }
 0x476   :  { %14544 = vst [vmem:[%s20898_s3 + $0x298] sm:$0xff] %v14190_v51   ;;  %v16249_v21 = vpop.f32.mrb[172].mxu0  ;;  %v14185_v31 = vpack.c.bf16 %v11365_v12, %v11364_v37  ;;  %v11370_v52 = vsel %vm10818_vm4, %v10542_v3, %v11094_v24  ;;  %vm10816_vm6 = vcmp.ge.f32.partialorder %v10540_v34, 0.0  ;;  %v4358_v43 = vpop.f32.mrb[173].mxu1 }
 0x477   :  { %v16563_v56 = vadd.f32 %v16249_v21, %v15665_v18  ;;  %v9674_v11 = vpop.f32.mrb[173].mxu0  ;;  %v11371_v57 = vsel %vm10819_vm5, %v10543_v40, %v11095_v33  ;;  %vm10817_vm7 = vcmp.ge.f32.partialorder %v10541_v41, 0.0  ;;  %v11093_v30 = vmul.f32 0.2, %v10541_v41  ;;  %v15666_v46 = vpop.f32.mrb[174].mxu1 }
 0x478   :  { %v16564_v36 = vadd.f32 %v9674_v11, %v4358_v43  ;;  %v16250_v13 = vpop.f32.mrb[174].mxu0  ;;  %14543 = vst [vmem:[%s20898_s3 + $0x290] sm:$0xff] %v14185_v31   ;;  %v14200_v45 = vpack.c.bf16 %v11371_v57, %v11370_v52  ;;  %v4361_v48 = vpop.f32.mrb[175].mxu1  ;;  %v11368_v32 = vsel %vm10816_vm6, %v10540_v34, %v11092_v9 }
 0x479   :  { %v10546_v17 = vadd.f32 %v20522_v25, %v16563_v56  ;;  %v16565_v16 = vadd.f32 %v16250_v13, %v15666_v46  ;;  %v9677_v23 = vpop.f32.mrb[175].mxu0  ;;  %v11369_v61 = vsel %vm10817_vm7, %v10541_v41, %v11093_v30 }
 0x47a   :  { %v10544_v22 = vadd.f32 %v20522_v25, %v16564_v36  ;;  %v16566_v53 = vadd.f32 %v9677_v23, %v4361_v48  ;;  %14546 = vst [vmem:[%s20898_s3 + $0x2a8] sm:$0xff] %v14200_v45   ;;  %v14195_v26 = vpack.c.bf16 %v11369_v61, %v11368_v32 }
 0x47b   :  { %v11098_v49 = vmul.f32 0.2, %v10546_v17  ;;  %v10547_v55 = vadd.f32 %v20522_v25, %v16565_v16  ;;  %vm10822_vm8 = vcmp.ge.f32.partialorder %v10546_v17, 0.0 }
 0x47c   :  { %v11096_v42 = vmul.f32 0.2, %v10544_v22  ;;  %v10545_v2 = vadd.f32 %v20522_v25, %v16566_v53  ;;  %14545 = vst [vmem:[%s20898_s3 + $0x2a0] sm:$0xff] %v14195_v26   ;;  %vm10820_vm9 = vcmp.ge.f32.partialorder %v10544_v22, 0.0 }
 0x47d   :  { %vm10823_vm10 = vcmp.ge.f32.partialorder %v10547_v55, 0.0  ;;  %v11099_v60 = vmul.f32 0.2, %v10547_v55  ;;  %v15669_v8 = vpop.f32.mrb[176].mxu1  ;;  %v11374_v14 = vsel %vm10822_vm8, %v10546_v17, %v11098_v49 }
 0x47e   :  { %vm10821_vm11 = vcmp.ge.f32.partialorder %v10545_v2, 0.0  ;;  %v11097_v35 = vmul.f32 0.2, %v10545_v2  ;;  %v16253_v28 = vpop.f32.mrb[176].mxu0  ;;  %v4374_v5 = vpop.f32.mrb[177].mxu1  ;;  %v11372_v59 = vsel %vm10820_vm9, %v10544_v22, %v11096_v42 }
 0x47f   :  { %v11375_v39 = vsel %vm10823_vm10, %v10547_v55, %v11099_v60  ;;  %v16567_v50 = vadd.f32 %v16253_v28, %v15669_v8  ;;  %v9690_v29 = vpop.f32.mrb[177].mxu0  ;;  %v15670_v58 = vpop.f32.mrb[178].mxu1 }
 0x480   :  { %v14210_v27 = vpack.c.bf16 %v11375_v39, %v11374_v14  ;;  %v11373_v63 = vsel %vm10821_vm11, %v10545_v2, %v11097_v35  ;;  %v16568_v38 = vadd.f32 %v9690_v29, %v4374_v5  ;;  %v16254_v44 = vpop.f32.mrb[178].mxu0  ;;  %v4377_v1 = vpop.f32.mrb[179].mxu1 }
 0x481   :  { %v14205_v54 = vpack.c.bf16 %v11373_v63, %v11372_v59  ;;  %v10550_v20 = vadd.f32 %v20522_v25, %v16567_v50  ;;  %v16569_v10 = vadd.f32 %v16254_v44, %v15670_v58  ;;  %v9693_v6 = vpop.f32.mrb[179].mxu0 }
 0x482   :  { %14548 = vst [vmem:[%s20898_s3 + $0x2b8] sm:$0xff] %v14210_v27   ;;  %v10548_v19 = vadd.f32 %v20522_v25, %v16568_v38  ;;  %v16570_v62 = vadd.f32 %v9693_v6, %v4377_v1 }
 0x483   :  { %14547 = vst [vmem:[%s20898_s3 + $0x2b0] sm:$0xff] %v14205_v54   ;;  %v11102_v15 = vmul.f32 0.2, %v10550_v20  ;;  %v10551_v3 = vadd.f32 %v20522_v25, %v16569_v10  ;;  %vm10826_vm12 = vcmp.ge.f32.partialorder %v10550_v20, 0.0 }
 0x484   :  { %v11100_v34 = vmul.f32 0.2, %v10548_v19  ;;  %v10549_v4 = vadd.f32 %v20522_v25, %v16570_v62  ;;  %vm10824_vm1 = vcmp.ge.f32.partialorder %v10548_v19, 0.0 }
 0x485   :  { %vm10827_vm13 = vcmp.ge.f32.partialorder %v10551_v3, 0.0  ;;  %v11103_v47 = vmul.f32 0.2, %v10551_v3  ;;  %v15673_v7 = vpop.f32.mrb[180].mxu1  ;;  %v11378_v37 = vsel %vm10826_vm12, %v10550_v20, %v11102_v15 }
 0x486   :  { %vm10825_vm14 = vcmp.ge.f32.partialorder %v10549_v4, 0.0  ;;  %v11101_v40 = vmul.f32 0.2, %v10549_v4  ;;  %v16257_v51 = vpop.f32.mrb[180].mxu0  ;;  %v4390_v0 = vpop.f32.mrb[181].mxu1  ;;  %v11376_v41 = vsel %vm10824_vm1, %v10548_v19, %v11100_v34 }
 0x487   :  { %v11379_v24 = vsel %vm10827_vm13, %v10551_v3, %v11103_v47  ;;  %v16571_v12 = vadd.f32 %v16257_v51, %v15673_v7  ;;  %v9706_v9 = vpop.f32.mrb[181].mxu0  ;;  %v15674_v33 = vpop.f32.mrb[182].mxu1 }
 0x488   :  { %v14220_v18 = vpack.c.bf16 %v11379_v24, %v11378_v37  ;;  %v11377_v21 = vsel %vm10825_vm14, %v10549_v4, %v11101_v40  ;;  %v16572_v31 = vadd.f32 %v9706_v9, %v4390_v0  ;;  %v16258_v52 = vpop.f32.mrb[182].mxu0  ;;  %v4393_v56 = vpop.f32.mrb[183].mxu1 }
 0x489   :  { %v14215_v43 = vpack.c.bf16 %v11377_v21, %v11376_v41  ;;  %v10554_v11 = vadd.f32 %v20522_v25, %v16571_v12  ;;  %v16573_v57 = vadd.f32 %v16258_v52, %v15674_v33  ;;  %v9709_v30 = vpop.f32.mrb[183].mxu0 }
 0x48a   :  { %14550 = vst [vmem:[%s20898_s3 + $0x2c8] sm:$0xff] %v14220_v18   ;;  %v10552_v36 = vadd.f32 %v20522_v25, %v16572_v31  ;;  %v16574_v46 = vadd.f32 %v9709_v30, %v4393_v56 }
 0x48b   :  { %14549 = vst [vmem:[%s20898_s3 + $0x2c0] sm:$0xff] %v14215_v43   ;;  %v11106_v13 = vmul.f32 0.2, %v10554_v11  ;;  %v10555_v45 = vadd.f32 %v20522_v25, %v16573_v57  ;;  %vm10830_vm15 = vcmp.ge.f32.partialorder %v10554_v11, 0.0 }
 0x48c   :  { %v11104_v17 = vmul.f32 0.2, %v10552_v36  ;;  %v10553_v16 = vadd.f32 %v20522_v25, %v16574_v46  ;;  %vm10828_vm0 = vcmp.ge.f32.partialorder %v10552_v36, 0.0 }
 0x48d   :  { %vm10831_vm2 = vcmp.ge.f32.partialorder %v10555_v45, 0.0  ;;  %v11107_v48 = vmul.f32 0.2, %v10555_v45  ;;  %v15677_v23 = vpop.f32.mrb[184].mxu1  ;;  %v11382_v53 = vsel %vm10830_vm15, %v10554_v11, %v11106_v13 }
 0x48e   :  { %vm10829_vm3 = vcmp.ge.f32.partialorder %v10553_v16, 0.0  ;;  %v11105_v32 = vmul.f32 0.2, %v10553_v16  ;;  %v16261_v61 = vpop.f32.mrb[184].mxu0  ;;  %v4406_v22 = vpop.f32.mrb[185].mxu1  ;;  %v11380_v2 = vsel %vm10828_vm0, %v10552_v36, %v11104_v17 }
 0x48f   :  { %v11383_v26 = vsel %vm10831_vm2, %v10555_v45, %v11107_v48  ;;  %v16575_v49 = vadd.f32 %v16261_v61, %v15677_v23  ;;  %v9722_v55 = vpop.f32.mrb[185].mxu0  ;;  %v15678_v42 = vpop.f32.mrb[186].mxu1 }
 0x490   :  { %v14230_v60 = vpack.c.bf16 %v11383_v26, %v11382_v53  ;;  %v11381_v8 = vsel %vm10829_vm3, %v10553_v16, %v11105_v32  ;;  %v16576_v35 = vadd.f32 %v9722_v55, %v4406_v22  ;;  %v16262_v28 = vpop.f32.mrb[186].mxu0  ;;  %v4409_v5 = vpop.f32.mrb[187].mxu1 }
 0x491   :  { %v14225_v14 = vpack.c.bf16 %v11381_v8, %v11380_v2  ;;  %v10558_v39 = vadd.f32 %v20522_v25, %v16575_v49  ;;  %v16577_v50 = vadd.f32 %v16262_v28, %v15678_v42  ;;  %v9725_v29 = vpop.f32.mrb[187].mxu0 }
 0x492   :  { %14552 = vst [vmem:[%s20898_s3 + $0x2d8] sm:$0xff] %v14230_v60   ;;  %v10556_v58 = vadd.f32 %v20522_v25, %v16576_v35  ;;  %v16578_v59 = vadd.f32 %v9725_v29, %v4409_v5 }
 0x493   :  { %14551 = vst [vmem:[%s20898_s3 + $0x2d0] sm:$0xff] %v14225_v14   ;;  %v11110_v27 = vmul.f32 0.2, %v10558_v39  ;;  %v10559_v63 = vadd.f32 %v20522_v25, %v16577_v50  ;;  %vm10834_vm4 = vcmp.ge.f32.partialorder %v10558_v39, 0.0 }
 0x494   :  { %v11108_v38 = vmul.f32 0.2, %v10556_v58  ;;  %v10557_v44 = vadd.f32 %v20522_v25, %v16578_v59  ;;  %vm10832_vm5 = vcmp.ge.f32.partialorder %v10556_v58, 0.0 }
 0x495   :  { %vm10835_vm6 = vcmp.ge.f32.partialorder %v10559_v63, 0.0  ;;  %v11111_v1 = vmul.f32 0.2, %v10559_v63  ;;  %v15681_v54 = vpop.f32.mrb[188].mxu1  ;;  %v11386_v19 = vsel %vm10834_vm4, %v10558_v39, %v11110_v27 }
 0x496   :  { %vm10833_vm7 = vcmp.ge.f32.partialorder %v10557_v44, 0.0  ;;  %v11109_v20 = vmul.f32 0.2, %v10557_v44  ;;  %v16265_v10 = vpop.f32.mrb[188].mxu0  ;;  %v4422_v6 = vpop.f32.mrb[189].mxu1  ;;  %v11384_v4 = vsel %vm10832_vm5, %v10556_v58, %v11108_v38 }
 0x497   :  { %v11387_v62 = vsel %vm10835_vm6, %v10559_v63, %v11111_v1  ;;  %v16579_v15 = vadd.f32 %v16265_v10, %v15681_v54  ;;  %v9738_v3 = vpop.f32.mrb[189].mxu0  ;;  %v15682_v34 = vpop.f32.mrb[190].mxu1 }
 0x498   :  { %v14240_v47 = vpack.c.bf16 %v11387_v62, %v11386_v19  ;;  %v11385_v7 = vsel %vm10833_vm7, %v10557_v44, %v11109_v20  ;;  %v16580_v40 = vadd.f32 %v9738_v3, %v4422_v6  ;;  %v16266_v51 = vpop.f32.mrb[190].mxu0  ;;  %v4425_v0 = vpop.f32.mrb[191].mxu1 }
 0x499   :  { %v14235_v37 = vpack.c.bf16 %v11385_v7, %v11384_v4  ;;  %v10562_v24 = vadd.f32 %v20522_v25, %v16579_v15  ;;  %v16581_v12 = vadd.f32 %v16266_v51, %v15682_v34  ;;  %v9741_v9 = vpop.f32.mrb[191].mxu0 }
 0x49a   :  { %14554 = vst [vmem:[%s20898_s3 + $0x2e8] sm:$0xff] %v14240_v47   ;;  %v10560_v33 = vadd.f32 %v20522_v25, %v16580_v40  ;;  %v16582_v41 = vadd.f32 %v9741_v9, %v4425_v0 }
 0x49b   :  { %14553 = vst [vmem:[%s20898_s3 + $0x2e0] sm:$0xff] %v14235_v37   ;;  %v11114_v18 = vmul.f32 0.2, %v10562_v24  ;;  %v10563_v21 = vadd.f32 %v20522_v25, %v16581_v12  ;;  %vm10838_vm8 = vcmp.ge.f32.partialorder %v10562_v24, 0.0 }
 0x49c   :  { %v11112_v31 = vmul.f32 0.2, %v10560_v33  ;;  %v10561_v52 = vadd.f32 %v20522_v25, %v16582_v41  ;;  %vm10836_vm9 = vcmp.ge.f32.partialorder %v10560_v33, 0.0 }
 0x49d   :  { %vm10839_vm10 = vcmp.ge.f32.partialorder %v10563_v21, 0.0  ;;  %v11115_v56 = vmul.f32 0.2, %v10563_v21  ;;  %v15685_v43 = vpop.f32.mrb[192].mxu1  ;;  %v11390_v36 = vsel %vm10838_vm8, %v10562_v24, %v11114_v18 }
 0x49e   :  { %vm10837_vm11 = vcmp.ge.f32.partialorder %v10561_v52, 0.0  ;;  %v11113_v11 = vmul.f32 0.2, %v10561_v52  ;;  %v16269_v57 = vpop.f32.mrb[192].mxu0  ;;  %v4438_v30 = vpop.f32.mrb[193].mxu1  ;;  %v11388_v16 = vsel %vm10836_vm9, %v10560_v33, %v11112_v31 }
 0x49f   :  { %v11391_v46 = vsel %vm10839_vm10, %v10563_v21, %v11115_v56  ;;  %v16583_v13 = vadd.f32 %v16269_v57, %v15685_v43  ;;  %v9754_v45 = vpop.f32.mrb[193].mxu0  ;;  %v15686_v17 = vpop.f32.mrb[194].mxu1 }
 0x4a0   :  { %v14250_v48 = vpack.c.bf16 %v11391_v46, %v11390_v36  ;;  %v11389_v23 = vsel %vm10837_vm11, %v10561_v52, %v11113_v11  ;;  %v16584_v32 = vadd.f32 %v9754_v45, %v4438_v30  ;;  %v16270_v61 = vpop.f32.mrb[194].mxu0  ;;  %v4441_v22 = vpop.f32.mrb[195].mxu1 }
 0x4a1   :  { %v14245_v53 = vpack.c.bf16 %v11389_v23, %v11388_v16  ;;  %v10566_v26 = vadd.f32 %v20522_v25, %v16583_v13  ;;  %v16585_v49 = vadd.f32 %v16270_v61, %v15686_v17  ;;  %v9757_v55 = vpop.f32.mrb[195].mxu0 }
 0x4a2   :  { %14556 = vst [vmem:[%s20898_s3 + $0x2f8] sm:$0xff] %v14250_v48   ;;  %v10564_v42 = vadd.f32 %v20522_v25, %v16584_v32  ;;  %v16586_v2 = vadd.f32 %v9757_v55, %v4441_v22 }
 0x4a3   :  { %14555 = vst [vmem:[%s20898_s3 + $0x2f0] sm:$0xff] %v14245_v53   ;;  %v11118_v60 = vmul.f32 0.2, %v10566_v26  ;;  %v10567_v8 = vadd.f32 %v20522_v25, %v16585_v49  ;;  %vm10842_vm12 = vcmp.ge.f32.partialorder %v10566_v26, 0.0 }
 0x4a4   :  { %v11116_v35 = vmul.f32 0.2, %v10564_v42  ;;  %v10565_v28 = vadd.f32 %v20522_v25, %v16586_v2  ;;  %vm10840_vm1 = vcmp.ge.f32.partialorder %v10564_v42, 0.0 }
 0x4a5   :  { %vm10843_vm13 = vcmp.ge.f32.partialorder %v10567_v8, 0.0  ;;  %v11119_v5 = vmul.f32 0.2, %v10567_v8  ;;  %v15689_v14 = vpop.f32.mrb[196].mxu1  ;;  %v11394_v58 = vsel %vm10842_vm12, %v10566_v26, %v11118_v60 }
 0x4a6   :  { %vm10841_vm14 = vcmp.ge.f32.partialorder %v10565_v28, 0.0  ;;  %v11117_v39 = vmul.f32 0.2, %v10565_v28  ;;  %v16273_v50 = vpop.f32.mrb[196].mxu0  ;;  %v4454_v29 = vpop.f32.mrb[197].mxu1  ;;  %v11392_v44 = vsel %vm10840_vm1, %v10564_v42, %v11116_v35 }
 0x4a7   :  { %v11395_v59 = vsel %vm10843_vm13, %v10567_v8, %v11119_v5  ;;  %v16587_v27 = vadd.f32 %v16273_v50, %v15689_v14  ;;  %v9770_v63 = vpop.f32.mrb[197].mxu0  ;;  %v15690_v38 = vpop.f32.mrb[198].mxu1 }
 0x4a8   :  { %v14260_v1 = vpack.c.bf16 %v11395_v59, %v11394_v58  ;;  %v11393_v54 = vsel %vm10841_vm14, %v10565_v28, %v11117_v39  ;;  %v16588_v20 = vadd.f32 %v9770_v63, %v4454_v29  ;;  %v16274_v10 = vpop.f32.mrb[198].mxu0  ;;  %v4457_v6 = vpop.f32.mrb[199].mxu1 }
 0x4a9   :  { %v14255_v19 = vpack.c.bf16 %v11393_v54, %v11392_v44  ;;  %v10570_v62 = vadd.f32 %v20522_v25, %v16587_v27  ;;  %v16589_v15 = vadd.f32 %v16274_v10, %v15690_v38  ;;  %v9773_v3 = vpop.f32.mrb[199].mxu0 }
 0x4aa   :  { %14558 = vst [vmem:[%s20898_s3 + $0x308] sm:$0xff] %v14260_v1   ;;  %v10568_v34 = vadd.f32 %v20522_v25, %v16588_v20  ;;  %v16590_v4 = vadd.f32 %v9773_v3, %v4457_v6 }
 0x4ab   :  { %14557 = vst [vmem:[%s20898_s3 + $0x300] sm:$0xff] %v14255_v19   ;;  %v11122_v47 = vmul.f32 0.2, %v10570_v62  ;;  %v10571_v7 = vadd.f32 %v20522_v25, %v16589_v15  ;;  %vm10846_vm15 = vcmp.ge.f32.partialorder %v10570_v62, 0.0 }
 0x4ac   :  { %v11120_v40 = vmul.f32 0.2, %v10568_v34  ;;  %v10569_v51 = vadd.f32 %v20522_v25, %v16590_v4  ;;  %vm10844_vm0 = vcmp.ge.f32.partialorder %v10568_v34, 0.0 }
 0x4ad   :  { %vm10847_vm2 = vcmp.ge.f32.partialorder %v10571_v7, 0.0  ;;  %v11123_v0 = vmul.f32 0.2, %v10571_v7  ;;  %v15693_v37 = vpop.f32.mrb[200].mxu1  ;;  %v11398_v33 = vsel %vm10846_vm15, %v10570_v62, %v11122_v47 }
 0x4ae   :  { %vm10845_vm3 = vcmp.ge.f32.partialorder %v10569_v51, 0.0  ;;  %v11121_v24 = vmul.f32 0.2, %v10569_v51  ;;  %v16277_v12 = vpop.f32.mrb[200].mxu0  ;;  %v4470_v9 = vpop.f32.mrb[201].mxu1  ;;  %v11396_v52 = vsel %vm10844_vm0, %v10568_v34, %v11120_v40 }
 0x4af   :  { %v11399_v41 = vsel %vm10847_vm2, %v10571_v7, %v11123_v0  ;;  %v16591_v18 = vadd.f32 %v16277_v12, %v15693_v37  ;;  %v9786_v21 = vpop.f32.mrb[201].mxu0  ;;  %v15694_v31 = vpop.f32.mrb[202].mxu1 }
 0x4b0   :  { %v14270_v56 = vpack.c.bf16 %v11399_v41, %v11398_v33  ;;  %v11397_v43 = vsel %vm10845_vm3, %v10569_v51, %v11121_v24  ;;  %v16592_v11 = vadd.f32 %v9786_v21, %v4470_v9  ;;  %v16278_v57 = vpop.f32.mrb[202].mxu0  ;;  %v4473_v30 = vpop.f32.mrb[203].mxu1 }
 0x4b1   :  { %v14265_v36 = vpack.c.bf16 %v11397_v43, %v11396_v52  ;;  %v10574_v46 = vadd.f32 %v20522_v25, %v16591_v18  ;;  %v16593_v13 = vadd.f32 %v16278_v57, %v15694_v31  ;;  %v9789_v45 = vpop.f32.mrb[203].mxu0 }
 0x4b2   :  { %14560 = vst [vmem:[%s20898_s3 + $0x318] sm:$0xff] %v14270_v56   ;;  %v10572_v17 = vadd.f32 %v20522_v25, %v16592_v11  ;;  %v16594_v16 = vadd.f32 %v9789_v45, %v4473_v30 }
 0x4b3   :  { %14559 = vst [vmem:[%s20898_s3 + $0x310] sm:$0xff] %v14265_v36   ;;  %v11126_v48 = vmul.f32 0.2, %v10574_v46  ;;  %v10575_v23 = vadd.f32 %v20522_v25, %v16593_v13  ;;  %vm10850_vm4 = vcmp.ge.f32.partialorder %v10574_v46, 0.0 }
 0x4b4   :  { %v11124_v32 = vmul.f32 0.2, %v10572_v17  ;;  %v10573_v61 = vadd.f32 %v20522_v25, %v16594_v16  ;;  %vm10848_vm5 = vcmp.ge.f32.partialorder %v10572_v17, 0.0 }
 0x4b5   :  { %vm10851_vm6 = vcmp.ge.f32.partialorder %v10575_v23, 0.0  ;;  %v11127_v22 = vmul.f32 0.2, %v10575_v23  ;;  %v15697_v53 = vpop.f32.mrb[204].mxu1  ;;  %v11402_v42 = vsel %vm10850_vm4, %v10574_v46, %v11126_v48 }
 0x4b6   :  { %vm10849_vm7 = vcmp.ge.f32.partialorder %v10573_v61, 0.0  ;;  %v11125_v26 = vmul.f32 0.2, %v10573_v61  ;;  %v16281_v49 = vpop.f32.mrb[204].mxu0  ;;  %v4486_v55 = vpop.f32.mrb[205].mxu1  ;;  %v11400_v28 = vsel %vm10848_vm5, %v10572_v17, %v11124_v32 }
 0x4b7   :  { %v11403_v2 = vsel %vm10851_vm6, %v10575_v23, %v11127_v22  ;;  %v16595_v60 = vadd.f32 %v16281_v49, %v15697_v53  ;;  %v9802_v8 = vpop.f32.mrb[205].mxu0  ;;  %v15698_v35 = vpop.f32.mrb[206].mxu1 }
 0x4b8   :  { %v14280_v5 = vpack.c.bf16 %v11403_v2, %v11402_v42  ;;  %v11401_v14 = vsel %vm10849_vm7, %v10573_v61, %v11125_v26  ;;  %v16596_v39 = vadd.f32 %v9802_v8, %v4486_v55  ;;  %v16282_v50 = vpop.f32.mrb[206].mxu0  ;;  %v4489_v29 = vpop.f32.mrb[207].mxu1 }
 0x4b9   :  { %v14275_v58 = vpack.c.bf16 %v11401_v14, %v11400_v28  ;;  %v10578_v59 = vadd.f32 %v20522_v25, %v16595_v60  ;;  %v16597_v27 = vadd.f32 %v16282_v50, %v15698_v35  ;;  %v9805_v63 = vpop.f32.mrb[207].mxu0  ;;  %v20736_v50 = vld [vmem:[%s20897_s2] ss:$0 sm:$0xff] }
 0x4ba   :  { %14562 = vst [vmem:[%s20898_s3 + $0x328] sm:$0xff] %v14280_v5   ;;  %v10576_v38 = vadd.f32 %v20522_v25, %v16596_v39  ;;  %v16598_v44 = vadd.f32 %v9805_v63, %v4489_v29 }
 0x4bb   :  { %14561 = vst [vmem:[%s20898_s3 + $0x320] sm:$0xff] %v14275_v58   ;;  %v11130_v1 = vmul.f32 0.2, %v10578_v59  ;;  %v10579_v54 = vadd.f32 %v20522_v25, %v16597_v27  ;;  %vm10854_vm8 = vcmp.ge.f32.partialorder %v10578_v59, 0.0 }
 0x4bc   :  { %v11128_v20 = vmul.f32 0.2, %v10576_v38  ;;  %v10577_v10 = vadd.f32 %v20522_v25, %v16598_v44  ;;  %vm10852_vm9 = vcmp.ge.f32.partialorder %v10576_v38, 0.0 }
 0x4bd   :  { %vm10855_vm10 = vcmp.ge.f32.partialorder %v10579_v54, 0.0  ;;  %v11131_v6 = vmul.f32 0.2, %v10579_v54  ;;  %v15701_v19 = vpop.f32.mrb[208].mxu1  ;;  %v11406_v34 = vsel %vm10854_vm8, %v10578_v59, %v11130_v1 }
 0x4be   :  { %vm10853_vm11 = vcmp.ge.f32.partialorder %v10577_v10, 0.0  ;;  %v11129_v62 = vmul.f32 0.2, %v10577_v10  ;;  %v16285_v15 = vpop.f32.mrb[208].mxu0  ;;  %v4502_v3 = vpop.f32.mrb[209].mxu1  ;;  %v11404_v51 = vsel %vm10852_vm9, %v10576_v38, %v11128_v20 }
 0x4bf   :  { %v11407_v4 = vsel %vm10855_vm10, %v10579_v54, %v11131_v6  ;;  %v16599_v47 = vadd.f32 %v16285_v15, %v15701_v19  ;;  %v9818_v7 = vpop.f32.mrb[209].mxu0  ;;  %v15702_v40 = vpop.f32.mrb[210].mxu1 }
 0x4c0   :  { %v14290_v0 = vpack.c.bf16 %v11407_v4, %v11406_v34  ;;  %v11405_v37 = vsel %vm10853_vm11, %v10577_v10, %v11129_v62  ;;  %v16600_v24 = vadd.f32 %v9818_v7, %v4502_v3  ;;  %v16286_v12 = vpop.f32.mrb[210].mxu0  ;;  %v4505_v9 = vpop.f32.mrb[211].mxu1 }
 0x4c1   :  { %v14285_v33 = vpack.c.bf16 %v11405_v37, %v11404_v51  ;;  %v10582_v41 = vadd.f32 %v20522_v25, %v16599_v47  ;;  %v16601_v18 = vadd.f32 %v16286_v12, %v15702_v40  ;;  %v9821_v21 = vpop.f32.mrb[211].mxu0 }
 0x4c2   :  { %14564 = vst [vmem:[%s20898_s3 + $0x338] sm:$0xff] %v14290_v0   ;;  %v10580_v31 = vadd.f32 %v20522_v25, %v16600_v24  ;;  %v16602_v52 = vadd.f32 %v9821_v21, %v4505_v9 }
 0x4c3   :  { %14563 = vst [vmem:[%s20898_s3 + $0x330] sm:$0xff] %v14285_v33   ;;  %v11134_v56 = vmul.f32 0.2, %v10582_v41  ;;  %v10583_v43 = vadd.f32 %v20522_v25, %v16601_v18  ;;  %vm10858_vm12 = vcmp.ge.f32.partialorder %v10582_v41, 0.0 }
 0x4c4   :  { %v11132_v11 = vmul.f32 0.2, %v10580_v31  ;;  %v10581_v57 = vadd.f32 %v20522_v25, %v16602_v52  ;;  %vm10856_vm1 = vcmp.ge.f32.partialorder %v10580_v31, 0.0 }
 0x4c5   :  { %vm10859_vm13 = vcmp.ge.f32.partialorder %v10583_v43, 0.0  ;;  %v11135_v30 = vmul.f32 0.2, %v10583_v43  ;;  %v15705_v36 = vpop.f32.mrb[212].mxu1  ;;  %v11410_v17 = vsel %vm10858_vm12, %v10582_v41, %v11134_v56 }
 0x4c6   :  { %vm10857_vm14 = vcmp.ge.f32.partialorder %v10581_v57, 0.0  ;;  %v11133_v46 = vmul.f32 0.2, %v10581_v57  ;;  %v16289_v13 = vpop.f32.mrb[212].mxu0  ;;  %v4518_v45 = vpop.f32.mrb[213].mxu1  ;;  %v11408_v61 = vsel %vm10856_vm1, %v10580_v31, %v11132_v11 }
 0x4c7   :  { %v11411_v16 = vsel %vm10859_vm13, %v10583_v43, %v11135_v30  ;;  %v16603_v48 = vadd.f32 %v16289_v13, %v15705_v36  ;;  %v9834_v23 = vpop.f32.mrb[213].mxu0  ;;  %v15706_v32 = vpop.f32.mrb[214].mxu1 }
 0x4c8   :  { %v14300_v22 = vpack.c.bf16 %v11411_v16, %v11410_v17  ;;  %v11409_v53 = vsel %vm10857_vm14, %v10581_v57, %v11133_v46  ;;  %v16604_v26 = vadd.f32 %v9834_v23, %v4518_v45  ;;  %v16290_v49 = vpop.f32.mrb[214].mxu0  ;;  %v4521_v55 = vpop.f32.mrb[215].mxu1 }
 0x4c9   :  { %v14295_v42 = vpack.c.bf16 %v11409_v53, %v11408_v61  ;;  %v10586_v2 = vadd.f32 %v20522_v25, %v16603_v48  ;;  %v16605_v60 = vadd.f32 %v16290_v49, %v15706_v32  ;;  %v9837_v8 = vpop.f32.mrb[215].mxu0 }
 0x4ca   :  { %14566 = vst [vmem:[%s20898_s3 + $0x348] sm:$0xff] %v14300_v22   ;;  %v10584_v35 = vadd.f32 %v20522_v25, %v16604_v26  ;;  %v16606_v28 = vadd.f32 %v9837_v8, %v4521_v55 }
 0x4cb   :  { %14565 = vst [vmem:[%s20898_s3 + $0x340] sm:$0xff] %v14295_v42   ;;  %v11138_v5 = vmul.f32 0.2, %v10586_v2  ;;  %v10587_v14 = vadd.f32 %v20522_v25, %v16605_v60  ;;  %vm10862_vm15 = vcmp.ge.f32.partialorder %v10586_v2, 0.0 }
 0x4cc   :  { %v11136_v39 = vmul.f32 0.2, %v10584_v35  ;;  %v10585_v29 = vadd.f32 %v20736_v50, %v16606_v28  ;;  %vm10860_vm0 = vcmp.ge.f32.partialorder %v10584_v35, 0.0 }
 0x4cd   :  { %vm10863_vm2 = vcmp.ge.f32.partialorder %v10587_v14, 0.0  ;;  %v11139_v58 = vmul.f32 0.2, %v10587_v14  ;;  %v15709_v59 = vpop.f32.mrb[216].mxu1  ;;  %v11414_v44 = vsel %vm10862_vm15, %v10586_v2, %v11138_v5 }
 0x4ce   :  { %vm10861_vm3 = vcmp.ge.f32.partialorder %v10585_v29, 0.0  ;;  %v11137_v27 = vmul.f32 0.2, %v10585_v29  ;;  %v16293_v63 = vpop.f32.mrb[216].mxu0  ;;  %v4534_v38 = vpop.f32.mrb[217].mxu1  ;;  %v11412_v10 = vsel %vm10860_vm0, %v10584_v35, %v11136_v39 }
 0x4cf   :  { %v11415_v1 = vsel %vm10863_vm2, %v10587_v14, %v11139_v58  ;;  %v16607_v25 = vadd.f32 %v16293_v63, %v15709_v59  ;;  %v9850_v54 = vpop.f32.mrb[217].mxu0  ;;  %v15710_v20 = vpop.f32.mrb[218].mxu1 }
 0x4d0   :  { %v14310_v6 = vpack.c.bf16 %v11415_v1, %v11414_v44  ;;  %v11413_v19 = vsel %vm10861_vm3, %v10585_v29, %v11137_v27  ;;  %v16608_v62 = vadd.f32 %v9850_v54, %v4534_v38  ;;  %v16294_v15 = vpop.f32.mrb[218].mxu0  ;;  %v4537_v3 = vpop.f32.mrb[219].mxu1 }
 0x4d1   :  { %v14305_v34 = vpack.c.bf16 %v11413_v19, %v11412_v10  ;;  %v10590_v4 = vadd.f32 %v20736_v50, %v16607_v25  ;;  %v16609_v47 = vadd.f32 %v16294_v15, %v15710_v20  ;;  %v9853_v7 = vpop.f32.mrb[219].mxu0 }
 0x4d2   :  { %14568 = vst [vmem:[%s20898_s3 + $0x358] sm:$0xff] %v14310_v6   ;;  %v10588_v40 = vadd.f32 %v20736_v50, %v16608_v62  ;;  %v16610_v51 = vadd.f32 %v9853_v7, %v4537_v3 }
 0x4d3   :  { %14567 = vst [vmem:[%s20898_s3 + $0x350] sm:$0xff] %v14305_v34   ;;  %v11142_v0 = vmul.f32 0.2, %v10590_v4  ;;  %v10591_v37 = vadd.f32 %v20736_v50, %v16609_v47  ;;  %vm10866_vm4 = vcmp.ge.f32.partialorder %v10590_v4, 0.0 }
 0x4d4   :  { %v11140_v24 = vmul.f32 0.2, %v10588_v40  ;;  %v10589_v12 = vadd.f32 %v20736_v50, %v16610_v51  ;;  %vm10864_vm5 = vcmp.ge.f32.partialorder %v10588_v40, 0.0 }
 0x4d5   :  { %vm10867_vm6 = vcmp.ge.f32.partialorder %v10591_v37, 0.0  ;;  %v11143_v9 = vmul.f32 0.2, %v10591_v37  ;;  %v15713_v33 = vpop.f32.mrb[220].mxu1  ;;  %v11418_v31 = vsel %vm10866_vm4, %v10590_v4, %v11142_v0 }
 0x4d6   :  { %vm10865_vm7 = vcmp.ge.f32.partialorder %v10589_v12, 0.0  ;;  %v11141_v41 = vmul.f32 0.2, %v10589_v12  ;;  %v16297_v18 = vpop.f32.mrb[220].mxu0  ;;  %v4550_v21 = vpop.f32.mrb[221].mxu1  ;;  %v11416_v57 = vsel %vm10864_vm5, %v10588_v40, %v11140_v24 }
 0x4d7   :  { %v11419_v52 = vsel %vm10867_vm6, %v10591_v37, %v11143_v9  ;;  %v16611_v56 = vadd.f32 %v16297_v18, %v15713_v33  ;;  %v9866_v43 = vpop.f32.mrb[221].mxu0  ;;  %v15714_v11 = vpop.f32.mrb[222].mxu1 }
 0x4d8   :  { %v14320_v30 = vpack.c.bf16 %v11419_v52, %v11418_v31  ;;  %v11417_v36 = vsel %vm10865_vm7, %v10589_v12, %v11141_v41  ;;  %v16612_v46 = vadd.f32 %v9866_v43, %v4550_v21  ;;  %v16298_v13 = vpop.f32.mrb[222].mxu0  ;;  %v4553_v45 = vpop.f32.mrb[223].mxu1 }
 0x4d9   :  { %v14315_v17 = vpack.c.bf16 %v11417_v36, %v11416_v57  ;;  %v10594_v16 = vadd.f32 %v20736_v50, %v16611_v56  ;;  %v16613_v48 = vadd.f32 %v16298_v13, %v15714_v11  ;;  %v9869_v23 = vpop.f32.mrb[223].mxu0 }
 0x4da   :  { %14570 = vst [vmem:[%s20898_s3 + $0x368] sm:$0xff] %v14320_v30   ;;  %v10592_v32 = vadd.f32 %v20736_v50, %v16612_v46  ;;  %v16614_v61 = vadd.f32 %v9869_v23, %v4553_v45 }
 0x4db   :  { %14569 = vst [vmem:[%s20898_s3 + $0x360] sm:$0xff] %v14315_v17   ;;  %v11146_v22 = vmul.f32 0.2, %v10594_v16  ;;  %v10595_v53 = vadd.f32 %v20736_v50, %v16613_v48  ;;  %vm10870_vm8 = vcmp.ge.f32.partialorder %v10594_v16, 0.0 }
 0x4dc   :  { %v11144_v26 = vmul.f32 0.2, %v10592_v32  ;;  %v10593_v49 = vadd.f32 %v20736_v50, %v16614_v61  ;;  %vm10868_vm9 = vcmp.ge.f32.partialorder %v10592_v32, 0.0 }
 0x4dd   :  { %vm10871_vm10 = vcmp.ge.f32.partialorder %v10595_v53, 0.0  ;;  %v11147_v55 = vmul.f32 0.2, %v10595_v53  ;;  %v15717_v42 = vpop.f32.mrb[224].mxu1  ;;  %v11422_v35 = vsel %vm10870_vm8, %v10594_v16, %v11146_v22 }
 0x4de   :  { %vm10869_vm11 = vcmp.ge.f32.partialorder %v10593_v49, 0.0  ;;  %v11145_v2 = vmul.f32 0.2, %v10593_v49  ;;  %v16301_v60 = vpop.f32.mrb[224].mxu0  ;;  %v4566_v8 = vpop.f32.mrb[225].mxu1  ;;  %v11420_v29 = vsel %vm10868_vm9, %v10592_v32, %v11144_v26 }
 0x4df   :  { %v11423_v28 = vsel %vm10871_vm10, %v10595_v53, %v11147_v55  ;;  %v16615_v5 = vadd.f32 %v16301_v60, %v15717_v42  ;;  %v9882_v14 = vpop.f32.mrb[225].mxu0  ;;  %v15718_v39 = vpop.f32.mrb[226].mxu1 }
 0x4e0   :  { %v14330_v58 = vpack.c.bf16 %v11423_v28, %v11422_v35  ;;  %v11421_v59 = vsel %vm10869_vm11, %v10593_v49, %v11145_v2  ;;  %v16616_v27 = vadd.f32 %v9882_v14, %v4566_v8  ;;  %v16302_v63 = vpop.f32.mrb[226].mxu0  ;;  %v4569_v38 = vpop.f32.mrb[227].mxu1 }
 0x4e1   :  { %v14325_v44 = vpack.c.bf16 %v11421_v59, %v11420_v29  ;;  %v10598_v1 = vadd.f32 %v20736_v50, %v16615_v5  ;;  %v16617_v25 = vadd.f32 %v16302_v63, %v15718_v39  ;;  %v9885_v54 = vpop.f32.mrb[227].mxu0 }
 0x4e2   :  { %14572 = vst [vmem:[%s20898_s3 + $0x378] sm:$0xff] %v14330_v58   ;;  %v10596_v20 = vadd.f32 %v20736_v50, %v16616_v27  ;;  %v16618_v10 = vadd.f32 %v9885_v54, %v4569_v38 }
 0x4e3   :  { %14571 = vst [vmem:[%s20898_s3 + $0x370] sm:$0xff] %v14325_v44   ;;  %v11150_v6 = vmul.f32 0.2, %v10598_v1  ;;  %v10599_v19 = vadd.f32 %v20736_v50, %v16617_v25  ;;  %vm10874_vm12 = vcmp.ge.f32.partialorder %v10598_v1, 0.0 }
 0x4e4   :  { %v11148_v62 = vmul.f32 0.2, %v10596_v20  ;;  %v10597_v15 = vadd.f32 %v20736_v50, %v16618_v10  ;;  %vm10872_vm1 = vcmp.ge.f32.partialorder %v10596_v20, 0.0 }
 0x4e5   :  { %vm10875_vm13 = vcmp.ge.f32.partialorder %v10599_v19, 0.0  ;;  %v11151_v3 = vmul.f32 0.2, %v10599_v19  ;;  %v15721_v34 = vpop.f32.mrb[228].mxu1  ;;  %v11426_v40 = vsel %vm10874_vm12, %v10598_v1, %v11150_v6 }
 0x4e6   :  { %vm10873_vm14 = vcmp.ge.f32.partialorder %v10597_v15, 0.0  ;;  %v11149_v4 = vmul.f32 0.2, %v10597_v15  ;;  %v16305_v47 = vpop.f32.mrb[228].mxu0  ;;  %v4582_v7 = vpop.f32.mrb[229].mxu1  ;;  %v11424_v12 = vsel %vm10872_vm1, %v10596_v20, %v11148_v62 }
 0x4e7   :  { %v11427_v51 = vsel %vm10875_vm13, %v10599_v19, %v11151_v3  ;;  %v16619_v0 = vadd.f32 %v16305_v47, %v15721_v34  ;;  %v9898_v37 = vpop.f32.mrb[229].mxu0  ;;  %v15722_v24 = vpop.f32.mrb[230].mxu1 }
 0x4e8   :  { %v14340_v9 = vpack.c.bf16 %v11427_v51, %v11426_v40  ;;  %v11425_v33 = vsel %vm10873_vm14, %v10597_v15, %v11149_v4  ;;  %v16620_v41 = vadd.f32 %v9898_v37, %v4582_v7  ;;  %v16306_v18 = vpop.f32.mrb[230].mxu0  ;;  %v4585_v21 = vpop.f32.mrb[231].mxu1 }
 0x4e9   :  { %v14335_v31 = vpack.c.bf16 %v11425_v33, %v11424_v12  ;;  %v10602_v52 = vadd.f32 %v20736_v50, %v16619_v0  ;;  %v16621_v56 = vadd.f32 %v16306_v18, %v15722_v24  ;;  %v9901_v43 = vpop.f32.mrb[231].mxu0 }
 0x4ea   :  { %14574 = vst [vmem:[%s20898_s3 + $0x388] sm:$0xff] %v14340_v9   ;;  %v10600_v11 = vadd.f32 %v20736_v50, %v16620_v41  ;;  %v16622_v57 = vadd.f32 %v9901_v43, %v4585_v21 }
 0x4eb   :  { %14573 = vst [vmem:[%s20898_s3 + $0x380] sm:$0xff] %v14335_v31   ;;  %v11154_v30 = vmul.f32 0.2, %v10602_v52  ;;  %v10603_v36 = vadd.f32 %v20736_v50, %v16621_v56  ;;  %vm10878_vm15 = vcmp.ge.f32.partialorder %v10602_v52, 0.0 }
 0x4ec   :  { %v11152_v46 = vmul.f32 0.2, %v10600_v11  ;;  %v10601_v13 = vadd.f32 %v20736_v50, %v16622_v57  ;;  %vm10876_vm0 = vcmp.ge.f32.partialorder %v10600_v11, 0.0 }
 0x4ed   :  { %vm10879_vm2 = vcmp.ge.f32.partialorder %v10603_v36, 0.0  ;;  %v11155_v45 = vmul.f32 0.2, %v10603_v36  ;;  %v15725_v17 = vpop.f32.mrb[232].mxu1  ;;  %v11430_v32 = vsel %vm10878_vm15, %v10602_v52, %v11154_v30 }
 0x4ee   :  { %vm10877_vm3 = vcmp.ge.f32.partialorder %v10601_v13, 0.0  ;;  %v11153_v16 = vmul.f32 0.2, %v10601_v13  ;;  %v16309_v48 = vpop.f32.mrb[232].mxu0  ;;  %v4598_v23 = vpop.f32.mrb[233].mxu1  ;;  %v11428_v49 = vsel %vm10876_vm0, %v10600_v11, %v11152_v46 }
 0x4ef   :  { %v11431_v61 = vsel %vm10879_vm2, %v10603_v36, %v11155_v45  ;;  %v16623_v22 = vadd.f32 %v16309_v48, %v15725_v17  ;;  %v9914_v53 = vpop.f32.mrb[233].mxu0  ;;  %v15726_v26 = vpop.f32.mrb[234].mxu1 }
 0x4f0   :  { %v14350_v55 = vpack.c.bf16 %v11431_v61, %v11430_v32  ;;  %v11429_v42 = vsel %vm10877_vm3, %v10601_v13, %v11153_v16  ;;  %v16624_v2 = vadd.f32 %v9914_v53, %v4598_v23  ;;  %v16310_v60 = vpop.f32.mrb[234].mxu0  ;;  %v4601_v8 = vpop.f32.mrb[235].mxu1 }
 0x4f1   :  { %v14345_v35 = vpack.c.bf16 %v11429_v42, %v11428_v49  ;;  %v10606_v28 = vadd.f32 %v20736_v50, %v16623_v22  ;;  %v16625_v5 = vadd.f32 %v16310_v60, %v15726_v26  ;;  %v9917_v14 = vpop.f32.mrb[235].mxu0 }
 0x4f2   :  { %14576 = vst [vmem:[%s20898_s3 + $0x398] sm:$0xff] %v14350_v55   ;;  %v10604_v39 = vadd.f32 %v20736_v50, %v16624_v2  ;;  %v16626_v29 = vadd.f32 %v9917_v14, %v4601_v8 }
 0x4f3   :  { %14575 = vst [vmem:[%s20898_s3 + $0x390] sm:$0xff] %v14345_v35   ;;  %v11158_v58 = vmul.f32 0.2, %v10606_v28  ;;  %v10607_v59 = vadd.f32 %v20736_v50, %v16625_v5  ;;  %vm10882_vm4 = vcmp.ge.f32.partialorder %v10606_v28, 0.0 }
 0x4f4   :  { %v11156_v27 = vmul.f32 0.2, %v10604_v39  ;;  %v10605_v63 = vadd.f32 %v20736_v50, %v16626_v29  ;;  %vm10880_vm5 = vcmp.ge.f32.partialorder %v10604_v39, 0.0 }
 0x4f5   :  { %vm10883_vm6 = vcmp.ge.f32.partialorder %v10607_v59, 0.0  ;;  %v11159_v38 = vmul.f32 0.2, %v10607_v59  ;;  %v15729_v44 = vpop.f32.mrb[236].mxu1  ;;  %v11434_v20 = vsel %vm10882_vm4, %v10606_v28, %v11158_v58 }
 0x4f6   :  { %vm10881_vm7 = vcmp.ge.f32.partialorder %v10605_v63, 0.0  ;;  %v11157_v1 = vmul.f32 0.2, %v10605_v63  ;;  %v16313_v25 = vpop.f32.mrb[236].mxu0  ;;  %v4614_v54 = vpop.f32.mrb[237].mxu1  ;;  %v11432_v15 = vsel %vm10880_vm5, %v10604_v39, %v11156_v27 }
 0x4f7   :  { %v11435_v10 = vsel %vm10883_vm6, %v10607_v59, %v11159_v38  ;;  %v16627_v6 = vadd.f32 %v16313_v25, %v15729_v44  ;;  %v9930_v19 = vpop.f32.mrb[237].mxu0  ;;  %v15730_v62 = vpop.f32.mrb[238].mxu1 }
 0x4f8   :  { %v14360_v3 = vpack.c.bf16 %v11435_v10, %v11434_v20  ;;  %v11433_v34 = vsel %vm10881_vm7, %v10605_v63, %v11157_v1  ;;  %v16628_v4 = vadd.f32 %v9930_v19, %v4614_v54  ;;  %v16314_v47 = vpop.f32.mrb[238].mxu0  ;;  %v4617_v7 = vpop.f32.mrb[239].mxu1 }
 0x4f9   :  { %v14355_v40 = vpack.c.bf16 %v11433_v34, %v11432_v15  ;;  %v10610_v51 = vadd.f32 %v20736_v50, %v16627_v6  ;;  %v16629_v0 = vadd.f32 %v16314_v47, %v15730_v62  ;;  %v9933_v37 = vpop.f32.mrb[239].mxu0 }
 0x4fa   :  { %14578 = vst [vmem:[%s20898_s3 + $0x3a8] sm:$0xff] %v14360_v3   ;;  %v10608_v24 = vadd.f32 %v20736_v50, %v16628_v4  ;;  %v16630_v12 = vadd.f32 %v9933_v37, %v4617_v7 }
 0x4fb   :  { %14577 = vst [vmem:[%s20898_s3 + $0x3a0] sm:$0xff] %v14355_v40   ;;  %v11162_v9 = vmul.f32 0.2, %v10610_v51  ;;  %v10611_v33 = vadd.f32 %v20736_v50, %v16629_v0  ;;  %vm10886_vm8 = vcmp.ge.f32.partialorder %v10610_v51, 0.0 }
 0x4fc   :  { %v11160_v41 = vmul.f32 0.2, %v10608_v24  ;;  %v10609_v18 = vadd.f32 %v20736_v50, %v16630_v12  ;;  %vm10884_vm9 = vcmp.ge.f32.partialorder %v10608_v24, 0.0 }
 0x4fd   :  { %vm10887_vm10 = vcmp.ge.f32.partialorder %v10611_v33, 0.0  ;;  %v11163_v21 = vmul.f32 0.2, %v10611_v33  ;;  %v15733_v31 = vpop.f32.mrb[240].mxu1  ;;  %v11438_v11 = vsel %vm10886_vm8, %v10610_v51, %v11162_v9 }
 0x4fe   :  { %vm10885_vm11 = vcmp.ge.f32.partialorder %v10609_v18, 0.0  ;;  %v11161_v52 = vmul.f32 0.2, %v10609_v18  ;;  %v16317_v56 = vpop.f32.mrb[240].mxu0  ;;  %v4630_v43 = vpop.f32.mrb[241].mxu1  ;;  %v11436_v13 = vsel %vm10884_vm9, %v10608_v24, %v11160_v41 }
 0x4ff   :  { %v11439_v57 = vsel %vm10887_vm10, %v10611_v33, %v11163_v21  ;;  %v16631_v30 = vadd.f32 %v16317_v56, %v15733_v31  ;;  %v9946_v36 = vpop.f32.mrb[241].mxu0  ;;  %v15734_v46 = vpop.f32.mrb[242].mxu1 }
 0x500   :  { %v14370_v45 = vpack.c.bf16 %v11439_v57, %v11438_v11  ;;  %v11437_v17 = vsel %vm10885_vm11, %v10609_v18, %v11161_v52  ;;  %v16632_v16 = vadd.f32 %v9946_v36, %v4630_v43  ;;  %v16318_v48 = vpop.f32.mrb[242].mxu0  ;;  %v4633_v23 = vpop.f32.mrb[243].mxu1 }
 0x501   :  { %v14365_v32 = vpack.c.bf16 %v11437_v17, %v11436_v13  ;;  %v10614_v61 = vadd.f32 %v20736_v50, %v16631_v30  ;;  %v16633_v22 = vadd.f32 %v16318_v48, %v15734_v46  ;;  %v9949_v53 = vpop.f32.mrb[243].mxu0 }
 0x502   :  { %14580 = vst [vmem:[%s20898_s3 + $0x3b8] sm:$0xff] %v14370_v45   ;;  %v10612_v26 = vadd.f32 %v20736_v50, %v16632_v16  ;;  %v16634_v49 = vadd.f32 %v9949_v53, %v4633_v23 }
 0x503   :  { %14579 = vst [vmem:[%s20898_s3 + $0x3b0] sm:$0xff] %v14365_v32   ;;  %v11166_v55 = vmul.f32 0.2, %v10614_v61  ;;  %v10615_v42 = vadd.f32 %v20736_v50, %v16633_v22  ;;  %vm10890_vm12 = vcmp.ge.f32.partialorder %v10614_v61, 0.0 }
 0x504   :  { %v11164_v2 = vmul.f32 0.2, %v10612_v26  ;;  %v10613_v60 = vadd.f32 %v20736_v50, %v16634_v49  ;;  %vm10888_vm1 = vcmp.ge.f32.partialorder %v10612_v26, 0.0 }
 0x505   :  { %vm10891_vm13 = vcmp.ge.f32.partialorder %v10615_v42, 0.0  ;;  %v11167_v8 = vmul.f32 0.2, %v10615_v42  ;;  %v15737_v35 = vpop.f32.mrb[244].mxu1  ;;  %v11442_v39 = vsel %vm10890_vm12, %v10614_v61, %v11166_v55 }
 0x506   :  { %vm10889_vm14 = vcmp.ge.f32.partialorder %v10613_v60, 0.0  ;;  %v11165_v28 = vmul.f32 0.2, %v10613_v60  ;;  %v16321_v5 = vpop.f32.mrb[244].mxu0  ;;  %v4646_v14 = vpop.f32.mrb[245].mxu1  ;;  %v11440_v63 = vsel %vm10888_vm1, %v10612_v26, %v11164_v2 }
 0x507   :  { %v11443_v29 = vsel %vm10891_vm13, %v10615_v42, %v11167_v8  ;;  %v16635_v58 = vadd.f32 %v16321_v5, %v15737_v35  ;;  %v9962_v59 = vpop.f32.mrb[245].mxu0  ;;  %v15738_v27 = vpop.f32.mrb[246].mxu1 }
 0x508   :  { %v14380_v38 = vpack.c.bf16 %v11443_v29, %v11442_v39  ;;  %v11441_v44 = vsel %vm10889_vm14, %v10613_v60, %v11165_v28  ;;  %v16636_v1 = vadd.f32 %v9962_v59, %v4646_v14  ;;  %v16322_v25 = vpop.f32.mrb[246].mxu0  ;;  %v4649_v54 = vpop.f32.mrb[247].mxu1 }
 0x509   :  { %v14375_v20 = vpack.c.bf16 %v11441_v44, %v11440_v63  ;;  %v10618_v10 = vadd.f32 %v20736_v50, %v16635_v58  ;;  %v16637_v6 = vadd.f32 %v16322_v25, %v15738_v27  ;;  %v9965_v19 = vpop.f32.mrb[247].mxu0 }
 0x50a   :  { %14582 = vst [vmem:[%s20898_s3 + $0x3c8] sm:$0xff] %v14380_v38   ;;  %v10616_v62 = vadd.f32 %v20736_v50, %v16636_v1  ;;  %v16638_v15 = vadd.f32 %v9965_v19, %v4649_v54 }
 0x50b   :  { %14581 = vst [vmem:[%s20898_s3 + $0x3c0] sm:$0xff] %v14375_v20   ;;  %v11170_v3 = vmul.f32 0.2, %v10618_v10  ;;  %v10619_v34 = vadd.f32 %v20736_v50, %v16637_v6  ;;  %vm10894_vm15 = vcmp.ge.f32.partialorder %v10618_v10, 0.0 }
 0x50c   :  { %v11168_v4 = vmul.f32 0.2, %v10616_v62  ;;  %v10617_v47 = vadd.f32 %v20736_v50, %v16638_v15  ;;  %vm10892_vm0 = vcmp.ge.f32.partialorder %v10616_v62, 0.0 }
 0x50d   :  { %vm10895_vm2 = vcmp.ge.f32.partialorder %v10619_v34, 0.0  ;;  %v11171_v7 = vmul.f32 0.2, %v10619_v34  ;;  %v15741_v40 = vpop.f32.mrb[248].mxu1  ;;  %v11446_v24 = vsel %vm10894_vm15, %v10618_v10, %v11170_v3 }
 0x50e   :  { %vm10893_vm3 = vcmp.ge.f32.partialorder %v10617_v47, 0.0  ;;  %v11169_v51 = vmul.f32 0.2, %v10617_v47  ;;  %v16325_v0 = vpop.f32.mrb[248].mxu0  ;;  %v4662_v37 = vpop.f32.mrb[249].mxu1  ;;  %v11444_v18 = vsel %vm10892_vm0, %v10616_v62, %v11168_v4 }
 0x50f   :  { %v11447_v12 = vsel %vm10895_vm2, %v10619_v34, %v11171_v7  ;;  %v16639_v9 = vadd.f32 %v16325_v0, %v15741_v40  ;;  %v9978_v33 = vpop.f32.mrb[249].mxu0  ;;  %v15742_v41 = vpop.f32.mrb[250].mxu1 }
 0x510   :  { %v14390_v21 = vpack.c.bf16 %v11447_v12, %v11446_v24  ;;  %v11445_v31 = vsel %vm10893_vm3, %v10617_v47, %v11169_v51  ;;  %v16640_v52 = vadd.f32 %v9978_v33, %v4662_v37  ;;  %v16326_v56 = vpop.f32.mrb[250].mxu0  ;;  %v4665_v43 = vpop.f32.mrb[251].mxu1 }
 0x511   :  { %v14385_v11 = vpack.c.bf16 %v11445_v31, %v11444_v18  ;;  %v10622_v57 = vadd.f32 %v20736_v50, %v16639_v9  ;;  %v16641_v30 = vadd.f32 %v16326_v56, %v15742_v41  ;;  %v9981_v36 = vpop.f32.mrb[251].mxu0 }
 0x512   :  { %14584 = vst [vmem:[%s20898_s3 + $0x3d8] sm:$0xff] %v14390_v21   ;;  %v10620_v46 = vadd.f32 %v20736_v50, %v16640_v52  ;;  %v16642_v13 = vadd.f32 %v9981_v36, %v4665_v43 }
 0x513   :  { %14583 = vst [vmem:[%s20898_s3 + $0x3d0] sm:$0xff] %v14385_v11   ;;  %v11174_v45 = vmul.f32 0.2, %v10622_v57  ;;  %v10623_v17 = vadd.f32 %v20736_v50, %v16641_v30  ;;  %vm10898_vm4 = vcmp.ge.f32.partialorder %v10622_v57, 0.0 }
 0x514   :  { %v11172_v16 = vmul.f32 0.2, %v10620_v46  ;;  %v10621_v48 = vadd.f32 %v20736_v50, %v16642_v13  ;;  %vm10896_vm5 = vcmp.ge.f32.partialorder %v10620_v46, 0.0 }
 0x515   :  { %vm10899_vm6 = vcmp.ge.f32.partialorder %v10623_v17, 0.0  ;;  %v11175_v23 = vmul.f32 0.2, %v10623_v17  ;;  %v15745_v32 = vpop.f32.mrb[252].mxu1  ;;  %v11450_v26 = vsel %vm10898_vm4, %v10622_v57, %v11174_v45 }
 0x516   :  { %vm10897_vm7 = vcmp.ge.f32.partialorder %v10621_v48, 0.0  ;;  %v11173_v61 = vmul.f32 0.2, %v10621_v48  ;;  %v16329_v22 = vpop.f32.mrb[252].mxu0  ;;  %v4678_v53 = vpop.f32.mrb[253].mxu1  ;;  %v11448_v60 = vsel %vm10896_vm5, %v10620_v46, %v11172_v16 }
 0x517   :  { %v11451_v49 = vsel %vm10899_vm6, %v10623_v17, %v11175_v23  ;;  %v16643_v55 = vadd.f32 %v16329_v22, %v15745_v32  ;;  %v9994_v42 = vpop.f32.mrb[253].mxu0  ;;  %v15746_v2 = vpop.f32.mrb[254].mxu1 }
 0x518   :  { %v14400_v8 = vpack.c.bf16 %v11451_v49, %v11450_v26  ;;  %v11449_v35 = vsel %vm10897_vm7, %v10621_v48, %v11173_v61  ;;  %v16644_v28 = vadd.f32 %v9994_v42, %v4678_v53  ;;  %v16330_v5 = vpop.f32.mrb[254].mxu0  ;;  %v4681_v14 = vpop.f32.mrb[255].mxu1 }
 0x519   :  { %v14395_v39 = vpack.c.bf16 %v11449_v35, %v11448_v60  ;;  %v10626_v29 = vadd.f32 %v20736_v50, %v16643_v55  ;;  %v16645_v58 = vadd.f32 %v16330_v5, %v15746_v2  ;;  %v9997_v59 = vpop.f32.mrb[255].mxu0 }
 0x51a   :  { %14586 = vst [vmem:[%s20898_s3 + $0x3e8] sm:$0xff] %v14400_v8   ;;  %v10624_v27 = vadd.f32 %v20736_v50, %v16644_v28  ;;  %v16646_v63 = vadd.f32 %v9997_v59, %v4681_v14 }
 0x51b   :  { %14585 = vst [vmem:[%s20898_s3 + $0x3e0] sm:$0xff] %v14395_v39   ;;  %v11178_v38 = vmul.f32 0.2, %v10626_v29  ;;  %v10627_v44 = vadd.f32 %v20736_v50, %v16645_v58  ;;  %vm10902_vm8 = vcmp.ge.f32.partialorder %v10626_v29, 0.0 }
 0x51c   :  { %v11176_v1 = vmul.f32 0.2, %v10624_v27  ;;  %v10625_v25 = vadd.f32 %v20736_v50, %v16646_v63  ;;  %vm10900_vm9 = vcmp.ge.f32.partialorder %v10624_v27, 0.0 }
 0x51d   :  { %vm10903_vm10 = vcmp.ge.f32.partialorder %v10627_v44, 0.0  ;;  %v11179_v54 = vmul.f32 0.2, %v10627_v44  ;;  %v15749_v20 = vpop.f32.mrb[148].mxu1  ;;  %v11454_v62 = vsel %vm10902_vm8, %v10626_v29, %v11178_v38 }
 0x51e   :  { %vm10901_vm11 = vcmp.ge.f32.partialorder %v10625_v25, 0.0  ;;  %v11177_v10 = vmul.f32 0.2, %v10625_v25  ;;  %v16333_v6 = vpop.f32.mrb[148].mxu0  ;;  %v4694_v19 = vpop.f32.mrb[149].mxu1  ;;  %v11452_v47 = vsel %vm10900_vm9, %v10624_v27, %v11176_v1 }
 0x51f   :  { %v11455_v15 = vsel %vm10903_vm10, %v10627_v44, %v11179_v54  ;;  %v16647_v3 = vadd.f32 %v16333_v6, %v15749_v20  ;;  %v10010_v34 = vpop.f32.mrb[149].mxu0  ;;  %v15750_v4 = vpop.f32.mrb[150].mxu1 }
 0x520   :  { %v14410_v7 = vpack.c.bf16 %v11455_v15, %v11454_v62  ;;  %v11453_v40 = vsel %vm10901_vm11, %v10625_v25, %v11177_v10  ;;  %v16648_v51 = vadd.f32 %v10010_v34, %v4694_v19  ;;  %v16334_v0 = vpop.f32.mrb[150].mxu0  ;;  %v4697_v37 = vpop.f32.mrb[151].mxu1 }
 0x521   :  { %v14405_v24 = vpack.c.bf16 %v11453_v40, %v11452_v47  ;;  %v10630_v12 = vadd.f32 %v20736_v50, %v16647_v3  ;;  %v16649_v9 = vadd.f32 %v16334_v0, %v15750_v4  ;;  %v10013_v33 = vpop.f32.mrb[151].mxu0 }
 0x522   :  { %14588 = vst [vmem:[%s20898_s3 + $0x3f8] sm:$0xff] %v14410_v7   ;;  %v10628_v41 = vadd.f32 %v20736_v50, %v16648_v51  ;;  %v16650_v18 = vadd.f32 %v10013_v33, %v4697_v37 }
 0x523   :  { %14587 = vst [vmem:[%s20898_s3 + $0x3f0] sm:$0xff] %v14405_v24   ;;  %v11182_v21 = vmul.f32 0.2, %v10630_v12  ;;  %v10631_v31 = vadd.f32 %v20736_v50, %v16649_v9  ;;  %vm10906_vm12 = vcmp.ge.f32.partialorder %v10630_v12, 0.0 }
 0x524   :  { %v11180_v52 = vmul.f32 0.2, %v10628_v41  ;;  %v10629_v56 = vadd.f32 %v20736_v50, %v16650_v18  ;;  %vm10904_vm1 = vcmp.ge.f32.partialorder %v10628_v41, 0.0 }
 0x525   :  { %vm10907_vm13 = vcmp.ge.f32.partialorder %v10631_v31, 0.0  ;;  %v11183_v43 = vmul.f32 0.2, %v10631_v31  ;;  %v15753_v11 = vpop.f32.mrb[152].mxu1  ;;  %v11458_v46 = vsel %vm10906_vm12, %v10630_v12, %v11182_v21 }
 0x526   :  { %vm10905_vm14 = vcmp.ge.f32.partialorder %v10629_v56, 0.0  ;;  %v11181_v57 = vmul.f32 0.2, %v10629_v56  ;;  %v16337_v30 = vpop.f32.mrb[152].mxu0  ;;  %v4710_v36 = vpop.f32.mrb[153].mxu1  ;;  %v11456_v48 = vsel %vm10904_vm1, %v10628_v41, %v11180_v52 }
 0x527   :  { %v11459_v13 = vsel %vm10907_vm13, %v10631_v31, %v11183_v43  ;;  %v16651_v45 = vadd.f32 %v16337_v30, %v15753_v11  ;;  %v10026_v17 = vpop.f32.mrb[153].mxu0  ;;  %v15754_v16 = vpop.f32.mrb[154].mxu1 }
 0x528   :  { %v14420_v23 = vpack.c.bf16 %v11459_v13, %v11458_v46  ;;  %v11457_v32 = vsel %vm10905_vm14, %v10629_v56, %v11181_v57  ;;  %v16652_v61 = vadd.f32 %v10026_v17, %v4710_v36  ;;  %v16338_v22 = vpop.f32.mrb[154].mxu0  ;;  %v4713_v53 = vpop.f32.mrb[155].mxu1 }
 0x529   :  { %v14415_v26 = vpack.c.bf16 %v11457_v32, %v11456_v48  ;;  %v10634_v49 = vadd.f32 %v20736_v50, %v16651_v45  ;;  %v16653_v55 = vadd.f32 %v16338_v22, %v15754_v16  ;;  %v10029_v42 = vpop.f32.mrb[155].mxu0 }
 0x52a   :  { %14590 = vst [vmem:[%s20898_s3 + $0x408] sm:$0xff] %v14420_v23   ;;  %v10632_v2 = vadd.f32 %v20736_v50, %v16652_v61  ;;  %v16654_v60 = vadd.f32 %v10029_v42, %v4713_v53 }
 0x52b   :  { %14589 = vst [vmem:[%s20898_s3 + $0x400] sm:$0xff] %v14415_v26   ;;  %v11186_v8 = vmul.f32 0.2, %v10634_v49  ;;  %v10635_v35 = vadd.f32 %v20736_v50, %v16653_v55  ;;  %vm10910_vm15 = vcmp.ge.f32.partialorder %v10634_v49, 0.0 }
 0x52c   :  { %v11184_v28 = vmul.f32 0.2, %v10632_v2  ;;  %v10633_v5 = vadd.f32 %v20736_v50, %v16654_v60  ;;  %vm10908_vm0 = vcmp.ge.f32.partialorder %v10632_v2, 0.0 }
 0x52d   :  { %vm10911_vm2 = vcmp.ge.f32.partialorder %v10635_v35, 0.0  ;;  %v11187_v14 = vmul.f32 0.2, %v10635_v35  ;;  %v15757_v39 = vpop.f32.mrb[156].mxu1  ;;  %v11462_v27 = vsel %vm10910_vm15, %v10634_v49, %v11186_v8 }
 0x52e   :  { %vm10909_vm3 = vcmp.ge.f32.partialorder %v10633_v5, 0.0  ;;  %v11185_v29 = vmul.f32 0.2, %v10633_v5  ;;  %v16341_v58 = vpop.f32.mrb[156].mxu0  ;;  %v4726_v59 = vpop.f32.mrb[157].mxu1  ;;  %v11460_v25 = vsel %vm10908_vm0, %v10632_v2, %v11184_v28 }
 0x52f   :  { %v11463_v63 = vsel %vm10911_vm2, %v10635_v35, %v11187_v14  ;;  %v16655_v38 = vadd.f32 %v16341_v58, %v15757_v39  ;;  %v10042_v44 = vpop.f32.mrb[157].mxu0  ;;  %v15758_v1 = vpop.f32.mrb[158].mxu1 }
 0x530   :  { %v14430_v54 = vpack.c.bf16 %v11463_v63, %v11462_v27  ;;  %v11461_v20 = vsel %vm10909_vm3, %v10633_v5, %v11185_v29  ;;  %v16656_v10 = vadd.f32 %v10042_v44, %v4726_v59  ;;  %v16342_v6 = vpop.f32.mrb[158].mxu0  ;;  %v4729_v19 = vpop.f32.mrb[159].mxu1 }
 0x531   :  { %v14425_v62 = vpack.c.bf16 %v11461_v20, %v11460_v25  ;;  %v10638_v15 = vadd.f32 %v20736_v50, %v16655_v38  ;;  %v16657_v3 = vadd.f32 %v16342_v6, %v15758_v1  ;;  %v10045_v34 = vpop.f32.mrb[159].mxu0 }
 0x532   :  { %14592 = vst [vmem:[%s20898_s3 + $0x418] sm:$0xff] %v14430_v54   ;;  %v10636_v4 = vadd.f32 %v20736_v50, %v16656_v10  ;;  %v16658_v47 = vadd.f32 %v10045_v34, %v4729_v19 }
 0x533   :  { %14591 = vst [vmem:[%s20898_s3 + $0x410] sm:$0xff] %v14425_v62   ;;  %v11190_v7 = vmul.f32 0.2, %v10638_v15  ;;  %v10639_v40 = vadd.f32 %v20736_v50, %v16657_v3  ;;  %vm10914_vm4 = vcmp.ge.f32.partialorder %v10638_v15, 0.0 }
 0x534   :  { %v11188_v51 = vmul.f32 0.2, %v10636_v4  ;;  %v10637_v0 = vadd.f32 %v20736_v50, %v16658_v47  ;;  %vm10912_vm5 = vcmp.ge.f32.partialorder %v10636_v4, 0.0 }
 0x535   :  { %vm10915_vm6 = vcmp.ge.f32.partialorder %v10639_v40, 0.0  ;;  %v11191_v37 = vmul.f32 0.2, %v10639_v40  ;;  %v15761_v24 = vpop.f32.mrb[160].mxu1  ;;  %v11466_v41 = vsel %vm10914_vm4, %v10638_v15, %v11190_v7 }
 0x536   :  { %vm10913_vm7 = vcmp.ge.f32.partialorder %v10637_v0, 0.0  ;;  %v11189_v12 = vmul.f32 0.2, %v10637_v0  ;;  %v16345_v9 = vpop.f32.mrb[160].mxu0  ;;  %v4742_v33 = vpop.f32.mrb[161].mxu1  ;;  %v11464_v56 = vsel %vm10912_vm5, %v10636_v4, %v11188_v51 }
 0x537   :  { %v11467_v18 = vsel %vm10915_vm6, %v10639_v40, %v11191_v37  ;;  %v16659_v21 = vadd.f32 %v16345_v9, %v15761_v24  ;;  %v10058_v31 = vpop.f32.mrb[161].mxu0  ;;  %v15762_v52 = vpop.f32.mrb[162].mxu1 }
 0x538   :  { %v14440_v43 = vpack.c.bf16 %v11467_v18, %v11466_v41  ;;  %v11465_v11 = vsel %vm10913_vm7, %v10637_v0, %v11189_v12  ;;  %v16660_v57 = vadd.f32 %v10058_v31, %v4742_v33  ;;  %v16346_v30 = vpop.f32.mrb[162].mxu0  ;;  %v4745_v36 = vpop.f32.mrb[163].mxu1 }
 0x539   :  { %v14435_v46 = vpack.c.bf16 %v11465_v11, %v11464_v56  ;;  %v10642_v13 = vadd.f32 %v20736_v50, %v16659_v21  ;;  %v16661_v45 = vadd.f32 %v16346_v30, %v15762_v52  ;;  %v10061_v17 = vpop.f32.mrb[163].mxu0 }
 0x53a   :  { %14594 = vst [vmem:[%s20898_s3 + $0x428] sm:$0xff] %v14440_v43   ;;  %v10640_v16 = vadd.f32 %v20736_v50, %v16660_v57  ;;  %v16662_v48 = vadd.f32 %v10061_v17, %v4745_v36 }
 0x53b   :  { %14593 = vst [vmem:[%s20898_s3 + $0x420] sm:$0xff] %v14435_v46   ;;  %v11194_v23 = vmul.f32 0.2, %v10642_v13  ;;  %v10643_v32 = vadd.f32 %v20736_v50, %v16661_v45  ;;  %vm10918_vm8 = vcmp.ge.f32.partialorder %v10642_v13, 0.0 }
 0x53c   :  { %v11192_v61 = vmul.f32 0.2, %v10640_v16  ;;  %v10641_v22 = vadd.f32 %v20736_v50, %v16662_v48  ;;  %vm10916_vm9 = vcmp.ge.f32.partialorder %v10640_v16, 0.0 }
 0x53d   :  { %vm10919_vm10 = vcmp.ge.f32.partialorder %v10643_v32, 0.0  ;;  %v11195_v53 = vmul.f32 0.2, %v10643_v32  ;;  %v15765_v26 = vpop.f32.mrb[164].mxu1  ;;  %v11470_v2 = vsel %vm10918_vm8, %v10642_v13, %v11194_v23 }
 0x53e   :  { %vm10917_vm11 = vcmp.ge.f32.partialorder %v10641_v22, 0.0  ;;  %v11193_v49 = vmul.f32 0.2, %v10641_v22  ;;  %v16349_v55 = vpop.f32.mrb[164].mxu0  ;;  %v4758_v42 = vpop.f32.mrb[165].mxu1  ;;  %v11468_v5 = vsel %vm10916_vm9, %v10640_v16, %v11192_v61 }
 0x53f   :  { %v11471_v60 = vsel %vm10919_vm10, %v10643_v32, %v11195_v53  ;;  %v16663_v8 = vadd.f32 %v16349_v55, %v15765_v26  ;;  %v10074_v35 = vpop.f32.mrb[165].mxu0  ;;  %v15766_v28 = vpop.f32.mrb[166].mxu1 }
 0x540   :  { %v14450_v14 = vpack.c.bf16 %v11471_v60, %v11470_v2  ;;  %v11469_v39 = vsel %vm10917_vm11, %v10641_v22, %v11193_v49  ;;  %v16664_v29 = vadd.f32 %v10074_v35, %v4758_v42  ;;  %v16350_v58 = vpop.f32.mrb[166].mxu0  ;;  %v4761_v59 = vpop.f32.mrb[167].mxu1 }
 0x541   :  { %v14445_v27 = vpack.c.bf16 %v11469_v39, %v11468_v5  ;;  %v10646_v63 = vadd.f32 %v20736_v50, %v16663_v8  ;;  %v16665_v38 = vadd.f32 %v16350_v58, %v15766_v28  ;;  %v10077_v44 = vpop.f32.mrb[167].mxu0 }
 0x542   :  { %14596 = vst [vmem:[%s20898_s3 + $0x438] sm:$0xff] %v14450_v14   ;;  %v10644_v1 = vadd.f32 %v20736_v50, %v16664_v29  ;;  %v16666_v25 = vadd.f32 %v10077_v44, %v4761_v59 }
 0x543   :  { %14595 = vst [vmem:[%s20898_s3 + $0x430] sm:$0xff] %v14445_v27   ;;  %v11198_v54 = vmul.f32 0.2, %v10646_v63  ;;  %v10647_v20 = vadd.f32 %v20736_v50, %v16665_v38  ;;  %vm10922_vm12 = vcmp.ge.f32.partialorder %v10646_v63, 0.0 }
 0x544   :  { %v11196_v10 = vmul.f32 0.2, %v10644_v1  ;;  %v10645_v6 = vadd.f32 %v20736_v50, %v16666_v25  ;;  %vm10920_vm1 = vcmp.ge.f32.partialorder %v10644_v1, 0.0 }
 0x545   :  { %vm10923_vm13 = vcmp.ge.f32.partialorder %v10647_v20, 0.0  ;;  %v11199_v19 = vmul.f32 0.2, %v10647_v20  ;;  %v11474_v15 = vsel %vm10922_vm12, %v10646_v63, %v11198_v54 }
 0x546   :  { %vm10921_vm14 = vcmp.ge.f32.partialorder %v10645_v6, 0.0  ;;  %v11197_v62 = vmul.f32 0.2, %v10645_v6  ;;  %v11472_v34 = vsel %vm10920_vm1, %v10644_v1, %v11196_v10 }
 0x547   :  { %v11475_v3 = vsel %vm10923_vm13, %v10647_v20, %v11199_v19 }
 0x548   :  { %v14460_v4 = vpack.c.bf16 %v11475_v3, %v11474_v15  ;;  %v11473_v47 = vsel %vm10921_vm14, %v10645_v6, %v11197_v62 }
 0x549   :  { %v14455_v7 = vpack.c.bf16 %v11473_v47, %v11472_v34 }
 0x54a   :  { %14598 = vst [vmem:[%s20898_s3 + $0x448] sm:$0xff] %v14460_v4  }
 0x54b   :  { %14597 = vst [vmem:[%s20898_s3 + $0x440] sm:$0xff] %v14455_v7  }

// kernel: discriminator_forward.5
= control target key start
LH: loop header
LB: loop body
LE: loop exit
PB: predicated region body
PF: predicated region fallthrough
CT: control target
= control target key end

     0   :  { %vm318_vm0 = vsmask.f32 7424  ;;  %vm2588_vm1 = vcmask 1046528   ;;  %s6369_s1 = inlined_call_operand.vmem [shape: bf16[4,128,128], index: 1, kind: input, shape index: {}]   ;;  %s6370_s0 = inlined_call_operand.vmem [shape: bf16[1,640,128], index: 0, kind: input, shape index: {}]   ;;  %s6371_s2 = inlined_call_operand.vmem [shape: f32[1,128], index: 2, kind: input, shape index: {}]   ;;  %s6372_s3 = inlined_call_operand.vmem [shape: bf16[1,608,128], index: 3, kind: output, shape index: {}]  }
   0x1   :  { %v5179_v0 = vld [vmem:[%s6369_s1 + $0x40] sm:$0xff]   ;;  %v5181_v2 = vld [vmem:[%s6369_s1 + $0x48] sm:$0xff]   ;;  %v5183_v4 = vld [vmem:[%s6369_s1 + $0x50] sm:$0xff]  }
   0x2   :  { %v5180_v1 = vld [vmem:[%s6369_s1 + $0x80] sm:$0xff]   ;;  %4583 = vmatprep.subr.bf16.mxu1 %v5179_v0  ;;  %v5182_v3 = vld [vmem:[%s6369_s1 + $0x88] sm:$0xff]   ;;  %v5184_v5 = vld [vmem:[%s6369_s1 + $0x90] sm:$0xff]  }
   0x3   :  { %4767 = vmatprep.subr.bf16.mxu0 %v5180_v1  ;;  %4584 = vmatpush3.bf16.msra.mxu1 %v5179_v0  ;;  %v5185_v6 = vld [vmem:[%s6369_s1 + $0x58] sm:$0xff]   ;;  %v5187_v8 = vld [vmem:[%s6369_s1 + $0x60] sm:$0xff]   ;;  %v5189_v10 = vld [vmem:[%s6369_s1 + $0x68] sm:$0xff]  }
   0x4   :  { %4768 = vmatpush3.bf16.msra.mxu0 %v5180_v1  ;;  %4585 = vmatprep.subr.bf16.mxu1 %v5181_v2  ;;  %v5186_v7 = vld [vmem:[%s6369_s1 + $0x98] sm:$0xff]   ;;  %v5188_v9 = vld [vmem:[%s6369_s1 + $0xa0] sm:$0xff]   ;;  %v5190_v11 = vld [vmem:[%s6369_s1 + $0xa8] sm:$0xff]  }
   0x5   :  { %4769 = vmatprep.subr.bf16.mxu0 %v5182_v3  ;;  %v5195_v12 = vld [vmem:[%s6370_s0] sm:$0xff]   ;;  %v5196_v13 = vld [vmem:[%s6370_s0 + $0x8] sm:$0xff]   ;;  %v5191_v14 = vld [vmem:[%s6369_s1 + $0x70] sm:$0xff]  }
   0x6   :  { %v1473_v15 = vld [vmem:[%s6370_s0 + $0x8] sm:$0xf]  ;;  %v1474_v16 = vld [vmem:[%s6370_s0 + $0xc] sm:$0xf]  ;;  %v5192_v17 = vld [vmem:[%s6369_s1 + $0xb0] sm:$0xff]   ;;  %v320_v18 = vshrl.u32 %v5195_v12, 16 }
   0x7   :  { %4586 = vmatpush3.bf16.msra.mxu1 %v5181_v2  ;;  %v322_v19 = vshll.u32 %v5195_v12, 16  ;;  %v327_v20 = vshll.u32 %v5196_v13, 16  ;;  %v3947_v21 = vcombine.low %v1473_v15, %v1474_v16  ;;  %v5198_v22 = vld [vmem:[%s6370_s0 + $0x10] sm:$0xff]   ;;  %v5193_v28 = vld [vmem:[%s6369_s1 + $0x78] sm:$0xff]   ;;  %v331_v35 = vshrl.u32 %v5196_v13, 16  ;;  %v5200_v42 = vld [vmem:[%s6369_s1] sm:$0xff]  }
   0x8   :  { %4770 = vmatpush3.bf16.msra.mxu0 %v5182_v3  ;;  %4587 = vmatprep.subr.bf16.mxu1 %v5183_v4  ;;  %v5199_v23 = vld [vmem:[%s6370_s0 + $0x10] sm:$0xff]   ;;  %v1768_v29 = vshll.u32 %v5198_v22, 16  ;;  %v5201_v31 = vld [vmem:[%s6370_s0 + $0x18] sm:$0xff]   ;;  %v1772_v38 = vshrl.u32 %v5198_v22, 16  ;;  %v5204_v46 = vld [vmem:[%s6370_s0 + $0x20] sm:$0xff]  }
   0x9   :  { %4771 = vmatprep.subr.bf16.mxu0 %v5184_v5  ;;  %v324_v24 = vrot.slane %v322_v19, 1  ;;  %v329_v25 = vrot.slane %v327_v20, 1  ;;  %v1761_v26 = vshrl.u32 %v3947_v21, 16  ;;  %v1763_v27 = vshll.u32 %v3947_v21, 16  ;;  %v5194_v32 = vld [vmem:[%s6369_s1 + $0xb8] sm:$0xff]   ;;  %v5205_v50 = vld [vmem:[%s6370_s0 + $0x20] sm:$0xff]  }
   0xa   :  { %v335_v30 = vshll.u32 %v5199_v23, 16  ;;  %v1770_v36 = vrot.slane %v1768_v29, 1  ;;  %v1776_v39 = vshll.u32 %v5201_v31, 16  ;;  %v5203_v44 = vld [vmem:[%s6370_s0 + $0x18] sm:$0xff]   ;;  %v339_v45 = vshrl.u32 %v5199_v23, 16  ;;  %v5202_v54 = vld [vmem:[%s6369_s1 + $0xc0] sm:$0xff]  }
   0xb   :  { %4588 = vmatpush3.bf16.msra.mxu1 %v5183_v4  ;;  %v325_v33 = vor.u32 %v324_v24, %v320_v18  ;;  %v1765_v34 = vrot.slane %v1763_v27, 1  ;;  %v333_v48 = vor.u32 %v331_v35, %v329_v25  ;;  %v1780_v49 = vshrl.u32 %v5201_v31, 16  ;;  %v5206_v57 = vld [vmem:[%s6370_s0 + $0x28] sm:$0xff]   ;;  %v5208_v4 = vld [vmem:[%s6370_s0 + $0x30] sm:$0xff]   ;;  %v5213_v24 = vld [vmem:[%s6370_s0 + $0x38] sm:$0xff]  }
   0xc   :  { %4772 = vmatpush3.bf16.msra.mxu0 %v5184_v5  ;;  %4589 = vmatprep.subr.bf16.mxu1 %v5185_v6  ;;  %v337_v37 = vrot.slane %v335_v30, 1  ;;  %v1778_v43 = vrot.slane %v1776_v39, 1  ;;  %v1774_v51 = vor.u32 %v1772_v38, %v1770_v36  ;;  %v343_v52 = vshll.u32 %v5203_v44, 16  ;;  %v5207_v1 = vld [vmem:[%s6370_s0 + $0x28] sm:$0xff]   ;;  %v5215_v38 = vld [vmem:[%s6370_s0 + $0x40] sm:$0xff]  }
   0xd   :  { %4773 = vmatprep.subr.bf16.mxu0 %v5186_v7  ;;  %v330_v40 = vsel %vm318_vm0, %v325_v33, %v329_v25  ;;  %v1766_v41 = vor.u32 %v1765_v34, %v1761_v26  ;;  %v1784_v53 = vshll.u32 %v5204_v46, 16  ;;  %v351_v56 = vshll.u32 %v5205_v50, 16  ;;  %v5211_v18 = vld [vmem:[%s6369_s1 + $0x8] sm:$0xff]   ;;  %v5214_v25 = vld [vmem:[%s6370_s0 + $0x40] sm:$0xff]  }
   0xe   :  { %4599 = vmatprep.mubr.bf16.mxu1 %v330_v40  ;;  %v341_v55 = vor.u32 %v339_v45, %v337_v37  ;;  %v345_v58 = vrot.slane %v343_v52, 1  ;;  %v1782_v59 = vor.u32 %v1780_v49, %v1778_v43  ;;  %v338_v61 = vsel %vm318_vm0, %v333_v48, %v337_v37  ;;  %v5212_v21 = vld [vmem:[%s6369_s1 + $0xc8] sm:$0xff]  }
   0xf   :  { %4590 = vmatpush3.bf16.msra.mxu1 %v5185_v6  ;;  %v1771_v47 = vsel %vm318_vm0, %v1766_v41, %v1770_v36  ;;  %v1786_v60 = vrot.slane %v1784_v53, 1  ;;  %v347_v62 = vshrl.u32 %v5203_v44, 16  ;;  %v1788_v63 = vshrl.u32 %v5204_v46, 16  ;;  %v5216_v39 = vld [vmem:[%s6370_s0 + $0x48] sm:$0xff]  }
  0x10   :  { %4774 = vmatpush3.bf16.msra.mxu0 %v5186_v7  ;;  %4591 = vmatprep.subr.bf16.mxu1 %v5187_v8  ;;  %v1792_v0 = vshll.u32 %v5206_v57, 16  ;;  %v1779_v2 = vsel %vm318_vm0, %v1774_v51, %v1778_v43  ;;  %v355_v3 = vshrl.u32 %v5205_v50, 16  ;;  %v346_v5 = vsel %vm318_vm0, %v341_v55, %v345_v58  ;;  %v5481_v43 = vld [vmem:[%s6370_s0 + $0x50] sm:$0xff]  }
  0x11   :  { %4775 = vmatprep.subr.bf16.mxu0 %v5188_v9  ;;  %4783 = vmatprep.mubr.bf16.mxu0 %v1771_v47  ;;  %v353_v6 = vrot.slane %v351_v56, 1  ;;  %v359_v7 = vshll.u32 %v5207_v1, 16  ;;  %v349_v12 = vor.u32 %v347_v62, %v345_v58  ;;  %v1790_v15 = vor.u32 %v1788_v63, %v1786_v60  ;;  %v5221_v56 = vld [vmem:[%s6369_s1 + $0x10] sm:$0xff]  }
  0x12   :  { %v1794_v13 = vrot.slane %v1792_v0, 1  ;;  %v363_v22 = vshrl.u32 %v5207_v1, 16  ;;  %v1804_v27 = vshrl.u32 %v5208_v4, 16  ;;  %v1816_v35 = vshll.u32 %v5214_v25, 16  ;;  %v5219_v63 = vld [vmem:[%s6370_s0 + $0x50] sm:$0xff]  }
  0x13   :  { %4592 = vmatpush3.bf16.msra.mxu1 %v5187_v8  ;;  %v1796_v8 = vshrl.u32 %v5206_v57, 16  ;;  %v357_v16 = vor.u32 %v355_v3, %v353_v6  ;;  %v354_v26 = vsel %vm318_vm0, %v349_v12, %v353_v6  ;;  %v379_v48 = vshrl.u32 %v5213_v24, 16  ;;  %v5223_v6 = vld [vmem:[%s6370_s0 + $0x58] sm:$0xff]  }
  0x14   :  { %4776 = vmatpush3.bf16.msra.mxu0 %v5188_v9  ;;  %4593 = vmatprep.subr.bf16.mxu1 %v5189_v10  ;;  %v1787_v9 = vsel %vm318_vm0, %v1782_v59, %v1786_v60  ;;  %v1795_v29 = vsel %vm318_vm0, %v1790_v15, %v1794_v13  ;;  %v1818_v47 = vrot.slane %v1816_v35, 1  ;;  %v383_v50 = vshll.u32 %v5215_v38, 16  ;;  %v5222_v60 = vld [vmem:[%s6369_s1 + $0xd0] sm:$0xff]  }
  0x15   :  { %4777 = vmatprep.subr.bf16.mxu0 %v5190_v11  ;;  %v1798_v19 = vor.u32 %v1796_v8, %v1794_v13  ;;  %v1820_v51 = vshrl.u32 %v5214_v25, 16  ;;  %v1824_v52 = vshll.u32 %v5216_v39, 16  ;;  %v387_v53 = vshrl.u32 %v5215_v38, 16  ;;  %v5226_v25 = vld [vmem:[%s6370_s0 + $0x68] sm:$0xff]  }
  0x16   :  { %v1828_v55 = vshrl.u32 %v5216_v39, 16  ;;  %v1832_v59 = vshll.u32 %v5481_v43, 16  ;;  %v385_v62 = vrot.slane %v383_v50, 1  ;;  %v1836_v13 = vshrl.u32 %v5481_v43, 16 }
  0x17   :  { %4594 = vmatpush3.bf16.msra.mxu1 %v5189_v10  ;;  %v1800_v10 = vshll.u32 %v5208_v4, 16  ;;  %v1826_v1 = vrot.slane %v1824_v52, 1  ;;  %v1822_v3 = vor.u32 %v1820_v51, %v1818_v47  ;;  %v5235_v51 = vld [vmem:[%s6369_s1 + $0x18] sm:$0xff]  }
  0x18   :  { %4778 = vmatpush3.bf16.msra.mxu0 %v5190_v11  ;;  %4595 = vmatprep.subr.bf16.mxu1 %v5191_v14  ;;  %v5209_v11 = vld [vmem:[%s6370_s0 + $0x30] sm:$0xff]   ;;  %v389_v4 = vor.u32 %v387_v53, %v385_v62  ;;  %v1834_v8 = vrot.slane %v1832_v59, 1  ;;  %v5236_v52 = vld [vmem:[%s6369_s1 + $0xd8] sm:$0xff]  }
  0x19   :  { %4779 = vmatprep.subr.bf16.mxu0 %v5192_v17  ;;  %v1802_v20 = vrot.slane %v1800_v10, 1  ;;  %v367_v23 = vshll.u32 %v5209_v11, 16  ;;  %v371_v31 = vshrl.u32 %v5209_v11, 16  ;;  %v399_v11 = vshll.u32 %v5219_v63, 16 }
  0x1a   :  { %v1827_v15 = vsel %vm318_vm0, %v1822_v3, %v1826_v1 }
  0x1b   :  { %4596 = vmatpush3.bf16.msra.mxu1 %v5191_v14  ;;  %v5210_v14 = vld [vmem:[%s6370_s0 + $0x38] sm:$0xff]   ;;  %v1803_v33 = vsel %vm318_vm0, %v1798_v19, %v1802_v20  ;;  %v369_v37 = vrot.slane %v367_v23, 1  ;;  %v1806_v44 = vor.u32 %v1804_v27, %v1802_v20  ;;  %v401_v23 = vrot.slane %v399_v11, 1  ;;  %v5227_v27 = vld [vmem:[%s6370_s0 + $0x68] sm:$0xff]  }
  0x1c   :  { %4780 = vmatpush3.bf16.msra.mxu0 %v5192_v17  ;;  %4597 = vmatprep.subr.bf16.mxu1 %v5193_v28  ;;  %v361_v17 = vrot.slane %v359_v7, 1  ;;  %v1812_v34 = vshrl.u32 %v5210_v14, 16  ;;  %v1830_v7 = vor.u32 %v1828_v55, %v1826_v1 }
  0x1d   :  { %4781 = vmatprep.subr.bf16.mxu0 %v5194_v32  ;;  %v373_v45 = vor.u32 %v371_v31, %v369_v37  ;;  %v5228_v31 = vld [vmem:[%s6370_s0 + $0x70] sm:$0xff]  }
  0x1e   :  { %v362_v30 = vsel %vm318_vm0, %v357_v16, %v361_v17  ;;  %v365_v36 = vor.u32 %v363_v22, %v361_v17  ;;  %v403_v17 = vshrl.u32 %v5219_v63, 16  ;;  %v1835_v19 = vsel %vm318_vm0, %v1830_v7, %v1834_v8 }
  0x1f   :  { %4598 = vmatpush3.bf16.msra.mxu1 %v5193_v28  ;;  %v1808_v28 = vshll.u32 %v5210_v14, 16  ;;  %v1864_v43 = vshll.u32 %v5228_v31, 16  ;;  %v1868_v3 = vshrl.u32 %v5228_v31, 16 }
  0x20   :  { %4782 = vmatpush3.bf16.msra.mxu0 %v5194_v32  ;;  %4675 = vmatprep.subr.bf16.mxu1 %v5200_v42  ;;  %v375_v32 = vshll.u32 %v5213_v24, 16  ;;  %v370_v49 = vsel %vm318_vm0, %v365_v36, %v369_v37  ;;  %v5225_v24 = vld [vmem:[%s6370_s0 + $0x60] sm:$0xff]   ;;  %v1856_v36 = vshll.u32 %v5226_v25, 16  ;;  %v411_v37 = vshrl.u32 %v5223_v6, 16 }
  0x21   :  { %4859 = vmatprep.subr.bf16.mxu0 %v5202_v54  ;;  %v1810_v40 = vrot.slane %v1808_v28, 1  ;;  %v1838_v28 = vor.u32 %v1836_v13, %v1834_v8  ;;  %v415_v35 = vshll.u32 %v5225_v24, 16  ;;  %v419_v39 = vshrl.u32 %v5225_v24, 16 }
  0x22   :  { %4600 = vmatmul.mubr.bf16.vlgmr.msra.gmra.mrb[0].mxu1 %v338_v61  ;;  %v377_v41 = vrot.slane %v375_v32, 1  ;;  %v1858_v50 = vrot.slane %v1856_v36, 1 }
  0x23   :  { %4784 = vmatmul.mubr.bf16.vlgmr.msra.gmra.mrb[0].mxu0 %v1779_v2  ;;  %4676 = vmatpush3.bf16.msra.mxu1 %v5200_v42  ;;  %v5217_v42 = vld [vmem:[%s6370_s0 + $0x48] sm:$0xff]   ;;  %v1814_v46 = vor.u32 %v1812_v34, %v1810_v40  ;;  %v1811_v57 = vsel %vm318_vm0, %v1806_v44, %v1810_v40  ;;  %v5220_v2 = vld [vmem:[%s6370_s0 + $0x58] sm:$0xff]   ;;  %v423_v40 = vshll.u32 %v5227_v27, 16  ;;  %v5229_v44 = vld [vmem:[%s6370_s0 + $0x70] sm:$0xff]  }
  0x24   :  { %4860 = vmatpush3.bf16.msra.mxu0 %v5202_v54  ;;  %4603 = vmatprep.mubr.bf16.mxu1 %v346_v5  ;;  %v391_v54 = vshll.u32 %v5217_v42, 16  ;;  %v378_v58 = vsel %vm318_vm0, %v373_v45, %v377_v41  ;;  %v381_v0 = vor.u32 %v379_v48, %v377_v41  ;;  %v395_v10 = vshrl.u32 %v5217_v42, 16  ;;  %v5536_v48 = vld [vmem:[%s6370_s0 + $0x78] sm:$0xff]  }
  0x25   :  { %4787 = vmatprep.mubr.bf16.mxu0 %v1787_v9  ;;  %4677 = vmatprep.subr.bf16.mxu1 %v5211_v18  ;;  %v1819_v61 = vsel %vm318_vm0, %v1814_v46, %v1818_v47  ;;  %v5224_v9 = vld [vmem:[%s6370_s0 + $0x60] sm:$0xff]   ;;  %v1840_v14 = vshll.u32 %v5220_v2, 16  ;;  %v1844_v20 = vshrl.u32 %v5220_v2, 16  ;;  %v1860_v46 = vshrl.u32 %v5226_v25, 16  ;;  %v5230_v47 = vld [vmem:[%s6370_s0 + $0x78] sm:$0xff]  }
  0x26   :  { %4861 = vmatprep.subr.bf16.mxu0 %v5212_v21  ;;  %v393_v5 = vrot.slane %v391_v54, 1  ;;  %v386_v12 = vsel %vm318_vm0, %v381_v0, %v385_v62  ;;  %v1852_v38 = vshrl.u32 %v5224_v9, 16  ;;  %v431_v59 = vshll.u32 %v5229_v44, 16  ;;  %v5246_v25 = vld [vmem:[%s6369_s1 + $0xe0] sm:$0xff]  }
  0x27   :  { %4678 = vmatpush3.bf16.msra.mxu1 %v5211_v18  ;;  %v407_v18 = vshll.u32 %v5223_v6, 16  ;;  %v1872_v0 = vshll.u32 %v5230_v47, 16  ;;  %v439_v1 = vshll.u32 %v5536_v48, 16 }
  0x28   :  { %4862 = vmatpush3.bf16.msra.mxu0 %v5212_v21  ;;  %4679 = vmatprep.subr.bf16.mxu1 %v5221_v56  ;;  %v394_v16 = vsel %vm318_vm0, %v389_v4, %v393_v5  ;;  %v1848_v21 = vshll.u32 %v5224_v9, 16  ;;  %v397_v22 = vor.u32 %v395_v10, %v393_v5  ;;  %v435_v4 = vshrl.u32 %v5229_v44, 16  ;;  %v5233_v9 = vld [vmem:[%s6370_s0 + $0x80] sm:$0xff]   ;;  %v5234_v10 = vld [vmem:[%s6370_s0 + $0x88] sm:$0xff]  }
  0x29   :  { %4863 = vmatprep.subr.bf16.mxu0 %v5222_v60  ;;  %v1876_v5 = vshrl.u32 %v5230_v47, 16  ;;  %v433_v7 = vrot.slane %v431_v59, 1  ;;  %v441_v13 = vrot.slane %v439_v1, 1  ;;  %v1888_v24 = vshll.u32 %v5234_v10, 16  ;;  %v5604_v59 = vld [vmem:[%s6370_s0 + $0xa0] sm:$0xff]  }
  0x2a   :  { %4604 = vmatmul.mubr.bf16.gmra.mrb[4].mxu1 %v354_v26  ;;  %v1842_v26 = vrot.slane %v1840_v14, 1  ;;  %v402_v34 = vsel %vm318_vm0, %v397_v22, %v401_v23  ;;  %v5238_v22 = vld [vmem:[%s6370_s0 + $0x90] sm:$0xff]  }
  0x2b   :  { %4788 = vmatmul.mubr.bf16.gmra.mrb[4].mxu0 %v1795_v29  ;;  %4607 = vmatprep.mubr.bf16.mxu1 %v362_v30  ;;  %v405_v29 = vor.u32 %v403_v17, %v401_v23  ;;  %v409_v30 = vrot.slane %v407_v18, 1  ;;  %v5237_v17 = vld [vmem:[%s6370_s0 + $0x88] sm:$0xff]   ;;  %v5245_v23 = vld [vmem:[%s6369_s1 + $0x20] sm:$0xff]  }
  0x2c   :  { %4791 = vmatprep.mubr.bf16.mxu0 %v1803_v33  ;;  %4680 = vmatpush3.bf16.msra.mxu1 %v5221_v56  ;;  %v1846_v32 = vor.u32 %v1844_v20, %v1842_v26  ;;  %v1850_v33 = vrot.slane %v1848_v21, 1  ;;  %v1843_v41 = vsel %vm318_vm0, %v1838_v28, %v1842_v26  ;;  %v425_v56 = vrot.slane %v423_v40, 1 }
  0x2d   :  { %4864 = vmatpush3.bf16.msra.mxu0 %v5222_v60  ;;  %v410_v42 = vsel %vm318_vm0, %v405_v29, %v409_v30  ;;  %v413_v53 = vor.u32 %v411_v37, %v409_v30  ;;  %4681 = vmatprep.subr.bf16.mxu1 %v5235_v51  ;;  %v5232_v60 = vld [vmem:[%s6370_s0 + $0x80] sm:$0xff]   ;;  %v447_v20 = vshll.u32 %v5233_v9, 16  ;;  %v451_v29 = vshrl.u32 %v5233_v9, 16 }
  0x2e   :  { %v1851_v45 = vsel %vm318_vm0, %v1846_v32, %v1850_v33  ;;  %v1854_v54 = vor.u32 %v1852_v38, %v1850_v33  ;;  %4865 = vmatprep.subr.bf16.mxu0 %v5236_v52  ;;  %v1880_v8 = vshll.u32 %v5232_v60, 16  ;;  %v1884_v21 = vshrl.u32 %v5232_v60, 16  ;;  %v5256_v60 = vld [vmem:[%s6369_s1 + $0x28] sm:$0xff]  }
  0x2f   :  { %v455_v30 = vshll.u32 %v5237_v17, 16  ;;  %v1892_v32 = vshrl.u32 %v5234_v10, 16  ;;  %v1896_v33 = vshll.u32 %v5238_v22, 16  ;;  %v1890_v38 = vrot.slane %v1888_v24, 1  ;;  %v5647_v24 = vld [vmem:[%s6370_s0 + $0xb8] sm:$0xff]  }
  0x30   :  { %4682 = vmatpush3.bf16.msra.mxu1 %v5235_v51  ;;  %v1859_v63 = vsel %vm318_vm0, %v1854_v54, %v1858_v50  ;;  %v479_v9 = vshll.u32 %v5604_v59, 16 }
  0x31   :  { %4866 = vmatpush3.bf16.msra.mxu0 %v5236_v52  ;;  %4683 = vmatprep.subr.bf16.mxu1 %v5245_v23  ;;  %v1898_v44 = vrot.slane %v1896_v33, 1  ;;  %v1900_v52 = vshrl.u32 %v5238_v22, 16  ;;  %v5642_v22 = vld [vmem:[%s6370_s0 + $0xb0] sm:$0xff]  }
  0x32   :  { %4608 = vmatmul.mubr.bf16.gmra.mrb[8].mxu1 %v370_v49  ;;  %v417_v49 = vrot.slane %v415_v35, 1  ;;  %4867 = vmatprep.subr.bf16.mxu0 %v5246_v25  ;;  %v5239_v35 = vld [vmem:[%s6370_s0 + $0x90] sm:$0xff]   ;;  %v495_v33 = vshll.u32 %v5642_v22, 16 }
  0x33   :  { %4792 = vmatmul.mubr.bf16.gmra.mrb[8].mxu0 %v1811_v57  ;;  %4611 = vmatprep.mubr.bf16.mxu1 %v378_v58  ;;  %v1866_v57 = vrot.slane %v1864_v43, 1  ;;  %v1862_v58 = vor.u32 %v1860_v46, %v1858_v50  ;;  %v1894_v43 = vor.u32 %v1892_v32, %v1890_v38  ;;  %v463_v46 = vshll.u32 %v5239_v35, 16 }
  0x34   :  { %4795 = vmatprep.mubr.bf16.mxu0 %v1819_v61  ;;  %v421_v55 = vor.u32 %v419_v39, %v417_v49  ;;  %v427_v61 = vshrl.u32 %v5227_v27, 16  ;;  %v418_v62 = vsel %vm318_vm0, %v413_v53, %v417_v49  ;;  %4684 = vmatpush3.bf16.msra.mxu1 %v5245_v23  ;;  %v5581_v39 = vld [vmem:[%s6370_s0 + $0x98] sm:$0xff]   ;;  %v459_v49 = vshrl.u32 %v5237_v17, 16 }
  0x35   :  { %v1867_v6 = vsel %vm318_vm0, %v1862_v58, %v1866_v57  ;;  %v1870_v14 = vor.u32 %v1868_v3, %v1866_v57  ;;  %4868 = vmatpush3.bf16.msra.mxu0 %v5246_v25  ;;  %v1904_v50 = vshll.u32 %v5581_v39, 16  ;;  %v467_v53 = vshrl.u32 %v5239_v35, 16  ;;  %4685 = vmatprep.subr.bf16.mxu1 %v5256_v60 }
  0x36   :  { %v426_v2 = vsel %vm318_vm0, %v421_v55, %v425_v56  ;;  %v429_v11 = vor.u32 %v427_v61, %v425_v56  ;;  %v1899_v55 = vsel %vm318_vm0, %v1894_v43, %v1898_v44  ;;  %v1908_v56 = vshrl.u32 %v5581_v39, 16 }
  0x37   :  { %v465_v58 = vrot.slane %v463_v46, 1  ;;  %v1902_v1 = vor.u32 %v1900_v52, %v1898_v44  ;;  %v1940_v46 = vshrl.u32 %v5647_v24, 16 }
  0x38   :  { %v434_v26 = vsel %vm318_vm0, %v429_v11, %v433_v7  ;;  %4686 = vmatpush3.bf16.msra.mxu1 %v5256_v60  ;;  %v5270_v60 = vld [vmem:[%s6369_s1 + $0xf0] sm:$0xff]  }
  0x3a   :  { %4612 = vmatmul.mubr.bf16.gmra.mrb[12].mxu1 %v386_v12  ;;  %v1874_v12 = vrot.slane %v1872_v0, 1  ;;  %v5617_v0 = vld [vmem:[%s6370_s0 + $0xa8] sm:$0xff]  }
  0x3b   :  { %4796 = vmatmul.mubr.bf16.gmra.mrb[12].mxu0 %v1827_v15  ;;  %4615 = vmatprep.mubr.bf16.mxu1 %v394_v16  ;;  %v437_v15 = vor.u32 %v435_v4, %v433_v7  ;;  %v443_v16 = vshrl.u32 %v5536_v48, 16  ;;  %v5258_v4 = vld [vmem:[%s6369_s1 + $0xe8] sm:$0xff]   ;;  %v5625_v7 = vld [vmem:[%s6370_s0 + $0xb0] sm:$0xff]  }
  0x3c   :  { %4799 = vmatprep.mubr.bf16.mxu0 %v1835_v19  ;;  %v1878_v18 = vor.u32 %v1876_v5, %v1874_v12  ;;  %v1882_v19 = vrot.slane %v1880_v8, 1  ;;  %v1875_v27 = vsel %vm318_vm0, %v1870_v14, %v1874_v12  ;;  %4869 = vmatprep.subr.bf16.mxu0 %v5258_v4  ;;  %v1932_v35 = vshrl.u32 %v5625_v7, 16 }
  0x3d   :  { %v442_v28 = vsel %vm318_vm0, %v437_v15, %v441_v13  ;;  %v445_v36 = vor.u32 %v443_v16, %v441_v13  ;;  %4870 = vmatpush3.bf16.msra.mxu0 %v5258_v4  ;;  %v483_v15 = vshrl.u32 %v5604_v59, 16  ;;  %v487_v16 = vshll.u32 %v5617_v0, 16 }
  0x3e   :  { %v1883_v31 = vsel %vm318_vm0, %v1878_v18, %v1882_v19  ;;  %v1886_v37 = vor.u32 %v1884_v21, %v1882_v19  ;;  %v1928_v19 = vshll.u32 %v5625_v7, 16  ;;  %v481_v21 = vrot.slane %v479_v9, 1  ;;  %4871 = vmatprep.subr.bf16.mxu0 %v5270_v60 }
  0x40   :  { %v1891_v48 = vsel %vm318_vm0, %v1886_v37, %v1890_v38  ;;  %v499_v37 = vshrl.u32 %v5642_v22, 16 }
  0x41   :  { %4872 = vmatpush3.bf16.msra.mxu0 %v5270_v60 }
  0x42   :  { %4616 = vmatmul.mubr.bf16.gmra.mrb[16].mxu1 %v402_v34  ;;  %v449_v34 = vrot.slane %v447_v20, 1 }
  0x43   :  { %4800 = vmatmul.mubr.bf16.gmra.mrb[16].mxu0 %v1843_v41  ;;  %4619 = vmatprep.mubr.bf16.mxu1 %v410_v42  ;;  %v457_v41 = vrot.slane %v455_v30, 1  ;;  %v5586_v42 = vld [vmem:[%s6370_s0 + $0x98] sm:$0xff]  }
  0x44   :  { %4803 = vmatprep.mubr.bf16.mxu0 %v1851_v45  ;;  %v453_v40 = vor.u32 %v451_v29, %v449_v34  ;;  %v5591_v45 = vld [vmem:[%s6370_s0 + $0xa0] sm:$0xff]   ;;  %v450_v47 = vsel %vm318_vm0, %v445_v36, %v449_v34  ;;  %v471_v54 = vshll.u32 %v5586_v42, 16  ;;  %v475_v8 = vshrl.u32 %v5586_v42, 16 }
  0x45   :  { %v1912_v57 = vshll.u32 %v5591_v45, 16  ;;  %v461_v61 = vor.u32 %v459_v49, %v457_v41  ;;  %v1916_v11 = vshrl.u32 %v5591_v45, 16  ;;  %v5657_v29 = vld [vmem:[%s6370_s0 + $0xc0] sm:$0xff]   ;;  %v491_v34 = vshrl.u32 %v5617_v0, 16  ;;  %v5679_v49 = vld [vmem:[%s6370_s0 + $0xc8] sm:$0xff]  }
  0x46   :  { %v458_v51 = vsel %vm318_vm0, %v453_v40, %v457_v41  ;;  %v473_v3 = vrot.slane %v471_v54, 1  ;;  %v1936_v36 = vshll.u32 %v5647_v24, 16  ;;  %v1944_v43 = vshll.u32 %v5657_v29, 16 }
  0x47   :  { %v466_v10 = vsel %vm318_vm0, %v461_v61, %v465_v58  ;;  %v1952_v4 = vshll.u32 %v5679_v49, 16 }
  0x48   :  { %v477_v20 = vor.u32 %v475_v8, %v473_v3  ;;  %v1938_v52 = vrot.slane %v1936_v36, 1 }
  0x4a   :  { %4620 = vmatmul.mubr.bf16.gmra.mrb[20].mxu1 %v418_v62  ;;  %v1906_v62 = vrot.slane %v1904_v50, 1  ;;  %v482_v32 = vsel %vm318_vm0, %v477_v20, %v481_v21  ;;  %v5684_v50 = vld [vmem:[%s6370_s0 + $0xc8] sm:$0xff]   ;;  %v1942_v61 = vor.u32 %v1940_v46, %v1938_v52 }
  0x4b   :  { %4804 = vmatmul.mubr.bf16.gmra.mrb[20].mxu0 %v1859_v63  ;;  %4623 = vmatprep.mubr.bf16.mxu1 %v426_v2  ;;  %v5612_v63 = vld [vmem:[%s6370_s0 + $0xa8] sm:$0xff]   ;;  %v469_v2 = vor.u32 %v467_v53, %v465_v58  ;;  %v5269_v53 = vld [vmem:[%s6369_s1 + $0x30] sm:$0xff]   ;;  %v519_v9 = vshll.u32 %v5684_v50, 16 }
  0x4c   :  { %4807 = vmatprep.mubr.bf16.mxu0 %v1867_v6  ;;  %v1910_v5 = vor.u32 %v1908_v56, %v1906_v62  ;;  %v1914_v6 = vrot.slane %v1912_v57, 1  ;;  %v1920_v12 = vshll.u32 %v5612_v63, 16  ;;  %v1907_v13 = vsel %vm318_vm0, %v1902_v1, %v1906_v62  ;;  %v5692_v58 = vld [vmem:[%s6370_s0 + $0xd0] sm:$0xff]   ;;  %4687 = vmatprep.subr.bf16.mxu1 %v5269_v53 }
  0x4d   :  { %v474_v14 = vsel %vm318_vm0, %v469_v2, %v473_v3  ;;  %v1924_v18 = vshrl.u32 %v5612_v63, 16  ;;  %v1946_v57 = vrot.slane %v1944_v43, 1  ;;  %4688 = vmatpush3.bf16.msra.mxu1 %v5269_v53  ;;  %v1948_v3 = vshrl.u32 %v5657_v29, 16 }
  0x4e   :  { %v1915_v17 = vsel %vm318_vm0, %v1910_v5, %v1914_v6  ;;  %v1922_v23 = vrot.slane %v1920_v12, 1  ;;  %v1918_v25 = vor.u32 %v1916_v11, %v1914_v6  ;;  %v1956_v11 = vshrl.u32 %v5679_v49, 16 }
  0x4f   :  { %v1960_v12 = vshll.u32 %v5692_v58, 16  ;;  %v521_v20 = vrot.slane %v519_v9, 1 }
  0x50   :  { %v1926_v30 = vor.u32 %v1924_v18, %v1922_v23  ;;  %v1923_v38 = vsel %vm318_vm0, %v1918_v25, %v1922_v23  ;;  %v1950_v18 = vor.u32 %v1948_v3, %v1946_v57 }
  0x51   :  { %v1962_v25 = vrot.slane %v1960_v12, 1 }
  0x52   :  { %4624 = vmatmul.mubr.bf16.gmra.mrb[24].mxu1 %v434_v26  ;;  %v485_v26 = vor.u32 %v483_v15, %v481_v21  ;;  %v5722_v21 = vld [vmem:[%s6370_s0 + $0xd8] sm:$0xff]  }
  0x53   :  { %4808 = vmatmul.mubr.bf16.gmra.mrb[24].mxu0 %v1875_v27  ;;  %4627 = vmatprep.mubr.bf16.mxu1 %v442_v28  ;;  %v489_v27 = vrot.slane %v487_v16, 1  ;;  %v5652_v28 = vld [vmem:[%s6370_s0 + $0xb8] sm:$0xff]   ;;  %v1954_v16 = vrot.slane %v1952_v4, 1 }
  0x54   :  { %4811 = vmatprep.mubr.bf16.mxu0 %v1883_v31  ;;  %v1930_v31 = vrot.slane %v1928_v19, 1  ;;  %v503_v41 = vshll.u32 %v5652_v28, 16  ;;  %v507_v62 = vshrl.u32 %v5652_v28, 16 }
  0x55   :  { %v490_v40 = vsel %vm318_vm0, %v485_v26, %v489_v27  ;;  %v1958_v23 = vor.u32 %v1956_v11, %v1954_v16  ;;  %v5727_v26 = vld [vmem:[%s6370_s0 + $0xe0] sm:$0xff]  }
  0x56   :  { %v1931_v44 = vsel %vm318_vm0, %v1926_v30, %v1930_v31  ;;  %v1934_v54 = vor.u32 %v1932_v35, %v1930_v31  ;;  %v505_v56 = vrot.slane %v503_v41, 1  ;;  %v1964_v31 = vshrl.u32 %v5692_v58, 16 }
  0x57   :  { %v1955_v35 = vsel %vm318_vm0, %v1950_v18, %v1954_v16  ;;  %v1963_v41 = vsel %vm318_vm0, %v1958_v23, %v1962_v25  ;;  %v5787_v18 = vld [vmem:[%s6370_s0 + $0xf8] sm:$0xff]  }
  0x58   :  { %v1939_v5 = vsel %vm318_vm0, %v1934_v54, %v1938_v52  ;;  %v509_v15 = vor.u32 %v507_v62, %v505_v56  ;;  %v1966_v52 = vor.u32 %v1964_v31, %v1962_v25  ;;  %v5755_v54 = vld [vmem:[%s6370_s0 + $0xe8] sm:$0xff]   ;;  %v5765_v62 = vld [vmem:[%s6370_s0 + $0xf0] sm:$0xff]   ;;  %v5792_v23 = vld [vmem:[%s6370_s0 + $0xf8] sm:$0xff]  }
  0x59   :  { %v1988_v11 = vshrl.u32 %v5755_v54, 16  ;;  %v5797_v31 = vld [vmem:[%s6370_s0 + $0x100] sm:$0xff]  }
  0x5a   :  { %4628 = vmatmul.mubr.bf16.gmra.mrb[28].mxu1 %v450_v47  ;;  %v5674_v47 = vld [vmem:[%s6370_s0 + $0xc0] sm:$0xff]  }
  0x5b   :  { %4812 = vmatmul.mubr.bf16.gmra.mrb[28].mxu0 %v1891_v48  ;;  %4631 = vmatprep.mubr.bf16.mxu1 %v458_v51  ;;  %v497_v48 = vrot.slane %v495_v33, 1  ;;  %v493_v51 = vor.u32 %v491_v34, %v489_v27  ;;  %v511_v1 = vshll.u32 %v5674_v47, 16  ;;  %v515_v8 = vshrl.u32 %v5674_v47, 16  ;;  %v5279_v34 = vld [vmem:[%s6369_s1 + $0x38] sm:$0xff]  }
  0x5c   :  { %4815 = vmatprep.mubr.bf16.mxu0 %v1899_v55  ;;  %v523_v27 = vshrl.u32 %v5684_v50, 16  ;;  %4689 = vmatprep.subr.bf16.mxu1 %v5279_v34 }
  0x5d   :  { %v501_v55 = vor.u32 %v499_v37, %v497_v48  ;;  %v498_v2 = vsel %vm318_vm0, %v493_v51, %v497_v48  ;;  %v5750_v48 = vld [vmem:[%s6370_s0 + $0xe0] sm:$0xff]   ;;  %4690 = vmatpush3.bf16.msra.mxu1 %v5279_v34 }
  0x5e   :  { %v525_v51 = vor.u32 %v523_v27, %v521_v20  ;;  %v547_v9 = vshrl.u32 %v5750_v48, 16 }
  0x5f   :  { %v506_v6 = vsel %vm318_vm0, %v501_v55, %v505_v56 }
  0x62   :  { %4632 = vmatmul.mubr.bf16.gmra.mrb[32].mxu1 %v466_v10  ;;  %v1947_v10 = vsel %vm318_vm0, %v1942_v61, %v1946_v57  ;;  %v5760_v57 = vld [vmem:[%s6370_s0 + $0xe8] sm:$0xff]  }
  0x63   :  { %4816 = vmatmul.mubr.bf16.gmra.mrb[32].mxu0 %v1907_v13  ;;  %4635 = vmatprep.mubr.bf16.mxu1 %v474_v14  ;;  %v513_v13 = vrot.slane %v511_v1, 1  ;;  %v5712_v14 = vld [vmem:[%s6370_s0 + $0xd0] sm:$0xff]   ;;  %v539_v1 = vshrl.u32 %v5722_v21, 16 }
  0x64   :  { %4819 = vmatprep.mubr.bf16.mxu0 %v1915_v17  ;;  %v5717_v17 = vld [vmem:[%s6370_s0 + $0xd8] sm:$0xff]   ;;  %v527_v30 = vshll.u32 %v5712_v14, 16  ;;  %v531_v37 = vshrl.u32 %v5712_v14, 16 }
  0x65   :  { %v517_v19 = vor.u32 %v515_v8, %v513_v13  ;;  %v1968_v33 = vshll.u32 %v5717_v17, 16  ;;  %v1972_v43 = vshrl.u32 %v5717_v17, 16 }
  0x66   :  { %v529_v46 = vrot.slane %v527_v30, 1 }
  0x67   :  { %v522_v36 = vsel %vm318_vm0, %v517_v19, %v521_v20  ;;  %v1970_v53 = vrot.slane %v1968_v33, 1 }
  0x68   :  { %v533_v55 = vor.u32 %v531_v37, %v529_v46  ;;  %v530_v3 = vsel %vm318_vm0, %v525_v51, %v529_v46  ;;  %v2004_v46 = vshrl.u32 %v5787_v18, 16  ;;  %v2008_v51 = vshll.u32 %v5797_v31, 16 }
  0x69   :  { %v1974_v60 = vor.u32 %v1972_v43, %v1970_v53  ;;  %v1971_v4 = vsel %vm318_vm0, %v1966_v52, %v1970_v53 }
  0x6a   :  { %4636 = vmatmul.mubr.bf16.gmra.mrb[36].mxu1 %v482_v32  ;;  %v514_v32 = vsel %vm318_vm0, %v509_v15, %v513_v13  ;;  %v1992_v13 = vshll.u32 %v5765_v62, 16  ;;  %v5782_v15 = vld [vmem:[%s6370_s0 + $0xf0] sm:$0xff]  }
  0x6b   :  { %4820 = vmatmul.mubr.bf16.gmra.mrb[36].mxu0 %v1923_v38  ;;  %4639 = vmatprep.mubr.bf16.mxu1 %v490_v40  ;;  %v535_v38 = vshll.u32 %v5722_v21, 16  ;;  %v5280_v40 = vld [vmem:[%s6369_s1 + $0xf8] sm:$0xff]   ;;  %v559_v34 = vshll.u32 %v5782_v15, 16 }
  0x6c   :  { %4823 = vmatprep.mubr.bf16.mxu0 %v1931_v44  ;;  %v1976_v44 = vshll.u32 %v5727_v26, 16  ;;  %4873 = vmatprep.subr.bf16.mxu0 %v5280_v40  ;;  %v1994_v33 = vrot.slane %v1992_v13, 1 }
  0x6d   :  { %v537_v56 = vrot.slane %v535_v38, 1  ;;  %4874 = vmatpush3.bf16.msra.mxu0 %v5280_v40  ;;  %v1996_v38 = vshrl.u32 %v5765_v62, 16  ;;  %v563_v40 = vshrl.u32 %v5782_v15, 16  ;;  %v561_v53 = vrot.slane %v559_v34, 1  ;;  %v5846_v34 = vld [vmem:[%s6370_s0 + $0x110] sm:$0xff]  }
  0x6e   :  { %v1978_v61 = vrot.slane %v1976_v44, 1 }
  0x6f   :  { %v538_v8 = vsel %vm318_vm0, %v533_v55, %v537_v56  ;;  %v541_v19 = vor.u32 %v539_v1, %v537_v56  ;;  %v565_v1 = vor.u32 %v563_v40, %v561_v53  ;;  %v2636_v40 = vrot.slane %v5679_v49, 1 }
  0x70   :  { %v1979_v12 = vsel %vm318_vm0, %v1974_v60, %v1978_v61  ;;  %v5814_v60 = vld [vmem:[%s6370_s0 + $0x100] sm:$0xff]   ;;  %v2638_v49 = vrot.slane %v5692_v58, 1 }
  0x72   :  { %4640 = vmatmul.mubr.bf16.gmra.mrb[40].mxu1 %v498_v2  ;;  %v543_v2 = vshll.u32 %v5750_v48, 16  ;;  %v5881_v58 = vsel %vm2588_vm1, %v2636_v40, %v2638_v49 }
  0x73   :  { %4824 = vmatmul.mubr.bf16.gmra.mrb[40].mxu0 %v1939_v5  ;;  %4643 = vmatprep.mubr.bf16.mxu1 %v506_v6  ;;  %v1980_v5 = vshrl.u32 %v5727_v26, 16  ;;  %v1984_v6 = vshll.u32 %v5755_v54, 16 }
  0x74   :  { %4827 = vmatprep.mubr.bf16.mxu0 %v1947_v10  ;;  %v551_v10 = vshll.u32 %v5760_v57, 16  ;;  %v545_v16 = vrot.slane %v543_v2, 1 }
  0x75   :  { %v1986_v20 = vrot.slane %v1984_v6, 1  ;;  %v1982_v25 = vor.u32 %v1980_v5, %v1978_v61  ;;  %v1998_v61 = vor.u32 %v1996_v38, %v1994_v33  ;;  %v2010_v5 = vrot.slane %v2008_v51, 1 }
  0x76   :  { %v549_v27 = vor.u32 %v547_v9, %v545_v16  ;;  %v553_v30 = vrot.slane %v551_v10, 1  ;;  %v546_v37 = vsel %vm318_vm0, %v541_v19, %v545_v16  ;;  %v571_v6 = vshrl.u32 %v5792_v23, 16  ;;  %v5830_v9 = vld [vmem:[%s6370_s0 + $0x110] sm:$0xff]  }
  0x77   :  { %v1987_v43 = vsel %vm318_vm0, %v1982_v25, %v1986_v20  ;;  %v2012_v16 = vshrl.u32 %v5797_v31, 16  ;;  %v2634_v38 = vrot.slane %v5657_v29, 1 }
  0x78   :  { %v554_v44 = vsel %vm318_vm0, %v549_v27, %v553_v30  ;;  %v579_v27 = vshrl.u32 %v5814_v60, 16 }
  0x7a   :  { %4644 = vmatmul.mubr.bf16.gmra.mrb[44].mxu1 %v514_v32  ;;  %v1990_v32 = vor.u32 %v1988_v11, %v1986_v20  ;;  %v575_v11 = vshll.u32 %v5814_v60, 16 }
  0x7b   :  { %4828 = vmatmul.mubr.bf16.gmra.mrb[44].mxu0 %v1955_v35  ;;  %4647 = vmatprep.mubr.bf16.mxu1 %v522_v36  ;;  %v555_v35 = vshrl.u32 %v5760_v57, 16  ;;  %v2000_v36 = vshll.u32 %v5787_v18, 16 }
  0x7c   :  { %4831 = vmatprep.mubr.bf16.mxu0 %v1963_v41  ;;  %v567_v41 = vshll.u32 %v5792_v23, 16  ;;  %v1995_v52 = vsel %vm318_vm0, %v1990_v32, %v1994_v33  ;;  %v2024_v33 = vshll.u32 %v5830_v9, 16 }
  0x7d   :  { %v557_v55 = vor.u32 %v555_v35, %v553_v30  ;;  %v2002_v56 = vrot.slane %v2000_v36, 1  ;;  %v2630_v35 = vrot.slane %v5625_v7, 1  ;;  %v2632_v36 = vrot.slane %v5647_v24, 1  ;;  %v5860_v24 = vld [vmem:[%s6370_s0 + $0x118] sm:$0xff]  }
  0x7e   :  { %v569_v2 = vrot.slane %v567_v41, 1  ;;  %v2014_v41 = vor.u32 %v2012_v16, %v2010_v5  ;;  %v2640_v16 = vrot.slane %v5717_v17, 1 }
  0x7f   :  { %v562_v10 = vsel %vm318_vm0, %v557_v55, %v561_v53  ;;  %v5865_v29 = vsel %vm2588_vm1, %v2630_v35, %v2632_v36  ;;  %v5872_v53 = vsel %vm2588_vm1, %v2634_v38, %v2636_v40  ;;  %v5906_v40 = vld [vmem:[%s6370_s0 + $0x128] sm:$0xff]  }
  0x80   :  { %v570_v13 = vsel %vm318_vm0, %v565_v1, %v569_v2  ;;  %v573_v25 = vor.u32 %v571_v6, %v569_v2  ;;  %v5878_v1 = vld [vmem:[%s6370_s0 + $0x120] sm:$0xff]  }
  0x82   :  { %4648 = vmatmul.mubr.bf16.gmra.mrb[48].mxu1 %v530_v3  ;;  %v5819_v3 = vld [vmem:[%s6370_s0 + $0x108] sm:$0xff]  }
  0x83   :  { %4832 = vmatmul.mubr.bf16.gmra.mrb[48].mxu0 %v1971_v4  ;;  %4651 = vmatprep.mubr.bf16.mxu1 %v538_v8  ;;  %v2006_v4 = vor.u32 %v2004_v46, %v2002_v56  ;;  %v5825_v8 = vld [vmem:[%s6370_s0 + $0x108] sm:$0xff]   ;;  %v2016_v19 = vshll.u32 %v5819_v3, 16  ;;  %v2020_v32 = vshrl.u32 %v5819_v3, 16 }
  0x84   :  { %4835 = vmatprep.mubr.bf16.mxu0 %v1979_v12  ;;  %v2003_v12 = vsel %vm318_vm0, %v1998_v61, %v2002_v56  ;;  %v583_v30 = vshll.u32 %v5825_v8, 16  ;;  %v2026_v56 = vrot.slane %v2024_v33, 1  ;;  %v591_v61 = vshll.u32 %v5846_v34, 16  ;;  %v5898_v33 = vld [vmem:[%s6370_s0 + $0x120] sm:$0xff]  }
  0x85   :  { %v2011_v20 = vsel %vm318_vm0, %v2006_v4, %v2010_v5  ;;  %v587_v2 = vshrl.u32 %v5825_v8, 16  ;;  %v2028_v4 = vshrl.u32 %v5830_v9, 16 }
  0x86   :  { %v585_v51 = vrot.slane %v583_v30, 1  ;;  %v2040_v30 = vshll.u32 %v5878_v1, 16 }
  0x8a   :  { %4652 = vmatmul.mubr.bf16.gmra.mrb[52].mxu1 %v546_v37  ;;  %v577_v37 = vrot.slane %v575_v11, 1  ;;  %v599_v11 = vshll.u32 %v5860_v24, 16 }
  0x8b   :  { %4836 = vmatmul.mubr.bf16.gmra.mrb[52].mxu0 %v1987_v43  ;;  %4655 = vmatprep.mubr.bf16.mxu1 %v554_v44  ;;  %v2018_v43 = vrot.slane %v2016_v19, 1  ;;  %v5855_v44 = vld [vmem:[%s6370_s0 + $0x118] sm:$0xff]  }
  0x8c   :  { %4839 = vmatprep.mubr.bf16.mxu0 %v1995_v52  ;;  %v581_v46 = vor.u32 %v579_v27, %v577_v37  ;;  %v5869_v52 = vsel %vm2588_vm1, %v2632_v36, %v2634_v38  ;;  %v578_v5 = vsel %vm318_vm0, %v573_v25, %v577_v37  ;;  %v2032_v6 = vshll.u32 %v5855_v44, 16 }
  0x8d   :  { %v2022_v55 = vor.u32 %v2020_v32, %v2018_v43  ;;  %v2036_v27 = vshrl.u32 %v5855_v44, 16  ;;  %v589_v25 = vor.u32 %v587_v2, %v585_v51  ;;  %v2030_v32 = vor.u32 %v2028_v4, %v2026_v56 }
  0x8e   :  { %v5901_v36 = vsel %vm2588_vm1, %v2638_v49, %v2640_v16  ;;  %v2034_v17 = vrot.slane %v2032_v6, 1  ;;  %v601_v38 = vrot.slane %v599_v11, 1  ;;  %v603_v4 = vshrl.u32 %v5860_v24, 16 }
  0x8f   :  { %v2027_v19 = vsel %vm318_vm0, %v2022_v55, %v2026_v56  ;;  %v2044_v6 = vshrl.u32 %v5878_v1, 16 }
  0x90   :  { %v2038_v49 = vor.u32 %v2036_v27, %v2034_v17 }
  0x92   :  { %4656 = vmatmul.mubr.bf16.gmra.mrb[56].mxu1 %v562_v10  ;;  %v595_v10 = vshrl.u32 %v5846_v34, 16 }
  0x93   :  { %4840 = vmatmul.mubr.bf16.gmra.mrb[56].mxu0 %v2003_v12  ;;  %4659 = vmatprep.mubr.bf16.mxu1 %v570_v13  ;;  %v2019_v12 = vsel %vm318_vm0, %v2014_v41, %v2018_v43  ;;  %v586_v13 = vsel %vm318_vm0, %v581_v46, %v585_v51  ;;  %v2642_v41 = vrot.slane %v5727_v26, 1  ;;  %v5912_v43 = vld [vmem:[%s6370_s0 + $0x128] sm:$0xff]   ;;  %v2042_v46 = vrot.slane %v2040_v30, 1  ;;  %v5917_v51 = vld [vmem:[%s6370_s0 + $0x130] sm:$0xff]  }
  0x94   :  { %4843 = vmatprep.mubr.bf16.mxu0 %v2011_v20  ;;  %v593_v20 = vrot.slane %v591_v61, 1  ;;  %v607_v26 = vshll.u32 %v5898_v33, 16  ;;  %v2035_v61 = vsel %vm318_vm0, %v2030_v32, %v2034_v17  ;;  %v615_v11 = vshll.u32 %v5912_v43, 16  ;;  %v5287_v32 = vld [vmem:[%s6370_s0 + $0x130] ss:$0 sps:$4 sm:$0x11]  }
  0x95   :  { %v5920_v55 = vsel %vm2588_vm1, %v2640_v16, %v2642_v41  ;;  %v2052_v16 = vshrl.u32 %v5906_v40, 16  ;;  %v605_v30 = vor.u32 %v603_v4, %v601_v38  ;;  %v2046_v17 = vor.u32 %v2044_v6, %v2042_v46 }
  0x96   :  { %v597_v37 = vor.u32 %v595_v10, %v593_v20  ;;  %v594_v56 = vsel %vm318_vm0, %v589_v25, %v593_v20  ;;  %v611_v10 = vshrl.u32 %v5898_v33, 16  ;;  %v609_v20 = vrot.slane %v607_v26, 1 }
  0x97   :  { %v2060_v4 = vshrl.u32 %v5917_v51, 16 }
  0x98   :  { %v602_v2 = vsel %vm318_vm0, %v597_v37, %v601_v38  ;;  %v613_v37 = vor.u32 %v611_v10, %v609_v20 }
  0x9a   :  { %4660 = vmatmul.mubr.bf16.gmra.mrb[60].mxu1 %v578_v5  ;;  %v2048_v5 = vshll.u32 %v5906_v40, 16 }
  0x9b   :  { %4844 = vmatmul.mubr.bf16.gmra.mrb[60].mxu0 %v2019_v12  ;;  %4663 = vmatprep.mubr.bf16.mxu1 %v586_v13  ;;  %v2644_v12 = vrot.slane %v5755_v54, 1  ;;  %v2043_v13 = vsel %vm318_vm0, %v2038_v49, %v2042_v46  ;;  %v2646_v54 = vrot.slane %v5765_v62, 1  ;;  %v617_v49 = vrot.slane %v615_v11, 1 }
  0x9c   :  { %4847 = vmatprep.mubr.bf16.mxu0 %v2027_v19  ;;  %v2056_v19 = vshll.u32 %v5917_v51, 16  ;;  %v2050_v25 = vrot.slane %v2048_v5, 1  ;;  %v610_v62 = vsel %vm318_vm0, %v605_v30, %v609_v20  ;;  %v619_v46 = vshrl.u32 %v5912_v43, 16 }
  0x9d   :  { %v5936_v27 = vsel %vm2588_vm1, %v2642_v41, %v2644_v12  ;;  %v5948_v38 = vsel %vm2588_vm1, %v2644_v12, %v2646_v54  ;;  %v618_v6 = vsel %vm318_vm0, %v613_v37, %v617_v49  ;;  %v2648_v11 = vrot.slane %v5787_v18, 1  ;;  %v5291_v37 = vld [vmem:[%s6370_s0 + $0x10] sm:$0xff]  }
  0x9e   :  { %v2054_v41 = vor.u32 %v2052_v16, %v2050_v25  ;;  %v2058_v26 = vrot.slane %v2056_v19, 1  ;;  %v2051_v5 = vsel %vm318_vm0, %v2046_v17, %v2050_v25  ;;  %v621_v20 = vor.u32 %v619_v46, %v617_v49  ;;  %v5292_v46 = vld [vmem:[%s6370_s0] sm:$0xff]  }
  0x9f   :  { %v5965_v19 = vsel %vm2588_vm1, %v2646_v54, %v2648_v11  ;;  %v2650_v25 = vrot.slane %v5797_v31, 1  ;;  %v2652_v49 = vrot.slane %v5819_v3, 1 }
  0xa0   :  { %v2059_v12 = vsel %vm318_vm0, %v2054_v41, %v2058_v26  ;;  %v2590_v41 = vrot.slane %v5291_v37, 1 }
  0xa2   :  { %4664 = vmatmul.mubr.bf16.gmra.mrb[64].mxu1 %v594_v56  ;;  %v5945_v56 = vld [vmem:[%s6370_s0 + $0x138] ss:$0 sps:$4 sm:$0x11]  }
  0xa3   :  { %4848 = vmatmul.mubr.bf16.gmra.mrb[64].mxu0 %v2035_v61  ;;  %4667 = vmatprep.mubr.bf16.mxu1 %v602_v2  ;;  %v2567_v61 = vld [vmem:[%s6370_s0 + $0x8] sm:$0xe]  ;;  %v623_v2 = vshll.u32 %v5287_v32, 16  ;;  %v2064_v10 = vshll.u32 %v5945_v56, 16  ;;  %v2062_v32 = vor.u32 %v2060_v4, %v2058_v26  ;;  %v5979_v26 = vsel %vm2588_vm1, %v2650_v25, %v2652_v49  ;;  %v5293_v4 = vld [vmem:[%s6370_s0 + $0x18] sm:$0xff]  }
  0xa4   :  { %4851 = vmatprep.mubr.bf16.mxu0 %v2043_v13  ;;  %v5290_v13 = vld [vmem:[%s6370_s0 + $0xc] sm:$0xf]  ;;  %v2592_v3 = vrot.slane %v5293_v4, 1 }
  0xa5   :  { %v4010_v16 = vcombine.low %v2567_v61, %v5290_v13  ;;  %v625_v30 = vrot.slane %v623_v2, 1  ;;  %v2066_v18 = vrot.slane %v2064_v10, 1  ;;  %v5972_v61 = vsel %vm2588_vm1, %v2648_v11, %v2650_v25  ;;  %v5295_v13 = vld [vmem:[%s6370_s0 + $0x8] sm:$0xff]  }
  0xa6   :  { %v2654_v2 = vrot.slane %v5830_v9, 1  ;;  %v2593_v11 = vsel %vm2588_vm1, %v2590_v41, %v2592_v3 }
  0xa7   :  { %v2589_v17 = vrot.slane %v4010_v16, 1  ;;  %v626_v54 = vsel %vm318_vm0, %v621_v20, %v625_v30  ;;  %v5296_v20 = vld [vmem:[%s6370_s0 + $0x10] sm:$0xff]   ;;  %v2658_v30 = vrot.slane %v5878_v1, 1 }
  0xa8   :  { %v5992_v10 = vsel %vm2588_vm1, %v2652_v49, %v2654_v2  ;;  %v5300_v49 = vld [vmem:[%s6370_s0 + $0x20] sm:$0xff]  }
  0xa9   :  { %v2591_v31 = vsel %vm2588_vm1, %v2589_v17, %v2590_v41  ;;  %v2660_v41 = vrot.slane %v5906_v40, 1 }
  0xaa   :  { %4668 = vmatmul.mubr.bf16.gmra.mrb[68].mxu1 %v610_v62  ;;  %v2067_v62 = vsel %vm318_vm0, %v2062_v32, %v2066_v18  ;;  %v5298_v32 = vld [vmem:[%s6370_s0 + $0x30] sm:$0xff]  }
  0xab   :  { %4852 = vmatmul.mubr.bf16.gmra.mrb[68].mxu0 %v2051_v5  ;;  %4671 = vmatprep.mubr.bf16.mxu1 %v618_v6  ;;  %v5294_v5 = vld [vmem:[%s6370_s0 + $0x20] sm:$0xff]   ;;  %v2598_v18 = vrot.slane %v5298_v32, 1 }
  0xac   :  { %4855 = vmatprep.mubr.bf16.mxu0 %v2059_v12  ;;  %v2594_v6 = vrot.slane %v5294_v5, 1  ;;  %v2656_v12 = vrot.slane %v5855_v44, 1  ;;  %v5297_v44 = vld [vmem:[%s6370_s0 + $0x28] sm:$0xff]   ;;  %v5308_v32 = vld [vmem:[%s6370_s0 + $0x40] sm:$0xff]  }
  0xad   :  { %v2596_v25 = vrot.slane %v5297_v44, 1 }
  0xae   :  { %v2595_v9 = vsel %vm2588_vm1, %v2592_v3, %v2594_v6  ;;  %v6001_v16 = vsel %vm2588_vm1, %v2654_v2, %v2656_v12  ;;  %v6014_v17 = vsel %vm2588_vm1, %v2656_v12, %v2658_v30  ;;  %v5302_v2 = vld [vmem:[%s6370_s0 + $0x40] sm:$0xff]   ;;  %v5305_v12 = vld [vmem:[%s6370_s0 + $0x48] sm:$0xff]  }
  0xaf   :  { %v2597_v37 = vsel %vm2588_vm1, %v2594_v6, %v2596_v25  ;;  %v2599_v1 = vsel %vm2588_vm1, %v2596_v25, %v2598_v18  ;;  %v2602_v4 = vrot.slane %v5302_v2, 1  ;;  %v5303_v6 = vld [vmem:[%s6370_s0 + $0x28] sm:$0xff]   ;;  %v5307_v25 = vld [vmem:[%s6370_s0 + $0x38] sm:$0xff]   ;;  %v5312_v2 = vld [vmem:[%s6370_s0 + $0x50] sm:$0xff]  }
  0xb2   :  { %4672 = vmatmul.mubr.bf16.gmra.mrb[72].mxu1 %v626_v54  ;;  %v5299_v54 = vld [vmem:[%s6370_s0 + $0x18] sm:$0xff]  }
  0xb3   :  { %4856 = vmatmul.mubr.bf16.gmra.mrb[72].mxu0 %v2067_v62  ;;  %4691 = vmatprep.mubr.bf16.mxu1 %v5292_v46  ;;  %v6025_v62 = vsel %vm2588_vm1, %v2658_v30, %v2660_v41 }
  0xb4   :  { %4875 = vmatprep.mubr.bf16.mxu0 %v2591_v31  ;;  %v5301_v31 = vld [vmem:[%s6370_s0 + $0x38] sm:$0xff]  }
  0xb5   :  { %v2600_v46 = vrot.slane %v5301_v31, 1 }
  0xb7   :  { %v2601_v3 = vsel %vm2588_vm1, %v2598_v18, %v2600_v46  ;;  %v2603_v5 = vsel %vm2588_vm1, %v2600_v46, %v2602_v4  ;;  %v5309_v18 = vld [vmem:[%s6370_s0 + $0x58] sm:$0xff]   ;;  %v5311_v46 = vld [vmem:[%s6370_s0 + $0x48] sm:$0xff]  }
  0xba   :  { %4692 = vmatmul.mubr.bf16.vlgmr.msra.gmra.mrb[0].mxu1 %v5295_v13  ;;  %v5306_v13 = vld [vmem:[%s6370_s0 + $0x50] sm:$0xff]  }
  0xbb   :  { %4876 = vmatmul.mubr.bf16.vlgmr.msra.gmra.mrb[0].mxu0 %v2593_v11  ;;  %4695 = vmatprep.mubr.bf16.mxu1 %v5296_v20  ;;  %v5304_v11 = vld [vmem:[%s6370_s0 + $0x30] sm:$0xff]   ;;  %v2606_v20 = vrot.slane %v5306_v13, 1  ;;  %v5316_v13 = vld [vmem:[%s6370_s0 + $0x60] sm:$0xff]  }
  0xbc   :  { %4879 = vmatprep.mubr.bf16.mxu0 %v2595_v9  ;;  %v2604_v9 = vrot.slane %v5305_v12, 1 }
  0xbe   :  { %v2605_v30 = vsel %vm2588_vm1, %v2602_v4, %v2604_v9  ;;  %v2607_v44 = vsel %vm2588_vm1, %v2604_v9, %v2606_v20  ;;  %v5313_v4 = vld [vmem:[%s6370_s0 + $0x68] sm:$0xff]   ;;  %v5315_v9 = vld [vmem:[%s6370_s0 + $0x58] sm:$0xff]  }
  0xc2   :  { %4696 = vmatmul.mubr.bf16.gmra.mrb[4].mxu1 %v5299_v54 }
  0xc3   :  { %4880 = vmatmul.mubr.bf16.gmra.mrb[4].mxu0 %v2597_v37  ;;  %4699 = vmatprep.mubr.bf16.mxu1 %v5300_v49  ;;  %v2608_v37 = vrot.slane %v5309_v18, 1 }
  0xc4   :  { %4883 = vmatprep.mubr.bf16.mxu0 %v2599_v1  ;;  %v5310_v1 = vld [vmem:[%s6370_s0 + $0x60] sm:$0xff]  }
  0xc5   :  { %v2610_v54 = vrot.slane %v5310_v1, 1  ;;  %v2609_v49 = vsel %vm2588_vm1, %v2606_v20, %v2608_v37  ;;  %v5317_v20 = vld [vmem:[%s6370_s0 + $0x78] sm:$0xff]   ;;  %v5320_v1 = vld [vmem:[%s6370_s0 + $0x70] sm:$0xff]  }
  0xc7   :  { %v2611_v31 = vsel %vm2588_vm1, %v2608_v37, %v2610_v54  ;;  %v5319_v37 = vld [vmem:[%s6370_s0 + $0x68] sm:$0xff]  }
  0xca   :  { %4700 = vmatmul.mubr.bf16.gmra.mrb[8].mxu1 %v5303_v6 }
  0xcb   :  { %4884 = vmatmul.mubr.bf16.gmra.mrb[8].mxu0 %v2601_v3  ;;  %4703 = vmatprep.mubr.bf16.mxu1 %v5304_v11  ;;  %v2612_v3 = vrot.slane %v5313_v4, 1 }
  0xcc   :  { %4887 = vmatprep.mubr.bf16.mxu0 %v2603_v5  ;;  %v5314_v5 = vld [vmem:[%s6370_s0 + $0x70] sm:$0xff]  }
  0xcd   :  { %v2614_v6 = vrot.slane %v5314_v5, 1  ;;  %v2613_v11 = vsel %vm2588_vm1, %v2610_v54, %v2612_v3  ;;  %v5321_v54 = vld [vmem:[%s6370_s0 + $0x88] sm:$0xff]   ;;  %v5324_v5 = vld [vmem:[%s6370_s0 + $0x80] sm:$0xff]  }
  0xcf   :  { %v2615_v12 = vsel %vm2588_vm1, %v2612_v3, %v2614_v6  ;;  %v5323_v3 = vld [vmem:[%s6370_s0 + $0x78] sm:$0xff]  }
  0xd2   :  { %4704 = vmatmul.mubr.bf16.gmra.mrb[12].mxu1 %v5307_v25 }
  0xd3   :  { %4888 = vmatmul.mubr.bf16.gmra.mrb[12].mxu0 %v2605_v30  ;;  %4707 = vmatprep.mubr.bf16.mxu1 %v5308_v32  ;;  %v2616_v30 = vrot.slane %v5317_v20, 1  ;;  %v5326_v20 = vld [vmem:[%s6370_s0 + $0x90] sm:$0xff]  }
  0xd4   :  { %4891 = vmatprep.mubr.bf16.mxu0 %v2607_v44  ;;  %v5318_v44 = vld [vmem:[%s6370_s0 + $0x80] sm:$0xff]  }
  0xd5   :  { %v2618_v25 = vrot.slane %v5318_v44, 1  ;;  %v2617_v32 = vsel %vm2588_vm1, %v2614_v6, %v2616_v30  ;;  %v2624_v6 = vrot.slane %v5581_v39, 1  ;;  %v2628_v39 = vrot.slane %v5612_v63, 1 }
  0xd6   :  { %v2664_v63 = vrot.slane %v5945_v56, 1 }
  0xd7   :  { %v2619_v18 = vsel %vm2588_vm1, %v2616_v30, %v2618_v25  ;;  %v2631_v30 = vsel %vm2588_vm1, %v2628_v39, %v2630_v35 }
  0xda   :  { %4708 = vmatmul.mubr.bf16.gmra.mrb[16].mxu1 %v5311_v46 }
  0xdb   :  { %4892 = vmatmul.mubr.bf16.gmra.mrb[16].mxu0 %v2609_v49  ;;  %4711 = vmatprep.mubr.bf16.mxu1 %v5312_v2  ;;  %v2620_v49 = vrot.slane %v5321_v54, 1 }
  0xdc   :  { %4895 = vmatprep.mubr.bf16.mxu0 %v2611_v31  ;;  %v5322_v31 = vld [vmem:[%s6370_s0 + $0x90] sm:$0xff]  }
  0xdd   :  { %v2622_v46 = vrot.slane %v5322_v31, 1  ;;  %v2621_v2 = vsel %vm2588_vm1, %v2618_v25, %v2620_v49 }
  0xdf   :  { %v2623_v4 = vsel %vm2588_vm1, %v2620_v49, %v2622_v46 }
  0xe2   :  { %4712 = vmatmul.mubr.bf16.gmra.mrb[20].mxu1 %v5315_v9 }
  0xe3   :  { %4896 = vmatmul.mubr.bf16.gmra.mrb[20].mxu0 %v2613_v11  ;;  %4715 = vmatprep.mubr.bf16.mxu1 %v5316_v13  ;;  %v2626_v11 = vrot.slane %v5591_v45, 1  ;;  %v5325_v13 = vld [vmem:[%s6370_s0 + $0x88] sm:$0xff]  }
  0xe4   :  { %4899 = vmatprep.mubr.bf16.mxu0 %v2615_v12  ;;  %v2625_v12 = vsel %vm2588_vm1, %v2622_v46, %v2624_v6 }
  0xe5   :  { %v2627_v9 = vsel %vm2588_vm1, %v2624_v6, %v2626_v11  ;;  %v2629_v45 = vsel %vm2588_vm1, %v2626_v11, %v2628_v39 }
  0xea   :  { %4716 = vmatmul.mubr.bf16.gmra.mrb[24].mxu1 %v5319_v37 }
  0xeb   :  { %4900 = vmatmul.mubr.bf16.gmra.mrb[24].mxu0 %v2617_v32  ;;  %4719 = vmatprep.mubr.bf16.mxu1 %v5320_v1 }
  0xec   :  { %4903 = vmatprep.mubr.bf16.mxu0 %v2619_v18 }
  0xf2   :  { %4720 = vmatmul.mubr.bf16.gmra.mrb[28].mxu1 %v5323_v3 }
  0xf3   :  { %4904 = vmatmul.mubr.bf16.gmra.mrb[28].mxu0 %v2621_v2  ;;  %4723 = vmatprep.mubr.bf16.mxu1 %v5324_v5 }
  0xf4   :  { %4907 = vmatprep.mubr.bf16.mxu0 %v2623_v4 }
  0xfa   :  { %4724 = vmatmul.mubr.bf16.gmra.mrb[32].mxu1 %v5325_v13 }
  0xfb   :  { %4908 = vmatmul.mubr.bf16.gmra.mrb[32].mxu0 %v2625_v12  ;;  %4727 = vmatprep.mubr.bf16.mxu1 %v5326_v20 }
  0xfc   :  { %4911 = vmatprep.mubr.bf16.mxu0 %v2627_v9 }
 0x102   :  { %4728 = vmatmul.mubr.bf16.gmra.mrb[36].mxu1 %v5586_v42  ;;  %v2662_v42 = vrot.slane %v5917_v51, 1 }
 0x103   :  { %4912 = vmatmul.mubr.bf16.gmra.mrb[36].mxu0 %v2629_v45  ;;  %4731 = vmatprep.mubr.bf16.mxu1 %v5604_v59 }
 0x104   :  { %4915 = vmatprep.mubr.bf16.mxu0 %v2631_v30  ;;  %v2663_v59 = vsel %vm2588_vm1, %v2660_v41, %v2662_v42 }
 0x10a   :  { %4732 = vmatmul.mubr.bf16.gmra.mrb[40].mxu1 %v5617_v0  ;;  %v2665_v0 = vsel %vm2588_vm1, %v2662_v42, %v2664_v63 }
 0x10b   :  { %4916 = vmatmul.mubr.bf16.gmra.mrb[40].mxu0 %v5865_v29  ;;  %4735 = vmatprep.mubr.bf16.mxu1 %v5642_v22 }
 0x10c   :  { %4919 = vmatprep.mubr.bf16.mxu0 %v5869_v52 }
 0x112   :  { %4736 = vmatmul.mubr.bf16.gmra.mrb[44].mxu1 %v5652_v28  ;;  %v6172_v28 = vld [vmem:[%s6371_s2] ss:$0 sm:$0xff] }
 0x113   :  { %4920 = vmatmul.mubr.bf16.gmra.mrb[44].mxu0 %v5872_v53  ;;  %4739 = vmatprep.mubr.bf16.mxu1 %v5674_v47 }
 0x114   :  { %4923 = vmatprep.mubr.bf16.mxu0 %v5881_v58 }
 0x11a   :  { %4740 = vmatmul.mubr.bf16.gmra.mrb[48].mxu1 %v5684_v50 }
 0x11b   :  { %4924 = vmatmul.mubr.bf16.gmra.mrb[48].mxu0 %v5901_v36  ;;  %4743 = vmatprep.mubr.bf16.mxu1 %v5712_v14 }
 0x11c   :  { %4927 = vmatprep.mubr.bf16.mxu0 %v5920_v55 }
 0x122   :  { %4744 = vmatmul.mubr.bf16.gmra.mrb[52].mxu1 %v5722_v21 }
 0x123   :  { %4928 = vmatmul.mubr.bf16.gmra.mrb[52].mxu0 %v5936_v27  ;;  %4747 = vmatprep.mubr.bf16.mxu1 %v5750_v48 }
 0x124   :  { %4931 = vmatprep.mubr.bf16.mxu0 %v5948_v38 }
 0x12a   :  { %4748 = vmatmul.mubr.bf16.gmra.mrb[56].mxu1 %v5760_v57 }
 0x12b   :  { %4932 = vmatmul.mubr.bf16.gmra.mrb[56].mxu0 %v5965_v19  ;;  %4751 = vmatprep.mubr.bf16.mxu1 %v5782_v15 }
 0x12c   :  { %4935 = vmatprep.mubr.bf16.mxu0 %v5972_v61 }
 0x132   :  { %4752 = vmatmul.mubr.bf16.gmra.mrb[60].mxu1 %v5792_v23 }
 0x133   :  { %4936 = vmatmul.mubr.bf16.gmra.mrb[60].mxu0 %v5979_v26  ;;  %4755 = vmatprep.mubr.bf16.mxu1 %v5814_v60 }
 0x134   :  { %4939 = vmatprep.mubr.bf16.mxu0 %v5992_v10 }
 0x13a   :  { %4756 = vmatmul.mubr.bf16.gmra.mrb[64].mxu1 %v5825_v8 }
 0x13b   :  { %4940 = vmatmul.mubr.bf16.gmra.mrb[64].mxu0 %v6001_v16  ;;  %4759 = vmatprep.mubr.bf16.mxu1 %v5846_v34 }
 0x13c   :  { %4943 = vmatprep.mubr.bf16.mxu0 %v6014_v17 }
 0x142   :  { %4760 = vmatmul.mubr.bf16.gmra.mrb[68].mxu1 %v5860_v24 }
 0x143   :  { %4944 = vmatmul.mubr.bf16.gmra.mrb[68].mxu0 %v6025_v62  ;;  %4763 = vmatprep.mubr.bf16.mxu1 %v5898_v33 }
 0x144   :  { %4947 = vmatprep.mubr.bf16.mxu0 %v2663_v59 }
 0x14a   :  { %4764 = vmatmul.mubr.bf16.gmra.mrb[72].mxu1 %v5912_v43 }
 0x14b   :  { %4948 = vmatmul.mubr.bf16.gmra.mrb[72].mxu0 %v2665_v0 }
 0x18d   :  { %v4693_v7 = vpop.f32.mrb[0].mxu1 }
 0x18e   :  { %v4877_v22 = vpop.f32.mrb[0].mxu0  ;;  %v1170_v47 = vpop.f32.mrb[1].mxu1 }
 0x18f   :  { %v4951_v50 = vadd.f32 %v4877_v22, %v4693_v7  ;;  %v2786_v14 = vpop.f32.mrb[1].mxu0  ;;  %v4694_v21 = vpop.f32.mrb[2].mxu1 }
 0x190   :  { %v4952_v48 = vadd.f32 %v2786_v14, %v1170_v47  ;;  %v4878_v57 = vpop.f32.mrb[2].mxu0  ;;  %v1173_v15 = vpop.f32.mrb[3].mxu1 }
 0x191   :  { %v3174_v23 = vadd.f32 %v4951_v50, %v6172_v28  ;;  %v4953_v60 = vadd.f32 %v4878_v57, %v4694_v21  ;;  %v2789_v8 = vpop.f32.mrb[3].mxu0 }
 0x192   :  { %v3172_v34 = vadd.f32 %v4952_v48, %v6172_v28  ;;  %v4954_v35 = vadd.f32 %v2789_v8, %v1173_v15 }
 0x193   :  { %v3326_v24 = vmul.f32 0.2, %v3174_v23  ;;  %v3175_v29 = vadd.f32 %v4953_v60, %v6172_v28  ;;  %vm3250_vm2 = vcmp.ge.f32.partialorder %v3174_v23, 0.0 }
 0x194   :  { %v3324_v52 = vmul.f32 0.2, %v3172_v34  ;;  %v3173_v53 = vadd.f32 %v4954_v35, %v6172_v28  ;;  %vm3248_vm3 = vcmp.ge.f32.partialorder %v3172_v34, 0.0 }
 0x195   :  { %vm3251_vm4 = vcmp.ge.f32.partialorder %v3175_v29, 0.0  ;;  %v3327_v58 = vmul.f32 0.2, %v3175_v29  ;;  %v4697_v33 = vpop.f32.mrb[4].mxu1  ;;  %v3402_v51 = vsel %vm3250_vm2, %v3174_v23, %v3326_v24 }
 0x196   :  { %vm3249_vm5 = vcmp.ge.f32.partialorder %v3173_v53, 0.0  ;;  %v3325_v36 = vmul.f32 0.2, %v3173_v53  ;;  %v4881_v40 = vpop.f32.mrb[4].mxu0  ;;  %v1186_v43 = vpop.f32.mrb[5].mxu1  ;;  %v3400_v19 = vsel %vm3248_vm3, %v3172_v34, %v3324_v52 }
 0x197   :  { %v3403_v55 = vsel %vm3251_vm4, %v3175_v29, %v3327_v58  ;;  %v4955_v27 = vadd.f32 %v4881_v40, %v4697_v33  ;;  %v2802_v56 = vpop.f32.mrb[5].mxu0  ;;  %v4698_v38 = vpop.f32.mrb[6].mxu1 }
 0x198   :  { %v4180_v61 = vpack.c.bf16 %v3403_v55, %v3402_v51  ;;  %v3401_v26 = vsel %vm3249_vm5, %v3173_v53, %v3325_v36  ;;  %v4956_v10 = vadd.f32 %v2802_v56, %v1186_v43  ;;  %v4882_v16 = vpop.f32.mrb[6].mxu0  ;;  %v1189_v17 = vpop.f32.mrb[7].mxu1 }
 0x199   :  { %v4175_v41 = vpack.c.bf16 %v3401_v26, %v3400_v19  ;;  %v3178_v62 = vadd.f32 %v4955_v27, %v6172_v28  ;;  %v4957_v44 = vadd.f32 %v4882_v16, %v4698_v38  ;;  %v2805_v25 = vpop.f32.mrb[7].mxu0 }
 0x19a   :  { %4362 = vst [vmem:[%s6372_s3 + $0x8] sm:$0xff] %v4180_v61   ;;  %v3176_v32 = vadd.f32 %v4956_v10, %v6172_v28  ;;  %v4958_v18 = vadd.f32 %v2805_v25, %v1189_v17 }
 0x19b   :  { %4176 = vst [vmem:[%s6372_s3] sm:$0xff] %v4175_v41   ;;  %v3330_v37 = vmul.f32 0.2, %v3178_v62  ;;  %v3179_v1 = vadd.f32 %v4957_v44, %v6172_v28  ;;  %vm3254_vm6 = vcmp.ge.f32.partialorder %v3178_v62, 0.0 }
 0x19c   :  { %v3328_v54 = vmul.f32 0.2, %v3176_v32  ;;  %v3177_v49 = vadd.f32 %v4958_v18, %v6172_v28  ;;  %vm3252_vm7 = vcmp.ge.f32.partialorder %v3176_v32, 0.0 }
 0x19d   :  { %vm3255_vm8 = vcmp.ge.f32.partialorder %v3179_v1, 0.0  ;;  %v3331_v31 = vmul.f32 0.2, %v3179_v1  ;;  %v4701_v46 = vpop.f32.mrb[8].mxu1  ;;  %v3406_v5 = vsel %vm3254_vm6, %v3178_v62, %v3330_v37 }
 0x19e   :  { %vm3253_vm9 = vcmp.ge.f32.partialorder %v3177_v49, 0.0  ;;  %v3329_v2 = vmul.f32 0.2, %v3177_v49  ;;  %v4885_v4 = vpop.f32.mrb[8].mxu0  ;;  %v1202_v3 = vpop.f32.mrb[9].mxu1  ;;  %v3404_v13 = vsel %vm3252_vm7, %v3176_v32, %v3328_v54 }
 0x19f   :  { %v3407_v6 = vsel %vm3255_vm8, %v3179_v1, %v3331_v31  ;;  %v4959_v11 = vadd.f32 %v4885_v4, %v4701_v46  ;;  %v2818_v12 = vpop.f32.mrb[9].mxu0  ;;  %v4702_v9 = vpop.f32.mrb[10].mxu1 }
 0x1a0   :  { %v4190_v20 = vpack.c.bf16 %v3407_v6, %v3406_v5  ;;  %v3405_v39 = vsel %vm3253_vm9, %v3177_v49, %v3329_v2  ;;  %v4960_v45 = vadd.f32 %v2818_v12, %v1202_v3  ;;  %v4886_v30 = vpop.f32.mrb[10].mxu0  ;;  %v1205_v42 = vpop.f32.mrb[11].mxu1 }
 0x1a1   :  { %v4185_v59 = vpack.c.bf16 %v3405_v39, %v3404_v13  ;;  %v3182_v63 = vadd.f32 %v4959_v11, %v6172_v28  ;;  %v4961_v0 = vadd.f32 %v4886_v30, %v4702_v9  ;;  %v2821_v7 = vpop.f32.mrb[11].mxu0 }
 0x1a2   :  { %4364 = vst [vmem:[%s6372_s3 + $0x18] sm:$0xff] %v4190_v20   ;;  %v3180_v22 = vadd.f32 %v4960_v45, %v6172_v28  ;;  %v4962_v47 = vadd.f32 %v2821_v7, %v1205_v42 }
 0x1a3   :  { %4363 = vst [vmem:[%s6372_s3 + $0x10] sm:$0xff] %v4185_v59   ;;  %v3334_v50 = vmul.f32 0.2, %v3182_v63  ;;  %v3183_v14 = vadd.f32 %v4961_v0, %v6172_v28  ;;  %vm3258_vm10 = vcmp.ge.f32.partialorder %v3182_v63, 0.0 }
 0x1a4   :  { %v3332_v21 = vmul.f32 0.2, %v3180_v22  ;;  %v3181_v48 = vadd.f32 %v4962_v47, %v6172_v28  ;;  %vm3256_vm11 = vcmp.ge.f32.partialorder %v3180_v22, 0.0 }
 0x1a5   :  { %vm3259_vm12 = vcmp.ge.f32.partialorder %v3183_v14, 0.0  ;;  %v3335_v57 = vmul.f32 0.2, %v3183_v14  ;;  %v4705_v15 = vpop.f32.mrb[12].mxu1  ;;  %v3410_v34 = vsel %vm3258_vm10, %v3182_v63, %v3334_v50 }
 0x1a6   :  { %vm3257_vm13 = vcmp.ge.f32.partialorder %v3181_v48, 0.0  ;;  %v3333_v23 = vmul.f32 0.2, %v3181_v48  ;;  %v4889_v60 = vpop.f32.mrb[12].mxu0  ;;  %v1218_v8 = vpop.f32.mrb[13].mxu1  ;;  %v3408_v53 = vsel %vm3256_vm11, %v3180_v22, %v3332_v21 }
 0x1a7   :  { %v3411_v35 = vsel %vm3259_vm12, %v3183_v14, %v3335_v57  ;;  %v4963_v24 = vadd.f32 %v4889_v60, %v4705_v15  ;;  %v2834_v29 = vpop.f32.mrb[13].mxu0  ;;  %v4706_v52 = vpop.f32.mrb[14].mxu1 }
 0x1a8   :  { %v4200_v58 = vpack.c.bf16 %v3411_v35, %v3410_v34  ;;  %v3409_v33 = vsel %vm3257_vm13, %v3181_v48, %v3333_v23  ;;  %v4964_v36 = vadd.f32 %v2834_v29, %v1218_v8  ;;  %v4890_v40 = vpop.f32.mrb[14].mxu0  ;;  %v1221_v43 = vpop.f32.mrb[15].mxu1 }
 0x1a9   :  { %v4195_v51 = vpack.c.bf16 %v3409_v33, %v3408_v53  ;;  %v3186_v55 = vadd.f32 %v4963_v24, %v6172_v28  ;;  %v4965_v27 = vadd.f32 %v4890_v40, %v4706_v52  ;;  %v2837_v56 = vpop.f32.mrb[15].mxu0 }
 0x1aa   :  { %4366 = vst [vmem:[%s6372_s3 + $0x28] sm:$0xff] %v4200_v58   ;;  %v3184_v38 = vadd.f32 %v4964_v36, %v6172_v28  ;;  %v4966_v19 = vadd.f32 %v2837_v56, %v1221_v43 }
 0x1ab   :  { %4365 = vst [vmem:[%s6372_s3 + $0x20] sm:$0xff] %v4195_v51   ;;  %v3338_v61 = vmul.f32 0.2, %v3186_v55  ;;  %v3187_v26 = vadd.f32 %v4965_v27, %v6172_v28  ;;  %vm3262_vm14 = vcmp.ge.f32.partialorder %v3186_v55, 0.0 }
 0x1ac   :  { %v3336_v10 = vmul.f32 0.2, %v3184_v38  ;;  %v3185_v16 = vadd.f32 %v4966_v19, %v6172_v28  ;;  %vm3260_vm15 = vcmp.ge.f32.partialorder %v3184_v38, 0.0 }
 0x1ad   :  { %vm3263_vm0 = vcmp.ge.f32.partialorder %v3187_v26, 0.0  ;;  %v3339_v17 = vmul.f32 0.2, %v3187_v26  ;;  %v4709_v41 = vpop.f32.mrb[16].mxu1  ;;  %v3414_v32 = vsel %vm3262_vm14, %v3186_v55, %v3338_v61 }
 0x1ae   :  { %vm3261_vm1 = vcmp.ge.f32.partialorder %v3185_v16, 0.0  ;;  %v3337_v62 = vmul.f32 0.2, %v3185_v16  ;;  %v4893_v44 = vpop.f32.mrb[16].mxu0  ;;  %v1234_v25 = vpop.f32.mrb[17].mxu1  ;;  %v3412_v49 = vsel %vm3260_vm15, %v3184_v38, %v3336_v10 }
 0x1af   :  { %v3415_v18 = vsel %vm3263_vm0, %v3187_v26, %v3339_v17  ;;  %v4967_v37 = vadd.f32 %v4893_v44, %v4709_v41  ;;  %v2850_v1 = vpop.f32.mrb[17].mxu0  ;;  %v4710_v54 = vpop.f32.mrb[18].mxu1 }
 0x1b0   :  { %v4210_v31 = vpack.c.bf16 %v3415_v18, %v3414_v32  ;;  %v3413_v46 = vsel %vm3261_vm1, %v3185_v16, %v3337_v62  ;;  %v4968_v2 = vadd.f32 %v2850_v1, %v1234_v25  ;;  %v4894_v4 = vpop.f32.mrb[18].mxu0  ;;  %v1237_v3 = vpop.f32.mrb[19].mxu1 }
 0x1b1   :  { %v4205_v5 = vpack.c.bf16 %v3413_v46, %v3412_v49  ;;  %v3190_v6 = vadd.f32 %v4967_v37, %v6172_v28  ;;  %v4969_v11 = vadd.f32 %v4894_v4, %v4710_v54  ;;  %v2853_v12 = vpop.f32.mrb[19].mxu0 }
 0x1b2   :  { %4368 = vst [vmem:[%s6372_s3 + $0x38] sm:$0xff] %v4210_v31   ;;  %v3188_v9 = vadd.f32 %v4968_v2, %v6172_v28  ;;  %v4970_v13 = vadd.f32 %v2853_v12, %v1237_v3 }
 0x1b3   :  { %4367 = vst [vmem:[%s6372_s3 + $0x30] sm:$0xff] %v4205_v5   ;;  %v3342_v20 = vmul.f32 0.2, %v3190_v6  ;;  %v3191_v39 = vadd.f32 %v4969_v11, %v6172_v28  ;;  %vm3266_vm2 = vcmp.ge.f32.partialorder %v3190_v6, 0.0 }
 0x1b4   :  { %v3340_v45 = vmul.f32 0.2, %v3188_v9  ;;  %v3189_v30 = vadd.f32 %v4970_v13, %v6172_v28  ;;  %vm3264_vm3 = vcmp.ge.f32.partialorder %v3188_v9, 0.0 }
 0x1b5   :  { %vm3267_vm4 = vcmp.ge.f32.partialorder %v3191_v39, 0.0  ;;  %v3343_v42 = vmul.f32 0.2, %v3191_v39  ;;  %v4713_v59 = vpop.f32.mrb[20].mxu1  ;;  %v3418_v22 = vsel %vm3266_vm2, %v3190_v6, %v3342_v20 }
 0x1b6   :  { %vm3265_vm5 = vcmp.ge.f32.partialorder %v3189_v30, 0.0  ;;  %v3341_v63 = vmul.f32 0.2, %v3189_v30  ;;  %v4897_v0 = vpop.f32.mrb[20].mxu0  ;;  %v1250_v7 = vpop.f32.mrb[21].mxu1  ;;  %v3416_v48 = vsel %vm3264_vm3, %v3188_v9, %v3340_v45 }
 0x1b7   :  { %v3419_v47 = vsel %vm3267_vm4, %v3191_v39, %v3343_v42  ;;  %v4971_v50 = vadd.f32 %v4897_v0, %v4713_v59  ;;  %v2866_v14 = vpop.f32.mrb[21].mxu0  ;;  %v4714_v21 = vpop.f32.mrb[22].mxu1 }
 0x1b8   :  { %v4220_v57 = vpack.c.bf16 %v3419_v47, %v3418_v22  ;;  %v3417_v15 = vsel %vm3265_vm5, %v3189_v30, %v3341_v63  ;;  %v4972_v23 = vadd.f32 %v2866_v14, %v1250_v7  ;;  %v4898_v60 = vpop.f32.mrb[22].mxu0  ;;  %v1253_v8 = vpop.f32.mrb[23].mxu1 }
 0x1b9   :  { %v4215_v34 = vpack.c.bf16 %v3417_v15, %v3416_v48  ;;  %v3194_v35 = vadd.f32 %v4971_v50, %v6172_v28  ;;  %v4973_v24 = vadd.f32 %v4898_v60, %v4714_v21  ;;  %v2869_v29 = vpop.f32.mrb[23].mxu0 }
 0x1ba   :  { %4370 = vst [vmem:[%s6372_s3 + $0x48] sm:$0xff] %v4220_v57   ;;  %v3192_v52 = vadd.f32 %v4972_v23, %v6172_v28  ;;  %v4974_v53 = vadd.f32 %v2869_v29, %v1253_v8 }
 0x1bb   :  { %4369 = vst [vmem:[%s6372_s3 + $0x40] sm:$0xff] %v4215_v34   ;;  %v3346_v58 = vmul.f32 0.2, %v3194_v35  ;;  %v3195_v33 = vadd.f32 %v4973_v24, %v6172_v28  ;;  %vm3270_vm6 = vcmp.ge.f32.partialorder %v3194_v35, 0.0 }
 0x1bc   :  { %v3344_v36 = vmul.f32 0.2, %v3192_v52  ;;  %v3193_v40 = vadd.f32 %v4974_v53, %v6172_v28  ;;  %vm3268_vm7 = vcmp.ge.f32.partialorder %v3192_v52, 0.0 }
 0x1bd   :  { %vm3271_vm8 = vcmp.ge.f32.partialorder %v3195_v33, 0.0  ;;  %v3347_v43 = vmul.f32 0.2, %v3195_v33  ;;  %v4717_v51 = vpop.f32.mrb[24].mxu1  ;;  %v3422_v38 = vsel %vm3270_vm6, %v3194_v35, %v3346_v58 }
 0x1be   :  { %vm3269_vm9 = vcmp.ge.f32.partialorder %v3193_v40, 0.0  ;;  %v3345_v55 = vmul.f32 0.2, %v3193_v40  ;;  %v4901_v27 = vpop.f32.mrb[24].mxu0  ;;  %v1266_v56 = vpop.f32.mrb[25].mxu1  ;;  %v3420_v16 = vsel %vm3268_vm7, %v3192_v52, %v3344_v36 }
 0x1bf   :  { %v3423_v19 = vsel %vm3271_vm8, %v3195_v33, %v3347_v43  ;;  %v4975_v61 = vadd.f32 %v4901_v27, %v4717_v51  ;;  %v2882_v26 = vpop.f32.mrb[25].mxu0  ;;  %v4718_v10 = vpop.f32.mrb[26].mxu1 }
 0x1c0   :  { %v4230_v17 = vpack.c.bf16 %v3423_v19, %v3422_v38  ;;  %v3421_v41 = vsel %vm3269_vm9, %v3193_v40, %v3345_v55  ;;  %v4976_v62 = vadd.f32 %v2882_v26, %v1266_v56  ;;  %v4902_v44 = vpop.f32.mrb[26].mxu0  ;;  %v1269_v25 = vpop.f32.mrb[27].mxu1 }
 0x1c1   :  { %v4225_v32 = vpack.c.bf16 %v3421_v41, %v3420_v16  ;;  %v3198_v18 = vadd.f32 %v4975_v61, %v6172_v28  ;;  %v4977_v37 = vadd.f32 %v4902_v44, %v4718_v10  ;;  %v2885_v1 = vpop.f32.mrb[27].mxu0 }
 0x1c2   :  { %4372 = vst [vmem:[%s6372_s3 + $0x58] sm:$0xff] %v4230_v17   ;;  %v3196_v54 = vadd.f32 %v4976_v62, %v6172_v28  ;;  %v4978_v49 = vadd.f32 %v2885_v1, %v1269_v25 }
 0x1c3   :  { %4371 = vst [vmem:[%s6372_s3 + $0x50] sm:$0xff] %v4225_v32   ;;  %v3350_v31 = vmul.f32 0.2, %v3198_v18  ;;  %v3199_v46 = vadd.f32 %v4977_v37, %v6172_v28  ;;  %vm3274_vm10 = vcmp.ge.f32.partialorder %v3198_v18, 0.0 }
 0x1c4   :  { %v3348_v2 = vmul.f32 0.2, %v3196_v54  ;;  %v3197_v4 = vadd.f32 %v4978_v49, %v6172_v28  ;;  %vm3272_vm11 = vcmp.ge.f32.partialorder %v3196_v54, 0.0 }
 0x1c5   :  { %vm3275_vm12 = vcmp.ge.f32.partialorder %v3199_v46, 0.0  ;;  %v3351_v3 = vmul.f32 0.2, %v3199_v46  ;;  %v4721_v5 = vpop.f32.mrb[28].mxu1  ;;  %v3426_v9 = vsel %vm3274_vm10, %v3198_v18, %v3350_v31 }
 0x1c6   :  { %vm3273_vm13 = vcmp.ge.f32.partialorder %v3197_v4, 0.0  ;;  %v3349_v6 = vmul.f32 0.2, %v3197_v4  ;;  %v4905_v11 = vpop.f32.mrb[28].mxu0  ;;  %v1282_v12 = vpop.f32.mrb[29].mxu1  ;;  %v3424_v30 = vsel %vm3272_vm11, %v3196_v54, %v3348_v2 }
 0x1c7   :  { %v3427_v13 = vsel %vm3275_vm12, %v3199_v46, %v3351_v3  ;;  %v4979_v20 = vadd.f32 %v4905_v11, %v4721_v5  ;;  %v2898_v39 = vpop.f32.mrb[29].mxu0  ;;  %v4722_v45 = vpop.f32.mrb[30].mxu1 }
 0x1c8   :  { %v4240_v42 = vpack.c.bf16 %v3427_v13, %v3426_v9  ;;  %v3425_v59 = vsel %vm3273_vm13, %v3197_v4, %v3349_v6  ;;  %v4980_v63 = vadd.f32 %v2898_v39, %v1282_v12  ;;  %v4906_v0 = vpop.f32.mrb[30].mxu0  ;;  %v1285_v7 = vpop.f32.mrb[31].mxu1 }
 0x1c9   :  { %v4235_v22 = vpack.c.bf16 %v3425_v59, %v3424_v30  ;;  %v3202_v47 = vadd.f32 %v4979_v20, %v6172_v28  ;;  %v4981_v50 = vadd.f32 %v4906_v0, %v4722_v45  ;;  %v2901_v14 = vpop.f32.mrb[31].mxu0 }
 0x1ca   :  { %4374 = vst [vmem:[%s6372_s3 + $0x68] sm:$0xff] %v4240_v42   ;;  %v3200_v21 = vadd.f32 %v4980_v63, %v6172_v28  ;;  %v4982_v48 = vadd.f32 %v2901_v14, %v1285_v7 }
 0x1cb   :  { %4373 = vst [vmem:[%s6372_s3 + $0x60] sm:$0xff] %v4235_v22   ;;  %v3354_v57 = vmul.f32 0.2, %v3202_v47  ;;  %v3203_v15 = vadd.f32 %v4981_v50, %v6172_v28  ;;  %vm3278_vm14 = vcmp.ge.f32.partialorder %v3202_v47, 0.0 }
 0x1cc   :  { %v3352_v23 = vmul.f32 0.2, %v3200_v21  ;;  %v3201_v60 = vadd.f32 %v4982_v48, %v6172_v28  ;;  %vm3276_vm15 = vcmp.ge.f32.partialorder %v3200_v21, 0.0 }
 0x1cd   :  { %vm3279_vm0 = vcmp.ge.f32.partialorder %v3203_v15, 0.0  ;;  %v3355_v8 = vmul.f32 0.2, %v3203_v15  ;;  %v4725_v34 = vpop.f32.mrb[32].mxu1  ;;  %v3430_v52 = vsel %vm3278_vm14, %v3202_v47, %v3354_v57 }
 0x1ce   :  { %vm3277_vm1 = vcmp.ge.f32.partialorder %v3201_v60, 0.0  ;;  %v3353_v35 = vmul.f32 0.2, %v3201_v60  ;;  %v4909_v24 = vpop.f32.mrb[32].mxu0  ;;  %v1298_v29 = vpop.f32.mrb[33].mxu1  ;;  %v3428_v40 = vsel %vm3276_vm15, %v3200_v21, %v3352_v23 }
 0x1cf   :  { %v3431_v53 = vsel %vm3279_vm0, %v3203_v15, %v3355_v8  ;;  %v4983_v58 = vadd.f32 %v4909_v24, %v4725_v34  ;;  %v2914_v33 = vpop.f32.mrb[33].mxu0  ;;  %v4726_v36 = vpop.f32.mrb[34].mxu1 }
 0x1d0   :  { %v4250_v43 = vpack.c.bf16 %v3431_v53, %v3430_v52  ;;  %v3429_v51 = vsel %vm3277_vm1, %v3201_v60, %v3353_v35  ;;  %v4984_v55 = vadd.f32 %v2914_v33, %v1298_v29  ;;  %v4910_v27 = vpop.f32.mrb[34].mxu0  ;;  %v1301_v56 = vpop.f32.mrb[35].mxu1 }
 0x1d1   :  { %v4245_v38 = vpack.c.bf16 %v3429_v51, %v3428_v40  ;;  %v3206_v19 = vadd.f32 %v4983_v58, %v6172_v28  ;;  %v4985_v61 = vadd.f32 %v4910_v27, %v4726_v36  ;;  %v2917_v26 = vpop.f32.mrb[35].mxu0 }
 0x1d2   :  { %4376 = vst [vmem:[%s6372_s3 + $0x78] sm:$0xff] %v4250_v43   ;;  %v3204_v10 = vadd.f32 %v4984_v55, %v6172_v28  ;;  %v4986_v16 = vadd.f32 %v2917_v26, %v1301_v56 }
 0x1d3   :  { %4375 = vst [vmem:[%s6372_s3 + $0x70] sm:$0xff] %v4245_v38   ;;  %v3358_v17 = vmul.f32 0.2, %v3206_v19  ;;  %v3207_v41 = vadd.f32 %v4985_v61, %v6172_v28  ;;  %vm3282_vm2 = vcmp.ge.f32.partialorder %v3206_v19, 0.0 }
 0x1d4   :  { %v3356_v62 = vmul.f32 0.2, %v3204_v10  ;;  %v3205_v44 = vadd.f32 %v4986_v16, %v6172_v28  ;;  %vm3280_vm3 = vcmp.ge.f32.partialorder %v3204_v10, 0.0 }
 0x1d5   :  { %vm3283_vm4 = vcmp.ge.f32.partialorder %v3207_v41, 0.0  ;;  %v3359_v25 = vmul.f32 0.2, %v3207_v41  ;;  %v4729_v32 = vpop.f32.mrb[36].mxu1  ;;  %v3434_v54 = vsel %vm3282_vm2, %v3206_v19, %v3358_v17 }
 0x1d6   :  { %vm3281_vm5 = vcmp.ge.f32.partialorder %v3205_v44, 0.0  ;;  %v3357_v18 = vmul.f32 0.2, %v3205_v44  ;;  %v4913_v37 = vpop.f32.mrb[36].mxu0  ;;  %v1314_v1 = vpop.f32.mrb[37].mxu1  ;;  %v3432_v4 = vsel %vm3280_vm3, %v3204_v10, %v3356_v62 }
 0x1d7   :  { %v3435_v49 = vsel %vm3283_vm4, %v3207_v41, %v3359_v25  ;;  %v4987_v31 = vadd.f32 %v4913_v37, %v4729_v32  ;;  %v2930_v46 = vpop.f32.mrb[37].mxu0  ;;  %v4730_v2 = vpop.f32.mrb[38].mxu1 }
 0x1d8   :  { %v4260_v3 = vpack.c.bf16 %v3435_v49, %v3434_v54  ;;  %v3433_v5 = vsel %vm3281_vm5, %v3205_v44, %v3357_v18  ;;  %v4988_v6 = vadd.f32 %v2930_v46, %v1314_v1  ;;  %v4914_v11 = vpop.f32.mrb[38].mxu0  ;;  %v1317_v12 = vpop.f32.mrb[39].mxu1 }
 0x1d9   :  { %v4255_v9 = vpack.c.bf16 %v3433_v5, %v3432_v4  ;;  %v3210_v13 = vadd.f32 %v4987_v31, %v6172_v28  ;;  %v4989_v20 = vadd.f32 %v4914_v11, %v4730_v2  ;;  %v2933_v39 = vpop.f32.mrb[39].mxu0 }
 0x1da   :  { %4378 = vst [vmem:[%s6372_s3 + $0x88] sm:$0xff] %v4260_v3   ;;  %v3208_v45 = vadd.f32 %v4988_v6, %v6172_v28  ;;  %v4990_v30 = vadd.f32 %v2933_v39, %v1317_v12 }
 0x1db   :  { %4377 = vst [vmem:[%s6372_s3 + $0x80] sm:$0xff] %v4255_v9   ;;  %v3362_v42 = vmul.f32 0.2, %v3210_v13  ;;  %v3211_v59 = vadd.f32 %v4989_v20, %v6172_v28  ;;  %vm3286_vm6 = vcmp.ge.f32.partialorder %v3210_v13, 0.0 }
 0x1dc   :  { %v3360_v63 = vmul.f32 0.2, %v3208_v45  ;;  %v3209_v0 = vadd.f32 %v4990_v30, %v6172_v28  ;;  %vm3284_vm7 = vcmp.ge.f32.partialorder %v3208_v45, 0.0 }
 0x1dd   :  { %vm3287_vm8 = vcmp.ge.f32.partialorder %v3211_v59, 0.0  ;;  %v3363_v7 = vmul.f32 0.2, %v3211_v59  ;;  %v4733_v22 = vpop.f32.mrb[40].mxu1  ;;  %v3438_v21 = vsel %vm3286_vm6, %v3210_v13, %v3362_v42 }
 0x1de   :  { %vm3285_vm9 = vcmp.ge.f32.partialorder %v3209_v0, 0.0  ;;  %v3361_v47 = vmul.f32 0.2, %v3209_v0  ;;  %v4917_v50 = vpop.f32.mrb[40].mxu0  ;;  %v1330_v14 = vpop.f32.mrb[41].mxu1  ;;  %v3436_v60 = vsel %vm3284_vm7, %v3208_v45, %v3360_v63 }
 0x1df   :  { %v3439_v48 = vsel %vm3287_vm8, %v3211_v59, %v3363_v7  ;;  %v4991_v57 = vadd.f32 %v4917_v50, %v4733_v22  ;;  %v2946_v15 = vpop.f32.mrb[41].mxu0  ;;  %v4734_v23 = vpop.f32.mrb[42].mxu1 }
 0x1e0   :  { %v4270_v8 = vpack.c.bf16 %v3439_v48, %v3438_v21  ;;  %v3437_v34 = vsel %vm3285_vm9, %v3209_v0, %v3361_v47  ;;  %v4992_v35 = vadd.f32 %v2946_v15, %v1330_v14  ;;  %v4918_v24 = vpop.f32.mrb[42].mxu0  ;;  %v1333_v29 = vpop.f32.mrb[43].mxu1 }
 0x1e1   :  { %v4265_v52 = vpack.c.bf16 %v3437_v34, %v3436_v60  ;;  %v3214_v53 = vadd.f32 %v4991_v57, %v6172_v28  ;;  %v4993_v58 = vadd.f32 %v4918_v24, %v4734_v23  ;;  %v2949_v33 = vpop.f32.mrb[43].mxu0 }
 0x1e2   :  { %4380 = vst [vmem:[%s6372_s3 + $0x98] sm:$0xff] %v4270_v8   ;;  %v3212_v36 = vadd.f32 %v4992_v35, %v6172_v28  ;;  %v4994_v40 = vadd.f32 %v2949_v33, %v1333_v29 }
 0x1e3   :  { %4379 = vst [vmem:[%s6372_s3 + $0x90] sm:$0xff] %v4265_v52   ;;  %v3366_v43 = vmul.f32 0.2, %v3214_v53  ;;  %v3215_v51 = vadd.f32 %v4993_v58, %v6172_v28  ;;  %vm3290_vm10 = vcmp.ge.f32.partialorder %v3214_v53, 0.0 }
 0x1e4   :  { %v3364_v55 = vmul.f32 0.2, %v3212_v36  ;;  %v3213_v27 = vadd.f32 %v4994_v40, %v6172_v28  ;;  %vm3288_vm11 = vcmp.ge.f32.partialorder %v3212_v36, 0.0 }
 0x1e5   :  { %vm3291_vm12 = vcmp.ge.f32.partialorder %v3215_v51, 0.0  ;;  %v3367_v56 = vmul.f32 0.2, %v3215_v51  ;;  %v4737_v38 = vpop.f32.mrb[44].mxu1  ;;  %v3442_v10 = vsel %vm3290_vm10, %v3214_v53, %v3366_v43 }
 0x1e6   :  { %vm3289_vm13 = vcmp.ge.f32.partialorder %v3213_v27, 0.0  ;;  %v3365_v19 = vmul.f32 0.2, %v3213_v27  ;;  %v4921_v61 = vpop.f32.mrb[44].mxu0  ;;  %v1346_v26 = vpop.f32.mrb[45].mxu1  ;;  %v3440_v44 = vsel %vm3288_vm11, %v3212_v36, %v3364_v55 }
 0x1e7   :  { %v3443_v16 = vsel %vm3291_vm12, %v3215_v51, %v3367_v56  ;;  %v4995_v17 = vadd.f32 %v4921_v61, %v4737_v38  ;;  %v2962_v41 = vpop.f32.mrb[45].mxu0  ;;  %v4738_v62 = vpop.f32.mrb[46].mxu1 }
 0x1e8   :  { %v4280_v25 = vpack.c.bf16 %v3443_v16, %v3442_v10  ;;  %v3441_v32 = vsel %vm3289_vm13, %v3213_v27, %v3365_v19  ;;  %v4996_v18 = vadd.f32 %v2962_v41, %v1346_v26  ;;  %v4922_v37 = vpop.f32.mrb[46].mxu0  ;;  %v1349_v1 = vpop.f32.mrb[47].mxu1 }
 0x1e9   :  { %v4275_v54 = vpack.c.bf16 %v3441_v32, %v3440_v44  ;;  %v3218_v49 = vadd.f32 %v4995_v17, %v6172_v28  ;;  %v4997_v31 = vadd.f32 %v4922_v37, %v4738_v62  ;;  %v2965_v46 = vpop.f32.mrb[47].mxu0 }
 0x1ea   :  { %4382 = vst [vmem:[%s6372_s3 + $0xa8] sm:$0xff] %v4280_v25   ;;  %v3216_v2 = vadd.f32 %v4996_v18, %v6172_v28  ;;  %v4998_v4 = vadd.f32 %v2965_v46, %v1349_v1 }
 0x1eb   :  { %4381 = vst [vmem:[%s6372_s3 + $0xa0] sm:$0xff] %v4275_v54   ;;  %v3370_v3 = vmul.f32 0.2, %v3218_v49  ;;  %v3219_v5 = vadd.f32 %v4997_v31, %v6172_v28  ;;  %vm3294_vm14 = vcmp.ge.f32.partialorder %v3218_v49, 0.0 }
 0x1ec   :  { %v3368_v6 = vmul.f32 0.2, %v3216_v2  ;;  %v3217_v11 = vadd.f32 %v4998_v4, %v6172_v28  ;;  %vm3292_vm15 = vcmp.ge.f32.partialorder %v3216_v2, 0.0 }
 0x1ed   :  { %vm3295_vm0 = vcmp.ge.f32.partialorder %v3219_v5, 0.0  ;;  %v3371_v12 = vmul.f32 0.2, %v3219_v5  ;;  %v4741_v9 = vpop.f32.mrb[48].mxu1  ;;  %v3446_v45 = vsel %vm3294_vm14, %v3218_v49, %v3370_v3 }
 0x1ee   :  { %vm3293_vm1 = vcmp.ge.f32.partialorder %v3217_v11, 0.0  ;;  %v3369_v13 = vmul.f32 0.2, %v3217_v11  ;;  %v4925_v20 = vpop.f32.mrb[48].mxu0  ;;  %v1362_v39 = vpop.f32.mrb[49].mxu1  ;;  %v3444_v0 = vsel %vm3292_vm15, %v3216_v2, %v3368_v6 }
 0x1ef   :  { %v3447_v30 = vsel %vm3295_vm0, %v3219_v5, %v3371_v12  ;;  %v4999_v42 = vadd.f32 %v4925_v20, %v4741_v9  ;;  %v2978_v59 = vpop.f32.mrb[49].mxu0  ;;  %v4742_v63 = vpop.f32.mrb[50].mxu1 }
 0x1f0   :  { %v4290_v7 = vpack.c.bf16 %v3447_v30, %v3446_v45  ;;  %v3445_v22 = vsel %vm3293_vm1, %v3217_v11, %v3369_v13  ;;  %v5000_v47 = vadd.f32 %v2978_v59, %v1362_v39  ;;  %v4926_v50 = vpop.f32.mrb[50].mxu0  ;;  %v1365_v14 = vpop.f32.mrb[51].mxu1 }
 0x1f1   :  { %v4285_v21 = vpack.c.bf16 %v3445_v22, %v3444_v0  ;;  %v3222_v48 = vadd.f32 %v4999_v42, %v6172_v28  ;;  %v5001_v57 = vadd.f32 %v4926_v50, %v4742_v63  ;;  %v2981_v15 = vpop.f32.mrb[51].mxu0 }
 0x1f2   :  { %4384 = vst [vmem:[%s6372_s3 + $0xb8] sm:$0xff] %v4290_v7   ;;  %v3220_v23 = vadd.f32 %v5000_v47, %v6172_v28  ;;  %v5002_v60 = vadd.f32 %v2981_v15, %v1365_v14 }
 0x1f3   :  { %4383 = vst [vmem:[%s6372_s3 + $0xb0] sm:$0xff] %v4285_v21   ;;  %v3374_v8 = vmul.f32 0.2, %v3222_v48  ;;  %v3223_v34 = vadd.f32 %v5001_v57, %v6172_v28  ;;  %vm3298_vm2 = vcmp.ge.f32.partialorder %v3222_v48, 0.0 }
 0x1f4   :  { %v3372_v35 = vmul.f32 0.2, %v3220_v23  ;;  %v3221_v24 = vadd.f32 %v5002_v60, %v6172_v28  ;;  %vm3296_vm3 = vcmp.ge.f32.partialorder %v3220_v23, 0.0 }
 0x1f5   :  { %vm3299_vm4 = vcmp.ge.f32.partialorder %v3223_v34, 0.0  ;;  %v3375_v29 = vmul.f32 0.2, %v3223_v34  ;;  %v4745_v52 = vpop.f32.mrb[52].mxu1  ;;  %v3450_v36 = vsel %vm3298_vm2, %v3222_v48, %v3374_v8 }
 0x1f6   :  { %vm3297_vm5 = vcmp.ge.f32.partialorder %v3221_v24, 0.0  ;;  %v3373_v53 = vmul.f32 0.2, %v3221_v24  ;;  %v4929_v58 = vpop.f32.mrb[52].mxu0  ;;  %v1378_v33 = vpop.f32.mrb[53].mxu1  ;;  %v3448_v27 = vsel %vm3296_vm3, %v3220_v23, %v3372_v35 }
 0x1f7   :  { %v3451_v40 = vsel %vm3299_vm4, %v3223_v34, %v3375_v29  ;;  %v5003_v43 = vadd.f32 %v4929_v58, %v4745_v52  ;;  %v2994_v51 = vpop.f32.mrb[53].mxu0  ;;  %v4746_v55 = vpop.f32.mrb[54].mxu1 }
 0x1f8   :  { %v4300_v56 = vpack.c.bf16 %v3451_v40, %v3450_v36  ;;  %v3449_v38 = vsel %vm3297_vm5, %v3221_v24, %v3373_v53  ;;  %v5004_v19 = vadd.f32 %v2994_v51, %v1378_v33  ;;  %v4930_v61 = vpop.f32.mrb[54].mxu0  ;;  %v1381_v26 = vpop.f32.mrb[55].mxu1 }
 0x1f9   :  { %v4295_v10 = vpack.c.bf16 %v3449_v38, %v3448_v27  ;;  %v3226_v16 = vadd.f32 %v5003_v43, %v6172_v28  ;;  %v5005_v17 = vadd.f32 %v4930_v61, %v4746_v55  ;;  %v2997_v41 = vpop.f32.mrb[55].mxu0 }
 0x1fa   :  { %4386 = vst [vmem:[%s6372_s3 + $0xc8] sm:$0xff] %v4300_v56   ;;  %v3224_v62 = vadd.f32 %v5004_v19, %v6172_v28  ;;  %v5006_v44 = vadd.f32 %v2997_v41, %v1381_v26 }
 0x1fb   :  { %4385 = vst [vmem:[%s6372_s3 + $0xc0] sm:$0xff] %v4295_v10   ;;  %v3378_v25 = vmul.f32 0.2, %v3226_v16  ;;  %v3227_v32 = vadd.f32 %v5005_v17, %v6172_v28  ;;  %vm3302_vm6 = vcmp.ge.f32.partialorder %v3226_v16, 0.0 }
 0x1fc   :  { %v3376_v18 = vmul.f32 0.2, %v3224_v62  ;;  %v3225_v37 = vadd.f32 %v5006_v44, %v6172_v28  ;;  %vm3300_vm7 = vcmp.ge.f32.partialorder %v3224_v62, 0.0 }
 0x1fd   :  { %vm3303_vm8 = vcmp.ge.f32.partialorder %v3227_v32, 0.0  ;;  %v3379_v1 = vmul.f32 0.2, %v3227_v32  ;;  %v4749_v54 = vpop.f32.mrb[56].mxu1  ;;  %v3454_v2 = vsel %vm3302_vm6, %v3226_v16, %v3378_v25 }
 0x1fe   :  { %vm3301_vm9 = vcmp.ge.f32.partialorder %v3225_v37, 0.0  ;;  %v3377_v49 = vmul.f32 0.2, %v3225_v37  ;;  %v4933_v31 = vpop.f32.mrb[56].mxu0  ;;  %v1394_v46 = vpop.f32.mrb[57].mxu1  ;;  %v3452_v11 = vsel %vm3300_vm7, %v3224_v62, %v3376_v18 }
 0x1ff   :  { %v3455_v4 = vsel %vm3303_vm8, %v3227_v32, %v3379_v1  ;;  %v5007_v3 = vadd.f32 %v4933_v31, %v4749_v54  ;;  %v3010_v5 = vpop.f32.mrb[57].mxu0  ;;  %v4750_v6 = vpop.f32.mrb[58].mxu1 }
 0x200   :  { %v4310_v12 = vpack.c.bf16 %v3455_v4, %v3454_v2  ;;  %v3453_v9 = vsel %vm3301_vm9, %v3225_v37, %v3377_v49  ;;  %v5008_v13 = vadd.f32 %v3010_v5, %v1394_v46  ;;  %v4934_v20 = vpop.f32.mrb[58].mxu0  ;;  %v1397_v39 = vpop.f32.mrb[59].mxu1  ;;  %v6331_v2 = vld [vmem:[%s6371_s2] ss:$0 sm:$0xff] }
 0x201   :  { %v4305_v45 = vpack.c.bf16 %v3453_v9, %v3452_v11  ;;  %v3230_v30 = vadd.f32 %v5007_v3, %v6172_v28  ;;  %v5009_v42 = vadd.f32 %v4934_v20, %v4750_v6  ;;  %v3013_v59 = vpop.f32.mrb[59].mxu0 }
 0x202   :  { %4388 = vst [vmem:[%s6372_s3 + $0xd8] sm:$0xff] %v4310_v12   ;;  %v3228_v63 = vadd.f32 %v5008_v13, %v6172_v28  ;;  %v5010_v0 = vadd.f32 %v3013_v59, %v1397_v39 }
 0x203   :  { %4387 = vst [vmem:[%s6372_s3 + $0xd0] sm:$0xff] %v4305_v45   ;;  %v3382_v7 = vmul.f32 0.2, %v3230_v30  ;;  %v3231_v22 = vadd.f32 %v5009_v42, %v6172_v28  ;;  %vm3306_vm10 = vcmp.ge.f32.partialorder %v3230_v30, 0.0 }
 0x204   :  { %v3380_v47 = vmul.f32 0.2, %v3228_v63  ;;  %v3229_v50 = vadd.f32 %v5010_v0, %v6172_v28  ;;  %vm3304_vm11 = vcmp.ge.f32.partialorder %v3228_v63, 0.0 }
 0x205   :  { %vm3307_vm12 = vcmp.ge.f32.partialorder %v3231_v22, 0.0  ;;  %v3383_v14 = vmul.f32 0.2, %v3231_v22  ;;  %v4753_v21 = vpop.f32.mrb[60].mxu1  ;;  %v3458_v23 = vsel %vm3306_vm10, %v3230_v30, %v3382_v7 }
 0x206   :  { %vm3305_vm13 = vcmp.ge.f32.partialorder %v3229_v50, 0.0  ;;  %v3381_v48 = vmul.f32 0.2, %v3229_v50  ;;  %v4937_v57 = vpop.f32.mrb[60].mxu0  ;;  %v1410_v15 = vpop.f32.mrb[61].mxu1  ;;  %v3456_v24 = vsel %vm3304_vm11, %v3228_v63, %v3380_v47 }
 0x207   :  { %v3459_v60 = vsel %vm3307_vm12, %v3231_v22, %v3383_v14  ;;  %v5011_v8 = vadd.f32 %v4937_v57, %v4753_v21  ;;  %v3026_v34 = vpop.f32.mrb[61].mxu0  ;;  %v4754_v35 = vpop.f32.mrb[62].mxu1 }
 0x208   :  { %v4320_v29 = vpack.c.bf16 %v3459_v60, %v3458_v23  ;;  %v3457_v52 = vsel %vm3305_vm13, %v3229_v50, %v3381_v48  ;;  %v5012_v53 = vadd.f32 %v3026_v34, %v1410_v15  ;;  %v4938_v58 = vpop.f32.mrb[62].mxu0  ;;  %v1413_v33 = vpop.f32.mrb[63].mxu1 }
 0x209   :  { %v4315_v36 = vpack.c.bf16 %v3457_v52, %v3456_v24  ;;  %v3234_v40 = vadd.f32 %v5011_v8, %v6172_v28  ;;  %v5013_v43 = vadd.f32 %v4938_v58, %v4754_v35  ;;  %v3029_v51 = vpop.f32.mrb[63].mxu0 }
 0x20a   :  { %4390 = vst [vmem:[%s6372_s3 + $0xe8] sm:$0xff] %v4320_v29   ;;  %v3232_v55 = vadd.f32 %v5012_v53, %v6172_v28  ;;  %v5014_v27 = vadd.f32 %v3029_v51, %v1413_v33 }
 0x20b   :  { %4389 = vst [vmem:[%s6372_s3 + $0xe0] sm:$0xff] %v4315_v36   ;;  %v3386_v56 = vmul.f32 0.2, %v3234_v40  ;;  %v3235_v38 = vadd.f32 %v5013_v43, %v6172_v28  ;;  %vm3310_vm14 = vcmp.ge.f32.partialorder %v3234_v40, 0.0 }
 0x20c   :  { %v3384_v19 = vmul.f32 0.2, %v3232_v55  ;;  %v3233_v61 = vadd.f32 %v5014_v27, %v6172_v28  ;;  %vm3308_vm15 = vcmp.ge.f32.partialorder %v3232_v55, 0.0 }
 0x20d   :  { %vm3311_vm0 = vcmp.ge.f32.partialorder %v3235_v38, 0.0  ;;  %v3387_v26 = vmul.f32 0.2, %v3235_v38  ;;  %v4757_v10 = vpop.f32.mrb[64].mxu1  ;;  %v3462_v62 = vsel %vm3310_vm14, %v3234_v40, %v3386_v56 }
 0x20e   :  { %vm3309_vm1 = vcmp.ge.f32.partialorder %v3233_v61, 0.0  ;;  %v3385_v16 = vmul.f32 0.2, %v3233_v61  ;;  %v4941_v17 = vpop.f32.mrb[64].mxu0  ;;  %v1426_v41 = vpop.f32.mrb[65].mxu1  ;;  %v3460_v37 = vsel %vm3308_vm15, %v3232_v55, %v3384_v19 }
 0x20f   :  { %v3463_v44 = vsel %vm3311_vm0, %v3235_v38, %v3387_v26  ;;  %v5015_v25 = vadd.f32 %v4941_v17, %v4757_v10  ;;  %v3042_v32 = vpop.f32.mrb[65].mxu0  ;;  %v4758_v18 = vpop.f32.mrb[66].mxu1 }
 0x210   :  { %v4330_v1 = vpack.c.bf16 %v3463_v44, %v3462_v62  ;;  %v3461_v54 = vsel %vm3309_vm1, %v3233_v61, %v3385_v16  ;;  %v5016_v49 = vadd.f32 %v3042_v32, %v1426_v41  ;;  %v4942_v31 = vpop.f32.mrb[66].mxu0  ;;  %v1429_v46 = vpop.f32.mrb[67].mxu1 }
 0x211   :  { %v4325_v28 = vpack.c.bf16 %v3461_v54, %v3460_v37  ;;  %v3238_v4 = vadd.f32 %v6331_v2, %v5015_v25  ;;  %v5017_v3 = vadd.f32 %v4942_v31, %v4758_v18  ;;  %v3045_v5 = vpop.f32.mrb[67].mxu0 }
 0x212   :  { %4392 = vst [vmem:[%s6372_s3 + $0xf8] sm:$0xff] %v4330_v1   ;;  %v3236_v6 = vadd.f32 %v6331_v2, %v5016_v49  ;;  %v5018_v11 = vadd.f32 %v3045_v5, %v1429_v46 }
 0x213   :  { %4391 = vst [vmem:[%s6372_s3 + $0xf0] sm:$0xff] %v4325_v28   ;;  %v3390_v12 = vmul.f32 0.2, %v3238_v4  ;;  %v3239_v9 = vadd.f32 %v6331_v2, %v5017_v3  ;;  %vm3314_vm2 = vcmp.ge.f32.partialorder %v3238_v4, 0.0 }
 0x214   :  { %v3388_v13 = vmul.f32 0.2, %v3236_v6  ;;  %v3237_v20 = vadd.f32 %v6331_v2, %v5018_v11  ;;  %vm3312_vm3 = vcmp.ge.f32.partialorder %v3236_v6, 0.0 }
 0x215   :  { %vm3315_vm4 = vcmp.ge.f32.partialorder %v3239_v9, 0.0  ;;  %v3391_v39 = vmul.f32 0.2, %v3239_v9  ;;  %v4761_v45 = vpop.f32.mrb[68].mxu1  ;;  %v3466_v63 = vsel %vm3314_vm2, %v3238_v4, %v3390_v12 }
 0x216   :  { %vm3313_vm5 = vcmp.ge.f32.partialorder %v3237_v20, 0.0  ;;  %v3389_v30 = vmul.f32 0.2, %v3237_v20  ;;  %v4945_v42 = vpop.f32.mrb[68].mxu0  ;;  %v1442_v59 = vpop.f32.mrb[69].mxu1  ;;  %v3464_v50 = vsel %vm3312_vm3, %v3236_v6, %v3388_v13 }
 0x217   :  { %v3467_v0 = vsel %vm3315_vm4, %v3239_v9, %v3391_v39  ;;  %v5019_v7 = vadd.f32 %v4945_v42, %v4761_v45  ;;  %v3058_v22 = vpop.f32.mrb[69].mxu0  ;;  %v4762_v47 = vpop.f32.mrb[70].mxu1 }
 0x218   :  { %v4340_v14 = vpack.c.bf16 %v3467_v0, %v3466_v63  ;;  %v3465_v21 = vsel %vm3313_vm5, %v3237_v20, %v3389_v30  ;;  %v5020_v48 = vadd.f32 %v3058_v22, %v1442_v59  ;;  %v4946_v57 = vpop.f32.mrb[70].mxu0  ;;  %v1445_v15 = vpop.f32.mrb[71].mxu1 }
 0x219   :  { %v4335_v23 = vpack.c.bf16 %v3465_v21, %v3464_v50  ;;  %v3242_v60 = vadd.f32 %v6331_v2, %v5019_v7  ;;  %v5021_v8 = vadd.f32 %v4946_v57, %v4762_v47  ;;  %v3061_v34 = vpop.f32.mrb[71].mxu0 }
 0x21a   :  { %4394 = vst [vmem:[%s6372_s3 + $0x108] sm:$0xff] %v4340_v14   ;;  %v3240_v35 = vadd.f32 %v6331_v2, %v5020_v48  ;;  %v5022_v24 = vadd.f32 %v3061_v34, %v1445_v15 }
 0x21b   :  { %4393 = vst [vmem:[%s6372_s3 + $0x100] sm:$0xff] %v4335_v23   ;;  %v3394_v29 = vmul.f32 0.2, %v3242_v60  ;;  %v3243_v52 = vadd.f32 %v6331_v2, %v5021_v8  ;;  %vm3318_vm6 = vcmp.ge.f32.partialorder %v3242_v60, 0.0 }
 0x21c   :  { %v3392_v53 = vmul.f32 0.2, %v3240_v35  ;;  %v3241_v58 = vadd.f32 %v6331_v2, %v5022_v24  ;;  %vm3316_vm7 = vcmp.ge.f32.partialorder %v3240_v35, 0.0 }
 0x21d   :  { %vm3319_vm8 = vcmp.ge.f32.partialorder %v3243_v52, 0.0  ;;  %v3395_v33 = vmul.f32 0.2, %v3243_v52  ;;  %v4765_v36 = vpop.f32.mrb[72].mxu1  ;;  %v3470_v55 = vsel %vm3318_vm6, %v3242_v60, %v3394_v29 }
 0x21e   :  { %vm3317_vm9 = vcmp.ge.f32.partialorder %v3241_v58, 0.0  ;;  %v3393_v40 = vmul.f32 0.2, %v3241_v58  ;;  %v4949_v43 = vpop.f32.mrb[72].mxu0  ;;  %v1458_v51 = vpop.f32.mrb[73].mxu1  ;;  %v3468_v61 = vsel %vm3316_vm7, %v3240_v35, %v3392_v53 }
 0x21f   :  { %v3471_v27 = vsel %vm3319_vm8, %v3243_v52, %v3395_v33  ;;  %v5023_v56 = vadd.f32 %v4949_v43, %v4765_v36  ;;  %v3074_v38 = vpop.f32.mrb[73].mxu0  ;;  %v4766_v19 = vpop.f32.mrb[74].mxu1 }
 0x220   :  { %v4350_v26 = vpack.c.bf16 %v3471_v27, %v3470_v55  ;;  %v3469_v10 = vsel %vm3317_vm9, %v3241_v58, %v3393_v40  ;;  %v5024_v16 = vadd.f32 %v3074_v38, %v1458_v51  ;;  %v4950_v17 = vpop.f32.mrb[74].mxu0  ;;  %v1461_v41 = vpop.f32.mrb[75].mxu1 }
 0x221   :  { %v4345_v62 = vpack.c.bf16 %v3469_v10, %v3468_v61  ;;  %v3246_v44 = vadd.f32 %v6331_v2, %v5023_v56  ;;  %v5025_v25 = vadd.f32 %v4950_v17, %v4766_v19  ;;  %v3077_v32 = vpop.f32.mrb[75].mxu0 }
 0x222   :  { %4396 = vst [vmem:[%s6372_s3 + $0x118] sm:$0xff] %v4350_v26   ;;  %v3244_v18 = vadd.f32 %v6331_v2, %v5024_v16  ;;  %v5026_v37 = vadd.f32 %v3077_v32, %v1461_v41 }
 0x223   :  { %4395 = vst [vmem:[%s6372_s3 + $0x110] sm:$0xff] %v4345_v62   ;;  %v3398_v1 = vmul.f32 0.2, %v3246_v44  ;;  %v3247_v54 = vadd.f32 %v6331_v2, %v5025_v25  ;;  %vm3322_vm10 = vcmp.ge.f32.partialorder %v3246_v44, 0.0 }
 0x224   :  { %v3396_v49 = vmul.f32 0.2, %v3244_v18  ;;  %v3245_v31 = vadd.f32 %v6331_v2, %v5026_v37  ;;  %vm3320_vm11 = vcmp.ge.f32.partialorder %v3244_v18, 0.0 }
 0x225   :  { %vm3323_vm12 = vcmp.ge.f32.partialorder %v3247_v54, 0.0  ;;  %v3399_v46 = vmul.f32 0.2, %v3247_v54  ;;  %v3474_v4 = vsel %vm3322_vm10, %v3246_v44, %v3398_v1 }
 0x226   :  { %vm3321_vm13 = vcmp.ge.f32.partialorder %v3245_v31, 0.0  ;;  %v3397_v28 = vmul.f32 0.2, %v3245_v31  ;;  %v3472_v5 = vsel %vm3320_vm11, %v3244_v18, %v3396_v49 }
 0x227   :  { %v3475_v3 = vsel %vm3323_vm12, %v3247_v54, %v3399_v46 }
 0x228   :  { %v4360_v6 = vpack.c.bf16 %v3475_v3, %v3474_v4  ;;  %v3473_v11 = vsel %vm3321_vm13, %v3245_v31, %v3397_v28 }
 0x229   :  { %v4355_v12 = vpack.c.bf16 %v3473_v11, %v3472_v5 }
 0x22a   :  { %4398 = vst [vmem:[%s6372_s3 + $0x128] sm:$0xff] %v4360_v6  }
 0x22b   :  { %4397 = vst [vmem:[%s6372_s3 + $0x120] sm:$0xff] %v4355_v12  }

// kernel: discriminator_forward.6
= control target key start
LH: loop header
LB: loop body
LE: loop exit
PB: predicated region body
PF: predicated region fallthrough
CT: control target
= control target key end

     0   :  { %vm136_vm0 = vsmask.f32 7424  ;;  %vm1054_vm1 = vcmask 1046528   ;;  %s2542_s1 = inlined_call_operand.vmem [shape: bf16[4,128,128], index: 1, kind: input, shape index: {}]   ;;  %s2543_s0 = inlined_call_operand.vmem [shape: bf16[1,208,128], index: 0, kind: input, shape index: {}]   ;;  %s2544_s2 = inlined_call_operand.vmem [shape: f32[1,128], index: 2, kind: input, shape index: {}]   ;;  %s2545_s3 = inlined_call_operand.vmem [shape: bf16[1,192,128], index: 3, kind: output, shape index: {}]  }
   0x1   :  { %v2059_v0 = vld [vmem:[%s2542_s1 + $0x40] sm:$0xff]   ;;  %v2061_v2 = vld [vmem:[%s2542_s1 + $0x48] sm:$0xff]   ;;  %v2063_v4 = vld [vmem:[%s2542_s1 + $0x50] sm:$0xff]  }
   0x2   :  { %v2060_v1 = vld [vmem:[%s2542_s1 + $0x80] sm:$0xff]   ;;  %1827 = vmatprep.subr.bf16.mxu1 %v2059_v0  ;;  %v2062_v3 = vld [vmem:[%s2542_s1 + $0x88] sm:$0xff]   ;;  %v2064_v5 = vld [vmem:[%s2542_s1 + $0x90] sm:$0xff]  }
   0x3   :  { %1907 = vmatprep.subr.bf16.mxu0 %v2060_v1  ;;  %1828 = vmatpush3.bf16.msra.mxu1 %v2059_v0  ;;  %v2065_v6 = vld [vmem:[%s2542_s1 + $0x58] sm:$0xff]   ;;  %v2067_v8 = vld [vmem:[%s2542_s1 + $0x60] sm:$0xff]   ;;  %v2069_v10 = vld [vmem:[%s2542_s1 + $0x68] sm:$0xff]  }
   0x4   :  { %1908 = vmatpush3.bf16.msra.mxu0 %v2060_v1  ;;  %1829 = vmatprep.subr.bf16.mxu1 %v2061_v2  ;;  %v2066_v7 = vld [vmem:[%s2542_s1 + $0x98] sm:$0xff]   ;;  %v2068_v9 = vld [vmem:[%s2542_s1 + $0xa0] sm:$0xff]   ;;  %v2070_v11 = vld [vmem:[%s2542_s1 + $0xa8] sm:$0xff]  }
   0x5   :  { %1909 = vmatprep.subr.bf16.mxu0 %v2062_v3  ;;  %v2177_v12 = vld [vmem:[%s2543_s0] sm:$0xff]   ;;  %v2182_v13 = vld [vmem:[%s2543_s0 + $0x8] sm:$0xff]   ;;  %v2071_v14 = vld [vmem:[%s2542_s1 + $0x70] sm:$0xff]  }
   0x6   :  { %v615_v15 = vld [vmem:[%s2543_s0 + $0x4] sm:$0xf]  ;;  %v2193_v16 = vld [vmem:[%s2543_s0 + $0x8] sm:$0xf]  ;;  %v2072_v17 = vld [vmem:[%s2542_s1 + $0xb0] sm:$0xff]   ;;  %v138_v18 = vshrl.u32 %v2177_v12, 16 }
   0x7   :  { %1830 = vmatpush3.bf16.msra.mxu1 %v2061_v2  ;;  %v140_v19 = vshll.u32 %v2177_v12, 16  ;;  %v145_v20 = vshll.u32 %v2182_v13, 16  ;;  %v1581_v21 = vcombine.low %v615_v15, %v2193_v16  ;;  %v2205_v22 = vld [vmem:[%s2543_s0 + $0xc] sm:$0xff]   ;;  %v149_v29 = vshrl.u32 %v2182_v13, 16  ;;  %v2218_v31 = vld [vmem:[%s2543_s0 + $0x14] sm:$0xff]   ;;  %v2080_v43 = vld [vmem:[%s2542_s1] sm:$0xff]  }
   0x8   :  { %1910 = vmatpush3.bf16.msra.mxu0 %v2062_v3  ;;  %1831 = vmatprep.subr.bf16.mxu1 %v2063_v4  ;;  %v2210_v23 = vld [vmem:[%s2543_s0 + $0x10] sm:$0xff]   ;;  %v728_v28 = vshll.u32 %v2205_v22, 16  ;;  %v732_v34 = vshrl.u32 %v2205_v22, 16  ;;  %v2073_v35 = vld [vmem:[%s2542_s1 + $0x78] sm:$0xff]   ;;  %v736_v38 = vshll.u32 %v2218_v31, 16  ;;  %v2082_v47 = vld [vmem:[%s2542_s1 + $0xc0] sm:$0xff]  }
   0x9   :  { %1911 = vmatprep.subr.bf16.mxu0 %v2064_v5  ;;  %v142_v24 = vrot.slane %v140_v19, 1  ;;  %v147_v25 = vrot.slane %v145_v20, 1  ;;  %v721_v26 = vshrl.u32 %v1581_v21, 16  ;;  %v723_v27 = vshll.u32 %v1581_v21, 16  ;;  %v2074_v36 = vld [vmem:[%s2542_s1 + $0xb8] sm:$0xff]   ;;  %v2083_v53 = vld [vmem:[%s2542_s1 + $0x8] sm:$0xff]  }
   0xa   :  { %v153_v30 = vshll.u32 %v2210_v23, 16  ;;  %v730_v37 = vrot.slane %v728_v28, 1  ;;  %v738_v46 = vrot.slane %v736_v38, 1  ;;  %v157_v48 = vshrl.u32 %v2210_v23, 16  ;;  %v2240_v49 = vld [vmem:[%s2543_s0 + $0x18] sm:$0xff]   ;;  %v2256_v56 = vld [vmem:[%s2543_s0 + $0x20] sm:$0xff]  }
   0xb   :  { %1832 = vmatpush3.bf16.msra.mxu1 %v2063_v4  ;;  %v143_v32 = vor.u32 %v142_v24, %v138_v18  ;;  %v725_v33 = vrot.slane %v723_v27, 1  ;;  %v151_v41 = vor.u32 %v149_v29, %v147_v25  ;;  %v740_v50 = vshrl.u32 %v2218_v31, 16  ;;  %v2246_v51 = vld [vmem:[%s2543_s0 + $0x1c] sm:$0xff]   ;;  %v2261_v57 = vld [vmem:[%s2543_s0 + $0x24] sm:$0xff]   ;;  %v2296_v21 = vld [vmem:[%s2543_s0 + $0x30] sm:$0xff]  }
   0xc   :  { %1912 = vmatpush3.bf16.msra.mxu0 %v2064_v5  ;;  %1833 = vmatprep.subr.bf16.mxu1 %v2065_v6  ;;  %v155_v42 = vrot.slane %v153_v30, 1  ;;  %v734_v45 = vor.u32 %v732_v34, %v730_v37  ;;  %v161_v55 = vshll.u32 %v2240_v49, 16  ;;  %v744_v60 = vshll.u32 %v2246_v51, 16  ;;  %v2084_v2 = vld [vmem:[%s2542_s1 + $0xc8] sm:$0xff]   ;;  %v2095_v34 = vld [vmem:[%s2542_s1 + $0x18] sm:$0xff]  }
   0xd   :  { %1913 = vmatprep.subr.bf16.mxu0 %v2066_v7  ;;  %v148_v39 = vsel %vm136_vm0, %v143_v32, %v147_v25  ;;  %v726_v40 = vor.u32 %v725_v33, %v721_v26  ;;  %v742_v59 = vor.u32 %v740_v50, %v738_v46  ;;  %v165_v61 = vshrl.u32 %v2240_v49, 16  ;;  %v2302_v25 = vld [vmem:[%s2543_s0 + $0x34] sm:$0xff]  }
   0xe   :  { %1843 = vmatprep.mubr.bf16.mxu1 %v148_v39  ;;  %v156_v52 = vsel %vm136_vm0, %v151_v41, %v155_v42  ;;  %v159_v54 = vor.u32 %v157_v48, %v155_v42  ;;  %v739_v58 = vsel %vm136_vm0, %v734_v45, %v738_v46  ;;  %v163_v62 = vrot.slane %v161_v55, 1  ;;  %v2321_v42 = vld [vmem:[%s2543_s0 + $0x38] sm:$0xff]  }
   0xf   :  { %1834 = vmatpush3.bf16.msra.mxu1 %v2065_v6  ;;  %v731_v44 = vsel %vm136_vm0, %v726_v40, %v730_v37  ;;  %v169_v63 = vshll.u32 %v2256_v56, 16  ;;  %v748_v0 = vshrl.u32 %v2246_v51, 16  ;;  %v752_v1 = vshll.u32 %v2261_v57, 16  ;;  %v2096_v37 = vld [vmem:[%s2542_s1 + $0xd8] sm:$0xff]  }
  0x10   :  { %1914 = vmatpush3.bf16.msra.mxu0 %v2066_v7  ;;  %1835 = vmatprep.subr.bf16.mxu1 %v2067_v8  ;;  %v746_v3 = vrot.slane %v744_v60, 1  ;;  %v164_v4 = vsel %vm136_vm0, %v159_v54, %v163_v62  ;;  %v2089_v7 = vld [vmem:[%s2542_s1 + $0x10] sm:$0xff]   ;;  %v756_v18 = vshrl.u32 %v2261_v57, 16  ;;  %v185_v32 = vshll.u32 %v2296_v21, 16  ;;  %v2327_v45 = vld [vmem:[%s2543_s0 + $0x3c] sm:$0xff]  }
  0x11   :  { %1915 = vmatprep.subr.bf16.mxu0 %v2068_v9  ;;  %1923 = vmatprep.mubr.bf16.mxu0 %v731_v44  ;;  %v171_v5 = vrot.slane %v169_v63, 1  ;;  %v754_v6 = vrot.slane %v752_v1, 1  ;;  %v768_v33 = vshll.u32 %v2302_v25, 16  ;;  %v772_v46 = vshrl.u32 %v2302_v25, 16  ;;  %v2100_v54 = vld [vmem:[%s2542_s1 + $0x20] sm:$0xff]  }
  0x12   :  { %v750_v15 = vor.u32 %v748_v0, %v746_v3  ;;  %v187_v39 = vrot.slane %v185_v32, 1  ;;  %v193_v50 = vshll.u32 %v2321_v42, 16  ;;  %v2102_v63 = vld [vmem:[%s2542_s1 + $0xe0] sm:$0xff]  }
  0x13   :  { %1836 = vmatpush3.bf16.msra.mxu1 %v2067_v8  ;;  %v747_v8 = vsel %vm136_vm0, %v742_v59, %v746_v3  ;;  %v758_v26 = vor.u32 %v756_v18, %v754_v6  ;;  %v770_v40 = vrot.slane %v768_v33, 1  ;;  %v2344_v59 = vld [vmem:[%s2543_s0 + $0x44] sm:$0xff]   ;;  %v2371_v18 = vld [vmem:[%s2543_s0 + $0x4c] sm:$0xff]  }
  0x14   :  { %1916 = vmatpush3.bf16.msra.mxu0 %v2068_v9  ;;  %1837 = vmatprep.subr.bf16.mxu1 %v2069_v10  ;;  %v167_v9 = vor.u32 %v165_v61, %v163_v62  ;;  %v195_v60 = vrot.slane %v193_v50, 1  ;;  %v780_v62 = vshrl.u32 %v2327_v45, 16 }
  0x15   :  { %1917 = vmatprep.subr.bf16.mxu0 %v2070_v11  ;;  %v774_v55 = vor.u32 %v772_v46, %v770_v40 }
  0x16   :  { %v172_v29 = vsel %vm136_vm0, %v167_v9, %v171_v5  ;;  %v2104_v9 = vld [vmem:[%s2542_s1 + $0xe8] sm:$0xff]  }
  0x17   :  { %1838 = vmatpush3.bf16.msra.mxu1 %v2069_v10  ;;  %v2090_v10 = vld [vmem:[%s2542_s1 + $0xd0] sm:$0xff]  }
  0x18   :  { %1918 = vmatpush3.bf16.msra.mxu0 %v2070_v11  ;;  %1839 = vmatprep.subr.bf16.mxu1 %v2071_v14  ;;  %v2283_v11 = vld [vmem:[%s2543_s0 + $0x28] sm:$0xff]  }
  0x19   :  { %1919 = vmatprep.subr.bf16.mxu0 %v2072_v17  ;;  %v177_v20 = vshll.u32 %v2283_v11, 16  ;;  %v181_v24 = vshrl.u32 %v2283_v11, 16 }
  0x1b   :  { %1840 = vmatpush3.bf16.msra.mxu1 %v2071_v14  ;;  %v173_v14 = vshrl.u32 %v2256_v56, 16  ;;  %v179_v30 = vrot.slane %v177_v20, 1 }
  0x1c   :  { %1920 = vmatpush3.bf16.msra.mxu0 %v2072_v17  ;;  %1841 = vmatprep.subr.bf16.mxu1 %v2073_v35  ;;  %v2289_v17 = vld [vmem:[%s2543_s0 + $0x2c] sm:$0xff]  }
  0x1d   :  { %1921 = vmatprep.subr.bf16.mxu0 %v2074_v36  ;;  %v175_v19 = vor.u32 %v173_v14, %v171_v5  ;;  %v760_v27 = vshll.u32 %v2289_v17, 16  ;;  %v764_v28 = vshrl.u32 %v2289_v17, 16  ;;  %v183_v44 = vor.u32 %v181_v24, %v179_v30 }
  0x1f   :  { %1842 = vmatpush3.bf16.msra.mxu1 %v2073_v35  ;;  %v755_v35 = vsel %vm136_vm0, %v750_v15, %v754_v6  ;;  %v180_v38 = vsel %vm136_vm0, %v175_v19, %v179_v30  ;;  %v188_v0 = vsel %vm136_vm0, %v183_v44, %v187_v39  ;;  %v2103_v6 = vld [vmem:[%s2542_s1 + $0x28] sm:$0xff]   ;;  %v788_v19 = vshrl.u32 %v2344_v59, 16  ;;  %v2402_v44 = vld [vmem:[%s2543_s0 + $0x58] sm:$0xff]  }
  0x20   :  { %1922 = vmatpush3.bf16.msra.mxu0 %v2074_v36  ;;  %1867 = vmatprep.subr.bf16.mxu1 %v2080_v43  ;;  %v762_v36 = vrot.slane %v760_v27, 1  ;;  %v2378_v27 = vld [vmem:[%s2543_s0 + $0x50] sm:$0xff]  }
  0x21   :  { %1947 = vmatprep.subr.bf16.mxu0 %v2082_v47  ;;  %v217_v33 = vshll.u32 %v2378_v27, 16 }
  0x22   :  { %1844 = vmatmul.mubr.bf16.vlgmr.msra.gmra.mrb[0].mxu1 %v156_v52  ;;  %v763_v41 = vsel %vm136_vm0, %v758_v26, %v762_v36  ;;  %v2334_v52 = vld [vmem:[%s2543_s0 + $0x40] sm:$0xff]  }
  0x23   :  { %1924 = vmatmul.mubr.bf16.vlgmr.msra.gmra.mrb[0].mxu0 %v739_v58  ;;  %1868 = vmatpush3.bf16.msra.mxu1 %v2080_v43  ;;  %v189_v43 = vshrl.u32 %v2296_v21, 16  ;;  %v776_v58 = vshll.u32 %v2327_v45, 16  ;;  %v201_v61 = vshll.u32 %v2334_v52, 16  ;;  %v205_v14 = vshrl.u32 %v2334_v52, 16 }
  0x24   :  { %1948 = vmatpush3.bf16.msra.mxu0 %v2082_v47  ;;  %1869 = vmatprep.subr.bf16.mxu1 %v2083_v53  ;;  %v766_v47 = vor.u32 %v764_v28, %v762_v36  ;;  %v219_v50 = vrot.slane %v217_v33, 1 }
  0x25   :  { %1949 = vmatprep.subr.bf16.mxu0 %v2084_v2  ;;  %1847 = vmatprep.mubr.bf16.mxu1 %v164_v4  ;;  %v191_v48 = vor.u32 %v189_v43, %v187_v39  ;;  %v778_v1 = vrot.slane %v776_v58, 1  ;;  %v203_v5 = vrot.slane %v201_v61, 1  ;;  %v2110_v43 = vld [vmem:[%s2542_s1 + $0xf0] sm:$0xff]   ;;  %v2115_v61 = vld [vmem:[%s2542_s1 + $0x38] sm:$0xff]  }
  0x26   :  { %1927 = vmatprep.mubr.bf16.mxu0 %v747_v8  ;;  %v771_v3 = vsel %vm136_vm0, %v766_v47, %v770_v40  ;;  %v796_v40 = vshrl.u32 %v2371_v18, 16  ;;  %v221_v47 = vshrl.u32 %v2378_v27, 16 }
  0x27   :  { %1870 = vmatpush3.bf16.msra.mxu1 %v2083_v53  ;;  %v197_v53 = vshrl.u32 %v2321_v42, 16  ;;  %v196_v4 = vsel %vm136_vm0, %v191_v48, %v195_v60  ;;  %v782_v20 = vor.u32 %v780_v62, %v778_v1  ;;  %v207_v24 = vor.u32 %v205_v14, %v203_v5  ;;  %v2409_v48 = vld [vmem:[%s2543_s0 + $0x5c] sm:$0xff]  }
  0x28   :  { %1950 = vmatpush3.bf16.msra.mxu0 %v2084_v2  ;;  %1871 = vmatprep.subr.bf16.mxu1 %v2089_v7  ;;  %v784_v2 = vshll.u32 %v2344_v59, 16 }
  0x29   :  { %1951 = vmatprep.subr.bf16.mxu0 %v2090_v10  ;;  %v199_v15 = vor.u32 %v197_v53, %v195_v60  ;;  %v225_v53 = vshll.u32 %v2402_v44, 16  ;;  %v808_v60 = vshll.u32 %v2409_v48, 16 }
  0x2a   :  { %1848 = vmatmul.mubr.bf16.gmra.mrb[4].mxu1 %v172_v29  ;;  %v786_v8 = vrot.slane %v784_v2, 1  ;;  %v792_v29 = vshll.u32 %v2371_v18, 16 }
  0x2b   :  { %1928 = vmatmul.mubr.bf16.gmra.mrb[4].mxu0 %v755_v35  ;;  %1872 = vmatpush3.bf16.msra.mxu1 %v2089_v7  ;;  %v779_v7 = vsel %vm136_vm0, %v774_v55, %v778_v1  ;;  %v204_v35 = vsel %vm136_vm0, %v199_v15, %v203_v5  ;;  %v2113_v1 = vld [vmem:[%s2543_s0 + $0x60] ss:$0 sps:$4 sm:$0x11]   ;;  %v2116_v5 = vld [vmem:[%s2542_s1 + $0xf8] sm:$0xff]   ;;  %v812_v15 = vshrl.u32 %v2409_v48, 16 }
  0x2c   :  { %1952 = vmatpush3.bf16.msra.mxu0 %v2090_v10  ;;  %1851 = vmatprep.mubr.bf16.mxu1 %v180_v38  ;;  %v2365_v10 = vld [vmem:[%s2543_s0 + $0x48] sm:$0xff]   ;;  %v790_v28 = vor.u32 %v788_v19, %v786_v8  ;;  %v794_v36 = vrot.slane %v792_v29, 1  ;;  %v787_v38 = vsel %vm136_vm0, %v782_v20, %v786_v8  ;;  %v233_v8 = vshll.u32 %v2113_v1, 16  ;;  %v1033_v20 = vld [vmem:[%s2543_s0 + $0x4] sm:$0xe] }
  0x2d   :  { %1931 = vmatprep.mubr.bf16.mxu0 %v763_v41  ;;  %1873 = vmatprep.subr.bf16.mxu1 %v2095_v34  ;;  %v209_v26 = vshll.u32 %v2365_v10, 16  ;;  %v213_v32 = vshrl.u32 %v2365_v10, 16 }
  0x2e   :  { %1953 = vmatprep.subr.bf16.mxu0 %v2096_v37  ;;  %v795_v46 = vsel %vm136_vm0, %v790_v28, %v794_v36  ;;  %v798_v62 = vor.u32 %v796_v40, %v794_v36  ;;  %v235_v29 = vrot.slane %v233_v8, 1 }
  0x2f   :  { %1874 = vmatpush3.bf16.msra.mxu1 %v2095_v34  ;;  %v211_v30 = vrot.slane %v209_v26, 1  ;;  %v2386_v34 = vld [vmem:[%s2543_s0 + $0x54] sm:$0xff]   ;;  %v1618_v26 = vcombine.low %v1033_v20, %v2193_v16  ;;  %v1058_v16 = vrot.slane %v2218_v31, 1 }
  0x30   :  { %1954 = vmatpush3.bf16.msra.mxu0 %v2096_v37  ;;  %1875 = vmatprep.subr.bf16.mxu1 %v2100_v54  ;;  %v2109_v37 = vld [vmem:[%s2542_s1 + $0x30] sm:$0xff]   ;;  %v800_v41 = vshll.u32 %v2386_v34, 16  ;;  %v804_v58 = vshrl.u32 %v2386_v34, 16 }
  0x31   :  { %1955 = vmatprep.subr.bf16.mxu0 %v2102_v63  ;;  %v212_v39 = vsel %vm136_vm0, %v207_v24, %v211_v30  ;;  %v1055_v33 = vrot.slane %v1618_v26, 1 }
  0x32   :  { %1852 = vmatmul.mubr.bf16.gmra.mrb[8].mxu1 %v188_v0  ;;  %v802_v55 = vrot.slane %v800_v41, 1  ;;  %v227_v0 = vrot.slane %v225_v53, 1  ;;  %v1062_v41 = vrot.slane %v2261_v57, 1 }
  0x33   :  { %1932 = vmatmul.mubr.bf16.gmra.mrb[8].mxu0 %v771_v3  ;;  %1855 = vmatprep.mubr.bf16.mxu1 %v196_v4  ;;  %v810_v3 = vrot.slane %v808_v60, 1  ;;  %v2423_v4 = vld [vmem:[%s2543_s0 + $0x64] ss:$0 sps:$4 sm:$0x11]  }
  0x34   :  { %1935 = vmatprep.mubr.bf16.mxu0 %v779_v7  ;;  %1876 = vmatpush3.bf16.msra.mxu1 %v2100_v54  ;;  %v215_v54 = vor.u32 %v213_v32, %v211_v30  ;;  %v806_v2 = vor.u32 %v804_v58, %v802_v55  ;;  %v229_v7 = vshrl.u32 %v2402_v44, 16  ;;  %v816_v19 = vshll.u32 %v2423_v4, 16 }
  0x35   :  { %1956 = vmatpush3.bf16.msra.mxu0 %v2102_v63  ;;  %1877 = vmatprep.subr.bf16.mxu1 %v2103_v6  ;;  %v223_v63 = vor.u32 %v221_v47, %v219_v50  ;;  %v814_v30 = vor.u32 %v812_v15, %v810_v3 }
  0x36   :  { %1957 = vmatprep.subr.bf16.mxu0 %v2104_v9  ;;  %v811_v24 = vsel %vm136_vm0, %v806_v2, %v810_v3  ;;  %v231_v28 = vor.u32 %v229_v7, %v227_v0  ;;  %v818_v32 = vrot.slane %v816_v19, 1 }
  0x37   :  { %v228_v14 = vsel %vm136_vm0, %v223_v63, %v227_v0 }
  0x38   :  { %1878 = vmatpush3.bf16.msra.mxu1 %v2103_v6  ;;  %v220_v6 = vsel %vm136_vm0, %v215_v54, %v219_v50  ;;  %v236_v36 = vsel %vm136_vm0, %v231_v28, %v235_v29 }
  0x39   :  { %1958 = vmatpush3.bf16.msra.mxu0 %v2104_v9  ;;  %1879 = vmatprep.subr.bf16.mxu1 %v2109_v37  ;;  %v803_v9 = vsel %vm136_vm0, %v798_v62, %v802_v55 }
  0x3a   :  { %1856 = vmatmul.mubr.bf16.gmra.mrb[12].mxu1 %v204_v35  ;;  %1959 = vmatprep.subr.bf16.mxu0 %v2110_v43  ;;  %v1056_v35 = vrot.slane %v2205_v22, 1 }
  0x3b   :  { %1936 = vmatmul.mubr.bf16.gmra.mrb[12].mxu0 %v787_v38  ;;  %1859 = vmatprep.mubr.bf16.mxu1 %v212_v39  ;;  %v1060_v39 = vrot.slane %v2246_v51, 1  ;;  %v1068_v51 = vrot.slane %v2327_v45, 1  ;;  %v1076_v45 = vrot.slane %v2409_v48, 1 }
  0x3c   :  { %1939 = vmatprep.mubr.bf16.mxu0 %v795_v46  ;;  %1880 = vmatpush3.bf16.msra.mxu1 %v2109_v37  ;;  %v819_v37 = vsel %vm136_vm0, %v814_v30, %v818_v32  ;;  %v1057_v38 = vsel %vm1054_vm1, %v1055_v33, %v1056_v35  ;;  %v1059_v40 = vsel %vm1054_vm1, %v1056_v35, %v1058_v16  ;;  %v2480_v46 = vld [vmem:[%s2544_s2] ss:$0 sm:$0xff] }
  0x3d   :  { %1960 = vmatpush3.bf16.msra.mxu0 %v2110_v43  ;;  %1881 = vmatprep.subr.bf16.mxu1 %v2115_v61  ;;  %v1061_v22 = vsel %vm1054_vm1, %v1058_v16, %v1060_v39  ;;  %v1064_v43 = vrot.slane %v2289_v17, 1  ;;  %v1072_v17 = vrot.slane %v2371_v18, 1 }
  0x3e   :  { %1961 = vmatprep.subr.bf16.mxu0 %v2116_v5 }
  0x3f   :  { %v1065_v31 = vsel %vm1054_vm1, %v1062_v41, %v1064_v43 }
  0x40   :  { %1882 = vmatpush3.bf16.msra.mxu1 %v2115_v61 }
  0x41   :  { %1962 = vmatpush3.bf16.msra.mxu0 %v2116_v5 }
  0x42   :  { %1860 = vmatmul.mubr.bf16.gmra.mrb[16].mxu1 %v220_v6 }
  0x43   :  { %1940 = vmatmul.mubr.bf16.gmra.mrb[16].mxu0 %v803_v9  ;;  %1863 = vmatprep.mubr.bf16.mxu1 %v228_v14 }
  0x44   :  { %1943 = vmatprep.mubr.bf16.mxu0 %v811_v24 }
  0x4a   :  { %1864 = vmatmul.mubr.bf16.gmra.mrb[20].mxu1 %v236_v36 }
  0x4b   :  { %1944 = vmatmul.mubr.bf16.gmra.mrb[20].mxu0 %v819_v37  ;;  %1883 = vmatprep.mubr.bf16.mxu1 %v2177_v12  ;;  %v1063_v12 = vsel %vm1054_vm1, %v1060_v39, %v1062_v41 }
  0x4c   :  { %1963 = vmatprep.mubr.bf16.mxu0 %v1057_v38 }
  0x52   :  { %1884 = vmatmul.mubr.bf16.vlgmr.msra.gmra.mrb[0].mxu1 %v2182_v13  ;;  %v1066_v13 = vrot.slane %v2302_v25, 1 }
  0x53   :  { %1964 = vmatmul.mubr.bf16.vlgmr.msra.gmra.mrb[0].mxu0 %v1059_v40  ;;  %1887 = vmatprep.mubr.bf16.mxu1 %v2210_v23 }
  0x54   :  { %1967 = vmatprep.mubr.bf16.mxu0 %v1061_v22  ;;  %v1067_v23 = vsel %vm1054_vm1, %v1064_v43, %v1066_v13  ;;  %v1069_v57 = vsel %vm1054_vm1, %v1066_v13, %v1068_v51 }
  0x5a   :  { %1888 = vmatmul.mubr.bf16.gmra.mrb[4].mxu1 %v2240_v49  ;;  %v1070_v49 = vrot.slane %v2344_v59, 1 }
  0x5b   :  { %1968 = vmatmul.mubr.bf16.gmra.mrb[4].mxu0 %v1063_v12  ;;  %1891 = vmatprep.mubr.bf16.mxu1 %v2256_v56 }
  0x5c   :  { %1971 = vmatprep.mubr.bf16.mxu0 %v1065_v31  ;;  %v1071_v56 = vsel %vm1054_vm1, %v1068_v51, %v1070_v49  ;;  %v1073_v25 = vsel %vm1054_vm1, %v1070_v49, %v1072_v17 }
  0x62   :  { %1892 = vmatmul.mubr.bf16.gmra.mrb[8].mxu1 %v2283_v11  ;;  %v1074_v11 = vrot.slane %v2386_v34, 1 }
  0x63   :  { %1972 = vmatmul.mubr.bf16.gmra.mrb[8].mxu0 %v1067_v23  ;;  %1895 = vmatprep.mubr.bf16.mxu1 %v2296_v21 }
  0x64   :  { %1975 = vmatprep.mubr.bf16.mxu0 %v1069_v57  ;;  %v1075_v21 = vsel %vm1054_vm1, %v1072_v17, %v1074_v11  ;;  %v1077_v59 = vsel %vm1054_vm1, %v1074_v11, %v1076_v45 }
  0x6a   :  { %1896 = vmatmul.mubr.bf16.gmra.mrb[12].mxu1 %v2321_v42  ;;  %v1078_v42 = vrot.slane %v2423_v4, 1 }
  0x6b   :  { %1976 = vmatmul.mubr.bf16.gmra.mrb[12].mxu0 %v1071_v56  ;;  %1899 = vmatprep.mubr.bf16.mxu1 %v2334_v52 }
  0x6c   :  { %1979 = vmatprep.mubr.bf16.mxu0 %v1073_v25  ;;  %v1079_v18 = vsel %vm1054_vm1, %v1076_v45, %v1078_v42 }
  0x72   :  { %1900 = vmatmul.mubr.bf16.gmra.mrb[16].mxu1 %v2365_v10 }
  0x73   :  { %1980 = vmatmul.mubr.bf16.gmra.mrb[16].mxu0 %v1075_v21  ;;  %1903 = vmatprep.mubr.bf16.mxu1 %v2378_v27 }
  0x74   :  { %1983 = vmatprep.mubr.bf16.mxu0 %v1077_v59 }
  0x7a   :  { %1904 = vmatmul.mubr.bf16.gmra.mrb[20].mxu1 %v2402_v44 }
  0x7b   :  { %1984 = vmatmul.mubr.bf16.gmra.mrb[20].mxu0 %v1079_v18 }
 0x125   :  { %v1885_v52 = vpop.f32.mrb[0].mxu1 }
 0x126   :  { %v1965_v34 = vpop.f32.mrb[0].mxu0  ;;  %v520_v47 = vpop.f32.mrb[1].mxu1 }
 0x127   :  { %v1987_v10 = vadd.f32 %v1965_v34, %v1885_v52  ;;  %v1174_v48 = vpop.f32.mrb[1].mxu0  ;;  %v1886_v50 = vpop.f32.mrb[2].mxu1 }
 0x128   :  { %v1988_v27 = vadd.f32 %v1174_v48, %v520_v47  ;;  %v1966_v53 = vpop.f32.mrb[2].mxu0  ;;  %v523_v54 = vpop.f32.mrb[3].mxu1 }
 0x129   :  { %v1302_v55 = vadd.f32 %v1987_v10, %v2480_v46  ;;  %v1989_v58 = vadd.f32 %v1966_v53, %v1886_v50  ;;  %v1177_v60 = vpop.f32.mrb[3].mxu0 }
 0x12a   :  { %v1300_v44 = vadd.f32 %v1988_v27, %v2480_v46  ;;  %v1990_v61 = vadd.f32 %v1177_v60, %v523_v54 }
 0x12b   :  { %v1350_v62 = vmul.f32 0.2, %v1302_v55  ;;  %v1303_v63 = vadd.f32 %v1989_v58, %v2480_v46  ;;  %vm1326_vm2 = vcmp.ge.f32.partialorder %v1302_v55, 0.0 }
 0x12c   :  { %v1348_v0 = vmul.f32 0.2, %v1300_v44  ;;  %v1301_v1 = vadd.f32 %v1990_v61, %v2480_v46  ;;  %vm1324_vm3 = vcmp.ge.f32.partialorder %v1300_v44, 0.0 }
 0x12d   :  { %vm1327_vm4 = vcmp.ge.f32.partialorder %v1303_v63, 0.0  ;;  %v1351_v2 = vmul.f32 0.2, %v1303_v63  ;;  %v1889_v3 = vpop.f32.mrb[4].mxu1  ;;  %v1374_v7 = vsel %vm1326_vm2, %v1302_v55, %v1350_v62 }
 0x12e   :  { %vm1325_vm5 = vcmp.ge.f32.partialorder %v1301_v1, 0.0  ;;  %v1349_v4 = vmul.f32 0.2, %v1301_v1  ;;  %v1969_v5 = vpop.f32.mrb[4].mxu0  ;;  %v536_v6 = vpop.f32.mrb[5].mxu1  ;;  %v1372_v19 = vsel %vm1324_vm3, %v1300_v44, %v1348_v0 }
 0x12f   :  { %v1375_v8 = vsel %vm1327_vm4, %v1303_v63, %v1351_v2  ;;  %v1991_v9 = vadd.f32 %v1969_v5, %v1889_v3  ;;  %v1190_v14 = vpop.f32.mrb[5].mxu0  ;;  %v1890_v15 = vpop.f32.mrb[6].mxu1 }
 0x130   :  { %v1684_v20 = vpack.c.bf16 %v1375_v8, %v1374_v7  ;;  %v1373_v24 = vsel %vm1325_vm5, %v1301_v1, %v1349_v4  ;;  %v1992_v26 = vadd.f32 %v1190_v14, %v536_v6  ;;  %v1970_v28 = vpop.f32.mrb[6].mxu0  ;;  %v539_v29 = vpop.f32.mrb[7].mxu1 }
 0x131   :  { %v1679_v30 = vpack.c.bf16 %v1373_v24, %v1372_v19  ;;  %v1306_v32 = vadd.f32 %v1991_v9, %v2480_v46  ;;  %v1993_v33 = vadd.f32 %v1970_v28, %v1890_v15  ;;  %v1193_v35 = vpop.f32.mrb[7].mxu0 }
 0x132   :  { %1736 = vst [vmem:[%s2545_s3 + $0x8] sm:$0xff] %v1684_v20   ;;  %v1304_v36 = vadd.f32 %v1992_v26, %v2480_v46  ;;  %v1994_v37 = vadd.f32 %v1193_v35, %v539_v29 }
 0x133   :  { %1680 = vst [vmem:[%s2545_s3] sm:$0xff] %v1679_v30   ;;  %v1354_v38 = vmul.f32 0.2, %v1306_v32  ;;  %v1307_v16 = vadd.f32 %v1993_v33, %v2480_v46  ;;  %vm1330_vm6 = vcmp.ge.f32.partialorder %v1306_v32, 0.0 }
 0x134   :  { %v1352_v39 = vmul.f32 0.2, %v1304_v36  ;;  %v1305_v40 = vadd.f32 %v1994_v37, %v2480_v46  ;;  %vm1328_vm7 = vcmp.ge.f32.partialorder %v1304_v36, 0.0 }
 0x135   :  { %vm1331_vm8 = vcmp.ge.f32.partialorder %v1307_v16, 0.0  ;;  %v1355_v22 = vmul.f32 0.2, %v1307_v16  ;;  %v1893_v41 = vpop.f32.mrb[8].mxu1  ;;  %v1378_v13 = vsel %vm1330_vm6, %v1306_v32, %v1354_v38 }
 0x136   :  { %vm1329_vm9 = vcmp.ge.f32.partialorder %v1305_v40, 0.0  ;;  %v1353_v43 = vmul.f32 0.2, %v1305_v40  ;;  %v1973_v12 = vpop.f32.mrb[8].mxu0  ;;  %v552_v31 = vpop.f32.mrb[9].mxu1  ;;  %v1376_v17 = vsel %vm1328_vm7, %v1304_v36, %v1352_v39 }
 0x137   :  { %v1379_v51 = vsel %vm1331_vm8, %v1307_v16, %v1355_v22  ;;  %v1995_v23 = vadd.f32 %v1973_v12, %v1893_v41  ;;  %v1206_v57 = vpop.f32.mrb[9].mxu0  ;;  %v1894_v49 = vpop.f32.mrb[10].mxu1 }
 0x138   :  { %v1694_v56 = vpack.c.bf16 %v1379_v51, %v1378_v13  ;;  %v1377_v25 = vsel %vm1329_vm9, %v1305_v40, %v1353_v43  ;;  %v1996_v11 = vadd.f32 %v1206_v57, %v552_v31  ;;  %v1974_v45 = vpop.f32.mrb[10].mxu0  ;;  %v555_v21 = vpop.f32.mrb[11].mxu1 }
 0x139   :  { %v1689_v59 = vpack.c.bf16 %v1377_v25, %v1376_v17  ;;  %v1310_v42 = vadd.f32 %v1995_v23, %v2480_v46  ;;  %v1997_v18 = vadd.f32 %v1974_v45, %v1894_v49  ;;  %v1209_v52 = vpop.f32.mrb[11].mxu0 }
 0x13a   :  { %1738 = vst [vmem:[%s2545_s3 + $0x18] sm:$0xff] %v1694_v56   ;;  %v1308_v34 = vadd.f32 %v1996_v11, %v2480_v46  ;;  %v1998_v47 = vadd.f32 %v1209_v52, %v555_v21 }
 0x13b   :  { %1737 = vst [vmem:[%s2545_s3 + $0x10] sm:$0xff] %v1689_v59   ;;  %v1358_v10 = vmul.f32 0.2, %v1310_v42  ;;  %v1311_v48 = vadd.f32 %v1997_v18, %v2480_v46  ;;  %vm1334_vm10 = vcmp.ge.f32.partialorder %v1310_v42, 0.0 }
 0x13c   :  { %v1356_v50 = vmul.f32 0.2, %v1308_v34  ;;  %v1309_v27 = vadd.f32 %v1998_v47, %v2480_v46  ;;  %vm1332_vm11 = vcmp.ge.f32.partialorder %v1308_v34, 0.0 }
 0x13d   :  { %vm1335_vm12 = vcmp.ge.f32.partialorder %v1311_v48, 0.0  ;;  %v1359_v53 = vmul.f32 0.2, %v1311_v48  ;;  %v1897_v54 = vpop.f32.mrb[12].mxu1  ;;  %v1382_v44 = vsel %vm1334_vm10, %v1310_v42, %v1358_v10 }
 0x13e   :  { %vm1333_vm13 = vcmp.ge.f32.partialorder %v1309_v27, 0.0  ;;  %v1357_v55 = vmul.f32 0.2, %v1309_v27  ;;  %v1977_v58 = vpop.f32.mrb[12].mxu0  ;;  %v568_v60 = vpop.f32.mrb[13].mxu1  ;;  %v1380_v1 = vsel %vm1332_vm11, %v1308_v34, %v1356_v50 }
 0x13f   :  { %v1383_v61 = vsel %vm1335_vm12, %v1311_v48, %v1359_v53  ;;  %v1999_v62 = vadd.f32 %v1977_v58, %v1897_v54  ;;  %v1222_v63 = vpop.f32.mrb[13].mxu0  ;;  %v1898_v0 = vpop.f32.mrb[14].mxu1 }
 0x140   :  { %v1704_v2 = vpack.c.bf16 %v1383_v61, %v1382_v44  ;;  %v1381_v3 = vsel %vm1333_vm13, %v1309_v27, %v1357_v55  ;;  %v2000_v4 = vadd.f32 %v1222_v63, %v568_v60  ;;  %v1978_v5 = vpop.f32.mrb[14].mxu0  ;;  %v571_v6 = vpop.f32.mrb[15].mxu1 }
 0x141   :  { %v1699_v7 = vpack.c.bf16 %v1381_v3, %v1380_v1  ;;  %v1314_v8 = vadd.f32 %v1999_v62, %v2480_v46  ;;  %v2001_v9 = vadd.f32 %v1978_v5, %v1898_v0  ;;  %v1225_v14 = vpop.f32.mrb[15].mxu0 }
 0x142   :  { %1740 = vst [vmem:[%s2545_s3 + $0x28] sm:$0xff] %v1704_v2   ;;  %v1312_v15 = vadd.f32 %v2000_v4, %v2480_v46  ;;  %v2002_v19 = vadd.f32 %v1225_v14, %v571_v6 }
 0x143   :  { %1739 = vst [vmem:[%s2545_s3 + $0x20] sm:$0xff] %v1699_v7   ;;  %v1362_v20 = vmul.f32 0.2, %v1314_v8  ;;  %v1315_v24 = vadd.f32 %v2001_v9, %v2480_v46  ;;  %vm1338_vm14 = vcmp.ge.f32.partialorder %v1314_v8, 0.0 }
 0x144   :  { %v1360_v26 = vmul.f32 0.2, %v1312_v15  ;;  %v1313_v28 = vadd.f32 %v2002_v19, %v2480_v46  ;;  %vm1336_vm15 = vcmp.ge.f32.partialorder %v1312_v15, 0.0 }
 0x145   :  { %vm1339_vm0 = vcmp.ge.f32.partialorder %v1315_v24, 0.0  ;;  %v1363_v29 = vmul.f32 0.2, %v1315_v24  ;;  %v1901_v30 = vpop.f32.mrb[16].mxu1  ;;  %v1386_v36 = vsel %vm1338_vm14, %v1314_v8, %v1362_v20 }
 0x146   :  { %vm1337_vm1 = vcmp.ge.f32.partialorder %v1313_v28, 0.0  ;;  %v1361_v32 = vmul.f32 0.2, %v1313_v28  ;;  %v1981_v33 = vpop.f32.mrb[16].mxu0  ;;  %v584_v35 = vpop.f32.mrb[17].mxu1  ;;  %v1384_v40 = vsel %vm1336_vm15, %v1312_v15, %v1360_v26 }
 0x147   :  { %v1387_v37 = vsel %vm1339_vm0, %v1315_v24, %v1363_v29  ;;  %v2003_v38 = vadd.f32 %v1981_v33, %v1901_v30  ;;  %v1238_v16 = vpop.f32.mrb[17].mxu0  ;;  %v1902_v39 = vpop.f32.mrb[18].mxu1 }
 0x148   :  { %v1714_v22 = vpack.c.bf16 %v1387_v37, %v1386_v36  ;;  %v1385_v41 = vsel %vm1337_vm1, %v1313_v28, %v1361_v32  ;;  %v2004_v43 = vadd.f32 %v1238_v16, %v584_v35  ;;  %v1982_v12 = vpop.f32.mrb[18].mxu0  ;;  %v587_v31 = vpop.f32.mrb[19].mxu1 }
 0x149   :  { %v1709_v13 = vpack.c.bf16 %v1385_v41, %v1384_v40  ;;  %v1318_v51 = vadd.f32 %v2003_v38, %v2480_v46  ;;  %v2005_v23 = vadd.f32 %v1982_v12, %v1902_v39  ;;  %v1241_v57 = vpop.f32.mrb[19].mxu0 }
 0x14a   :  { %1742 = vst [vmem:[%s2545_s3 + $0x38] sm:$0xff] %v1714_v22   ;;  %v1316_v49 = vadd.f32 %v2004_v43, %v2480_v46  ;;  %v2006_v17 = vadd.f32 %v1241_v57, %v587_v31 }
 0x14b   :  { %1741 = vst [vmem:[%s2545_s3 + $0x30] sm:$0xff] %v1709_v13   ;;  %v1366_v56 = vmul.f32 0.2, %v1318_v51  ;;  %v1319_v25 = vadd.f32 %v2005_v23, %v2480_v46  ;;  %vm1342_vm2 = vcmp.ge.f32.partialorder %v1318_v51, 0.0 }
 0x14c   :  { %v1364_v11 = vmul.f32 0.2, %v1316_v49  ;;  %v1317_v45 = vadd.f32 %v2006_v17, %v2480_v46  ;;  %vm1340_vm3 = vcmp.ge.f32.partialorder %v1316_v49, 0.0 }
 0x14d   :  { %vm1343_vm4 = vcmp.ge.f32.partialorder %v1319_v25, 0.0  ;;  %v1367_v21 = vmul.f32 0.2, %v1319_v25  ;;  %v1905_v59 = vpop.f32.mrb[20].mxu1  ;;  %v1390_v34 = vsel %vm1342_vm2, %v1318_v51, %v1366_v56 }
 0x14e   :  { %vm1341_vm5 = vcmp.ge.f32.partialorder %v1317_v45, 0.0  ;;  %v1365_v42 = vmul.f32 0.2, %v1317_v45  ;;  %v1985_v18 = vpop.f32.mrb[20].mxu0  ;;  %v600_v52 = vpop.f32.mrb[21].mxu1  ;;  %v1388_v27 = vsel %vm1340_vm3, %v1316_v49, %v1364_v11 }
 0x14f   :  { %v1391_v47 = vsel %vm1343_vm4, %v1319_v25, %v1367_v21  ;;  %v2007_v10 = vadd.f32 %v1985_v18, %v1905_v59  ;;  %v1254_v48 = vpop.f32.mrb[21].mxu0  ;;  %v1906_v50 = vpop.f32.mrb[22].mxu1 }
 0x150   :  { %v1724_v53 = vpack.c.bf16 %v1391_v47, %v1390_v34  ;;  %v1389_v54 = vsel %vm1341_vm5, %v1317_v45, %v1365_v42  ;;  %v2008_v55 = vadd.f32 %v1254_v48, %v600_v52  ;;  %v1986_v58 = vpop.f32.mrb[22].mxu0  ;;  %v603_v60 = vpop.f32.mrb[23].mxu1 }
 0x151   :  { %v1719_v44 = vpack.c.bf16 %v1389_v54, %v1388_v27  ;;  %v1322_v61 = vadd.f32 %v2007_v10, %v2480_v46  ;;  %v2009_v62 = vadd.f32 %v1986_v58, %v1906_v50  ;;  %v1257_v63 = vpop.f32.mrb[23].mxu0 }
 0x152   :  { %1744 = vst [vmem:[%s2545_s3 + $0x48] sm:$0xff] %v1724_v53   ;;  %v1320_v0 = vadd.f32 %v2008_v55, %v2480_v46  ;;  %v2010_v1 = vadd.f32 %v1257_v63, %v603_v60 }
 0x153   :  { %1743 = vst [vmem:[%s2545_s3 + $0x40] sm:$0xff] %v1719_v44   ;;  %v1370_v2 = vmul.f32 0.2, %v1322_v61  ;;  %v1323_v3 = vadd.f32 %v2009_v62, %v2480_v46  ;;  %vm1346_vm6 = vcmp.ge.f32.partialorder %v1322_v61, 0.0 }
 0x154   :  { %v1368_v4 = vmul.f32 0.2, %v1320_v0  ;;  %v1321_v5 = vadd.f32 %v2010_v1, %v2480_v46  ;;  %vm1344_vm7 = vcmp.ge.f32.partialorder %v1320_v0, 0.0 }
 0x155   :  { %vm1347_vm8 = vcmp.ge.f32.partialorder %v1323_v3, 0.0  ;;  %v1371_v6 = vmul.f32 0.2, %v1323_v3  ;;  %v1394_v8 = vsel %vm1346_vm6, %v1322_v61, %v1370_v2 }
 0x156   :  { %vm1345_vm9 = vcmp.ge.f32.partialorder %v1321_v5, 0.0  ;;  %v1369_v7 = vmul.f32 0.2, %v1321_v5  ;;  %v1392_v14 = vsel %vm1344_vm7, %v1320_v0, %v1368_v4 }
 0x157   :  { %v1395_v9 = vsel %vm1347_vm8, %v1323_v3, %v1371_v6 }
 0x158   :  { %v1734_v15 = vpack.c.bf16 %v1395_v9, %v1394_v8  ;;  %v1393_v19 = vsel %vm1345_vm9, %v1321_v5, %v1369_v7 }
 0x159   :  { %v1729_v20 = vpack.c.bf16 %v1393_v19, %v1392_v14 }
 0x15a   :  { %1746 = vst [vmem:[%s2545_s3 + $0x58] sm:$0xff] %v1734_v15  }
 0x15b   :  { %1745 = vst [vmem:[%s2545_s3 + $0x50] sm:$0xff] %v1729_v20  }

// kernel: discriminator_forward.7
= control target key start
LH: loop header
LB: loop body
LE: loop exit
PB: predicated region body
PF: predicated region fallthrough
CT: control target
= control target key end

     0   :  { %vm83_vm0 = vsmask.f32 7424  ;;  %vm379_vm1 = vsmask.f32 5376  ;;  %vm555_vm2 = vcmask 1044480   ;;  %vm776_vm11 = vcmask 130112   ;;  %s1341_s1 = inlined_call_operand.vmem [shape: bf16[4,128,128], index: 1, kind: input, shape index: {}]   ;;  %s1342_s0 = inlined_call_operand.vmem [shape: bf16[1,80,128], index: 0, kind: input, shape index: {}]   ;;  %s1343_s2 = inlined_call_operand.vmem [shape: f32[1,128], index: 2, kind: input, shape index: {}]   ;;  %s1344_s3 = inlined_call_operand.vmem [shape: f32[32,128], index: 3, kind: input, shape index: {}]   ;;  %s1345_s4 = inlined_call_operand.vmem [shape: f32[1,2,128], index: 4, kind: output, shape index: {}]  }
   0x1   :  { %v1086_v0 = vld [vmem:[%s1341_s1 + $0x40] sm:$0xff]   ;;  %v1088_v2 = vld [vmem:[%s1341_s1 + $0x48] sm:$0xff]   ;;  %v1090_v4 = vld [vmem:[%s1341_s1 + $0x50] sm:$0xff]   ;;  %vm783_vm12 = vcmask 195712   ;;  %vm790_vm13 = vcmask 261312   ;;  %vm811_vm14 = vcmask 1041409  }
   0x2   :  { %v1087_v1 = vld [vmem:[%s1341_s1 + $0x80] sm:$0xff]   ;;  %966 = vmatprep.subr.bf16.mxu1 %v1086_v0  ;;  %v1089_v3 = vld [vmem:[%s1341_s1 + $0x88] sm:$0xff]   ;;  %v1091_v5 = vld [vmem:[%s1341_s1 + $0x90] sm:$0xff]   ;;  %vm814_vm15 = vcmask 254976  }
   0x3   :  { %1014 = vmatprep.subr.bf16.mxu0 %v1087_v1  ;;  %967 = vmatpush3.bf16.msra.mxu1 %v1086_v0  ;;  %v1092_v6 = vld [vmem:[%s1341_s1 + $0x58] sm:$0xff]   ;;  %v1094_v8 = vld [vmem:[%s1341_s1 + $0x60] sm:$0xff]   ;;  %v1096_v10 = vld [vmem:[%s1341_s1 + $0x68] sm:$0xff]  }
   0x4   :  { %1015 = vmatpush3.bf16.msra.mxu0 %v1087_v1  ;;  %968 = vmatprep.subr.bf16.mxu1 %v1088_v2  ;;  %v1093_v7 = vld [vmem:[%s1341_s1 + $0x98] sm:$0xff]   ;;  %v1095_v9 = vld [vmem:[%s1341_s1 + $0xa0] sm:$0xff]   ;;  %v1097_v11 = vld [vmem:[%s1341_s1 + $0xa8] sm:$0xff]  }
   0x5   :  { %1016 = vmatprep.subr.bf16.mxu0 %v1089_v3  ;;  %v18_v12 = vld [vmem:[%s1342_s0] sm:$0xf]  ;;  %v1197_v13 = vld [vmem:[%s1342_s0 + $0x4] sm:$0xf]  ;;  %v1205_v15 = vld [vmem:[%s1342_s0 + $0x8] sm:$0xff]  }
   0x6   :  { %v1200_v14 = vcombine.low %v18_v12, %v1197_v13  ;;  %v1098_v16 = vld [vmem:[%s1341_s1 + $0x70] sm:$0xff]   ;;  %v354_v17 = vld [vmem:[%s1342_s0] sm:$0xc]  ;;  %v92_v20 = vshll.u32 %v1205_v15, 16  ;;  %v96_v21 = vshrl.u32 %v1205_v15, 16  ;;  %v1100_v33 = vld [vmem:[%s1341_s1 + $0x78] sm:$0xff]  }
   0x7   :  { %969 = vmatpush3.bf16.msra.mxu1 %v1088_v2  ;;  %v1099_v22 = vld [vmem:[%s1341_s1 + $0xb0] sm:$0xff]   ;;  %v882_v23 = vcombine.low %v354_v17, %v1197_v13  ;;  %v1101_v34 = vld [vmem:[%s1341_s1 + $0xb8] sm:$0xff]   ;;  %v1104_v45 = vld [vmem:[%s1341_s1] sm:$0xff]  }
   0x8   :  { %1017 = vmatpush3.bf16.msra.mxu0 %v1089_v3  ;;  %970 = vmatprep.subr.bf16.mxu1 %v1090_v4  ;;  %v85_v18 = vshrl.u32 %v1200_v14, 16  ;;  %v87_v19 = vshll.u32 %v1200_v14, 16  ;;  %v94_v25 = vrot.slane %v92_v20, 1  ;;  %v388_v26 = vrot.slane %v96_v21, 2  ;;  %v1224_v30 = vld [vmem:[%s1342_s0 + $0x10] sm:$0xff]   ;;  %v1106_v48 = vld [vmem:[%s1341_s1 + $0xc0] sm:$0xff]  }
   0x9   :  { %1018 = vmatprep.subr.bf16.mxu0 %v1091_v5  ;;  %v389_v27 = vrot.slane %v92_v20, 3  ;;  %v381_v28 = vshrl.u32 %v882_v23, 16  ;;  %v384_v29 = vshll.u32 %v882_v23, 16  ;;  %v100_v37 = vshll.u32 %v1224_v30, 16  ;;  %v1108_v50 = vld [vmem:[%s1341_s1 + $0x8] sm:$0xff]   ;;  %v1253_v53 = vld [vmem:[%s1342_s0 + $0x18] sm:$0xff]  }
   0xa   :  { %v89_v24 = vrot.slane %v87_v19, 1  ;;  %v104_v38 = vshrl.u32 %v1224_v30, 16  ;;  %v98_v43 = vor.u32 %v96_v21, %v94_v25  ;;  %v1109_v52 = vld [vmem:[%s1341_s1 + $0xc8] sm:$0xff]   ;;  %v1110_v54 = vld [vmem:[%s1341_s1 + $0x10] sm:$0xff]   ;;  %v108_v57 = vshll.u32 %v1253_v53, 16  ;;  %v1114_v20 = vld [vmem:[%s1341_s1 + $0x20] sm:$0xff]  }
   0xb   :  { %971 = vmatpush3.bf16.msra.mxu1 %v1090_v4  ;;  %v390_v32 = vor.u32 %v389_v27, %v388_v26  ;;  %v383_v35 = vrot.slane %v381_v28, 2  ;;  %v386_v36 = vrot.slane %v384_v29, 3  ;;  %v393_v42 = vrot.slane %v100_v37, 3  ;;  %v1119_v55 = vld [vmem:[%s1342_s0 + $0x20] ss:$0 sps:$4 sm:$0x11]  }
   0xc   :  { %1019 = vmatpush3.bf16.msra.mxu0 %v1091_v5  ;;  %972 = vmatprep.subr.bf16.mxu1 %v1092_v6  ;;  %v90_v31 = vor.u32 %v89_v24, %v85_v18  ;;  %v392_v41 = vrot.slane %v104_v38, 2  ;;  %v102_v44 = vrot.slane %v100_v37, 1  ;;  %v112_v58 = vshrl.u32 %v1253_v53, 16  ;;  %v1266_v60 = vld [vmem:[%s1342_s0 + $0x20] ss:$0 sps:$4 sm:$0x77]  }
   0xd   :  { %1020 = vmatprep.subr.bf16.mxu0 %v1093_v7  ;;  %v387_v40 = vor.u32 %v386_v36, %v383_v35  ;;  %v116_v59 = vshll.u32 %v1119_v55, 16  ;;  %v1111_v61 = vld [vmem:[%s1341_s1 + $0xd0] sm:$0xff]   ;;  %v110_v62 = vrot.slane %v108_v57, 1  ;;  %v397_v0 = vrot.slane %v108_v57, 3  ;;  %v1117_v24 = vld [vmem:[%s1341_s1 + $0xe8] sm:$0xff]   ;;  %v1123_v27 = vld [vmem:[%s1341_s1 + $0x38] sm:$0xff]  }
   0xe   :  { %v95_v39 = vsel %vm83_vm0, %v90_v31, %v94_v25  ;;  %v394_v47 = vor.u32 %v393_v42, %v392_v41  ;;  %v103_v49 = vsel %vm83_vm0, %v98_v43, %v102_v44  ;;  %v106_v56 = vor.u32 %v104_v38, %v102_v44  ;;  %v1120_v25 = vld [vmem:[%s1341_s1 + $0x30] sm:$0xff]   ;;  %v1124_v28 = vld [vmem:[%s1341_s1 + $0xf8] sm:$0xff]   ;;  %v917_v38 = vld [vmem:[%s1343_s2] ss:$0 sm:$0xff] }
   0xf   :  { %973 = vmatpush3.bf16.msra.mxu1 %v1092_v6  ;;  %982 = vmatprep.mubr.bf16.mxu1 %v95_v39  ;;  %v391_v46 = vsel %vm379_vm1, %v387_v40, %v390_v32  ;;  %v396_v63 = vrot.slane %v112_v58, 2  ;;  %v118_v1 = vrot.slane %v116_v59, 1  ;;  %v401_v2 = vshrl.u32 %v1266_v60, 16  ;;  %v1122_v26 = vld [vmem:[%s1341_s1 + $0xf0] sm:$0xff]  }
  0x10   :  { %1021 = vmatpush3.bf16.msra.mxu0 %v1093_v7  ;;  %974 = vmatprep.subr.bf16.mxu1 %v1094_v8  ;;  %v395_v51 = vsel %vm379_vm1, %v390_v32, %v394_v47  ;;  %v404_v3 = vshll.u32 %v1266_v60, 16  ;;  %v111_v4 = vsel %vm83_vm0, %v106_v56, %v110_v62  ;;  %v114_v6 = vor.u32 %v112_v58, %v110_v62  ;;  %v1112_v7 = vld [vmem:[%s1341_s1 + $0x18] sm:$0xff]  }
  0x11   :  { %1022 = vmatprep.subr.bf16.mxu0 %v1095_v9  ;;  %1030 = vmatprep.mubr.bf16.mxu0 %v391_v46  ;;  %v398_v5 = vor.u32 %v397_v0, %v396_v63  ;;  %v557_v19 = vrot.slane %v1205_v15, 3  ;;  %v559_v29 = vrot.slane %v1224_v30, 3  ;;  %v561_v31 = vrot.slane %v1253_v53, 3  ;;  %v729_v63 = vld [vmem:[%s1344_s3] sm:$0xff] }
  0x12   :  { %v119_v12 = vsel %vm83_vm0, %v114_v6, %v118_v1 }
  0x13   :  { %975 = vmatpush3.bf16.msra.mxu1 %v1094_v8  ;;  %v403_v8 = vrot.slane %v401_v2, 2  ;;  %v560_v32 = vsel %vm555_vm2, %v557_v19, %v559_v29 }
  0x14   :  { %1023 = vmatpush3.bf16.msra.mxu0 %v1095_v9  ;;  %976 = vmatprep.subr.bf16.mxu1 %v1096_v10  ;;  %v406_v9 = vrot.slane %v404_v3, 3 }
  0x15   :  { %1024 = vmatprep.subr.bf16.mxu0 %v1097_v11 }
  0x16   :  { %v407_v17 = vor.u32 %v406_v9, %v403_v8 }
  0x17   :  { %977 = vmatpush3.bf16.msra.mxu1 %v1096_v10  ;;  %v1113_v10 = vld [vmem:[%s1341_s1 + $0xd8] sm:$0xff]  }
  0x18   :  { %1025 = vmatpush3.bf16.msra.mxu0 %v1097_v11  ;;  %978 = vmatprep.subr.bf16.mxu1 %v1098_v16  ;;  %v399_v11 = vsel %vm379_vm1, %v394_v47, %v398_v5  ;;  %v408_v21 = vsel %vm379_vm1, %v398_v5, %v407_v17 }
  0x19   :  { %1026 = vmatprep.subr.bf16.mxu0 %v1099_v22 }
  0x1b   :  { %979 = vmatpush3.bf16.msra.mxu1 %v1098_v16  ;;  %v534_v16 = vld [vmem:[%s1342_s0] sm:$0x8] }
  0x1c   :  { %1027 = vmatpush3.bf16.msra.mxu0 %v1099_v22  ;;  %980 = vmatprep.subr.bf16.mxu1 %v1100_v33  ;;  %v908_v18 = vcombine.low %v534_v16, %v1197_v13  ;;  %v1115_v13 = vld [vmem:[%s1341_s1 + $0xe0] sm:$0xff]  }
  0x1d   :  { %1028 = vmatprep.subr.bf16.mxu0 %v1101_v34 }
  0x1e   :  { %v556_v22 = vrot.slane %v908_v18, 3 }
  0x1f   :  { %981 = vmatpush3.bf16.msra.mxu1 %v1100_v33  ;;  %v562_v33 = vsel %vm555_vm2, %v559_v29, %v561_v31 }
  0x20   :  { %1029 = vmatpush3.bf16.msra.mxu0 %v1101_v34  ;;  %990 = vmatprep.subr.bf16.mxu1 %v1104_v45  ;;  %v558_v23 = vsel %vm555_vm2, %v556_v22, %v557_v19  ;;  %v563_v34 = vrot.slane %v1266_v60, 3 }
  0x21   :  { %1038 = vmatprep.subr.bf16.mxu0 %v1106_v48 }
  0x22   :  { %983 = vmatmul.mubr.bf16.vlgmr.msra.gmra.mrb[0].mxu1 %v103_v49  ;;  %v564_v35 = vsel %vm555_vm2, %v561_v31, %v563_v34  ;;  %v765_v34 = vlaneseq }
  0x23   :  { %991 = vmatpush3.bf16.msra.mxu1 %v1104_v45  ;;  %1031 = vmatmul.mubr.bf16.vlgmr.msra.gmra.mrb[0].mxu0 %v395_v51 }
  0x24   :  { %1039 = vmatpush3.bf16.msra.mxu0 %v1106_v48  ;;  %992 = vmatprep.subr.bf16.mxu1 %v1108_v50 }
  0x25   :  { %1040 = vmatprep.subr.bf16.mxu0 %v1109_v52  ;;  %986 = vmatprep.mubr.bf16.mxu1 %v111_v4 }
  0x26   :  { %1034 = vmatprep.mubr.bf16.mxu0 %v399_v11  ;;  %v730_v11 = vld [vmem:[%s1344_s3 + $0x8] sm:$0xff] }
  0x27   :  { %993 = vmatpush3.bf16.msra.mxu1 %v1108_v50  ;;  %v731_v50 = vld [vmem:[%s1344_s3 + $0x10] sm:$0xff] }
  0x28   :  { %1041 = vmatpush3.bf16.msra.mxu0 %v1109_v52  ;;  %994 = vmatprep.subr.bf16.mxu1 %v1110_v54 }
  0x29   :  { %1042 = vmatprep.subr.bf16.mxu0 %v1111_v61 }
  0x2a   :  { %987 = vmatmul.mubr.bf16.gmra.mrb[4].mxu1 %v119_v12 }
  0x2b   :  { %995 = vmatpush3.bf16.msra.mxu1 %v1110_v54  ;;  %1006 = vmatprep.mubr.bf16.mxu1 %v1200_v14  ;;  %v1116_v14 = vld [vmem:[%s1341_s1 + $0x28] sm:$0xff]  }
  0x2c   :  { %1043 = vmatpush3.bf16.msra.mxu0 %v1111_v61  ;;  %996 = vmatprep.subr.bf16.mxu1 %v1112_v7 }
  0x2d   :  { %1044 = vmatprep.subr.bf16.mxu0 %v1113_v10  ;;  %1035 = vmatmul.mubr.bf16.gmra.mrb[4].mxu0 %v408_v21 }
  0x2e   :  { %1054 = vmatprep.mubr.bf16.mxu0 %v558_v23  ;;  %v732_v23 = vld [vmem:[%s1344_s3 + $0x18] sm:$0xff] }
  0x2f   :  { %997 = vmatpush3.bf16.msra.mxu1 %v1112_v7 }
  0x30   :  { %1045 = vmatpush3.bf16.msra.mxu0 %v1113_v10  ;;  %998 = vmatprep.subr.bf16.mxu1 %v1114_v20 }
  0x31   :  { %1046 = vmatprep.subr.bf16.mxu0 %v1115_v13 }
  0x33   :  { %999 = vmatpush3.bf16.msra.mxu1 %v1114_v20 }
  0x34   :  { %1047 = vmatpush3.bf16.msra.mxu0 %v1115_v13  ;;  %1000 = vmatprep.subr.bf16.mxu1 %v1116_v14 }
  0x35   :  { %1048 = vmatprep.subr.bf16.mxu0 %v1117_v24 }
  0x37   :  { %1001 = vmatpush3.bf16.msra.mxu1 %v1116_v14 }
  0x38   :  { %1049 = vmatpush3.bf16.msra.mxu0 %v1117_v24  ;;  %1002 = vmatprep.subr.bf16.mxu1 %v1120_v25 }
  0x39   :  { %1050 = vmatprep.subr.bf16.mxu0 %v1122_v26 }
  0x3b   :  { %1003 = vmatpush3.bf16.msra.mxu1 %v1120_v25 }
  0x3c   :  { %1051 = vmatpush3.bf16.msra.mxu0 %v1122_v26  ;;  %1004 = vmatprep.subr.bf16.mxu1 %v1123_v27 }
  0x3d   :  { %1052 = vmatprep.subr.bf16.mxu0 %v1124_v28 }
  0x3f   :  { %1005 = vmatpush3.bf16.msra.mxu1 %v1123_v27 }
  0x40   :  { %1053 = vmatpush3.bf16.msra.mxu0 %v1124_v28 }
  0x42   :  { %1007 = vmatmul.mubr.bf16.vlgmr.msra.gmra.mrb[0].mxu1 %v1205_v15 }
  0x43   :  { %1055 = vmatmul.mubr.bf16.vlgmr.msra.gmra.mrb[0].mxu0 %v560_v32  ;;  %1010 = vmatprep.mubr.bf16.mxu1 %v1224_v30 }
  0x44   :  { %1058 = vmatprep.mubr.bf16.mxu0 %v562_v33 }
  0x4a   :  { %1011 = vmatmul.mubr.bf16.gmra.mrb[4].mxu1 %v1253_v53 }
  0x4b   :  { %1059 = vmatmul.mubr.bf16.gmra.mrb[4].mxu0 %v564_v35 }
 0x115   :  { %v1008_v36 = vpop.f32.mrb[0].mxu1 }
 0x116   :  { %v1056_v37 = vpop.f32.mrb[0].mxu0  ;;  %v323_v39 = vpop.f32.mrb[1].mxu1 }
 0x117   :  { %v1062_v40 = vadd.f32 %v1056_v37, %v1008_v36  ;;  %v651_v15 = vpop.f32.mrb[1].mxu0  ;;  %v1009_v41 = vpop.f32.mrb[2].mxu1  ;;  %v766_v36 = vand.u32 127, %v765_v34 }
 0x118   :  { %v1063_v42 = vadd.f32 %v651_v15, %v323_v39  ;;  %v1057_v30 = vpop.f32.mrb[2].mxu0  ;;  %v326_v43 = vpop.f32.mrb[3].mxu1  ;;  %v768_v39 = vshrl.u32 %v765_v34, 7 }
 0x119   :  { %v699_v44 = vadd.f32 %v1062_v40, %v917_v38  ;;  %v1064_v45 = vadd.f32 %v1057_v30, %v1009_v41  ;;  %v654_v46 = vpop.f32.mrb[3].mxu0  ;;  %v771_v37 = vadd.s32 4294967288, %v766_v36  ;;  %v785_v41 = vadd.s32 4294967272, %v766_v36 }
 0x11a   :  { %v697_v47 = vadd.f32 %v1063_v42, %v917_v38  ;;  %v1065_v48 = vadd.f32 %v654_v46, %v326_v43  ;;  %v778_v42 = vadd.s32 4294967280, %v766_v36  ;;  %v769_v43 = vsub.s32 %v766_v36, %v768_v39 }
 0x11b   :  { %vm707_vm3 = vcmp.ge.f32.partialorder %v699_v44, 0.0  ;;  %v715_v49 = vmul.f32 0.2, %v699_v44  ;;  %v700_v58 = vadd.f32 %v1064_v45, %v917_v38  ;;  %v774_v15 = vsub.s32 %v771_v37, %v768_v39 }
 0x11c   :  { %v698_v51 = vadd.f32 %v1065_v48, %v917_v38  ;;  %vm705_vm4 = vcmp.ge.f32.partialorder %v697_v47, 0.0  ;;  %v713_v52 = vmul.f32 0.2, %v697_v47  ;;  %v788_v45 = vsub.s32 %v785_v41, %v768_v39 }
 0x11d   :  { %v1012_v53 = vpop.f32.mrb[4].mxu1  ;;  %v723_v54 = vsel %vm707_vm3, %v699_v44, %v715_v49  ;;  %v716_v16 = vmul.f32 0.2, %v700_v58  ;;  %vm708_vm7 = vcmp.ge.f32.partialorder %v700_v58, 0.0  ;;  %v781_v46 = vsub.s32 %v778_v42, %v768_v39 }
 0x11e   :  { %v1060_v55 = vpop.f32.mrb[4].mxu0  ;;  %v339_v56 = vpop.f32.mrb[5].mxu1  ;;  %v735_v57 = vmul.f32 %v731_v50, %v723_v54  ;;  %v721_v62 = vsel %vm705_vm4, %v697_v47, %v713_v52  ;;  %v714_v0 = vmul.f32 0.2, %v698_v51  ;;  %vm706_vm5 = vcmp.ge.f32.partialorder %v698_v51, 0.0 }
 0x11f   :  { %v1066_v59 = vadd.f32 %v1060_v55, %v1012_v53  ;;  %v667_v60 = vpop.f32.mrb[5].mxu0  ;;  %v1013_v61 = vpop.f32.mrb[6].mxu1  ;;  %v733_v9 = vmul.f32 %v729_v63, %v721_v62  ;;  %v724_v13 = vsel %vm708_vm7, %v700_v58, %v716_v16 }
 0x120   :  { %v1067_v1 = vadd.f32 %v667_v60, %v339_v56  ;;  %v1061_v2 = vpop.f32.mrb[6].mxu0  ;;  %745 = vadd.xlane.f32.xlu0 %v735_v57  ;;  %v342_v3 = vpop.f32.mrb[7].mxu1  ;;  %v722_v10 = vsel %vm706_vm5, %v698_v51, %v714_v0  ;;  %v736_v25 = vmul.f32 %v732_v23, %v724_v13 }
 0x121   :  { %v703_v4 = vadd.f32 %v1066_v59, %v917_v38  ;;  %v1068_v5 = vadd.f32 %v1061_v2, %v1013_v61  ;;  %v670_v6 = vpop.f32.mrb[7].mxu0  ;;  %v734_v20 = vmul.f32 %v730_v11, %v722_v10 }
 0x122   :  { %v701_v7 = vadd.f32 %v1067_v1, %v917_v38  ;;  %v1069_v8 = vadd.f32 %v670_v6, %v342_v3 }
 0x123   :  { %vm711_vm6 = vcmp.ge.f32.partialorder %v703_v4, 0.0  ;;  %v719_v12 = vmul.f32 0.2, %v703_v4  ;;  %v704_v22 = vadd.f32 %v1068_v5, %v917_v38 }
 0x124   :  { %v702_v17 = vadd.f32 %v1069_v8, %v917_v38  ;;  %741 = vadd.xlane.f32.xlu0 %v733_v9  ;;  %vm709_vm8 = vcmp.ge.f32.partialorder %v701_v7, 0.0  ;;  %v717_v18 = vmul.f32 0.2, %v701_v7 }
 0x125   :  { %v727_v19 = vsel %vm711_vm6, %v703_v4, %v719_v12  ;;  %v720_v28 = vmul.f32 0.2, %v704_v22  ;;  %vm712_vm10 = vcmp.ge.f32.partialorder %v704_v22, 0.0 }
 0x126   :  { %v739_v21 = vmul.f32 %v731_v50, %v727_v19  ;;  %v725_v14 = vsel %vm709_vm8, %v701_v7, %v717_v18  ;;  %v718_v24 = vmul.f32 0.2, %v702_v17  ;;  %vm710_vm9 = vcmp.ge.f32.partialorder %v702_v17, 0.0 }
 0x127   :  { %v737_v26 = vmul.f32 %v729_v63, %v725_v14  ;;  %v728_v31 = vsel %vm712_vm10, %v704_v22, %v720_v28 }
 0x128   :  { %743 = vadd.xlane.f32.xlu0 %v734_v20  ;;  %753 = vadd.xlane.f32.xlu1 %v739_v21  ;;  %v726_v27 = vsel %vm710_vm9, %v702_v17, %v718_v24  ;;  %v740_v32 = vmul.f32 %v732_v23, %v728_v31 }
 0x129   :  { %v738_v29 = vmul.f32 %v730_v11, %v726_v27 }
 0x12c   :  { %747 = vadd.xlane.f32.xlu0 %v736_v25  ;;  %749 = vadd.xlane.f32.xlu1 %v737_v26 }
 0x130   :  { %751 = vadd.xlane.f32.xlu1 %v738_v29 }
 0x134   :  { %755 = vadd.xlane.f32.xlu1 %v740_v32 }
 0x1ad   :  { %v746_v33 = vpop.xlane.xlu0 %745 }
 0x1ae   :  { %v782_v55 = vrot.slane %v746_v33, %v781_v46 }
 0x1b1   :  { %v742_v35 = vpop.xlane.xlu0 %741 }
 0x1b2   :  { %v770_v49 = vrot.slane %v742_v35, %v769_v43 }
 0x1b5   :  { %v754_v38 = vpop.xlane.xlu1 %753  ;;  %v744_v40 = vpop.xlane.xlu0 %743 }
 0x1b6   :  { %v775_v44 = vrot.slane %v744_v40, %v774_v15  ;;  %v804_v56 = vrot.slane %v754_v38, %v781_v46 }
 0x1b8   :  { %v777_v52 = vsel %vm776_vm11, %v775_v44, %v770_v49 }
 0x1b9   :  { %v750_v30 = vpop.xlane.xlu1 %749  ;;  %v748_v47 = vpop.xlane.xlu0 %747  ;;  %v784_v59 = vsel %vm783_vm12, %v782_v55, %v777_v52 }
 0x1ba   :  { %v795_v50 = vrot.slane %v750_v30, %v769_v43  ;;  %v789_v53 = vrot.slane %v748_v47, %v788_v45 }
 0x1bc   :  { %v791_v61 = vsel %vm790_vm13, %v789_v53, %v784_v59 }
 0x1bd   :  { %v752_v48 = vpop.xlane.xlu1 %751 }
 0x1be   :  { %v799_v51 = vrot.slane %v752_v48, %v774_v15 }
 0x1c0   :  { %v800_v54 = vsel %vm776_vm11, %v799_v51, %v795_v50 }
 0x1c1   :  { %v756_v57 = vpop.xlane.xlu1 %755  ;;  %v805_v60 = vsel %vm783_vm12, %v804_v56, %v800_v54 }
 0x1c2   :  { %v809_v58 = vrot.slane %v756_v57, %v788_v45 }
 0x1c4   :  { %v810_v62 = vsel %vm790_vm13, %v809_v58, %v805_v60 }
 0x1c5   :  { %v812_v63 = vsel %vm811_vm14, %v810_v62, %v791_v61 }
 0x1c6   :  { %v815_v0 = vsel %vm814_vm15, %v812_v63, 0.0 }
 0x1c7   :  { %816 = vadd.xlane.f32.xlu0 %v815_v0 }
 0x254   :  { %v817_v1 = vpop.xlane.xlu0 %816 }
 0x255   :  { %v818_v2 = vsub.f32 0.0, %v817_v1 }
 0x257   :  { %v819_v3 = vmul.f32 1.442695, %v818_v2 }
 0x259   :  { %1126 = vpow2.f32 %v819_v3 }
 0x263   :  { %v1127_v4 = vpop.eup %1126 }
 0x264   :  { %v821_v5 = vadd.f32 1.0, %v1127_v4 }
 0x266   :  { %1128 = vrcp.f32 %v821_v5 }
 0x270   :  { %v1129_v6 = vpop.eup %1128 }
 0x271   :  { %824 = vst [vmem:[%s1345_s4] sm:$0x3] %v1129_v6 }

</bundles_post_ra>
